<compile_context>
chip_gen: v7x
topology: tpu7x:2x2x1
jax: 0.10.0
libtpu: 0.0.40
codegen_flags: <defaults>
</compile_context>

<pallas_src>
import jax
import jax.numpy as jnp
from jax.experimental import pallas as pl
from jax.experimental.pallas import tpu as pltpu

LEAKY_SLOPE = 0.2
BN_EPS = 1e-5


# ----------------------------- Pallas kernels ------------------------------


def _gemm_bn_lrelu_kernel(p_ref, w_ref, shift_ref, o_ref):
    # im2col GEMM (bf16 operands, f32 accumulate) fused with the BatchNorm
    # shift (scale is pre-folded into w) and LeakyReLU(0.2).
    z = jnp.dot(p_ref[...], w_ref[...], preferred_element_type=jnp.float32)
    z = z + shift_ref[...]
    o_ref[...] = jnp.where(z >= 0.0, z, LEAKY_SLOPE * z).astype(o_ref.dtype)


def _fc_kernel(x_ref, w1_ref, w2_ref, b2_ref, o_ref):
    # Linear(3136->1000, no bias) + LeakyReLU(0.2) + Dropout(eval: identity)
    # + Linear(1000->10, bias). Weights resident across the batch grid.
    h = jnp.dot(x_ref[...], w1_ref[...], preferred_element_type=jnp.float32)
    h = jnp.where(h >= 0.0, h, LEAKY_SLOPE * h)
    # TODO(synk): Dropout(p=0.5) is reproduced in eval mode (identity); the
    # train-mode stochastic mask is not implemented here.
    o_ref[...] = (
        jnp.dot(h.astype(w2_ref.dtype), w2_ref[...],
                preferred_element_type=jnp.float32)
        + b2_ref[...]
    )


# ------------------------------ JAX glue ------------------------------------


def _im2col_concat(x_nhwc, ksize=4, stride=2, pad=1):
    """Extract conv patches. The 16 shifted slices are concatenated along the
    last (lane) axis, so the flattened tap order is (KH, KW, Cin) — the conv
    weights are pre-permuted to match (no 5-D transpose of the activation)."""
    n, h, w, c = x_nhwc.shape
    xp = jnp.pad(x_nhwc, ((0, 0), (pad, pad), (pad, pad), (0, 0)))
    oh = (h + 2 * pad - ksize) // stride + 1
    ow = (w + 2 * pad - ksize) // stride + 1
    cols = [
        xp[:, kh:kh + stride * oh:stride, kw:kw + stride * ow:stride, :]
        for kh in range(ksize) for kw in range(ksize)
    ]
    patches = jnp.concatenate(cols, axis=-1)          # (N, OH, OW, KH*KW*C)
    return patches.reshape(n * oh * ow, ksize * ksize * c), (n, oh, ow)


def _pick_tile(dim, target):
    # `target` is a multiple of 8; partial trailing blocks are masked by Pallas.
    return dim if dim <= target else target


def _conv_bn_lrelu(x_nhwc, wmat, shift, *, tm_target=512):
    """wmat: (KH*KW*Cin, Cout) bf16 with BN scale folded in; shift: (1,Cout) f32."""
    patches, (n, oh, ow) = _im2col_concat(x_nhwc)
    patches = patches.astype(jnp.bfloat16)
    m, k = patches.shape
    cout = wmat.shape[1]
    tm = _pick_tile(m, tm_target)
    out = pl.pallas_call(
        _gemm_bn_lrelu_kernel,
        out_shape=jax.ShapeDtypeStruct((m, cout), jnp.bfloat16),
        grid_spec=pltpu.PrefetchScalarGridSpec(
            num_scalar_prefetch=0,
            grid=(pl.cdiv(m, tm),),
            in_specs=[
                pl.BlockSpec((tm, k), lambda i: (i, 0)),       # stream activations
                pl.BlockSpec((k, cout), lambda i: (0, 0)),     # resident weight
                pl.BlockSpec((1, cout), lambda i: (0, 0)),     # resident BN shift
            ],
            out_specs=pl.BlockSpec((tm, cout), lambda i: (i, 0)),
        ),
        compiler_params=pltpu.CompilerParams(
            dimension_semantics=("parallel",)),
    )(patches, wmat, shift)
    return out.reshape(n, oh, ow, cout)


def _fc_head(z_flat, w1, w2, b2, *, tb_target=256):
    """z_flat: (N, 3136) bf16 in NHWC feature order; w1: (3136,1000) bf16
    (rows pre-permuted to NHWC order); w2: (1000,10) bf16; b2: (1,10) f32."""
    n, k = z_flat.shape
    hid = w1.shape[1]
    ncls = w2.shape[1]
    tb = _pick_tile(n, tb_target)
    return pl.pallas_call(
        _fc_kernel,
        out_shape=jax.ShapeDtypeStruct((n, ncls), jnp.float32),
        grid_spec=pltpu.PrefetchScalarGridSpec(
            num_scalar_prefetch=0,
            grid=(pl.cdiv(n, tb),),
            in_specs=[
                pl.BlockSpec((tb, k), lambda i: (i, 0)),       # stream batch rows
                pl.BlockSpec((k, hid), lambda i: (0, 0)),      # resident fc1
                pl.BlockSpec((hid, ncls), lambda i: (0, 0)),   # resident fc2
                pl.BlockSpec((1, ncls), lambda i: (0, 0)),     # resident bias
            ],
            out_specs=pl.BlockSpec((tb, ncls), lambda i: (i, 0)),
        ),
        compiler_params=pltpu.CompilerParams(
            dimension_semantics=("parallel",),
            vmem_limit_bytes=32 * 1024 * 1024),   # fits v7x's 64 MiB physical VMEM
    )(z_flat, w1, w2, b2)


def encoder_z_forward(x_nchw, prep):
    # NCHW -> NHWC once at entry; everything downstream stays NHWC because the
    # fc1 weight rows were pre-permuted to NHWC feature order.
    x = jnp.transpose(x_nchw, (0, 2, 3, 1)).astype(jnp.bfloat16)
    x = _conv_bn_lrelu(x, prep["conv1_w"], prep["bn1_shift"])   # (N,14,14,32)
    x = _conv_bn_lrelu(x, prep["conv2_w"], prep["bn2_shift"])   # (N, 7, 7,64)
    n = x.shape[0]
    z = x.reshape(n, -1)                                        # NHWC flatten
    return _fc_head(z, prep["fc1_w"], prep["fc2_w"], prep["fc2_b"])


# --------------------- one-time host-side weight prep -----------------------


def _prep_conv(w_oihw, gamma, beta, mean, var):
    cout = w_oihw.shape[0]
    scale = gamma / jnp.sqrt(var + BN_EPS)            # eval-mode BN
    shift = beta - mean * scale
    # (Cout, Cin, KH, KW) -> (KH, KW, Cin, Cout) -> (KH*KW*Cin, Cout);
    # row order matches the concat-last-axis im2col tap order.
    wmat = jnp.transpose(w_oihw, (2, 3, 1, 0)).reshape(-1, cout)
    wmat = (wmat * scale[None, :]).astype(jnp.bfloat16)         # fold BN scale
    return wmat, shift.reshape(1, cout).astype(jnp.float32)


def prepare_params(params):
    """Fold BN into conv weights, permute / transpose / cast all weights once."""
    conv1_w, bn1_shift = _prep_conv(params["conv1_w"], params["bn1_gamma"],
                                    params["bn1_beta"], params["bn1_mean"],
                                    params["bn1_var"])
    conv2_w, bn2_shift = _prep_conv(params["conv2_w"], params["bn2_gamma"],
                                    params["bn2_beta"], params["bn2_mean"],
                                    params["bn2_var"])
    # fc1: torch input-feature order is (C=64, H=7, W=7); permute rows to
    # (H, W, C) so the NHWC-flattened activation can be used directly.
    hid, feat = params["fc1_w"].shape                 # (1000, 3136)
    c = params["conv2_w"].shape[0]                    # 64
    hw = int(round((feat // c) ** 0.5))               # 7
    fc1 = params["fc1_w"].reshape(hid, c, hw, hw)     # (out, C, H, W)
    fc1 = jnp.transpose(fc1, (2, 3, 1, 0)).reshape(feat, hid)   # rows (H,W,C)
    ncls = params["fc2_w"].shape[0]
    return {
        "conv1_w": conv1_w, "bn1_shift": bn1_shift,
        "conv2_w": conv2_w, "bn2_shift": bn2_shift,
        "fc1_w": fc1.astype(jnp.bfloat16),
        "fc2_w": jnp.transpose(params["fc2_w"]).astype(jnp.bfloat16),
        "fc2_b": params["fc2_b"].reshape(1, ncls).astype(jnp.float32),
    }


def init_params(key):
    ks = jax.random.split(key, 13)
    f32 = jnp.float32
    return {
        "conv1_w":  0.05 * jax.random.normal(ks[0], (32, 1, 4, 4), f32),
        "bn1_gamma": 1.0 + 0.1 * jax.random.normal(ks[1], (32,), f32),
        "bn1_beta": 0.1 * jax.random.normal(ks[2], (32,), f32),
        "bn1_mean": 0.1 * jax.random.normal(ks[3], (32,), f32),
        "bn1_var":  1.0 + 0.1 * jax.random.uniform(ks[4], (32,), f32),
        "conv2_w":  0.05 * jax.random.normal(ks[5], (64, 32, 4, 4), f32),
        "bn2_gamma": 1.0 + 0.1 * jax.random.normal(ks[6], (64,), f32),
        "bn2_beta": 0.1 * jax.random.normal(ks[7], (64,), f32),
        "bn2_mean": 0.1 * jax.random.normal(ks[8], (64,), f32),
        "bn2_var":  1.0 + 0.1 * jax.random.uniform(ks[9], (64,), f32),
        "fc1_w":    0.02 * jax.random.normal(ks[10], (1000, 7 * 7 * 64), f32),
        "fc2_w":    0.02 * jax.random.normal(ks[11], (10, 1000), f32),
        "fc2_b":    0.02 * jax.random.normal(ks[12], (10,), f32),
    }


if __name__ == "__main__":
    key = jax.random.PRNGKey(0)
    pkey, xkey = jax.random.split(key)
    params = init_params(pkey)
    prep = prepare_params(params)          # one-time host-side weight prep

    # fc layer (7*7*64 input features) implies 28x28 single-channel input.
    x = jax.random.normal(xkey, (2, 1, 28, 28), jnp.float32)

    fwd = jax.jit(encoder_z_forward)
    y = fwd(x, prep)
    jax.block_until_ready(y)
    assert y.shape == (2, 10), y.shape
    assert y.dtype == jnp.float32
    print("KERNEL_OK")
</pallas_src>

<mosaic_0001>
module attributes {stable_mosaic.version = 11 : i64} {
  func.func @_gemm_bn_lrelu_kernel(%arg0: i32, %arg1: memref<392x16xbf16, #tpu.memory_space<vmem>>, %arg2: memref<16x32xbf16, #tpu.memory_space<vmem>>, %arg3: memref<1x32xf32, #tpu.memory_space<vmem>>, %arg4: memref<392x32xbf16, #tpu.memory_space<vmem>>) attributes {dimension_semantics = [#tpu.dimension_semantics<parallel>], iteration_bounds = array<i64: 1>, scalar_prefetch = 0 : i64, scratch_operands = 0 : i64, tpu.core_type = #tpu.core_type<tc>, window_params = [{transform_indices = @transform_0, window_bounds = array<i64: 392, 16>}, {pipeline_mode = #tpu.pipeline_mode<synchronous>, transform_indices = @transform_1, window_bounds = array<i64: 16, 32>}, {pipeline_mode = #tpu.pipeline_mode<synchronous>, transform_indices = @transform_2, window_bounds = array<i64: 1, 32>}, {transform_indices = @transform_3, window_bounds = array<i64: 392, 32>}]} {
    %c0 = arith.constant 0 : index
    %c0_0 = arith.constant 0 : index
    %0 = vector.load %arg1[%c0, %c0_0] : memref<392x16xbf16, #tpu.memory_space<vmem>>, vector<392x16xbf16>
    %c0_1 = arith.constant 0 : index
    %c0_2 = arith.constant 0 : index
    %1 = vector.load %arg2[%c0_1, %c0_2] : memref<16x32xbf16, #tpu.memory_space<vmem>>, vector<16x32xbf16>
    %cst = arith.constant dense<0.000000e+00> : vector<392x32xf32>
    %2 = tpu.matmul %0, %1, %cst {dimension_numbers = #tpu.dot_dimension_numbers<[1], [0], [0], [1], [0, 0, 1, 1], [], []>} : vector<392x16xbf16>, vector<16x32xbf16>, vector<392x32xf32> -> vector<392x32xf32>
    %c0_3 = arith.constant 0 : index
    %c0_4 = arith.constant 0 : index
    %3 = vector.load %arg3[%c0_3, %c0_4] : memref<1x32xf32, #tpu.memory_space<vmem>>, vector<1x32xf32>
    %4 = vector.broadcast %3 : vector<1x32xf32> to vector<392x32xf32>
    %5 = arith.addf %2, %4 : vector<392x32xf32>
    %cst_5 = arith.constant 0.000000e+00 : f32
    %6 = vector.broadcast %cst_5 : f32 to vector<392x32xf32>
    %7 = arith.cmpf oge, %5, %6 : vector<392x32xf32>
    %cst_6 = arith.constant 2.000000e-01 : f32
    %8 = vector.broadcast %cst_6 : f32 to vector<392x32xf32>
    %9 = arith.mulf %8, %5 : vector<392x32xf32>
    %10 = arith.select %7, %5, %9 : vector<392x32xi1>, vector<392x32xf32>
    %11 = arith.truncf %10 : vector<392x32xf32> to vector<392x32xbf16>
    %c0_7 = arith.constant 0 : index
    %c0_8 = arith.constant 0 : index
    %12 = vector.load %arg4[%c0_7, %c0_8] : memref<392x32xbf16, #tpu.memory_space<vmem>>, vector<392x32xbf16>
    tpu.vector_store %arg4[%c0_7, %c0_8], %11 {strides = array<i32>} : memref<392x32xbf16, #tpu.memory_space<vmem>>, vector<392x32xbf16>,
    return
  }
  func.func @transform_0(%arg0: i32) -> (i32, i32) {
    %c0_i32 = arith.constant 0 : i32
    %c0_i32_0 = arith.constant 0 : i32
    return %arg0, %c0_i32 : i32, i32
  }
  func.func @transform_1(%arg0: i32) -> (i32, i32) {
    %c0_i32 = arith.constant 0 : i32
    %c0_i32_0 = arith.constant 0 : i32
    %c0_i32_1 = arith.constant 0 : i32
    return %c0_i32, %c0_i32_0 : i32, i32
  }
  func.func @transform_2(%arg0: i32) -> (i32, i32) {
    %c0_i32 = arith.constant 0 : i32
    %c0_i32_0 = arith.constant 0 : i32
    %c0_i32_1 = arith.constant 0 : i32
    return %c0_i32, %c0_i32_0 : i32, i32
  }
  func.func @transform_3(%arg0: i32) -> (i32, i32) {
    %c0_i32 = arith.constant 0 : i32
    %c0_i32_0 = arith.constant 0 : i32
    return %arg0, %c0_i32 : i32, i32
  }
}

module attributes {stable_mosaic.version = 11 : i64} {
  func.func @_gemm_bn_lrelu_kernel(%arg0: i32, %arg1: memref<98x512xbf16, #tpu.memory_space<vmem>>, %arg2: memref<512x64xbf16, #tpu.memory_space<vmem>>, %arg3: memref<1x64xf32, #tpu.memory_space<vmem>>, %arg4: memref<98x64xbf16, #tpu.memory_space<vmem>>) attributes {dimension_semantics = [#tpu.dimension_semantics<parallel>], iteration_bounds = array<i64: 1>, scalar_prefetch = 0 : i64, scratch_operands = 0 : i64, tpu.core_type = #tpu.core_type<tc>, window_params = [{transform_indices = @transform_0, window_bounds = array<i64: 98, 512>}, {pipeline_mode = #tpu.pipeline_mode<synchronous>, transform_indices = @transform_1, window_bounds = array<i64: 512, 64>}, {pipeline_mode = #tpu.pipeline_mode<synchronous>, transform_indices = @transform_2, window_bounds = array<i64: 1, 64>}, {transform_indices = @transform_3, window_bounds = array<i64: 98, 64>}]} {
    %c0 = arith.constant 0 : index
    %c0_0 = arith.constant 0 : index
    %0 = vector.load %arg1[%c0, %c0_0] : memref<98x512xbf16, #tpu.memory_space<vmem>>, vector<98x512xbf16>
    %c0_1 = arith.constant 0 : index
    %c0_2 = arith.constant 0 : index
    %1 = vector.load %arg2[%c0_1, %c0_2] : memref<512x64xbf16, #tpu.memory_space<vmem>>, vector<512x64xbf16>
    %cst = arith.constant dense<0.000000e+00> : vector<98x64xf32>
    %2 = tpu.matmul %0, %1, %cst {dimension_numbers = #tpu.dot_dimension_numbers<[1], [0], [0], [1], [0, 0, 1, 1], [], []>} : vector<98x512xbf16>, vector<512x64xbf16>, vector<98x64xf32> -> vector<98x64xf32>
    %c0_3 = arith.constant 0 : index
    %c0_4 = arith.constant 0 : index
    %3 = vector.load %arg3[%c0_3, %c0_4] : memref<1x64xf32, #tpu.memory_space<vmem>>, vector<1x64xf32>
    %4 = vector.broadcast %3 : vector<1x64xf32> to vector<98x64xf32>
    %5 = arith.addf %2, %4 : vector<98x64xf32>
    %cst_5 = arith.constant 0.000000e+00 : f32
    %6 = vector.broadcast %cst_5 : f32 to vector<98x64xf32>
    %7 = arith.cmpf oge, %5, %6 : vector<98x64xf32>
    %cst_6 = arith.constant 2.000000e-01 : f32
    %8 = vector.broadcast %cst_6 : f32 to vector<98x64xf32>
    %9 = arith.mulf %8, %5 : vector<98x64xf32>
    %10 = arith.select %7, %5, %9 : vector<98x64xi1>, vector<98x64xf32>
    %11 = arith.truncf %10 : vector<98x64xf32> to vector<98x64xbf16>
    %c0_7 = arith.constant 0 : index
    %c0_8 = arith.constant 0 : index
    %12 = vector.load %arg4[%c0_7, %c0_8] : memref<98x64xbf16, #tpu.memory_space<vmem>>, vector<98x64xbf16>
    tpu.vector_store %arg4[%c0_7, %c0_8], %11 {strides = array<i32>} : memref<98x64xbf16, #tpu.memory_space<vmem>>, vector<98x64xbf16>,
    return
  }
  func.func @transform_0(%arg0: i32) -> (i32, i32) {
    %c0_i32 = arith.constant 0 : i32
    %c0_i32_0 = arith.constant 0 : i32
    return %arg0, %c0_i32 : i32, i32
  }
  func.func @transform_1(%arg0: i32) -> (i32, i32) {
    %c0_i32 = arith.constant 0 : i32
    %c0_i32_0 = arith.constant 0 : i32
    %c0_i32_1 = arith.constant 0 : i32
    return %c0_i32, %c0_i32_0 : i32, i32
  }
  func.func @transform_2(%arg0: i32) -> (i32, i32) {
    %c0_i32 = arith.constant 0 : i32
    %c0_i32_0 = arith.constant 0 : i32
    %c0_i32_1 = arith.constant 0 : i32
    return %c0_i32, %c0_i32_0 : i32, i32
  }
  func.func @transform_3(%arg0: i32) -> (i32, i32) {
    %c0_i32 = arith.constant 0 : i32
    %c0_i32_0 = arith.constant 0 : i32
    return %arg0, %c0_i32 : i32, i32
  }
}

module attributes {stable_mosaic.version = 11 : i64} {
  func.func @_fc_kernel(%arg0: i32, %arg1: memref<2x3136xbf16, #tpu.memory_space<vmem>>, %arg2: memref<3136x1000xbf16, #tpu.memory_space<vmem>>, %arg3: memref<1000x10xbf16, #tpu.memory_space<vmem>>, %arg4: memref<1x10xf32, #tpu.memory_space<vmem>>, %arg5: memref<2x10xf32, #tpu.memory_space<vmem>>) attributes {dimension_semantics = [#tpu.dimension_semantics<parallel>], iteration_bounds = array<i64: 1>, scalar_prefetch = 0 : i64, scratch_operands = 0 : i64, tpu.core_type = #tpu.core_type<tc>, window_params = [{transform_indices = @transform_0, window_bounds = array<i64: 2, 3136>}, {pipeline_mode = #tpu.pipeline_mode<synchronous>, transform_indices = @transform_1, window_bounds = array<i64: 3136, 1000>}, {pipeline_mode = #tpu.pipeline_mode<synchronous>, transform_indices = @transform_2, window_bounds = array<i64: 1000, 10>}, {pipeline_mode = #tpu.pipeline_mode<synchronous>, transform_indices = @transform_3, window_bounds = array<i64: 1, 10>}, {transform_indices = @transform_4, window_bounds = array<i64: 2, 10>}]} {
    %c0 = arith.constant 0 : index
    %c0_0 = arith.constant 0 : index
    %0 = vector.load %arg1[%c0, %c0_0] : memref<2x3136xbf16, #tpu.memory_space<vmem>>, vector<2x3136xbf16>
    %c0_1 = arith.constant 0 : index
    %c0_2 = arith.constant 0 : index
    %1 = vector.load %arg2[%c0_1, %c0_2] : memref<3136x1000xbf16, #tpu.memory_space<vmem>>, vector<3136x1000xbf16>
    %cst = arith.constant dense<0.000000e+00> : vector<2x1000xf32>
    %2 = tpu.matmul %0, %1, %cst {dimension_numbers = #tpu.dot_dimension_numbers<[1], [0], [0], [1], [0, 0, 1, 1], [], []>} : vector<2x3136xbf16>, vector<3136x1000xbf16>, vector<2x1000xf32> -> vector<2x1000xf32>
    %cst_3 = arith.constant 0.000000e+00 : f32
    %3 = vector.broadcast %cst_3 : f32 to vector<2x1000xf32>
    %4 = arith.cmpf oge, %2, %3 : vector<2x1000xf32>
    %cst_4 = arith.constant 2.000000e-01 : f32
    %5 = vector.broadcast %cst_4 : f32 to vector<2x1000xf32>
    %6 = arith.mulf %5, %2 : vector<2x1000xf32>
    %7 = arith.select %4, %2, %6 : vector<2x1000xi1>, vector<2x1000xf32>
    %8 = arith.truncf %7 : vector<2x1000xf32> to vector<2x1000xbf16>
    %c0_5 = arith.constant 0 : index
    %c0_6 = arith.constant 0 : index
    %9 = vector.load %arg3[%c0_5, %c0_6] : memref<1000x10xbf16, #tpu.memory_space<vmem>>, vector<1000x10xbf16>
    %cst_7 = arith.constant dense<0.000000e+00> : vector<2x10xf32>
    %10 = tpu.matmul %8, %9, %cst_7 {dimension_numbers = #tpu.dot_dimension_numbers<[1], [0], [0], [1], [0, 0, 1, 1], [], []>} : vector<2x1000xbf16>, vector<1000x10xbf16>, vector<2x10xf32> -> vector<2x10xf32>
    %c0_8 = arith.constant 0 : index
    %c0_9 = arith.constant 0 : index
    %11 = vector.load %arg4[%c0_8, %c0_9] : memref<1x10xf32, #tpu.memory_space<vmem>>, vector<1x10xf32>
    %12 = vector.broadcast %11 : vector<1x10xf32> to vector<2x10xf32>
    %13 = arith.addf %10, %12 : vector<2x10xf32>
    %c0_10 = arith.constant 0 : index
    %c0_11 = arith.constant 0 : index
    %14 = vector.load %arg5[%c0_10, %c0_11] : memref<2x10xf32, #tpu.memory_space<vmem>>, vector<2x10xf32>
    tpu.vector_store %arg5[%c0_10, %c0_11], %13 {strides = array<i32>} : memref<2x10xf32, #tpu.memory_space<vmem>>, vector<2x10xf32>,
    return
  }
  func.func @transform_0(%arg0: i32) -> (i32, i32) {
    %c0_i32 = arith.constant 0 : i32
    %c0_i32_0 = arith.constant 0 : i32
    return %arg0, %c0_i32 : i32, i32
  }
  func.func @transform_1(%arg0: i32) -> (i32, i32) {
    %c0_i32 = arith.constant 0 : i32
    %c0_i32_0 = arith.constant 0 : i32
    %c0_i32_1 = arith.constant 0 : i32
    return %c0_i32, %c0_i32_0 : i32, i32
  }
  func.func @transform_2(%arg0: i32) -> (i32, i32) {
    %c0_i32 = arith.constant 0 : i32
    %c0_i32_0 = arith.constant 0 : i32
    %c0_i32_1 = arith.constant 0 : i32
    return %c0_i32, %c0_i32_0 : i32, i32
  }
  func.func @transform_3(%arg0: i32) -> (i32, i32) {
    %c0_i32 = arith.constant 0 : i32
    %c0_i32_0 = arith.constant 0 : i32
    %c0_i32_1 = arith.constant 0 : i32
    return %c0_i32, %c0_i32_0 : i32, i32
  }
  func.func @transform_4(%arg0: i32) -> (i32, i32) {
    %c0_i32 = arith.constant 0 : i32
    %c0_i32_0 = arith.constant 0 : i32
    return %arg0, %c0_i32 : i32, i32
  }
}

</mosaic_0001>

<bundles_post_ra>
// kernel: encoder_z_forward.3
= control target key start
LH: loop header
LB: loop body
LE: loop exit
PB: predicated region body
PF: predicated region fallthrough
CT: control target
= control target key end

     0   :  { %8 = vsyncpa [#allocation3], 0  ;;  %s1745_s0 = inlined_call_operand.vmem [shape: bf16[392,16], index: 0, kind: input, shape index: {}]   ;;  %s1746_s1 = inlined_call_operand.hbm [shape: bf16[16,32], index: 1, kind: input, shape index: {}]   ;;  %s1747_s2 = inlined_call_operand.hbm [shape: f32[1,32], index: 2, kind: input, shape index: {}]   ;;  %s1748_s3 = inlined_call_operand.vmem [shape: bf16[392,32], index: 3, kind: output, shape index: {}]  }
   0x1   :  { %9 = vsyncpa [#allocation5], 0  ;;  %s1296_s12 = smov [#allocation2]   ;;  %s1248_s16 = scalar_lea.hbm %s1746_s1, 128 }
   0x2   :  { %s17_s13 = sshll.u32 %s1296_s12, 4  ;;  %p1249_p0 = scmp.ne.s32.totalorder %s1746_s1, %s1248_s16  ;;  %s18_s13 = int_to_ptr.vmem [resolvable:$true] %s17_s13 }
   0x3   :  { %p1252_p1 = scmp.lt.u32.totalorder %s1248_s16, %s1746_s1 }
   0x5   :  { %p1254_p2 = pnand %p1252_p1, %p1249_p0 }
   0x7   :  { %1257 = shalt.err (!%p1254_p2)
}
   0x8   :  { %s1258_s21 = scalar_lea.vmem %s18_s13, 128  ;;  %p1263_p4 = scmp.lt.s32.totalorder %s18_s13, %s18_s13 }
   0x9   :  { %p1259_p3 = scmp.ne.s32.totalorder %s18_s13, %s1258_s21  ;;  %p1264_p5 = scmp.lt.s32.totalorder %s1258_s21, %s1258_s21 }
   0xb   :  { %p1265_p6 = por %p1264_p5, %p1263_p4 }
   0xd   :  { %p1266_p7 = pnand %p1265_p6, %p1259_p3 }
   0xf   :  { %1269 = shalt.err (!%p1266_p7)
}
  0x10   :  { %s1297_s22 = smov 64   ;;  %s1298_s23 = smov 4  }
  0x11   :  { %23 = dma.hbm_to_vmem [thread:$0]  %s1746_s1, 128, %s18_s13, [#allocation3], %s1297_s22, %s1297_s22, %s1298_s23  }
  0x12   :  { %s1299_s26 = smov [#allocation4]   ;;  %s1270_s30 = scalar_lea.hbm %s1747_s2, 16 }
  0x13   :  { %s30_s27 = sshll.u32 %s1299_s26, 4  ;;  %p1271_p8 = scmp.ne.s32.totalorder %s1747_s2, %s1270_s30  ;;  %s31_s27 = int_to_ptr.vmem [resolvable:$true] %s30_s27 }
  0x14   :  { %p1274_p9 = scmp.lt.u32.totalorder %s1270_s30, %s1747_s2 }
  0x16   :  { %p1276_p10 = pnand %p1274_p9, %p1271_p8 }
  0x18   :  { %1279 = shalt.err (!%p1276_p10)
}
  0x19   :  { %s1280_s8 = scalar_lea.vmem %s31_s27, 16  ;;  %s1284_s1 = scalar_lea.vmem %s31_s27, 32 }
  0x1a   :  { %p1281_p11 = scmp.ne.s32.totalorder %s31_s27, %s1280_s8  ;;  %p1285_p12 = scmp.lt.s32.totalorder %s31_s27, %s31_s27 }
  0x1b   :  { %p1286_p13 = scmp.lt.s32.totalorder %s1284_s1, %s1280_s8 }
  0x1d   :  { %p1287_p0 = por %p1286_p13, %p1285_p12 }
  0x1f   :  { %p1288_p1 = pnand %p1287_p0, %p1281_p11 }
  0x21   :  { %1291 = shalt.err (!%p1288_p1)
}
  0x22   :  { %33 = dma.hbm_to_vmem [thread:$0]  %s1747_s2, 16, %s31_s27, [#allocation5]  }
  0x23   :  { %1292 = dma.done.wait [#allocation3], 128  }
  0x24   :  { %1293 = vsyncadd [#allocation3], 4294967168 }
  0x25   :  { %1294 = dma.done.wait [#allocation5], 16  }
  0x26   :  { %1295 = vsyncadd [#allocation5], 4294967280  ;;  %v1300_v0 = vmov 0.0   ;;  %vm1301_vm0 = vmmov 0   ;;  %v1222_v1 = vld [vmem:[#allocation2] sm:$0xff]   ;;  %vm228_vm1 = vcmask 130048  }
  0x27   :  { %1112 = vmatprep.subr.bf16.mxu0 %v1300_v0  ;;  %1114 = vmatprep.mubr.msk.bf16.mxu0 %vm1301_vm0, %v1300_v0  ;;  %v1223_v2 = vld [vmem:[%s1745_s0] sm:$0xff]   ;;  %v1224_v3 = vld [vmem:[%s1745_s0 + $0x68] sm:$0xff]   ;;  %v1226_v5 = vld [vmem:[%s1745_s0 + $0x70] sm:$0xff]   ;;  %vm880_vm4 = vcmask 257024  }
  0x28   :  { %1214 = vmatprep.subr.bf16.mxu1 %v1300_v0  ;;  %1166 = vmatprep.mubr.msk.bf16.mxu1 %vm1301_vm0, %v1300_v0  ;;  %v1225_v4 = vld [vmem:[%s1745_s0 + $0x8] sm:$0xff]   ;;  %v1227_v6 = vld [vmem:[%s1745_s0 + $0x10] sm:$0xff]   ;;  %v1228_v7 = vld [vmem:[%s1745_s0 + $0x78] sm:$0xff]  }
  0x29   :  { %1113 = vmatpush3.bf16.msra.mxu0 %v1222_v1  ;;  %1215 = vmatpush3.bf16.msra.mxu1 %v1222_v1  ;;  %v1229_v8 = vld [vmem:[%s1745_s0 + $0x18] sm:$0xff]   ;;  %v1230_v9 = vld [vmem:[%s1745_s0 + $0x80] sm:$0xff]   ;;  %v1232_v11 = vld [vmem:[%s1745_s0 + $0x88] sm:$0xff]  }
  0x2a   :  { %v1231_v10 = vld [vmem:[%s1745_s0 + $0x20] sm:$0xff]   ;;  %v1233_v12 = vld [vmem:[%s1745_s0 + $0x28] sm:$0xff]   ;;  %v1234_v13 = vld [vmem:[%s1745_s0 + $0x90] sm:$0xff]  }
  0x2b   :  { %v1235_v14 = vld [vmem:[%s1745_s0 + $0x30] sm:$0xff]   ;;  %v1236_v15 = vld [vmem:[%s1745_s0 + $0x98] sm:$0xff]   ;;  %v1238_v17 = vld [vmem:[%s1745_s0 + $0xa0] sm:$0xff]  }
  0x2c   :  { %1115 = vmatmul.mubr.msk.bf16.vlgmr.msra.gmra.mrb[0].mxu0 %vm228_vm1, %v1223_v2  ;;  %1167 = vmatmul.mubr.msk.bf16.vlgmr.msra.gmra.mrb[0].mxu1 %vm228_vm1, %v1224_v3  ;;  %v1237_v16 = vld [vmem:[%s1745_s0 + $0x38] sm:$0xff]   ;;  %v1239_v18 = vld [vmem:[%s1745_s0 + $0x40] sm:$0xff]   ;;  %v1240_v19 = vld [vmem:[%s1745_s0 + $0xa8] sm:$0xff]  }
  0x2d   :  { %1118 = vmatprep.mubr.msk.bf16.mxu0 %vm1301_vm0, %v1300_v0  ;;  %1170 = vmatprep.mubr.msk.bf16.mxu1 %vm1301_vm0, %v1300_v0  ;;  %v1241_v20 = vld [vmem:[%s1745_s0 + $0x48] sm:$0xff]   ;;  %v1242_v21 = vld [vmem:[%s1745_s0 + $0xb0] sm:$0xff]   ;;  %v1244_v23 = vld [vmem:[%s1745_s0 + $0xb8] sm:$0xff]  }
  0x2e   :  { %v1243_v22 = vld [vmem:[%s1745_s0 + $0x50] sm:$0xff]   ;;  %v1245_v24 = vld [vmem:[%s1745_s0 + $0x58] sm:$0xff]   ;;  %v1246_v25 = vld [vmem:[%s1745_s0 + $0xc0] ss:$0 sps:$4 sm:$0xff]  }
  0x2f   :  { %v1247_v26 = vld [vmem:[%s1745_s0 + $0x60] sm:$0xff]   ;;  %v1498_v27 = vld [vmem:[#allocation4] ss:$0 sm:$0xff] }
  0x34   :  { %1119 = vmatmul.mubr.msk.bf16.gmra.mrb[4].mxu0 %vm228_vm1, %v1225_v4  ;;  %1171 = vmatmul.mubr.msk.bf16.gmra.mrb[4].mxu1 %vm228_vm1, %v1226_v5 }
  0x35   :  { %1122 = vmatprep.mubr.msk.bf16.mxu0 %vm1301_vm0, %v1300_v0  ;;  %1174 = vmatprep.mubr.msk.bf16.mxu1 %vm1301_vm0, %v1300_v0 }
  0x3c   :  { %1123 = vmatmul.mubr.msk.bf16.gmra.mrb[8].mxu0 %vm228_vm1, %v1227_v6  ;;  %1175 = vmatmul.mubr.msk.bf16.gmra.mrb[8].mxu1 %vm228_vm1, %v1228_v7 }
  0x3d   :  { %1126 = vmatprep.mubr.msk.bf16.mxu0 %vm1301_vm0, %v1300_v0  ;;  %1178 = vmatprep.mubr.msk.bf16.mxu1 %vm1301_vm0, %v1300_v0 }
  0x44   :  { %1127 = vmatmul.mubr.msk.bf16.gmra.mrb[12].mxu0 %vm228_vm1, %v1229_v8  ;;  %1179 = vmatmul.mubr.msk.bf16.gmra.mrb[12].mxu1 %vm228_vm1, %v1230_v9 }
  0x45   :  { %1130 = vmatprep.mubr.msk.bf16.mxu0 %vm1301_vm0, %v1300_v0  ;;  %1182 = vmatprep.mubr.msk.bf16.mxu1 %vm1301_vm0, %v1300_v0 }
  0x4c   :  { %1131 = vmatmul.mubr.msk.bf16.gmra.mrb[16].mxu0 %vm228_vm1, %v1231_v10  ;;  %1183 = vmatmul.mubr.msk.bf16.gmra.mrb[16].mxu1 %vm228_vm1, %v1232_v11 }
  0x4d   :  { %1134 = vmatprep.mubr.msk.bf16.mxu0 %vm1301_vm0, %v1300_v0  ;;  %1186 = vmatprep.mubr.msk.bf16.mxu1 %vm1301_vm0, %v1300_v0 }
  0x54   :  { %1135 = vmatmul.mubr.msk.bf16.gmra.mrb[20].mxu0 %vm228_vm1, %v1233_v12  ;;  %1187 = vmatmul.mubr.msk.bf16.gmra.mrb[20].mxu1 %vm228_vm1, %v1234_v13 }
  0x55   :  { %1138 = vmatprep.mubr.msk.bf16.mxu0 %vm1301_vm0, %v1300_v0  ;;  %1190 = vmatprep.mubr.msk.bf16.mxu1 %vm1301_vm0, %v1300_v0 }
  0x5c   :  { %1139 = vmatmul.mubr.msk.bf16.gmra.mrb[24].mxu0 %vm228_vm1, %v1235_v14  ;;  %1191 = vmatmul.mubr.msk.bf16.gmra.mrb[24].mxu1 %vm228_vm1, %v1236_v15 }
  0x5d   :  { %1142 = vmatprep.mubr.msk.bf16.mxu0 %vm1301_vm0, %v1300_v0  ;;  %1194 = vmatprep.mubr.msk.bf16.mxu1 %vm1301_vm0, %v1300_v0 }
  0x64   :  { %1143 = vmatmul.mubr.msk.bf16.gmra.mrb[28].mxu0 %vm228_vm1, %v1237_v16  ;;  %1195 = vmatmul.mubr.msk.bf16.gmra.mrb[28].mxu1 %vm228_vm1, %v1238_v17 }
  0x65   :  { %1146 = vmatprep.mubr.msk.bf16.mxu0 %vm1301_vm0, %v1300_v0  ;;  %1198 = vmatprep.mubr.msk.bf16.mxu1 %vm1301_vm0, %v1300_v0 }
  0x6c   :  { %1147 = vmatmul.mubr.msk.bf16.gmra.mrb[32].mxu0 %vm228_vm1, %v1239_v18  ;;  %1199 = vmatmul.mubr.msk.bf16.gmra.mrb[32].mxu1 %vm228_vm1, %v1240_v19 }
  0x6d   :  { %1150 = vmatprep.mubr.msk.bf16.mxu0 %vm1301_vm0, %v1300_v0  ;;  %1202 = vmatprep.mubr.msk.bf16.mxu1 %vm1301_vm0, %v1300_v0 }
  0x74   :  { %1151 = vmatmul.mubr.msk.bf16.gmra.mrb[36].mxu0 %vm228_vm1, %v1241_v20  ;;  %1203 = vmatmul.mubr.msk.bf16.gmra.mrb[36].mxu1 %vm228_vm1, %v1242_v21 }
  0x75   :  { %1154 = vmatprep.mubr.msk.bf16.mxu0 %vm1301_vm0, %v1300_v0  ;;  %1206 = vmatprep.mubr.msk.bf16.mxu1 %vm1301_vm0, %v1300_v0 }
  0x7c   :  { %1155 = vmatmul.mubr.msk.bf16.gmra.mrb[40].mxu0 %vm228_vm1, %v1243_v22  ;;  %1207 = vmatmul.mubr.msk.bf16.gmra.mrb[40].mxu1 %vm228_vm1, %v1244_v23 }
  0x7d   :  { %1158 = vmatprep.mubr.msk.bf16.mxu0 %vm1301_vm0, %v1300_v0  ;;  %1210 = vmatprep.mubr.msk.bf16.mxu1 %vm1301_vm0, %v1300_v0 }
  0x84   :  { %1159 = vmatmul.mubr.msk.bf16.gmra.mrb[44].mxu0 %vm228_vm1, %v1245_v24  ;;  %1211 = vmatmul.mubr.msk.bf16.gmra.mrb[44].mxu1 %vm228_vm1, %v1246_v25 }
  0x85   :  { %1162 = vmatprep.mubr.msk.bf16.mxu0 %vm1301_vm0, %v1300_v0 }
  0x8c   :  { %1163 = vmatmul.mubr.msk.bf16.gmra.mrb[48].mxu0 %vm228_vm1, %v1247_v26 }
  0xff   :  { %v338_v28 = vpop.f32.mrb[0].mxu0  ;;  %v442_v29 = vpop.f32.mrb[0].mxu1 }
 0x100   :  { %v339_v30 = vadd.f32 %v1498_v27, %v338_v28  ;;  %v1116_v31 = vpop.f32.mrb[1].mxu0  ;;  %v443_v32 = vadd.f32 %v1498_v27, %v442_v29  ;;  %v1168_v33 = vpop.f32.mrb[1].mxu1 }
 0x101   :  { %v341_v34 = vpop.f32.mrb[2].mxu0  ;;  %v445_v35 = vpop.f32.mrb[2].mxu1 }
 0x102   :  { %vm536_vm2 = vcmp.ge.f32.partialorder %v339_v30, 0.0  ;;  %v585_v36 = vmul.f32 0.2, %v339_v30  ;;  %v342_v37 = vadd.f32 %v1498_v27, %v341_v34  ;;  %v1117_v38 = vpop.f32.mrb[3].mxu0  ;;  %vm562_vm3 = vcmp.ge.f32.partialorder %v443_v32, 0.0  ;;  %v1169_v39 = vpop.f32.mrb[3].mxu1 }
 0x103   :  { %v611_v40 = vmul.f32 0.2, %v443_v32  ;;  %v446_v41 = vadd.f32 %v1498_v27, %v445_v35 }
 0x104   :  { %v634_v42 = vsel %vm536_vm2, %v339_v30, %v585_v36  ;;  %vm537_vm5 = vcmp.ge.f32.partialorder %v342_v37, 0.0  ;;  %v586_v43 = vmul.f32 0.2, %v342_v37 }
 0x105   :  { %v1037_v44 = vpack.c.bf16 %v634_v42, %v634_v42  ;;  %v660_v45 = vsel %vm562_vm3, %v443_v32, %v611_v40  ;;  %vm563_vm6 = vcmp.ge.f32.partialorder %v446_v41, 0.0  ;;  %v612_v46 = vmul.f32 0.2, %v446_v41 }
 0x106   :  { %v635_v47 = vsel %vm537_vm5, %v342_v37, %v586_v43  ;;  %v1063_v48 = vpack.c.bf16 %v660_v45, %v660_v45 }
 0x107   :  { %881 = vst.msk [vmem:[%s1748_s3] sm:$0xf] %vm880_vm4, %v1037_v44  ;;  %v1038_v49 = vpack.c.bf16 %v635_v47, %v635_v47  ;;  %v346_v50 = vpop.f32.mrb[4].mxu0  ;;  %v661_v51 = vsel %vm563_vm6, %v446_v41, %v612_v46  ;;  %v450_v52 = vpop.f32.mrb[4].mxu1 }
 0x108   :  { %907 = vst.msk [vmem:[%s1748_s3 + $0x68] sm:$0xf] %vm880_vm4, %v1063_v48  ;;  %v347_v53 = vadd.f32 %v1498_v27, %v346_v50  ;;  %v1064_v54 = vpack.c.bf16 %v661_v51, %v661_v51  ;;  %v1120_v55 = vpop.f32.mrb[5].mxu0  ;;  %v451_v56 = vadd.f32 %v1498_v27, %v450_v52  ;;  %v1172_v57 = vpop.f32.mrb[5].mxu1 }
 0x109   :  { %882 = vst.msk [vmem:[%s1748_s3 + $0x4] sm:$0xf] %vm880_vm4, %v1038_v49  ;;  %v349_v58 = vpop.f32.mrb[6].mxu0  ;;  %v453_v59 = vpop.f32.mrb[6].mxu1 }
 0x10a   :  { %vm538_vm7 = vcmp.ge.f32.partialorder %v347_v53, 0.0  ;;  %v587_v60 = vmul.f32 0.2, %v347_v53  ;;  %908 = vst.msk [vmem:[%s1748_s3 + $0x6c] sm:$0xf] %vm880_vm4, %v1064_v54  ;;  %v350_v61 = vadd.f32 %v1498_v27, %v349_v58  ;;  %v1121_v62 = vpop.f32.mrb[7].mxu0  ;;  %v454_v1 = vadd.f32 %v1498_v27, %v453_v59 }
 0x10b   :  { %vm564_vm8 = vcmp.ge.f32.partialorder %v451_v56, 0.0  ;;  %v1173_v63 = vpop.f32.mrb[7].mxu1  ;;  %v613_v0 = vmul.f32 0.2, %v451_v56 }
 0x10c   :  { %v636_v2 = vsel %vm538_vm7, %v347_v53, %v587_v60  ;;  %vm539_vm9 = vcmp.ge.f32.partialorder %v350_v61, 0.0  ;;  %v588_v3 = vmul.f32 0.2, %v350_v61  ;;  %vm565_vm10 = vcmp.ge.f32.partialorder %v454_v1, 0.0 }
 0x10d   :  { %v1039_v4 = vpack.c.bf16 %v636_v2, %v636_v2  ;;  %v662_v5 = vsel %vm564_vm8, %v451_v56, %v613_v0  ;;  %v614_v6 = vmul.f32 0.2, %v454_v1 }
 0x10e   :  { %v637_v7 = vsel %vm539_vm9, %v350_v61, %v588_v3  ;;  %v1065_v8 = vpack.c.bf16 %v662_v5, %v662_v5 }
 0x10f   :  { %883 = vst.msk [vmem:[%s1748_s3 + $0x8] sm:$0xf] %vm880_vm4, %v1039_v4  ;;  %v1040_v9 = vpack.c.bf16 %v637_v7, %v637_v7  ;;  %v354_v10 = vpop.f32.mrb[8].mxu0  ;;  %v663_v11 = vsel %vm565_vm10, %v454_v1, %v614_v6  ;;  %v458_v12 = vpop.f32.mrb[8].mxu1 }
 0x110   :  { %909 = vst.msk [vmem:[%s1748_s3 + $0x70] sm:$0xf] %vm880_vm4, %v1065_v8  ;;  %v355_v13 = vadd.f32 %v1498_v27, %v354_v10  ;;  %v1066_v14 = vpack.c.bf16 %v663_v11, %v663_v11  ;;  %v1124_v15 = vpop.f32.mrb[9].mxu0  ;;  %v459_v16 = vadd.f32 %v1498_v27, %v458_v12  ;;  %v1176_v17 = vpop.f32.mrb[9].mxu1 }
 0x111   :  { %884 = vst.msk [vmem:[%s1748_s3 + $0xc] sm:$0xf] %vm880_vm4, %v1040_v9  ;;  %v357_v18 = vpop.f32.mrb[10].mxu0  ;;  %v461_v19 = vpop.f32.mrb[10].mxu1 }
 0x112   :  { %vm540_vm11 = vcmp.ge.f32.partialorder %v355_v13, 0.0  ;;  %v589_v20 = vmul.f32 0.2, %v355_v13  ;;  %910 = vst.msk [vmem:[%s1748_s3 + $0x74] sm:$0xf] %vm880_vm4, %v1066_v14  ;;  %v358_v21 = vadd.f32 %v1498_v27, %v357_v18  ;;  %v1125_v22 = vpop.f32.mrb[11].mxu0  ;;  %v462_v25 = vadd.f32 %v1498_v27, %v461_v19 }
 0x113   :  { %vm566_vm12 = vcmp.ge.f32.partialorder %v459_v16, 0.0  ;;  %v1177_v23 = vpop.f32.mrb[11].mxu1  ;;  %v615_v24 = vmul.f32 0.2, %v459_v16 }
 0x114   :  { %v638_v26 = vsel %vm540_vm11, %v355_v13, %v589_v20  ;;  %vm541_vm13 = vcmp.ge.f32.partialorder %v358_v21, 0.0  ;;  %v590_v28 = vmul.f32 0.2, %v358_v21  ;;  %vm567_vm14 = vcmp.ge.f32.partialorder %v462_v25, 0.0 }
 0x115   :  { %v1041_v29 = vpack.c.bf16 %v638_v26, %v638_v26  ;;  %v664_v30 = vsel %vm566_vm12, %v459_v16, %v615_v24  ;;  %v616_v31 = vmul.f32 0.2, %v462_v25 }
 0x116   :  { %v639_v32 = vsel %vm541_vm13, %v358_v21, %v590_v28  ;;  %v1067_v33 = vpack.c.bf16 %v664_v30, %v664_v30 }
 0x117   :  { %885 = vst.msk [vmem:[%s1748_s3 + $0x10] sm:$0xf] %vm880_vm4, %v1041_v29  ;;  %v1042_v34 = vpack.c.bf16 %v639_v32, %v639_v32  ;;  %v362_v35 = vpop.f32.mrb[12].mxu0  ;;  %v665_v36 = vsel %vm567_vm14, %v462_v25, %v616_v31  ;;  %v466_v37 = vpop.f32.mrb[12].mxu1 }
 0x118   :  { %911 = vst.msk [vmem:[%s1748_s3 + $0x78] sm:$0xf] %vm880_vm4, %v1067_v33  ;;  %v363_v38 = vadd.f32 %v1498_v27, %v362_v35  ;;  %v1068_v39 = vpack.c.bf16 %v665_v36, %v665_v36  ;;  %v1128_v40 = vpop.f32.mrb[13].mxu0  ;;  %v467_v41 = vadd.f32 %v1498_v27, %v466_v37  ;;  %v1180_v42 = vpop.f32.mrb[13].mxu1 }
 0x119   :  { %886 = vst.msk [vmem:[%s1748_s3 + $0x14] sm:$0xf] %vm880_vm4, %v1042_v34  ;;  %v365_v43 = vpop.f32.mrb[14].mxu0  ;;  %v469_v44 = vpop.f32.mrb[14].mxu1 }
 0x11a   :  { %vm542_vm15 = vcmp.ge.f32.partialorder %v363_v38, 0.0  ;;  %v591_v45 = vmul.f32 0.2, %v363_v38  ;;  %912 = vst.msk [vmem:[%s1748_s3 + $0x7c] sm:$0xf] %vm880_vm4, %v1068_v39  ;;  %v366_v46 = vadd.f32 %v1498_v27, %v365_v43  ;;  %v1129_v47 = vpop.f32.mrb[15].mxu0  ;;  %v470_v50 = vadd.f32 %v1498_v27, %v469_v44 }
 0x11b   :  { %vm568_vm0 = vcmp.ge.f32.partialorder %v467_v41, 0.0  ;;  %v1181_v48 = vpop.f32.mrb[15].mxu1  ;;  %v617_v49 = vmul.f32 0.2, %v467_v41 }
 0x11c   :  { %v640_v51 = vsel %vm542_vm15, %v363_v38, %v591_v45  ;;  %vm543_vm1 = vcmp.ge.f32.partialorder %v366_v46, 0.0  ;;  %v592_v52 = vmul.f32 0.2, %v366_v46  ;;  %vm569_vm2 = vcmp.ge.f32.partialorder %v470_v50, 0.0 }
 0x11d   :  { %v1043_v53 = vpack.c.bf16 %v640_v51, %v640_v51  ;;  %v666_v54 = vsel %vm568_vm0, %v467_v41, %v617_v49  ;;  %v618_v55 = vmul.f32 0.2, %v470_v50 }
 0x11e   :  { %v641_v56 = vsel %vm543_vm1, %v366_v46, %v592_v52  ;;  %v1069_v57 = vpack.c.bf16 %v666_v54, %v666_v54 }
 0x11f   :  { %887 = vst.msk [vmem:[%s1748_s3 + $0x18] sm:$0xf] %vm880_vm4, %v1043_v53  ;;  %v1044_v58 = vpack.c.bf16 %v641_v56, %v641_v56  ;;  %v370_v59 = vpop.f32.mrb[16].mxu0  ;;  %v667_v60 = vsel %vm569_vm2, %v470_v50, %v618_v55  ;;  %v474_v61 = vpop.f32.mrb[16].mxu1 }
 0x120   :  { %913 = vst.msk [vmem:[%s1748_s3 + $0x80] sm:$0xf] %vm880_vm4, %v1069_v57  ;;  %v371_v62 = vadd.f32 %v1498_v27, %v370_v59  ;;  %v1070_v63 = vpack.c.bf16 %v667_v60, %v667_v60  ;;  %v1132_v0 = vpop.f32.mrb[17].mxu0  ;;  %v475_v1 = vadd.f32 %v1498_v27, %v474_v61  ;;  %v1184_v2 = vpop.f32.mrb[17].mxu1 }
 0x121   :  { %888 = vst.msk [vmem:[%s1748_s3 + $0x1c] sm:$0xf] %vm880_vm4, %v1044_v58  ;;  %v373_v3 = vpop.f32.mrb[18].mxu0  ;;  %v477_v4 = vpop.f32.mrb[18].mxu1 }
 0x122   :  { %vm544_vm3 = vcmp.ge.f32.partialorder %v371_v62, 0.0  ;;  %v593_v5 = vmul.f32 0.2, %v371_v62  ;;  %914 = vst.msk [vmem:[%s1748_s3 + $0x84] sm:$0xf] %vm880_vm4, %v1070_v63  ;;  %v374_v6 = vadd.f32 %v1498_v27, %v373_v3  ;;  %v1133_v7 = vpop.f32.mrb[19].mxu0  ;;  %v478_v10 = vadd.f32 %v1498_v27, %v477_v4 }
 0x123   :  { %vm570_vm5 = vcmp.ge.f32.partialorder %v475_v1, 0.0  ;;  %v1185_v8 = vpop.f32.mrb[19].mxu1  ;;  %v619_v9 = vmul.f32 0.2, %v475_v1 }
 0x124   :  { %v642_v11 = vsel %vm544_vm3, %v371_v62, %v593_v5  ;;  %vm545_vm6 = vcmp.ge.f32.partialorder %v374_v6, 0.0  ;;  %v594_v12 = vmul.f32 0.2, %v374_v6  ;;  %vm571_vm7 = vcmp.ge.f32.partialorder %v478_v10, 0.0 }
 0x125   :  { %v1045_v13 = vpack.c.bf16 %v642_v11, %v642_v11  ;;  %v668_v14 = vsel %vm570_vm5, %v475_v1, %v619_v9  ;;  %v620_v15 = vmul.f32 0.2, %v478_v10 }
 0x126   :  { %v643_v16 = vsel %vm545_vm6, %v374_v6, %v594_v12  ;;  %v1071_v17 = vpack.c.bf16 %v668_v14, %v668_v14 }
 0x127   :  { %889 = vst.msk [vmem:[%s1748_s3 + $0x20] sm:$0xf] %vm880_vm4, %v1045_v13  ;;  %v1046_v18 = vpack.c.bf16 %v643_v16, %v643_v16  ;;  %v378_v19 = vpop.f32.mrb[20].mxu0  ;;  %v669_v20 = vsel %vm571_vm7, %v478_v10, %v620_v15  ;;  %v482_v21 = vpop.f32.mrb[20].mxu1 }
 0x128   :  { %915 = vst.msk [vmem:[%s1748_s3 + $0x88] sm:$0xf] %vm880_vm4, %v1071_v17  ;;  %v379_v22 = vadd.f32 %v1498_v27, %v378_v19  ;;  %v1072_v23 = vpack.c.bf16 %v669_v20, %v669_v20  ;;  %v1136_v24 = vpop.f32.mrb[21].mxu0  ;;  %v483_v25 = vadd.f32 %v1498_v27, %v482_v21  ;;  %v1188_v26 = vpop.f32.mrb[21].mxu1 }
 0x129   :  { %890 = vst.msk [vmem:[%s1748_s3 + $0x24] sm:$0xf] %vm880_vm4, %v1046_v18  ;;  %v381_v28 = vpop.f32.mrb[22].mxu0  ;;  %v485_v29 = vpop.f32.mrb[22].mxu1 }
 0x12a   :  { %vm546_vm8 = vcmp.ge.f32.partialorder %v379_v22, 0.0  ;;  %v595_v30 = vmul.f32 0.2, %v379_v22  ;;  %916 = vst.msk [vmem:[%s1748_s3 + $0x8c] sm:$0xf] %vm880_vm4, %v1072_v23  ;;  %v382_v31 = vadd.f32 %v1498_v27, %v381_v28  ;;  %v1137_v32 = vpop.f32.mrb[23].mxu0  ;;  %v486_v35 = vadd.f32 %v1498_v27, %v485_v29 }
 0x12b   :  { %vm572_vm9 = vcmp.ge.f32.partialorder %v483_v25, 0.0  ;;  %v1189_v33 = vpop.f32.mrb[23].mxu1  ;;  %v621_v34 = vmul.f32 0.2, %v483_v25 }
 0x12c   :  { %v644_v36 = vsel %vm546_vm8, %v379_v22, %v595_v30  ;;  %vm547_vm10 = vcmp.ge.f32.partialorder %v382_v31, 0.0  ;;  %v596_v37 = vmul.f32 0.2, %v382_v31  ;;  %vm573_vm11 = vcmp.ge.f32.partialorder %v486_v35, 0.0 }
 0x12d   :  { %v1047_v38 = vpack.c.bf16 %v644_v36, %v644_v36  ;;  %v670_v39 = vsel %vm572_vm9, %v483_v25, %v621_v34  ;;  %v622_v40 = vmul.f32 0.2, %v486_v35 }
 0x12e   :  { %v645_v41 = vsel %vm547_vm10, %v382_v31, %v596_v37  ;;  %v1073_v42 = vpack.c.bf16 %v670_v39, %v670_v39 }
 0x12f   :  { %891 = vst.msk [vmem:[%s1748_s3 + $0x28] sm:$0xf] %vm880_vm4, %v1047_v38  ;;  %v1048_v43 = vpack.c.bf16 %v645_v41, %v645_v41  ;;  %v386_v44 = vpop.f32.mrb[24].mxu0  ;;  %v671_v45 = vsel %vm573_vm11, %v486_v35, %v622_v40  ;;  %v490_v46 = vpop.f32.mrb[24].mxu1 }
 0x130   :  { %917 = vst.msk [vmem:[%s1748_s3 + $0x90] sm:$0xf] %vm880_vm4, %v1073_v42  ;;  %v387_v47 = vadd.f32 %v1498_v27, %v386_v44  ;;  %v1074_v48 = vpack.c.bf16 %v671_v45, %v671_v45  ;;  %v1140_v49 = vpop.f32.mrb[25].mxu0  ;;  %v491_v50 = vadd.f32 %v1498_v27, %v490_v46  ;;  %v1192_v51 = vpop.f32.mrb[25].mxu1 }
 0x131   :  { %892 = vst.msk [vmem:[%s1748_s3 + $0x2c] sm:$0xf] %vm880_vm4, %v1048_v43  ;;  %v389_v52 = vpop.f32.mrb[26].mxu0  ;;  %v493_v53 = vpop.f32.mrb[26].mxu1 }
 0x132   :  { %vm548_vm12 = vcmp.ge.f32.partialorder %v387_v47, 0.0  ;;  %v597_v54 = vmul.f32 0.2, %v387_v47  ;;  %918 = vst.msk [vmem:[%s1748_s3 + $0x94] sm:$0xf] %vm880_vm4, %v1074_v48  ;;  %v390_v55 = vadd.f32 %v1498_v27, %v389_v52  ;;  %v1141_v56 = vpop.f32.mrb[27].mxu0  ;;  %v494_v59 = vadd.f32 %v1498_v27, %v493_v53 }
 0x133   :  { %vm574_vm13 = vcmp.ge.f32.partialorder %v491_v50, 0.0  ;;  %v1193_v57 = vpop.f32.mrb[27].mxu1  ;;  %v623_v58 = vmul.f32 0.2, %v491_v50 }
 0x134   :  { %v646_v60 = vsel %vm548_vm12, %v387_v47, %v597_v54  ;;  %vm549_vm14 = vcmp.ge.f32.partialorder %v390_v55, 0.0  ;;  %v598_v61 = vmul.f32 0.2, %v390_v55  ;;  %vm575_vm15 = vcmp.ge.f32.partialorder %v494_v59, 0.0 }
 0x135   :  { %v1049_v62 = vpack.c.bf16 %v646_v60, %v646_v60  ;;  %v672_v63 = vsel %vm574_vm13, %v491_v50, %v623_v58  ;;  %v624_v0 = vmul.f32 0.2, %v494_v59 }
 0x136   :  { %v647_v1 = vsel %vm549_vm14, %v390_v55, %v598_v61  ;;  %v1075_v2 = vpack.c.bf16 %v672_v63, %v672_v63 }
 0x137   :  { %893 = vst.msk [vmem:[%s1748_s3 + $0x30] sm:$0xf] %vm880_vm4, %v1049_v62  ;;  %v1050_v3 = vpack.c.bf16 %v647_v1, %v647_v1  ;;  %v394_v4 = vpop.f32.mrb[28].mxu0  ;;  %v673_v5 = vsel %vm575_vm15, %v494_v59, %v624_v0  ;;  %v498_v6 = vpop.f32.mrb[28].mxu1 }
 0x138   :  { %919 = vst.msk [vmem:[%s1748_s3 + $0x98] sm:$0xf] %vm880_vm4, %v1075_v2  ;;  %v395_v7 = vadd.f32 %v1498_v27, %v394_v4  ;;  %v1076_v8 = vpack.c.bf16 %v673_v5, %v673_v5  ;;  %v1144_v9 = vpop.f32.mrb[29].mxu0  ;;  %v499_v10 = vadd.f32 %v1498_v27, %v498_v6  ;;  %v1196_v11 = vpop.f32.mrb[29].mxu1 }
 0x139   :  { %894 = vst.msk [vmem:[%s1748_s3 + $0x34] sm:$0xf] %vm880_vm4, %v1050_v3  ;;  %v397_v12 = vpop.f32.mrb[30].mxu0  ;;  %v501_v13 = vpop.f32.mrb[30].mxu1 }
 0x13a   :  { %vm550_vm0 = vcmp.ge.f32.partialorder %v395_v7, 0.0  ;;  %v599_v14 = vmul.f32 0.2, %v395_v7  ;;  %920 = vst.msk [vmem:[%s1748_s3 + $0x9c] sm:$0xf] %vm880_vm4, %v1076_v8  ;;  %v398_v15 = vadd.f32 %v1498_v27, %v397_v12  ;;  %v1145_v16 = vpop.f32.mrb[31].mxu0  ;;  %v502_v19 = vadd.f32 %v1498_v27, %v501_v13 }
 0x13b   :  { %vm576_vm1 = vcmp.ge.f32.partialorder %v499_v10, 0.0  ;;  %v1197_v17 = vpop.f32.mrb[31].mxu1  ;;  %v625_v18 = vmul.f32 0.2, %v499_v10 }
 0x13c   :  { %v648_v20 = vsel %vm550_vm0, %v395_v7, %v599_v14  ;;  %vm551_vm2 = vcmp.ge.f32.partialorder %v398_v15, 0.0  ;;  %v600_v21 = vmul.f32 0.2, %v398_v15  ;;  %vm577_vm3 = vcmp.ge.f32.partialorder %v502_v19, 0.0 }
 0x13d   :  { %v1051_v22 = vpack.c.bf16 %v648_v20, %v648_v20  ;;  %v674_v23 = vsel %vm576_vm1, %v499_v10, %v625_v18  ;;  %v626_v24 = vmul.f32 0.2, %v502_v19 }
 0x13e   :  { %v649_v25 = vsel %vm551_vm2, %v398_v15, %v600_v21  ;;  %v1077_v26 = vpack.c.bf16 %v674_v23, %v674_v23 }
 0x13f   :  { %895 = vst.msk [vmem:[%s1748_s3 + $0x38] sm:$0xf] %vm880_vm4, %v1051_v22  ;;  %v1052_v28 = vpack.c.bf16 %v649_v25, %v649_v25  ;;  %v402_v29 = vpop.f32.mrb[32].mxu0  ;;  %v675_v30 = vsel %vm577_vm3, %v502_v19, %v626_v24  ;;  %v506_v31 = vpop.f32.mrb[32].mxu1 }
 0x140   :  { %921 = vst.msk [vmem:[%s1748_s3 + $0xa0] sm:$0xf] %vm880_vm4, %v1077_v26  ;;  %v403_v32 = vadd.f32 %v1498_v27, %v402_v29  ;;  %v1078_v33 = vpack.c.bf16 %v675_v30, %v675_v30  ;;  %v1148_v34 = vpop.f32.mrb[33].mxu0  ;;  %v507_v35 = vadd.f32 %v1498_v27, %v506_v31  ;;  %v1200_v36 = vpop.f32.mrb[33].mxu1 }
 0x141   :  { %896 = vst.msk [vmem:[%s1748_s3 + $0x3c] sm:$0xf] %vm880_vm4, %v1052_v28  ;;  %v405_v37 = vpop.f32.mrb[34].mxu0  ;;  %v509_v38 = vpop.f32.mrb[34].mxu1 }
 0x142   :  { %vm552_vm5 = vcmp.ge.f32.partialorder %v403_v32, 0.0  ;;  %v601_v39 = vmul.f32 0.2, %v403_v32  ;;  %922 = vst.msk [vmem:[%s1748_s3 + $0xa4] sm:$0xf] %vm880_vm4, %v1078_v33  ;;  %v406_v40 = vadd.f32 %v1498_v27, %v405_v37  ;;  %v1149_v41 = vpop.f32.mrb[35].mxu0  ;;  %v510_v44 = vadd.f32 %v1498_v27, %v509_v38 }
 0x143   :  { %vm578_vm6 = vcmp.ge.f32.partialorder %v507_v35, 0.0  ;;  %v1201_v42 = vpop.f32.mrb[35].mxu1  ;;  %v627_v43 = vmul.f32 0.2, %v507_v35 }
 0x144   :  { %v650_v45 = vsel %vm552_vm5, %v403_v32, %v601_v39  ;;  %vm553_vm7 = vcmp.ge.f32.partialorder %v406_v40, 0.0  ;;  %v602_v46 = vmul.f32 0.2, %v406_v40  ;;  %vm579_vm8 = vcmp.ge.f32.partialorder %v510_v44, 0.0 }
 0x145   :  { %v1053_v47 = vpack.c.bf16 %v650_v45, %v650_v45  ;;  %v676_v48 = vsel %vm578_vm6, %v507_v35, %v627_v43  ;;  %v628_v49 = vmul.f32 0.2, %v510_v44 }
 0x146   :  { %v651_v50 = vsel %vm553_vm7, %v406_v40, %v602_v46  ;;  %v1079_v51 = vpack.c.bf16 %v676_v48, %v676_v48 }
 0x147   :  { %897 = vst.msk [vmem:[%s1748_s3 + $0x40] sm:$0xf] %vm880_vm4, %v1053_v47  ;;  %v1054_v52 = vpack.c.bf16 %v651_v50, %v651_v50  ;;  %v410_v53 = vpop.f32.mrb[36].mxu0  ;;  %v677_v54 = vsel %vm579_vm8, %v510_v44, %v628_v49  ;;  %v514_v55 = vpop.f32.mrb[36].mxu1 }
 0x148   :  { %923 = vst.msk [vmem:[%s1748_s3 + $0xa8] sm:$0xf] %vm880_vm4, %v1079_v51  ;;  %v411_v56 = vadd.f32 %v1498_v27, %v410_v53  ;;  %v1080_v57 = vpack.c.bf16 %v677_v54, %v677_v54  ;;  %v1152_v58 = vpop.f32.mrb[37].mxu0  ;;  %v515_v59 = vadd.f32 %v1498_v27, %v514_v55  ;;  %v1204_v60 = vpop.f32.mrb[37].mxu1 }
 0x149   :  { %898 = vst.msk [vmem:[%s1748_s3 + $0x44] sm:$0xf] %vm880_vm4, %v1054_v52  ;;  %v413_v61 = vpop.f32.mrb[38].mxu0  ;;  %v517_v62 = vpop.f32.mrb[38].mxu1 }
 0x14a   :  { %vm554_vm9 = vcmp.ge.f32.partialorder %v411_v56, 0.0  ;;  %v603_v63 = vmul.f32 0.2, %v411_v56  ;;  %924 = vst.msk [vmem:[%s1748_s3 + $0xac] sm:$0xf] %vm880_vm4, %v1080_v57  ;;  %v414_v0 = vadd.f32 %v1498_v27, %v413_v61  ;;  %v1153_v1 = vpop.f32.mrb[39].mxu0  ;;  %v518_v4 = vadd.f32 %v1498_v27, %v517_v62 }
 0x14b   :  { %vm580_vm10 = vcmp.ge.f32.partialorder %v515_v59, 0.0  ;;  %v1205_v2 = vpop.f32.mrb[39].mxu1  ;;  %v629_v3 = vmul.f32 0.2, %v515_v59 }
 0x14c   :  { %v652_v5 = vsel %vm554_vm9, %v411_v56, %v603_v63  ;;  %vm555_vm11 = vcmp.ge.f32.partialorder %v414_v0, 0.0  ;;  %v604_v6 = vmul.f32 0.2, %v414_v0  ;;  %vm581_vm12 = vcmp.ge.f32.partialorder %v518_v4, 0.0 }
 0x14d   :  { %v1055_v7 = vpack.c.bf16 %v652_v5, %v652_v5  ;;  %v678_v8 = vsel %vm580_vm10, %v515_v59, %v629_v3  ;;  %v630_v9 = vmul.f32 0.2, %v518_v4 }
 0x14e   :  { %v653_v10 = vsel %vm555_vm11, %v414_v0, %v604_v6  ;;  %v1081_v11 = vpack.c.bf16 %v678_v8, %v678_v8 }
 0x14f   :  { %899 = vst.msk [vmem:[%s1748_s3 + $0x48] sm:$0xf] %vm880_vm4, %v1055_v7  ;;  %v1056_v12 = vpack.c.bf16 %v653_v10, %v653_v10  ;;  %v418_v13 = vpop.f32.mrb[40].mxu0  ;;  %v679_v14 = vsel %vm581_vm12, %v518_v4, %v630_v9  ;;  %v522_v15 = vpop.f32.mrb[40].mxu1 }
 0x150   :  { %925 = vst.msk [vmem:[%s1748_s3 + $0xb0] sm:$0xf] %vm880_vm4, %v1081_v11  ;;  %v419_v16 = vadd.f32 %v1498_v27, %v418_v13  ;;  %v1082_v17 = vpack.c.bf16 %v679_v14, %v679_v14  ;;  %v1156_v18 = vpop.f32.mrb[41].mxu0  ;;  %v523_v19 = vadd.f32 %v1498_v27, %v522_v15  ;;  %v1208_v20 = vpop.f32.mrb[41].mxu1 }
 0x151   :  { %900 = vst.msk [vmem:[%s1748_s3 + $0x4c] sm:$0xf] %vm880_vm4, %v1056_v12  ;;  %v421_v21 = vpop.f32.mrb[42].mxu0  ;;  %v525_v22 = vpop.f32.mrb[42].mxu1 }
 0x152   :  { %vm556_vm13 = vcmp.ge.f32.partialorder %v419_v16, 0.0  ;;  %v605_v23 = vmul.f32 0.2, %v419_v16  ;;  %926 = vst.msk [vmem:[%s1748_s3 + $0xb4] sm:$0xf] %vm880_vm4, %v1082_v17  ;;  %v422_v24 = vadd.f32 %v1498_v27, %v421_v21  ;;  %v1157_v25 = vpop.f32.mrb[43].mxu0  ;;  %v526_v29 = vadd.f32 %v1498_v27, %v525_v22 }
 0x153   :  { %vm582_vm14 = vcmp.ge.f32.partialorder %v523_v19, 0.0  ;;  %v1209_v26 = vpop.f32.mrb[43].mxu1  ;;  %v631_v28 = vmul.f32 0.2, %v523_v19 }
 0x154   :  { %v654_v30 = vsel %vm556_vm13, %v419_v16, %v605_v23  ;;  %vm557_vm15 = vcmp.ge.f32.partialorder %v422_v24, 0.0  ;;  %v606_v31 = vmul.f32 0.2, %v422_v24  ;;  %vm583_vm0 = vcmp.ge.f32.partialorder %v526_v29, 0.0 }
 0x155   :  { %v1057_v32 = vpack.c.bf16 %v654_v30, %v654_v30  ;;  %v680_v33 = vsel %vm582_vm14, %v523_v19, %v631_v28  ;;  %v632_v34 = vmul.f32 0.2, %v526_v29 }
 0x156   :  { %v655_v35 = vsel %vm557_vm15, %v422_v24, %v606_v31  ;;  %v1083_v36 = vpack.c.bf16 %v680_v33, %v680_v33 }
 0x157   :  { %901 = vst.msk [vmem:[%s1748_s3 + $0x50] sm:$0xf] %vm880_vm4, %v1057_v32  ;;  %v1058_v37 = vpack.c.bf16 %v655_v35, %v655_v35  ;;  %v426_v38 = vpop.f32.mrb[44].mxu0  ;;  %v681_v39 = vsel %vm583_vm0, %v526_v29, %v632_v34  ;;  %v530_v40 = vpop.f32.mrb[44].mxu1 }
 0x158   :  { %927 = vst.msk [vmem:[%s1748_s3 + $0xb8] sm:$0xf] %vm880_vm4, %v1083_v36  ;;  %v427_v41 = vadd.f32 %v1498_v27, %v426_v38  ;;  %v1084_v42 = vpack.c.bf16 %v681_v39, %v681_v39  ;;  %v1160_v43 = vpop.f32.mrb[45].mxu0  ;;  %v531_v44 = vadd.f32 %v1498_v27, %v530_v40  ;;  %v1212_v45 = vpop.f32.mrb[45].mxu1 }
 0x159   :  { %902 = vst.msk [vmem:[%s1748_s3 + $0x54] sm:$0xf] %vm880_vm4, %v1058_v37  ;;  %v429_v46 = vpop.f32.mrb[46].mxu0  ;;  %v533_v47 = vpop.f32.mrb[46].mxu1 }
 0x15a   :  { %vm558_vm1 = vcmp.ge.f32.partialorder %v427_v41, 0.0  ;;  %v607_v48 = vmul.f32 0.2, %v427_v41  ;;  %928 = vst.msk [vmem:[%s1748_s3 + $0xbc] sm:$0xf] %vm880_vm4, %v1084_v42  ;;  %v430_v49 = vadd.f32 %v1498_v27, %v429_v46  ;;  %v1161_v50 = vpop.f32.mrb[47].mxu0 }
 0x15b   :  { %vm584_vm2 = vcmp.ge.f32.partialorder %v531_v44, 0.0  ;;  %v1213_v51 = vpop.f32.mrb[47].mxu1  ;;  %v633_v52 = vmul.f32 0.2, %v531_v44 }
 0x15c   :  { %v656_v53 = vsel %vm558_vm1, %v427_v41, %v607_v48  ;;  %vm559_vm3 = vcmp.ge.f32.partialorder %v430_v49, 0.0  ;;  %v608_v54 = vmul.f32 0.2, %v430_v49 }
 0x15d   :  { %v1059_v55 = vpack.c.bf16 %v656_v53, %v656_v53  ;;  %v682_v56 = vsel %vm584_vm2, %v531_v44, %v633_v52 }
 0x15e   :  { %v657_v57 = vsel %vm559_vm3, %v430_v49, %v608_v54  ;;  %v1085_v58 = vpack.c.bf16 %v682_v56, %v682_v56 }
 0x15f   :  { %903 = vst.msk [vmem:[%s1748_s3 + $0x58] sm:$0xf] %vm880_vm4, %v1059_v55  ;;  %v1060_v59 = vpack.c.bf16 %v657_v57, %v657_v57  ;;  %v434_v60 = vpop.f32.mrb[48].mxu0 }
 0x160   :  { %929 = vst.msk [vmem:[%s1748_s3 + $0xc0] sm:$0xf] %vm880_vm4, %v1085_v58  ;;  %v435_v61 = vadd.f32 %v1498_v27, %v434_v60  ;;  %v1164_v62 = vpop.f32.mrb[49].mxu0 }
 0x161   :  { %904 = vst.msk [vmem:[%s1748_s3 + $0x5c] sm:$0xf] %vm880_vm4, %v1060_v59  ;;  %v437_v63 = vpop.f32.mrb[50].mxu0 }
 0x162   :  { %vm560_vm5 = vcmp.ge.f32.partialorder %v435_v61, 0.0  ;;  %v609_v0 = vmul.f32 0.2, %v435_v61  ;;  %v438_v1 = vadd.f32 %v1498_v27, %v437_v63  ;;  %v1165_v2 = vpop.f32.mrb[51].mxu0 }
 0x164   :  { %v658_v3 = vsel %vm560_vm5, %v435_v61, %v609_v0  ;;  %vm561_vm6 = vcmp.ge.f32.partialorder %v438_v1, 0.0  ;;  %v610_v4 = vmul.f32 0.2, %v438_v1 }
 0x165   :  { %v1061_v5 = vpack.c.bf16 %v658_v3, %v658_v3 }
 0x166   :  { %v659_v6 = vsel %vm561_vm6, %v438_v1, %v610_v4 }
 0x167   :  { %905 = vst.msk [vmem:[%s1748_s3 + $0x60] sm:$0xf] %vm880_vm4, %v1061_v5  ;;  %v1062_v7 = vpack.c.bf16 %v659_v6, %v659_v6 }
 0x169   :  { %906 = vst.msk [vmem:[%s1748_s3 + $0x64] sm:$0xf] %vm880_vm4, %v1062_v7 }
 0x16a   :  { %934 = vsyncpa [#allocation3], 1 }
 0x16b   :  { %935 = vsyncpa [#allocation5], 1 }

// kernel: encoder_z_forward.4
= control target key start
LH: loop header
LB: loop body
LE: loop exit
PB: predicated region body
PF: predicated region fallthrough
CT: control target
= control target key end

     0   :  { %8 = vsyncpa [#allocation3], 0  ;;  %s1038_s12 = smov [#allocation2]   ;;  %s1311_s0 = inlined_call_operand.vmem [shape: bf16[98,512], index: 0, kind: input, shape index: {}]   ;;  %s1312_s1 = inlined_call_operand.vmem [shape: bf16[512,64], index: 1, kind: input, shape index: {}]   ;;  %s1313_s2 = inlined_call_operand.hbm [shape: f32[1,64], index: 2, kind: input, shape index: {}]   ;;  %s1314_s3 = inlined_call_operand.vmem [shape: bf16[98,64], index: 3, kind: output, shape index: {}]  }
   0x1   :  { %s19_s13 = sshll.u32 %s1038_s12, 4  ;;  %s1014_s16 = scalar_lea.hbm %s1313_s2, 16  ;;  %s20_s13 = int_to_ptr.vmem [resolvable:$true] %s19_s13 }
   0x2   :  { %p1015_p0 = scmp.ne.s32.totalorder %s1313_s2, %s1014_s16  ;;  %p1018_p1 = scmp.lt.u32.totalorder %s1014_s16, %s1313_s2 }
   0x4   :  { %p1020_p2 = pnand %p1018_p1, %p1015_p0 }
   0x6   :  { %1023 = shalt.err (!%p1020_p2)
}
   0x7   :  { %s1024_s21 = scalar_lea.vmem %s20_s13, 16  ;;  %s1028_s22 = scalar_lea.vmem %s20_s13, 32 }
   0x8   :  { %p1025_p3 = scmp.ne.s32.totalorder %s20_s13, %s1024_s21  ;;  %p1029_p4 = scmp.lt.s32.totalorder %s20_s13, %s20_s13 }
   0x9   :  { %p1030_p5 = scmp.lt.s32.totalorder %s1028_s22, %s1024_s21 }
   0xb   :  { %p1031_p6 = por %p1030_p5, %p1029_p4 }
   0xd   :  { %p1032_p7 = pnand %p1031_p6, %p1025_p3 }
   0xf   :  { %1035 = shalt.err (!%p1032_p7)
}
  0x10   :  { %22 = dma.hbm_to_vmem [thread:$0]  %s1313_s2, 16, %s20_s13, [#allocation3]  }
  0x11   :  { %1036 = dma.done.wait [#allocation3], 16  }
  0x12   :  { %1037 = vsyncadd [#allocation3], 4294967280  ;;  %v942_v0 = vld [vmem:[%s1312_s1 + $0x40] sm:$0xff]   ;;  %v946_v4 = vld [vmem:[%s1312_s1 + $0x48] sm:$0xff]   ;;  %vm718_vm1 = vcmask 519168   ;;  %vm731_vm14 = vcmask 516096  }
  0x13   :  { %v943_v1 = vld [vmem:[%s1312_s1 + $0xc0] sm:$0xff]   ;;  %825 = vmatprep.subr.bf16.mxu0 %v942_v0  ;;  %v947_v5 = vld [vmem:[%s1312_s1 + $0xc8] sm:$0xff]   ;;  %v950_v8 = vld [vmem:[%s1312_s1 + $0x50] sm:$0xff]  }
  0x14   :  { %v944_v2 = vld [vmem:[%s1312_s1] sm:$0xff]   ;;  %883 = vmatprep.subr.bf16.mxu1 %v943_v1  ;;  %v948_v6 = vld [vmem:[%s1312_s1 + $0x8] sm:$0xff]   ;;  %v951_v9 = vld [vmem:[%s1312_s1 + $0xd0] sm:$0xff]  }
  0x15   :  { %v945_v3 = vld [vmem:[%s1312_s1 + $0x80] sm:$0xff]   ;;  %826 = vmatpush3.bf16.msra.mxu0 %v944_v2  ;;  %v949_v7 = vld [vmem:[%s1312_s1 + $0x88] sm:$0xff]   ;;  %v952_v10 = vld [vmem:[%s1312_s1 + $0x10] sm:$0xff]  }
  0x16   :  { %884 = vmatpush3.bf16.msra.mxu1 %v945_v3  ;;  %827 = vmatprep.subr.bf16.mxu0 %v946_v4  ;;  %v953_v11 = vld [vmem:[%s1312_s1 + $0x90] sm:$0xff]   ;;  %v954_v12 = vld [vmem:[%s1312_s1 + $0x58] sm:$0xff]   ;;  %v958_v16 = vld [vmem:[%s1312_s1 + $0x60] sm:$0xff]  }
  0x17   :  { %885 = vmatprep.subr.bf16.mxu1 %v947_v5  ;;  %v955_v13 = vld [vmem:[%s1312_s1 + $0xd8] sm:$0xff]   ;;  %v959_v17 = vld [vmem:[%s1312_s1 + $0xe0] sm:$0xff]   ;;  %v962_v20 = vld [vmem:[%s1312_s1 + $0x68] sm:$0xff]  }
  0x18   :  { %v956_v14 = vld [vmem:[%s1312_s1 + $0x18] sm:$0xff]   ;;  %v960_v18 = vld [vmem:[%s1312_s1 + $0x20] sm:$0xff]   ;;  %v963_v21 = vld [vmem:[%s1312_s1 + $0xe8] sm:$0xff]  }
  0x19   :  { %828 = vmatpush3.bf16.msra.mxu0 %v948_v6  ;;  %v957_v15 = vld [vmem:[%s1312_s1 + $0x98] sm:$0xff]   ;;  %v961_v19 = vld [vmem:[%s1312_s1 + $0xa0] sm:$0xff]   ;;  %v964_v22 = vld [vmem:[%s1312_s1 + $0x28] sm:$0xff]  }
  0x1a   :  { %886 = vmatpush3.bf16.msra.mxu1 %v949_v7  ;;  %829 = vmatprep.subr.bf16.mxu0 %v950_v8  ;;  %v965_v23 = vld [vmem:[%s1312_s1 + $0xa8] sm:$0xff]   ;;  %v966_v24 = vld [vmem:[%s1312_s1 + $0x70] sm:$0xff]   ;;  %v970_v28 = vld [vmem:[%s1312_s1 + $0x78] sm:$0xff]  }
  0x1b   :  { %887 = vmatprep.subr.bf16.mxu1 %v951_v9  ;;  %v967_v25 = vld [vmem:[%s1312_s1 + $0xf0] sm:$0xff]   ;;  %v971_v29 = vld [vmem:[%s1312_s1 + $0xf8] sm:$0xff]   ;;  %v51_v54 = vld [vmem:[%s1311_s0 + $0xc0] sm:$0x11] }
  0x1c   :  { %v968_v26 = vld [vmem:[%s1312_s1 + $0x30] sm:$0xff]   ;;  %v972_v30 = vld [vmem:[%s1312_s1 + $0x38] sm:$0xff]   ;;  %v52_v55 = vld [vmem:[%s1311_s0 + $0xc8] sm:$0x11]  ;;  %v764_v58 = vcombine.high %v51_v54, %v51_v54  ;;  %v763_v60 = vcombine.low %v51_v54, %v51_v54 }
  0x1d   :  { %830 = vmatpush3.bf16.msra.mxu0 %v952_v10  ;;  %v969_v27 = vld [vmem:[%s1312_s1 + $0xb0] sm:$0xff]   ;;  %v973_v31 = vld [vmem:[%s1312_s1 + $0xb8] sm:$0xff]   ;;  %v766_v59 = vcombine.high %v52_v55, %v52_v55  ;;  %v765_v61 = vcombine.low %v52_v55, %v52_v55  ;;  %v1245_v0 = vld [vmem:[#allocation2] ss:$0 sm:$0xff] }
  0x1e   :  { %888 = vmatpush3.bf16.msra.mxu1 %v953_v11  ;;  %831 = vmatprep.subr.bf16.mxu0 %v954_v12  ;;  %v974_v32 = vld [vmem:[%s1311_s0] ss:$16 sps:$4 sm:$0xff]   ;;  %v976_v33 = vld [vmem:[%s1311_s0 + $0x4] ss:$16 sps:$4 sm:$0xff]   ;;  %v977_v34 = vld [vmem:[%s1311_s0 + $0x8] ss:$16 sps:$4 sm:$0xff]  }
  0x1f   :  { %889 = vmatprep.subr.bf16.mxu1 %v955_v13  ;;  %v979_v35 = vld [vmem:[%s1311_s0 + $0xc] ss:$16 sps:$4 sm:$0xff]   ;;  %482 = vmatprep.mubr.bf16.mxu0 %v976_v33  ;;  %v980_v36 = vld [vmem:[%s1311_s0 + $0x24] ss:$16 sps:$4 sm:$0xff]   ;;  %v984_v38 = vld [vmem:[%s1311_s0 + $0x20] ss:$16 sps:$4 sm:$0xff]  }
  0x20   :  { %570 = vmatprep.mubr.bf16.mxu1 %v979_v35  ;;  %v982_v37 = vld [vmem:[%s1311_s0 + $0x2c] ss:$16 sps:$4 sm:$0xff]   ;;  %v985_v39 = vld [vmem:[%s1311_s0 + $0x28] ss:$16 sps:$4 sm:$0xff]   ;;  %v986_v40 = vld [vmem:[%s1311_s0 + $0x44] ss:$16 sps:$4 sm:$0xff]  }
  0x21   :  { %832 = vmatpush3.bf16.msra.mxu0 %v956_v14  ;;  %v988_v41 = vld [vmem:[%s1311_s0 + $0x4c] ss:$16 sps:$4 sm:$0xff]   ;;  %v990_v42 = vld [vmem:[%s1311_s0 + $0x40] ss:$16 sps:$4 sm:$0xff]   ;;  %v991_v43 = vld [vmem:[%s1311_s0 + $0x48] ss:$16 sps:$4 sm:$0xff]  }
  0x22   :  { %890 = vmatpush3.bf16.msra.mxu1 %v957_v15  ;;  %833 = vmatprep.subr.bf16.mxu0 %v958_v16  ;;  %v992_v44 = vld [vmem:[%s1311_s0 + $0x64] ss:$16 sps:$4 sm:$0xff]   ;;  %v994_v45 = vld [vmem:[%s1311_s0 + $0x6c] ss:$16 sps:$4 sm:$0xff]   ;;  %v996_v46 = vld [vmem:[%s1311_s0 + $0x60] ss:$16 sps:$4 sm:$0xff]  }
  0x23   :  { %891 = vmatprep.subr.bf16.mxu1 %v959_v17  ;;  %v997_v47 = vld [vmem:[%s1311_s0 + $0x68] ss:$16 sps:$4 sm:$0xff]   ;;  %v998_v48 = vld [vmem:[%s1311_s0 + $0x84] ss:$16 sps:$4 sm:$0xff]   ;;  %v1000_v49 = vld [vmem:[%s1311_s0 + $0x8c] ss:$16 sps:$4 sm:$0xff]  }
  0x24   :  { %v1002_v50 = vld [vmem:[%s1311_s0 + $0x80] ss:$16 sps:$4 sm:$0xff]   ;;  %v1003_v51 = vld [vmem:[%s1311_s0 + $0x88] ss:$16 sps:$4 sm:$0xff]   ;;  %v1004_v52 = vld [vmem:[%s1311_s0 + $0xa4] ss:$16 sps:$4 sm:$0xff]  }
  0x25   :  { %834 = vmatpush3.bf16.msra.mxu0 %v960_v18  ;;  %v1006_v53 = vld [vmem:[%s1311_s0 + $0xac] ss:$16 sps:$4 sm:$0xff]   ;;  %v1008_v56 = vld [vmem:[%s1311_s0 + $0xa0] ss:$16 sps:$4 sm:$0xff]   ;;  %v1009_v57 = vld [vmem:[%s1311_s0 + $0xa8] ss:$16 sps:$4 sm:$0xff]  }
  0x26   :  { %892 = vmatpush3.bf16.msra.mxu1 %v961_v19  ;;  %835 = vmatprep.subr.bf16.mxu0 %v962_v20 }
  0x27   :  { %893 = vmatprep.subr.bf16.mxu1 %v963_v21 }
  0x29   :  { %836 = vmatpush3.bf16.msra.mxu0 %v964_v22 }
  0x2a   :  { %894 = vmatpush3.bf16.msra.mxu1 %v965_v23  ;;  %837 = vmatprep.subr.bf16.mxu0 %v966_v24 }
  0x2b   :  { %895 = vmatprep.subr.bf16.mxu1 %v967_v25 }
  0x2d   :  { %838 = vmatpush3.bf16.msra.mxu0 %v968_v26 }
  0x2e   :  { %896 = vmatpush3.bf16.msra.mxu1 %v969_v27  ;;  %839 = vmatprep.subr.bf16.mxu0 %v970_v28 }
  0x2f   :  { %897 = vmatprep.subr.bf16.mxu1 %v971_v29 }
  0x31   :  { %840 = vmatpush3.bf16.msra.mxu0 %v972_v30 }
  0x32   :  { %898 = vmatpush3.bf16.msra.mxu1 %v973_v31 }
  0x34   :  { %483 = vmatmul.mubr.bf16.vlgmr.msra.gmra.mrb[0].mxu0 %v974_v32 }
  0x35   :  { %571 = vmatmul.mubr.bf16.vlgmr.msra.gmra.mrb[0].mxu1 %v977_v34  ;;  %490 = vmatprep.mubr.bf16.mxu0 %v980_v36 }
  0x36   :  { %578 = vmatprep.mubr.bf16.mxu1 %v982_v37 }
  0x3c   :  { %491 = vmatmul.mubr.bf16.gmra.mrb[4].mxu0 %v984_v38 }
  0x3d   :  { %579 = vmatmul.mubr.bf16.gmra.mrb[4].mxu1 %v985_v39  ;;  %498 = vmatprep.mubr.bf16.mxu0 %v986_v40 }
  0x3e   :  { %586 = vmatprep.mubr.bf16.mxu1 %v988_v41 }
  0x44   :  { %499 = vmatmul.mubr.bf16.gmra.mrb[8].mxu0 %v990_v42 }
  0x45   :  { %587 = vmatmul.mubr.bf16.gmra.mrb[8].mxu1 %v991_v43  ;;  %506 = vmatprep.mubr.bf16.mxu0 %v992_v44 }
  0x46   :  { %594 = vmatprep.mubr.bf16.mxu1 %v994_v45 }
  0x4c   :  { %507 = vmatmul.mubr.bf16.gmra.mrb[12].mxu0 %v996_v46 }
  0x4d   :  { %595 = vmatmul.mubr.bf16.gmra.mrb[12].mxu1 %v997_v47  ;;  %514 = vmatprep.mubr.bf16.mxu0 %v998_v48 }
  0x4e   :  { %602 = vmatprep.mubr.bf16.mxu1 %v1000_v49 }
  0x54   :  { %515 = vmatmul.mubr.bf16.gmra.mrb[16].mxu0 %v1002_v50 }
  0x55   :  { %603 = vmatmul.mubr.bf16.gmra.mrb[16].mxu1 %v1003_v51  ;;  %522 = vmatprep.mubr.bf16.mxu0 %v1004_v52 }
  0x56   :  { %610 = vmatprep.mubr.bf16.mxu1 %v1006_v53 }
  0x5c   :  { %523 = vmatmul.mubr.bf16.gmra.mrb[20].mxu0 %v1008_v56 }
  0x5d   :  { %611 = vmatmul.mubr.bf16.gmra.mrb[20].mxu1 %v1009_v57  ;;  %530 = vmatprep.mubr.bf16.mxu0 %v764_v58 }
  0x5e   :  { %618 = vmatprep.mubr.bf16.mxu1 %v766_v59 }
  0x64   :  { %531 = vmatmul.mubr.bf16.gmra.mrb[24].mxu0 %v763_v60 }
  0x65   :  { %619 = vmatmul.mubr.bf16.gmra.mrb[24].mxu1 %v765_v61 }
 0x107   :  { %v841_v62 = vpop.f32.mrb[0].mxu0 }
 0x108   :  { %v899_v63 = vpop.f32.mrb[0].mxu1  ;;  %v842_v1 = vpop.f32.mrb[1].mxu0 }
 0x109   :  { %v843_v2 = vadd.f32 %v842_v1, %v841_v62  ;;  %v900_v3 = vpop.f32.mrb[1].mxu1  ;;  %v844_v4 = vpop.f32.mrb[2].mxu0 }
 0x10a   :  { %v901_v5 = vadd.f32 %v900_v3, %v899_v63  ;;  %v902_v6 = vpop.f32.mrb[2].mxu1  ;;  %v845_v7 = vpop.f32.mrb[3].mxu0 }
 0x10b   :  { %v485_v8 = vadd.f32 %v843_v2, %v1245_v0  ;;  %v846_v9 = vadd.f32 %v845_v7, %v844_v4  ;;  %v903_v10 = vpop.f32.mrb[3].mxu1 }
 0x10c   :  { %v904_v11 = vadd.f32 %v903_v10, %v902_v6 }
 0x10d   :  { %v573_v12 = vadd.f32 %v901_v5, %v485_v8  ;;  %v488_v13 = vadd.f32 %v846_v9, %v1245_v0 }
 0x10f   :  { %vm626_vm0 = vcmp.ge.f32.partialorder %v573_v12, 0.0  ;;  %v639_v14 = vmul.f32 0.2, %v573_v12  ;;  %v576_v15 = vadd.f32 %v904_v11, %v488_v13  ;;  %v847_v16 = vpop.f32.mrb[4].mxu0 }
 0x110   :  { %v905_v17 = vpop.f32.mrb[4].mxu1  ;;  %v848_v18 = vpop.f32.mrb[5].mxu0 }
 0x111   :  { %v652_v19 = vsel %vm626_vm0, %v573_v12, %v639_v14  ;;  %vm627_vm2 = vcmp.ge.f32.partialorder %v576_v15, 0.0  ;;  %v640_v20 = vmul.f32 0.2, %v576_v15  ;;  %v849_v21 = vadd.f32 %v848_v18, %v847_v16  ;;  %v906_v22 = vpop.f32.mrb[5].mxu1  ;;  %v850_v23 = vpop.f32.mrb[6].mxu0 }
 0x112   :  { %v812_v24 = vpack.c.bf16 %v652_v19, %v652_v19  ;;  %v907_v25 = vadd.f32 %v906_v22, %v905_v17  ;;  %v908_v26 = vpop.f32.mrb[6].mxu1  ;;  %v851_v27 = vpop.f32.mrb[7].mxu0 }
 0x113   :  { %v653_v28 = vsel %vm627_vm2, %v576_v15, %v640_v20  ;;  %v493_v29 = vadd.f32 %v849_v21, %v1245_v0  ;;  %v852_v30 = vadd.f32 %v851_v27, %v850_v23  ;;  %v909_v31 = vpop.f32.mrb[7].mxu1 }
 0x114   :  { %719 = vst.msk [vmem:[%s1314_s3] sm:$0xf] %vm718_vm1, %v812_v24  ;;  %v813_v32 = vpack.c.bf16 %v653_v28, %v653_v28  ;;  %v910_v33 = vadd.f32 %v909_v31, %v908_v26 }
 0x115   :  { %v581_v34 = vadd.f32 %v907_v25, %v493_v29  ;;  %v496_v35 = vadd.f32 %v852_v30, %v1245_v0 }
 0x116   :  { %720 = vst.msk [vmem:[%s1314_s3 + $0x4] sm:$0xf] %vm718_vm1, %v813_v32 }
 0x117   :  { %vm628_vm3 = vcmp.ge.f32.partialorder %v581_v34, 0.0  ;;  %v641_v36 = vmul.f32 0.2, %v581_v34  ;;  %v584_v37 = vadd.f32 %v910_v33, %v496_v35  ;;  %v853_v38 = vpop.f32.mrb[8].mxu0 }
 0x118   :  { %v911_v39 = vpop.f32.mrb[8].mxu1  ;;  %v854_v40 = vpop.f32.mrb[9].mxu0 }
 0x119   :  { %v654_v41 = vsel %vm628_vm3, %v581_v34, %v641_v36  ;;  %vm629_vm4 = vcmp.ge.f32.partialorder %v584_v37, 0.0  ;;  %v642_v42 = vmul.f32 0.2, %v584_v37  ;;  %v855_v43 = vadd.f32 %v854_v40, %v853_v38  ;;  %v912_v44 = vpop.f32.mrb[9].mxu1  ;;  %v856_v45 = vpop.f32.mrb[10].mxu0 }
 0x11a   :  { %v814_v46 = vpack.c.bf16 %v654_v41, %v654_v41  ;;  %v913_v47 = vadd.f32 %v912_v44, %v911_v39  ;;  %v914_v48 = vpop.f32.mrb[10].mxu1  ;;  %v857_v49 = vpop.f32.mrb[11].mxu0 }
 0x11b   :  { %v655_v50 = vsel %vm629_vm4, %v584_v37, %v642_v42  ;;  %v501_v51 = vadd.f32 %v855_v43, %v1245_v0  ;;  %v858_v52 = vadd.f32 %v857_v49, %v856_v45  ;;  %v915_v53 = vpop.f32.mrb[11].mxu1 }
 0x11c   :  { %721 = vst.msk [vmem:[%s1314_s3 + $0x8] sm:$0xf] %vm718_vm1, %v814_v46  ;;  %v815_v54 = vpack.c.bf16 %v655_v50, %v655_v50  ;;  %v916_v55 = vadd.f32 %v915_v53, %v914_v48 }
 0x11d   :  { %v589_v56 = vadd.f32 %v913_v47, %v501_v51  ;;  %v504_v57 = vadd.f32 %v858_v52, %v1245_v0 }
 0x11e   :  { %722 = vst.msk [vmem:[%s1314_s3 + $0xc] sm:$0xf] %vm718_vm1, %v815_v54 }
 0x11f   :  { %vm630_vm5 = vcmp.ge.f32.partialorder %v589_v56, 0.0  ;;  %v643_v58 = vmul.f32 0.2, %v589_v56  ;;  %v592_v59 = vadd.f32 %v916_v55, %v504_v57  ;;  %v859_v60 = vpop.f32.mrb[12].mxu0 }
 0x120   :  { %v917_v61 = vpop.f32.mrb[12].mxu1  ;;  %v860_v62 = vpop.f32.mrb[13].mxu0 }
 0x121   :  { %v656_v63 = vsel %vm630_vm5, %v589_v56, %v643_v58  ;;  %vm631_vm6 = vcmp.ge.f32.partialorder %v592_v59, 0.0  ;;  %v644_v1 = vmul.f32 0.2, %v592_v59  ;;  %v861_v2 = vadd.f32 %v860_v62, %v859_v60  ;;  %v918_v3 = vpop.f32.mrb[13].mxu1  ;;  %v862_v4 = vpop.f32.mrb[14].mxu0 }
 0x122   :  { %v816_v5 = vpack.c.bf16 %v656_v63, %v656_v63  ;;  %v919_v6 = vadd.f32 %v918_v3, %v917_v61  ;;  %v920_v7 = vpop.f32.mrb[14].mxu1  ;;  %v863_v8 = vpop.f32.mrb[15].mxu0 }
 0x123   :  { %v657_v9 = vsel %vm631_vm6, %v592_v59, %v644_v1  ;;  %v509_v10 = vadd.f32 %v861_v2, %v1245_v0  ;;  %v864_v11 = vadd.f32 %v863_v8, %v862_v4  ;;  %v921_v12 = vpop.f32.mrb[15].mxu1 }
 0x124   :  { %723 = vst.msk [vmem:[%s1314_s3 + $0x10] sm:$0xf] %vm718_vm1, %v816_v5  ;;  %v817_v13 = vpack.c.bf16 %v657_v9, %v657_v9  ;;  %v922_v14 = vadd.f32 %v921_v12, %v920_v7 }
 0x125   :  { %v597_v15 = vadd.f32 %v919_v6, %v509_v10  ;;  %v512_v16 = vadd.f32 %v864_v11, %v1245_v0 }
 0x126   :  { %724 = vst.msk [vmem:[%s1314_s3 + $0x14] sm:$0xf] %vm718_vm1, %v817_v13 }
 0x127   :  { %vm632_vm7 = vcmp.ge.f32.partialorder %v597_v15, 0.0  ;;  %v645_v17 = vmul.f32 0.2, %v597_v15  ;;  %v600_v18 = vadd.f32 %v922_v14, %v512_v16  ;;  %v865_v19 = vpop.f32.mrb[16].mxu0 }
 0x128   :  { %v923_v20 = vpop.f32.mrb[16].mxu1  ;;  %v866_v21 = vpop.f32.mrb[17].mxu0 }
 0x129   :  { %v658_v22 = vsel %vm632_vm7, %v597_v15, %v645_v17  ;;  %vm633_vm8 = vcmp.ge.f32.partialorder %v600_v18, 0.0  ;;  %v646_v23 = vmul.f32 0.2, %v600_v18  ;;  %v867_v24 = vadd.f32 %v866_v21, %v865_v19  ;;  %v924_v25 = vpop.f32.mrb[17].mxu1  ;;  %v868_v26 = vpop.f32.mrb[18].mxu0 }
 0x12a   :  { %v818_v27 = vpack.c.bf16 %v658_v22, %v658_v22  ;;  %v925_v28 = vadd.f32 %v924_v25, %v923_v20  ;;  %v926_v29 = vpop.f32.mrb[18].mxu1  ;;  %v869_v30 = vpop.f32.mrb[19].mxu0 }
 0x12b   :  { %v659_v31 = vsel %vm633_vm8, %v600_v18, %v646_v23  ;;  %v517_v32 = vadd.f32 %v867_v24, %v1245_v0  ;;  %v870_v33 = vadd.f32 %v869_v30, %v868_v26  ;;  %v927_v34 = vpop.f32.mrb[19].mxu1 }
 0x12c   :  { %725 = vst.msk [vmem:[%s1314_s3 + $0x18] sm:$0xf] %vm718_vm1, %v818_v27  ;;  %v819_v35 = vpack.c.bf16 %v659_v31, %v659_v31  ;;  %v928_v36 = vadd.f32 %v927_v34, %v926_v29 }
 0x12d   :  { %v605_v37 = vadd.f32 %v925_v28, %v517_v32  ;;  %v520_v38 = vadd.f32 %v870_v33, %v1245_v0 }
 0x12e   :  { %726 = vst.msk [vmem:[%s1314_s3 + $0x1c] sm:$0xf] %vm718_vm1, %v819_v35 }
 0x12f   :  { %vm634_vm9 = vcmp.ge.f32.partialorder %v605_v37, 0.0  ;;  %v647_v39 = vmul.f32 0.2, %v605_v37  ;;  %v608_v40 = vadd.f32 %v928_v36, %v520_v38  ;;  %v871_v41 = vpop.f32.mrb[20].mxu0 }
 0x130   :  { %v929_v42 = vpop.f32.mrb[20].mxu1  ;;  %v872_v43 = vpop.f32.mrb[21].mxu0 }
 0x131   :  { %v660_v44 = vsel %vm634_vm9, %v605_v37, %v647_v39  ;;  %vm635_vm10 = vcmp.ge.f32.partialorder %v608_v40, 0.0  ;;  %v648_v45 = vmul.f32 0.2, %v608_v40  ;;  %v873_v46 = vadd.f32 %v872_v43, %v871_v41  ;;  %v930_v47 = vpop.f32.mrb[21].mxu1  ;;  %v874_v48 = vpop.f32.mrb[22].mxu0 }
 0x132   :  { %v820_v49 = vpack.c.bf16 %v660_v44, %v660_v44  ;;  %v931_v50 = vadd.f32 %v930_v47, %v929_v42  ;;  %v932_v51 = vpop.f32.mrb[22].mxu1  ;;  %v875_v52 = vpop.f32.mrb[23].mxu0 }
 0x133   :  { %v661_v53 = vsel %vm635_vm10, %v608_v40, %v648_v45  ;;  %v525_v54 = vadd.f32 %v873_v46, %v1245_v0  ;;  %v876_v55 = vadd.f32 %v875_v52, %v874_v48  ;;  %v933_v56 = vpop.f32.mrb[23].mxu1 }
 0x134   :  { %727 = vst.msk [vmem:[%s1314_s3 + $0x20] sm:$0xf] %vm718_vm1, %v820_v49  ;;  %v821_v57 = vpack.c.bf16 %v661_v53, %v661_v53  ;;  %v934_v58 = vadd.f32 %v933_v56, %v932_v51 }
 0x135   :  { %v613_v59 = vadd.f32 %v931_v50, %v525_v54  ;;  %v528_v60 = vadd.f32 %v876_v55, %v1245_v0 }
 0x136   :  { %728 = vst.msk [vmem:[%s1314_s3 + $0x24] sm:$0xf] %vm718_vm1, %v821_v57 }
 0x137   :  { %vm636_vm11 = vcmp.ge.f32.partialorder %v613_v59, 0.0  ;;  %v649_v61 = vmul.f32 0.2, %v613_v59  ;;  %v616_v62 = vadd.f32 %v934_v58, %v528_v60  ;;  %v877_v63 = vpop.f32.mrb[24].mxu0 }
 0x138   :  { %v935_v1 = vpop.f32.mrb[24].mxu1  ;;  %v878_v2 = vpop.f32.mrb[25].mxu0 }
 0x139   :  { %v662_v3 = vsel %vm636_vm11, %v613_v59, %v649_v61  ;;  %vm637_vm12 = vcmp.ge.f32.partialorder %v616_v62, 0.0  ;;  %v650_v4 = vmul.f32 0.2, %v616_v62  ;;  %v879_v5 = vadd.f32 %v878_v2, %v877_v63  ;;  %v936_v6 = vpop.f32.mrb[25].mxu1  ;;  %v880_v7 = vpop.f32.mrb[26].mxu0 }
 0x13a   :  { %v822_v8 = vpack.c.bf16 %v662_v3, %v662_v3  ;;  %v937_v9 = vadd.f32 %v936_v6, %v935_v1  ;;  %v938_v10 = vpop.f32.mrb[26].mxu1  ;;  %v881_v11 = vpop.f32.mrb[27].mxu0 }
 0x13b   :  { %v663_v12 = vsel %vm637_vm12, %v616_v62, %v650_v4  ;;  %v533_v13 = vadd.f32 %v879_v5, %v1245_v0  ;;  %v939_v14 = vpop.f32.mrb[27].mxu1 }
 0x13c   :  { %729 = vst.msk [vmem:[%s1314_s3 + $0x28] sm:$0xf] %vm718_vm1, %v822_v8  ;;  %v823_v15 = vpack.c.bf16 %v663_v12, %v663_v12 }
 0x13d   :  { %v621_v16 = vadd.f32 %v937_v9, %v533_v13 }
 0x13e   :  { %730 = vst.msk [vmem:[%s1314_s3 + $0x2c] sm:$0xf] %vm718_vm1, %v823_v15 }
 0x13f   :  { %vm638_vm13 = vcmp.ge.f32.partialorder %v621_v16, 0.0  ;;  %v651_v17 = vmul.f32 0.2, %v621_v16 }
 0x141   :  { %v664_v18 = vsel %vm638_vm13, %v621_v16, %v651_v17 }
 0x142   :  { %v824_v19 = vpack.c.bf16 %v664_v18, %v664_v18 }
 0x144   :  { %732 = vst.msk [vmem:[%s1314_s3 + $0x30] sm:$0x1] %vm731_vm14, %v824_v19 }
 0x145   :  { %737 = vsyncpa [#allocation3], 1 }

// kernel: encoder_z_forward.5
= control target key start
LH: loop header
LB: loop body
LE: loop exit
PB: predicated region body
PF: predicated region fallthrough
CT: control target
= control target key end

     0   :  { %v14466_v32 = vmov 1966171168   ;;  %v1599_v34 = vlaneseq  ;;  %s19703_s0 = inlined_call_operand.vmem [shape: bf16[2,3136], index: 0, kind: input, shape index: {}]   ;;  %s19704_s1 = inlined_call_operand.vmem [shape: bf16[3136,1000], index: 1, kind: input, shape index: {}]   ;;  %s19705_s2 = inlined_call_operand.vmem [shape: bf16[1000,10], index: 2, kind: input, shape index: {}]   ;;  %s19706_s3 = inlined_call_operand.vmem [shape: f32[1,10], index: 3, kind: input, shape index: {}]   ;;  %s19707_s4 = inlined_call_operand.hbm [shape: f32[2,10], index: 4, kind: output, shape index: {}]  }
   0x1   :  { %v23_v0 = vld [vmem:[%s19704_s1] sm:$0xff]  ;;  %v24_v2 = vld [vmem:[%s19704_s1 + $0x8] sm:$0xff]  ;;  %v1597_v33 = vunpack.c.l.s4 %v14466_v32 }
   0x2   :  { %v27_v1 = vld [vmem:[%s19704_s1 + $0x20] sm:$0xff]  ;;  %v28_v4 = vld [vmem:[%s19704_s1 + $0x28] sm:$0xff]  ;;  %v1600_v44 = vshrl.u32 %v1599_v34, 7 }
   0x3   :  { %v12481_v3 = vcombine.high %v23_v0, %v27_v1  ;;  %v12480_v5 = vcombine.low %v23_v0, %v27_v1  ;;  %v31_v6 = vld [vmem:[%s19704_s1 + $0x40] sm:$0xff]  ;;  %v12483_v8 = vcombine.high %v24_v2, %v28_v4  ;;  %v12482_v9 = vcombine.low %v24_v2, %v28_v4  ;;  %v32_v11 = vld [vmem:[%s19704_s1 + $0x48] sm:$0xff] }
   0x4   :  { %v35_v7 = vld [vmem:[%s19704_s1 + $0x60] sm:$0xff]  ;;  %v36_v12 = vld [vmem:[%s19704_s1 + $0x68] sm:$0xff]  ;;  %v1598_v43 = vunpack.c.0.s8 %v1597_v33 }
   0x5   :  { %v12489_v10 = vcombine.high %v31_v6, %v35_v7  ;;  %v39_v13 = vld [vmem:[%s19704_s1 + $0x80] sm:$0xff]  ;;  %9624 = vmatprep.subr.bf16.mxu0 %v12481_v3  ;;  %v12491_v14 = vcombine.high %v32_v11, %v36_v12  ;;  %v40_v16 = vld [vmem:[%s19704_s1 + $0x88] sm:$0xff]  ;;  %10157 = vmatprep.subr.bf16.mxu1 %v12483_v8  ;;  %v12488_v18 = vcombine.low %v31_v6, %v35_v7 }
   0x6   :  { %v43_v15 = vld [vmem:[%s19704_s1 + $0xa0] sm:$0xff]  ;;  %v44_v17 = vld [vmem:[%s19704_s1 + $0xa8] sm:$0xff]  ;;  %9625 = vmatpush1.bf16.msra.mxu0 %v12480_v5  ;;  %10158 = vmatpush1.bf16.msra.mxu1 %v12482_v9  ;;  %v12490_v19 = vcombine.low %v32_v11, %v36_v12  ;;  %v14572_v53 = vsub.s32 %v1598_v43, %v1600_v44 }
   0x7   :  { %9626 = vmatprep.subr.bf16.mxu0 %v12489_v10  ;;  %v12497_v20 = vcombine.high %v39_v13, %v43_v15  ;;  %10159 = vmatprep.subr.bf16.mxu1 %v12491_v14  ;;  %v12499_v21 = vcombine.high %v40_v16, %v44_v17  ;;  %v47_v22 = vld [vmem:[%s19704_s1 + $0xc0] sm:$0xff]  ;;  %v48_v24 = vld [vmem:[%s19704_s1 + $0xc8] sm:$0xff]  ;;  %v12496_v26 = vcombine.low %v39_v13, %v43_v15 }
   0x8   :  { %v51_v23 = vld [vmem:[%s19704_s1 + $0xe0] sm:$0xff]  ;;  %v52_v25 = vld [vmem:[%s19704_s1 + $0xe8] sm:$0xff]  ;;  %v12498_v27 = vcombine.low %v40_v16, %v44_v17 }
   0x9   :  { %v12505_v28 = vcombine.high %v47_v22, %v51_v23  ;;  %v12507_v29 = vcombine.high %v48_v24, %v52_v25  ;;  %v55_v30 = vld [vmem:[%s19704_s1 + $0x100] sm:$0xff]  ;;  %v56_v35 = vld [vmem:[%s19704_s1 + $0x108] sm:$0xff]  ;;  %v12504_v37 = vcombine.low %v47_v22, %v51_v23  ;;  %v12506_v38 = vcombine.low %v48_v24, %v52_v25 }
   0xa   :  { %9627 = vmatpush1.bf16.msra.mxu0 %v12488_v18  ;;  %10160 = vmatpush1.bf16.msra.mxu1 %v12490_v19  ;;  %v59_v31 = vld [vmem:[%s19704_s1 + $0x120] sm:$0xff]  ;;  %v60_v36 = vld [vmem:[%s19704_s1 + $0x128] sm:$0xff] }
   0xb   :  { %9628 = vmatprep.subr.bf16.mxu0 %v12497_v20  ;;  %10161 = vmatprep.subr.bf16.mxu1 %v12499_v21  ;;  %v12513_v39 = vcombine.high %v55_v30, %v59_v31  ;;  %v12515_v40 = vcombine.high %v56_v35, %v60_v36  ;;  %v63_v41 = vld [vmem:[%s19704_s1 + $0x140] sm:$0xff]  ;;  %v64_v45 = vld [vmem:[%s19704_s1 + $0x148] sm:$0xff]  ;;  %v12512_v47 = vcombine.low %v55_v30, %v59_v31 }
   0xc   :  { %v67_v42 = vld [vmem:[%s19704_s1 + $0x160] sm:$0xff]  ;;  %v68_v46 = vld [vmem:[%s19704_s1 + $0x168] sm:$0xff]  ;;  %v12514_v48 = vcombine.low %v56_v35, %v60_v36 }
   0xd   :  { %v12521_v49 = vcombine.high %v63_v41, %v67_v42  ;;  %v12523_v50 = vcombine.high %v64_v45, %v68_v46  ;;  %v71_v51 = vld [vmem:[%s19704_s1 + $0x180] sm:$0xff]  ;;  %v72_v54 = vld [vmem:[%s19704_s1 + $0x188] sm:$0xff]  ;;  %v12520_v56 = vcombine.low %v63_v41, %v67_v42  ;;  %v12522_v57 = vcombine.low %v64_v45, %v68_v46 }
   0xe   :  { %9629 = vmatpush1.bf16.msra.mxu0 %v12496_v26  ;;  %10162 = vmatpush1.bf16.msra.mxu1 %v12498_v27  ;;  %v75_v52 = vld [vmem:[%s19704_s1 + $0x1a0] sm:$0xff]  ;;  %v76_v55 = vld [vmem:[%s19704_s1 + $0x1a8] sm:$0xff] }
   0xf   :  { %9630 = vmatprep.subr.bf16.mxu0 %v12505_v28  ;;  %10163 = vmatprep.subr.bf16.mxu1 %v12507_v29  ;;  %v12529_v58 = vcombine.high %v71_v51, %v75_v52  ;;  %v14583_v59 = vld [vmem:[%s19703_s0] sm:$0xff]  ;;  %v12531_v60 = vcombine.high %v72_v54, %v76_v55  ;;  %v80_v0 = vld [vmem:[%s19704_s1 + $0x1c8] sm:$0xff]  ;;  %v12528_v2 = vcombine.low %v71_v51, %v75_v52 }
  0x10   :  { %v79_v61 = vld [vmem:[%s19704_s1 + $0x1c0] sm:$0xff]  ;;  %v14593_v63 = vrot.slane %v14583_v59, %v14572_v53  ;;  %v84_v1 = vld [vmem:[%s19704_s1 + $0x1e8] sm:$0xff]  ;;  %v12530_v4 = vcombine.low %v72_v54, %v76_v55 }
  0x11   :  { %v83_v62 = vld [vmem:[%s19704_s1 + $0x1e0] sm:$0xff]  ;;  %v12539_v6 = vcombine.high %v80_v0, %v84_v1  ;;  %v88_v10 = vld [vmem:[%s19704_s1 + $0x208] sm:$0xff]  ;;  %v12538_v13 = vcombine.low %v80_v0, %v84_v1 }
  0x12   :  { %9631 = vmatpush1.bf16.msra.mxu0 %v12504_v37  ;;  %10164 = vmatpush1.bf16.msra.mxu1 %v12506_v38  ;;  %v1610_v3 = vcombine.high %v14593_v63, %v14593_v63  ;;  %v12537_v5 = vcombine.high %v79_v61, %v83_v62  ;;  %v87_v7 = vld [vmem:[%s19704_s1 + $0x200] sm:$0xff]  ;;  %v92_v11 = vld [vmem:[%s19704_s1 + $0x228] sm:$0xff]  ;;  %v12536_v12 = vcombine.low %v79_v61, %v83_v62 }
  0x13   :  { %9632 = vmatprep.subr.bf16.mxu0 %v12513_v39  ;;  %10165 = vmatprep.subr.bf16.mxu1 %v12515_v40  ;;  %v91_v8 = vld [vmem:[%s19704_s1 + $0x220] sm:$0xff]  ;;  %v12547_v15 = vcombine.high %v88_v10, %v92_v11  ;;  %v96_v18 = vld [vmem:[%s19704_s1 + $0x248] sm:$0xff]  ;;  %v12546_v21 = vcombine.low %v88_v10, %v92_v11 }
  0x14   :  { %v14610_v9 = vrot.slane %v1610_v3, %v14572_v53  ;;  %v12545_v14 = vcombine.high %v87_v7, %v91_v8  ;;  %v95_v16 = vld [vmem:[%s19704_s1 + $0x240] sm:$0xff]  ;;  %v100_v19 = vld [vmem:[%s19704_s1 + $0x268] sm:$0xff]  ;;  %v12544_v20 = vcombine.low %v87_v7, %v91_v8 }
  0x15   :  { %v99_v17 = vld [vmem:[%s19704_s1 + $0x260] sm:$0xff]  ;;  %v12555_v23 = vcombine.high %v96_v18, %v100_v19  ;;  %v104_v26 = vld [vmem:[%s19704_s1 + $0x288] sm:$0xff]  ;;  %v12554_v29 = vcombine.low %v96_v18, %v100_v19 }
  0x16   :  { %9633 = vmatpush1.bf16.msra.mxu0 %v12512_v47  ;;  %10166 = vmatpush1.bf16.msra.mxu1 %v12514_v48  ;;  %v12553_v22 = vcombine.high %v95_v16, %v99_v17  ;;  %v103_v24 = vld [vmem:[%s19704_s1 + $0x280] sm:$0xff]  ;;  %v108_v27 = vld [vmem:[%s19704_s1 + $0x2a8] sm:$0xff]  ;;  %v12552_v28 = vcombine.low %v95_v16, %v99_v17 }
  0x17   :  { %9634 = vmatprep.subr.bf16.mxu0 %v12521_v49  ;;  %10167 = vmatprep.subr.bf16.mxu1 %v12523_v50  ;;  %v107_v25 = vld [vmem:[%s19704_s1 + $0x2a0] sm:$0xff]  ;;  %v12563_v31 = vcombine.high %v104_v26, %v108_v27  ;;  %v112_v34 = vld [vmem:[%s19704_s1 + $0x2c8] sm:$0xff]  ;;  %v12562_v37 = vcombine.low %v104_v26, %v108_v27 }
  0x18   :  { %9656 = vmatprep.mubr.bf16.mxu0 %v14610_v9  ;;  %10189 = vmatprep.mubr.bf16.mxu1 %v14610_v9  ;;  %v12561_v30 = vcombine.high %v103_v24, %v107_v25  ;;  %v111_v32 = vld [vmem:[%s19704_s1 + $0x2c0] sm:$0xff]  ;;  %v116_v35 = vld [vmem:[%s19704_s1 + $0x2e8] sm:$0xff]  ;;  %v12560_v36 = vcombine.low %v103_v24, %v107_v25 }
  0x19   :  { %v115_v33 = vld [vmem:[%s19704_s1 + $0x2e0] sm:$0xff]  ;;  %v12571_v39 = vcombine.high %v112_v34, %v116_v35  ;;  %v120_v42 = vld [vmem:[%s19704_s1 + $0x308] sm:$0xff]  ;;  %v12570_v45 = vcombine.low %v112_v34, %v116_v35 }
  0x1a   :  { %9635 = vmatpush1.bf16.msra.mxu0 %v12520_v56  ;;  %10168 = vmatpush1.bf16.msra.mxu1 %v12522_v57  ;;  %v12569_v38 = vcombine.high %v111_v32, %v115_v33  ;;  %v119_v40 = vld [vmem:[%s19704_s1 + $0x300] sm:$0xff]  ;;  %v124_v43 = vld [vmem:[%s19704_s1 + $0x328] sm:$0xff]  ;;  %v12568_v44 = vcombine.low %v111_v32, %v115_v33  ;;  %v14746_v32 = vcombine.high %v14610_v9, %v14610_v9 }
  0x1b   :  { %9636 = vmatprep.subr.bf16.mxu0 %v12529_v58  ;;  %10169 = vmatprep.subr.bf16.mxu1 %v12531_v60  ;;  %v123_v41 = vld [vmem:[%s19704_s1 + $0x320] sm:$0xff]  ;;  %v12579_v47 = vcombine.high %v120_v42, %v124_v43  ;;  %v128_v50 = vld [vmem:[%s19704_s1 + $0x348] sm:$0xff]  ;;  %v12578_v54 = vcombine.low %v120_v42, %v124_v43 }
  0x1c   :  { %v12577_v46 = vcombine.high %v119_v40, %v123_v41  ;;  %v127_v48 = vld [vmem:[%s19704_s1 + $0x340] sm:$0xff]  ;;  %v132_v51 = vld [vmem:[%s19704_s1 + $0x368] sm:$0xff]  ;;  %v12576_v52 = vcombine.low %v119_v40, %v123_v41 }
  0x1d   :  { %v131_v49 = vld [vmem:[%s19704_s1 + $0x360] sm:$0xff]  ;;  %v12587_v56 = vcombine.high %v128_v50, %v132_v51  ;;  %v136_v60 = vld [vmem:[%s19704_s1 + $0x388] sm:$0xff]  ;;  %v12586_v0 = vcombine.low %v128_v50, %v132_v51 }
  0x1e   :  { %9637 = vmatpush1.bf16.msra.mxu0 %v12528_v2  ;;  %10170 = vmatpush1.bf16.msra.mxu1 %v12530_v4  ;;  %v12585_v55 = vcombine.high %v127_v48, %v131_v49  ;;  %v135_v57 = vld [vmem:[%s19704_s1 + $0x380] sm:$0xff]  ;;  %v140_v61 = vld [vmem:[%s19704_s1 + $0x3a8] sm:$0xff]  ;;  %v12584_v62 = vcombine.low %v127_v48, %v131_v49 }
  0x1f   :  { %9638 = vmatprep.subr.bf16.mxu0 %v12537_v5  ;;  %10171 = vmatprep.subr.bf16.mxu1 %v12539_v6  ;;  %v139_v58 = vld [vmem:[%s19704_s1 + $0x3a0] sm:$0xff]  ;;  %v12595_v2 = vcombine.high %v136_v60, %v140_v61  ;;  %v144_v5 = vld [vmem:[%s19704_s1 + $0x3c8] sm:$0xff]  ;;  %v12594_v8 = vcombine.low %v136_v60, %v140_v61 }
  0x20   :  { %v12593_v1 = vcombine.high %v135_v57, %v139_v58  ;;  %v143_v3 = vld [vmem:[%s19704_s1 + $0x3c0] sm:$0xff]  ;;  %v148_v6 = vld [vmem:[%s19704_s1 + $0x3e8] sm:$0xff]  ;;  %v12592_v7 = vcombine.low %v135_v57, %v139_v58 }
  0x21   :  { %v147_v4 = vld [vmem:[%s19704_s1 + $0x3e0] sm:$0xff]  ;;  %v12603_v11 = vcombine.high %v144_v5, %v148_v6  ;;  %v12602_v17 = vcombine.low %v144_v5, %v148_v6  ;;  %v164_v24 = vld [vmem:[%s19704_s1 + $0x468] sm:$0xff] }
  0x22   :  { %9639 = vmatpush1.bf16.msra.mxu0 %v12536_v12  ;;  %10172 = vmatpush1.bf16.msra.mxu1 %v12538_v13  ;;  %v12601_v10 = vcombine.high %v143_v3, %v147_v4  ;;  %v151_v12 = vld [vmem:[%s19704_s1 + $0x400] sm:$0xff]  ;;  %v12600_v16 = vcombine.low %v143_v3, %v147_v4  ;;  %v180_v40 = vld [vmem:[%s19704_s1 + $0x4e8] sm:$0xff] }
  0x23   :  { %9640 = vmatprep.subr.bf16.mxu0 %v12545_v14  ;;  %10173 = vmatprep.subr.bf16.mxu1 %v12547_v15  ;;  %v155_v13 = vld [vmem:[%s19704_s1 + $0x420] sm:$0xff]  ;;  %v152_v14 = vld [vmem:[%s19704_s1 + $0x408] sm:$0xff] }
  0x24   :  { %v156_v15 = vld [vmem:[%s19704_s1 + $0x428] sm:$0xff]  ;;  %v12609_v18 = vcombine.high %v151_v12, %v155_v13  ;;  %v12608_v25 = vcombine.low %v151_v12, %v155_v13 }
  0x25   :  { %v12611_v19 = vcombine.high %v152_v14, %v156_v15  ;;  %v12610_v26 = vcombine.low %v152_v14, %v156_v15  ;;  %v188_v48 = vld [vmem:[%s19704_s1 + $0x528] sm:$0xff] }
  0x26   :  { %9641 = vmatpush1.bf16.msra.mxu0 %v12544_v20  ;;  %10174 = vmatpush1.bf16.msra.mxu1 %v12546_v21  ;;  %v159_v20 = vld [vmem:[%s19704_s1 + $0x440] sm:$0xff]  ;;  %v196_v57 = vld [vmem:[%s19704_s1 + $0x568] sm:$0xff] }
  0x27   :  { %9642 = vmatprep.subr.bf16.mxu0 %v12553_v22  ;;  %10175 = vmatprep.subr.bf16.mxu1 %v12555_v23  ;;  %v163_v21 = vld [vmem:[%s19704_s1 + $0x460] sm:$0xff]  ;;  %v14724_v22 = vrot.slane %v14593_v63, %v14572_v53  ;;  %v160_v23 = vld [vmem:[%s19704_s1 + $0x448] sm:$0xff] }
  0x28   :  { %v12617_v27 = vcombine.high %v159_v20, %v163_v21  ;;  %v171_v63 = vld [vmem:[%s19704_s1 + $0x4a0] sm:$0xff]  ;;  %v12616_v33 = vcombine.low %v159_v20, %v163_v21  ;;  %v12618_v34 = vcombine.low %v160_v23, %v164_v24  ;;  %v204_v3 = vld [vmem:[%s19704_s1 + $0x5a8] sm:$0xff] }
  0x29   :  { %v212_v12 = vld [vmem:[%s19704_s1 + $0x5e8] sm:$0xff] }
  0x2a   :  { %9643 = vmatpush1.bf16.msra.mxu0 %v12552_v28  ;;  %10176 = vmatpush1.bf16.msra.mxu1 %v12554_v29  ;;  %v167_v28 = vld [vmem:[%s19704_s1 + $0x480] sm:$0xff]  ;;  %v168_v29 = vld [vmem:[%s19704_s1 + $0x488] sm:$0xff] }
  0x2b   :  { %9644 = vmatprep.subr.bf16.mxu0 %v12561_v30  ;;  %10177 = vmatprep.subr.bf16.mxu1 %v12563_v31  ;;  %v12619_v30 = vcombine.high %v160_v23, %v164_v24  ;;  %v172_v31 = vld [vmem:[%s19704_s1 + $0x4a8] sm:$0xff]  ;;  %v12625_v35 = vcombine.high %v167_v28, %v171_v63  ;;  %v12624_v41 = vcombine.low %v167_v28, %v171_v63 }
  0x2c   :  { %v12626_v42 = vcombine.low %v168_v29, %v172_v31  ;;  %v220_v20 = vld [vmem:[%s19704_s1 + $0x628] sm:$0xff] }
  0x2d   :  { %v228_v63 = vld [vmem:[%s19704_s1 + $0x668] sm:$0xff] }
  0x2e   :  { %9645 = vmatpush1.bf16.msra.mxu0 %v12560_v36  ;;  %10178 = vmatpush1.bf16.msra.mxu1 %v12562_v37  ;;  %v175_v36 = vld [vmem:[%s19704_s1 + $0x4c0] sm:$0xff] }
  0x2f   :  { %9646 = vmatprep.subr.bf16.mxu0 %v12569_v38  ;;  %10179 = vmatprep.subr.bf16.mxu1 %v12571_v39  ;;  %v179_v37 = vld [vmem:[%s19704_s1 + $0x4e0] sm:$0xff]  ;;  %v176_v38 = vld [vmem:[%s19704_s1 + $0x4c8] sm:$0xff]  ;;  %v12627_v39 = vcombine.high %v168_v29, %v172_v31 }
  0x30   :  { %v12633_v43 = vcombine.high %v175_v36, %v179_v37  ;;  %v12632_v49 = vcombine.low %v175_v36, %v179_v37  ;;  %v12634_v50 = vcombine.low %v176_v38, %v180_v40  ;;  %v236_v37 = vld [vmem:[%s19704_s1 + $0x6a8] sm:$0xff] }
  0x32   :  { %9647 = vmatpush1.bf16.msra.mxu0 %v12568_v44  ;;  %10180 = vmatpush1.bf16.msra.mxu1 %v12570_v45  ;;  %v183_v44 = vld [vmem:[%s19704_s1 + $0x500] sm:$0xff] }
  0x33   :  { %9648 = vmatprep.subr.bf16.mxu0 %v12577_v46  ;;  %10181 = vmatprep.subr.bf16.mxu1 %v12579_v47  ;;  %v187_v45 = vld [vmem:[%s19704_s1 + $0x520] sm:$0xff]  ;;  %v184_v46 = vld [vmem:[%s19704_s1 + $0x508] sm:$0xff]  ;;  %v12635_v47 = vcombine.high %v176_v38, %v180_v40 }
  0x34   :  { %v12641_v51 = vcombine.high %v183_v44, %v187_v45  ;;  %v12640_v58 = vcombine.low %v183_v44, %v187_v45  ;;  %v12642_v60 = vcombine.low %v184_v46, %v188_v48  ;;  %v244_v45 = vld [vmem:[%s19704_s1 + $0x6e8] sm:$0xff] }
  0x36   :  { %9649 = vmatpush1.bf16.msra.mxu0 %v12576_v52  ;;  %10182 = vmatpush1.bf16.msra.mxu1 %v12578_v54  ;;  %v191_v52 = vld [vmem:[%s19704_s1 + $0x540] sm:$0xff] }
  0x37   :  { %9650 = vmatprep.subr.bf16.mxu0 %v12585_v55  ;;  %10183 = vmatprep.subr.bf16.mxu1 %v12587_v56  ;;  %v195_v54 = vld [vmem:[%s19704_s1 + $0x560] sm:$0xff]  ;;  %v192_v55 = vld [vmem:[%s19704_s1 + $0x548] sm:$0xff]  ;;  %v12643_v56 = vcombine.high %v184_v46, %v188_v48 }
  0x38   :  { %v12649_v61 = vcombine.high %v191_v52, %v195_v54  ;;  %v12648_v4 = vcombine.low %v191_v52, %v195_v54  ;;  %v12650_v5 = vcombine.low %v192_v55, %v196_v57  ;;  %v252_v54 = vld [vmem:[%s19704_s1 + $0x728] sm:$0xff] }
  0x3a   :  { %9651 = vmatpush1.bf16.msra.mxu0 %v12584_v62  ;;  %10184 = vmatpush1.bf16.msra.mxu1 %v12586_v0  ;;  %v199_v62 = vld [vmem:[%s19704_s1 + $0x580] sm:$0xff] }
  0x3b   :  { %9652 = vmatprep.subr.bf16.mxu0 %v12593_v1  ;;  %10185 = vmatprep.subr.bf16.mxu1 %v12595_v2  ;;  %v203_v0 = vld [vmem:[%s19704_s1 + $0x5a0] sm:$0xff]  ;;  %v200_v1 = vld [vmem:[%s19704_s1 + $0x588] sm:$0xff]  ;;  %v12651_v2 = vcombine.high %v192_v55, %v196_v57 }
  0x3c   :  { %v12657_v6 = vcombine.high %v199_v62, %v203_v0  ;;  %v12656_v13 = vcombine.low %v199_v62, %v203_v0  ;;  %v12658_v14 = vcombine.low %v200_v1, %v204_v3  ;;  %v260_v0 = vld [vmem:[%s19704_s1 + $0x768] sm:$0xff] }
  0x3e   :  { %9653 = vmatpush1.bf16.msra.mxu0 %v12592_v7  ;;  %10186 = vmatpush1.bf16.msra.mxu1 %v12594_v8  ;;  %v207_v7 = vld [vmem:[%s19704_s1 + $0x5c0] sm:$0xff] }
  0x3f   :  { %9654 = vmatprep.subr.bf16.mxu0 %v12601_v10  ;;  %10187 = vmatprep.subr.bf16.mxu1 %v12603_v11  ;;  %v211_v8 = vld [vmem:[%s19704_s1 + $0x5e0] sm:$0xff]  ;;  %v208_v10 = vld [vmem:[%s19704_s1 + $0x5c8] sm:$0xff]  ;;  %v12659_v11 = vcombine.high %v200_v1, %v204_v3 }
  0x40   :  { %v12665_v15 = vcombine.high %v207_v7, %v211_v8  ;;  %v12664_v21 = vcombine.low %v207_v7, %v211_v8  ;;  %v12666_v23 = vcombine.low %v208_v10, %v212_v12  ;;  %v268_v8 = vld [vmem:[%s19704_s1 + $0x7a8] sm:$0xff] }
  0x42   :  { %9655 = vmatpush1.bf16.msra.mxu0 %v12600_v16  ;;  %10188 = vmatpush1.bf16.msra.mxu1 %v12602_v17  ;;  %v215_v16 = vld [vmem:[%s19704_s1 + $0x600] sm:$0xff] }
  0x43   :  { %9665 = vmatprep.subr.bf16.mxu0 %v12609_v18  ;;  %10198 = vmatprep.subr.bf16.mxu1 %v12611_v19  ;;  %v219_v17 = vld [vmem:[%s19704_s1 + $0x620] sm:$0xff]  ;;  %v216_v18 = vld [vmem:[%s19704_s1 + $0x608] sm:$0xff]  ;;  %v12667_v19 = vcombine.high %v208_v10, %v212_v12 }
  0x44   :  { %v12673_v24 = vcombine.high %v215_v16, %v219_v17  ;;  %v12675_v28 = vcombine.high %v216_v18, %v220_v20  ;;  %v12672_v29 = vcombine.low %v215_v16, %v219_v17  ;;  %v276_v17 = vld [vmem:[%s19704_s1 + $0x7e8] sm:$0xff] }
  0x45   :  { %9657 = vmatmul.mubr.bf16.vlgmr.msra.gmra.mrb[0].mxu0 %v14724_v22  ;;  %10190 = vmatmul.mubr.bf16.vlgmr.msra.gmra.mrb[0].mxu1 %v14724_v22 }
  0x46   :  { %9666 = vmatpush1.bf16.msra.mxu0 %v12608_v25  ;;  %10199 = vmatpush1.bf16.msra.mxu1 %v12610_v26  ;;  %v223_v25 = vld [vmem:[%s19704_s1 + $0x640] sm:$0xff] }
  0x47   :  { %9667 = vmatprep.subr.bf16.mxu0 %v12617_v27  ;;  %10200 = vmatprep.subr.bf16.mxu1 %v12619_v30  ;;  %v227_v26 = vld [vmem:[%s19704_s1 + $0x660] sm:$0xff]  ;;  %v224_v27 = vld [vmem:[%s19704_s1 + $0x648] sm:$0xff]  ;;  %v12674_v30 = vcombine.low %v216_v18, %v220_v20  ;;  %v1595_v18 = vcombine.high %v14583_v59, %v14583_v59 }
  0x48   :  { %9697 = vmatprep.mubr.bf16.mxu0 %v14746_v32  ;;  %10230 = vmatprep.mubr.bf16.mxu1 %v14746_v32  ;;  %v12681_v31 = vcombine.high %v223_v25, %v227_v26  ;;  %v12683_v36 = vcombine.high %v224_v27, %v228_v63  ;;  %v12680_v38 = vcombine.low %v223_v25, %v227_v26  ;;  %v280_v25 = vld [vmem:[%s19704_s1 + $0x808] sm:$0xff] }
  0x49   :  { %v284_v26 = vld [vmem:[%s19704_s1 + $0x828] sm:$0xff] }
  0x4a   :  { %9668 = vmatpush1.bf16.msra.mxu0 %v12616_v33  ;;  %10201 = vmatpush1.bf16.msra.mxu1 %v12618_v34  ;;  %v231_v33 = vld [vmem:[%s19704_s1 + $0x680] sm:$0xff] }
  0x4b   :  { %9669 = vmatprep.subr.bf16.mxu0 %v12625_v35  ;;  %10202 = vmatprep.subr.bf16.mxu1 %v12627_v39  ;;  %v235_v34 = vld [vmem:[%s19704_s1 + $0x6a0] sm:$0xff]  ;;  %v232_v35 = vld [vmem:[%s19704_s1 + $0x688] sm:$0xff]  ;;  %v12682_v39 = vcombine.low %v224_v27, %v228_v63  ;;  %v14923_v27 = vrot.slane %v1595_v18, %v14572_v53 }
  0x4c   :  { %v12689_v40 = vcombine.high %v231_v33, %v235_v34  ;;  %v12691_v44 = vcombine.high %v232_v35, %v236_v37  ;;  %v12688_v46 = vcombine.low %v231_v33, %v235_v34  ;;  %v12739_v33 = vcombine.high %v280_v25, %v284_v26  ;;  %v288_v34 = vld [vmem:[%s19704_s1 + $0x848] sm:$0xff] }
  0x4e   :  { %9670 = vmatpush1.bf16.msra.mxu0 %v12624_v41  ;;  %10203 = vmatpush1.bf16.msra.mxu1 %v12626_v42  ;;  %v239_v41 = vld [vmem:[%s19704_s1 + $0x6c0] sm:$0xff] }
  0x4f   :  { %9671 = vmatprep.subr.bf16.mxu0 %v12633_v43  ;;  %10204 = vmatprep.subr.bf16.mxu1 %v12635_v47  ;;  %v243_v42 = vld [vmem:[%s19704_s1 + $0x6e0] sm:$0xff]  ;;  %v240_v43 = vld [vmem:[%s19704_s1 + $0x6c8] sm:$0xff]  ;;  %v12690_v47 = vcombine.low %v232_v35, %v236_v37  ;;  %v1611_v35 = vcombine.high %v14923_v27, %v14923_v27 }
  0x50   :  { %v12697_v48 = vcombine.high %v239_v41, %v243_v42  ;;  %v12699_v52 = vcombine.high %v240_v43, %v244_v45  ;;  %v12696_v55 = vcombine.low %v239_v41, %v243_v42  ;;  %v292_v37 = vld [vmem:[%s19704_s1 + $0x868] sm:$0xff] }
  0x52   :  { %9672 = vmatpush1.bf16.msra.mxu0 %v12632_v49  ;;  %10205 = vmatpush1.bf16.msra.mxu1 %v12634_v50  ;;  %v247_v49 = vld [vmem:[%s19704_s1 + $0x700] sm:$0xff] }
  0x53   :  { %9673 = vmatprep.subr.bf16.mxu0 %v12641_v51  ;;  %10206 = vmatprep.subr.bf16.mxu1 %v12643_v56  ;;  %v251_v50 = vld [vmem:[%s19704_s1 + $0x720] sm:$0xff]  ;;  %v248_v51 = vld [vmem:[%s19704_s1 + $0x708] sm:$0xff]  ;;  %v12698_v56 = vcombine.low %v240_v43, %v244_v45 }
  0x54   :  { %v12705_v57 = vcombine.high %v247_v49, %v251_v50  ;;  %v12707_v62 = vcombine.high %v248_v51, %v252_v54  ;;  %v12704_v1 = vcombine.low %v247_v49, %v251_v50 }
  0x56   :  { %9674 = vmatpush1.bf16.msra.mxu0 %v12640_v58  ;;  %10207 = vmatpush1.bf16.msra.mxu1 %v12642_v60  ;;  %v255_v58 = vld [vmem:[%s19704_s1 + $0x740] sm:$0xff] }
  0x57   :  { %9675 = vmatprep.subr.bf16.mxu0 %v12649_v61  ;;  %10208 = vmatprep.subr.bf16.mxu1 %v12651_v2  ;;  %v259_v60 = vld [vmem:[%s19704_s1 + $0x760] sm:$0xff]  ;;  %v256_v61 = vld [vmem:[%s19704_s1 + $0x748] sm:$0xff]  ;;  %v12706_v2 = vcombine.low %v248_v51, %v252_v54 }
  0x58   :  { %v12713_v3 = vcombine.high %v255_v58, %v259_v60  ;;  %v12715_v7 = vcombine.high %v256_v61, %v260_v0  ;;  %v12712_v10 = vcombine.low %v255_v58, %v259_v60 }
  0x5a   :  { %9676 = vmatpush1.bf16.msra.mxu0 %v12648_v4  ;;  %10209 = vmatpush1.bf16.msra.mxu1 %v12650_v5  ;;  %v263_v4 = vld [vmem:[%s19704_s1 + $0x780] sm:$0xff] }
  0x5b   :  { %9677 = vmatprep.subr.bf16.mxu0 %v12657_v6  ;;  %10210 = vmatprep.subr.bf16.mxu1 %v12659_v11  ;;  %v267_v5 = vld [vmem:[%s19704_s1 + $0x7a0] sm:$0xff]  ;;  %v264_v6 = vld [vmem:[%s19704_s1 + $0x788] sm:$0xff]  ;;  %v12714_v11 = vcombine.low %v256_v61, %v260_v0 }
  0x5c   :  { %v12721_v12 = vcombine.high %v263_v4, %v267_v5  ;;  %v12723_v16 = vcombine.high %v264_v6, %v268_v8  ;;  %v12722_v20 = vcombine.low %v264_v6, %v268_v8 }
  0x5e   :  { %9678 = vmatpush1.bf16.msra.mxu0 %v12656_v13  ;;  %10211 = vmatpush1.bf16.msra.mxu1 %v12658_v14  ;;  %v271_v13 = vld [vmem:[%s19704_s1 + $0x7c0] sm:$0xff] }
  0x5f   :  { %9679 = vmatprep.subr.bf16.mxu0 %v12665_v15  ;;  %10212 = vmatprep.subr.bf16.mxu1 %v12667_v19  ;;  %v275_v14 = vld [vmem:[%s19704_s1 + $0x7e0] sm:$0xff]  ;;  %v272_v15 = vld [vmem:[%s19704_s1 + $0x7c8] sm:$0xff]  ;;  %v12720_v19 = vcombine.low %v263_v4, %v267_v5 }
  0x60   :  { %v12731_v59 = vcombine.high %v272_v15, %v276_v17  ;;  %v12730_v63 = vcombine.low %v272_v15, %v276_v17 }
  0x62   :  { %9680 = vmatpush1.bf16.msra.mxu0 %v12664_v21  ;;  %10213 = vmatpush1.bf16.msra.mxu1 %v12666_v23  ;;  %v12729_v21 = vcombine.high %v271_v13, %v275_v14  ;;  %v279_v23 = vld [vmem:[%s19704_s1 + $0x800] sm:$0xff] }
  0x63   :  { %9681 = vmatprep.subr.bf16.mxu0 %v12673_v24  ;;  %10214 = vmatprep.subr.bf16.mxu1 %v12675_v28  ;;  %v283_v24 = vld [vmem:[%s19704_s1 + $0x820] sm:$0xff]  ;;  %v12728_v28 = vcombine.low %v271_v13, %v275_v14 }
  0x66   :  { %9682 = vmatpush1.bf16.msra.mxu0 %v12672_v29  ;;  %10215 = vmatpush1.bf16.msra.mxu1 %v12674_v30  ;;  %v12737_v29 = vcombine.high %v279_v23, %v283_v24  ;;  %v287_v30 = vld [vmem:[%s19704_s1 + $0x840] sm:$0xff] }
  0x67   :  { %9683 = vmatprep.subr.bf16.mxu0 %v12681_v31  ;;  %10216 = vmatprep.subr.bf16.mxu1 %v12683_v36  ;;  %v291_v31 = vld [vmem:[%s19704_s1 + $0x860] sm:$0xff]  ;;  %v14938_v36 = vcombine.high %v14724_v22, %v14724_v22 }
  0x6a   :  { %9684 = vmatpush1.bf16.msra.mxu0 %v12680_v38  ;;  %10217 = vmatpush1.bf16.msra.mxu1 %v12682_v39 }
  0x6b   :  { %9685 = vmatprep.subr.bf16.mxu0 %v12689_v40  ;;  %10218 = vmatprep.subr.bf16.mxu1 %v12691_v44 }
  0x6e   :  { %9686 = vmatpush1.bf16.msra.mxu0 %v12688_v46  ;;  %10219 = vmatpush1.bf16.msra.mxu1 %v12690_v47 }
  0x6f   :  { %9687 = vmatprep.subr.bf16.mxu0 %v12697_v48  ;;  %10220 = vmatprep.subr.bf16.mxu1 %v12699_v52 }
  0x72   :  { %9688 = vmatpush1.bf16.msra.mxu0 %v12696_v55  ;;  %10221 = vmatpush1.bf16.msra.mxu1 %v12698_v56 }
  0x73   :  { %9689 = vmatprep.subr.bf16.mxu0 %v12705_v57  ;;  %10222 = vmatprep.subr.bf16.mxu1 %v12707_v62 }
  0x76   :  { %9690 = vmatpush1.bf16.msra.mxu0 %v12704_v1  ;;  %10223 = vmatpush1.bf16.msra.mxu1 %v12706_v2 }
  0x77   :  { %9691 = vmatprep.subr.bf16.mxu0 %v12713_v3  ;;  %10224 = vmatprep.subr.bf16.mxu1 %v12715_v7 }
  0x7a   :  { %9692 = vmatpush1.bf16.msra.mxu0 %v12712_v10  ;;  %10225 = vmatpush1.bf16.msra.mxu1 %v12714_v11 }
  0x7b   :  { %9693 = vmatprep.subr.bf16.mxu0 %v12721_v12  ;;  %10226 = vmatprep.subr.bf16.mxu1 %v12723_v16 }
  0x7e   :  { %9694 = vmatpush1.bf16.msra.mxu0 %v12720_v19  ;;  %10227 = vmatpush1.bf16.msra.mxu1 %v12722_v20 }
  0x7f   :  { %9695 = vmatprep.subr.bf16.mxu0 %v12729_v21  ;;  %10228 = vmatprep.subr.bf16.mxu1 %v12731_v59 }
  0x80   :  { %9 = vsyncpa [#allocation3], 0  ;;  %v12736_v38 = vcombine.low %v279_v23, %v283_v24  ;;  %v12738_v39 = vcombine.low %v280_v25, %v284_v26  ;;  %v12745_v40 = vcombine.high %v287_v30, %v291_v31  ;;  %v12747_v41 = vcombine.high %v288_v34, %v292_v37  ;;  %v295_v42 = vld [vmem:[%s19704_s1 + $0x880] sm:$0xff]  ;;  %v296_v45 = vld [vmem:[%s19704_s1 + $0x888] sm:$0xff]  ;;  %s14468_s21 = smov [#allocation2]  }
  0x81   :  { %v299_v43 = vld [vmem:[%s19704_s1 + $0x8a0] sm:$0xff]  ;;  %v14950_v44 = vrot.slane %v1611_v35, %v14572_v53  ;;  %v300_v46 = vld [vmem:[%s19704_s1 + $0x8a8] sm:$0xff]  ;;  %v12744_v47 = vcombine.low %v287_v30, %v291_v31  ;;  %v12746_v48 = vcombine.low %v288_v34, %v292_v37  ;;  %vm9620_vm0 = vcmask 523264   ;;  %s12471_s22 = sshll.u32 %s14468_s21, 4  ;;  %s12472_s22 = int_to_ptr.vmem [resolvable:$true] %s12471_s22 }
  0x82   :  { %9696 = vmatpush1.bf16.msra.mxu0 %v12728_v28  ;;  %10229 = vmatpush1.bf16.msra.mxu1 %v12730_v63  ;;  %v12753_v49 = vcombine.high %v295_v42, %v299_v43  ;;  %v12755_v50 = vcombine.high %v296_v45, %v300_v46  ;;  %v303_v51 = vld [vmem:[%s19704_s1 + $0x8c0] sm:$0xff]  ;;  %v304_v54 = vld [vmem:[%s19704_s1 + $0x8c8] sm:$0xff]  ;;  %v12752_v56 = vcombine.low %v295_v42, %v299_v43  ;;  %vm12299_vm5 = vcmask 1043456   ;;  %p14447_p1 = scmp.lt.s32.totalorder %s12472_s22, %s12472_s22 }
  0x83   :  { %9706 = vmatprep.subr.bf16.mxu0 %v12737_v29  ;;  %10239 = vmatprep.subr.bf16.mxu1 %v12739_v33  ;;  %v307_v52 = vld [vmem:[%s19704_s1 + $0x8e0] sm:$0xff]  ;;  %v308_v55 = vld [vmem:[%s19704_s1 + $0x8e8] sm:$0xff]  ;;  %v12754_v57 = vcombine.low %v296_v45, %v300_v46  ;;  %vm12295_vm8 = vcmask 850944   ;;  %vm12463_vm11 = vcmask 74752  }
  0x84   :  { %v12761_v58 = vcombine.high %v303_v51, %v307_v52  ;;  %v12763_v60 = vcombine.high %v304_v54, %v308_v55  ;;  %v311_v61 = vld [vmem:[%s19704_s1 + $0x900] sm:$0xff]  ;;  %v312_v0 = vld [vmem:[%s19704_s1 + $0x908] sm:$0xff]  ;;  %v12760_v2 = vcombine.low %v303_v51, %v307_v52  ;;  %v12762_v3 = vcombine.low %v304_v54, %v308_v55 }
  0x85   :  { %9698 = vmatmul.mubr.bf16.vlgmr.msra.gmra.mrb[0].mxu0 %v14938_v36  ;;  %10231 = vmatmul.mubr.bf16.vlgmr.msra.gmra.mrb[0].mxu1 %v14938_v36  ;;  %v315_v62 = vld [vmem:[%s19704_s1 + $0x920] sm:$0xff]  ;;  %v316_v1 = vld [vmem:[%s19704_s1 + $0x928] sm:$0xff] }
  0x86   :  { %9707 = vmatpush1.bf16.msra.mxu0 %v12736_v38  ;;  %10240 = vmatpush1.bf16.msra.mxu1 %v12738_v39  ;;  %v12769_v4 = vcombine.high %v311_v61, %v315_v62  ;;  %v12771_v5 = vcombine.high %v312_v0, %v316_v1  ;;  %v319_v6 = vld [vmem:[%s19704_s1 + $0x940] sm:$0xff]  ;;  %v320_v8 = vld [vmem:[%s19704_s1 + $0x948] sm:$0xff]  ;;  %v12768_v11 = vcombine.low %v311_v61, %v315_v62 }
  0x87   :  { %9708 = vmatprep.subr.bf16.mxu0 %v12745_v40  ;;  %10241 = vmatprep.subr.bf16.mxu1 %v12747_v41  ;;  %v323_v7 = vld [vmem:[%s19704_s1 + $0x960] sm:$0xff]  ;;  %v324_v10 = vld [vmem:[%s19704_s1 + $0x968] sm:$0xff]  ;;  %v12770_v12 = vcombine.low %v312_v0, %v316_v1 }
  0x88   :  { %9738 = vmatprep.mubr.bf16.mxu0 %v14950_v44  ;;  %10271 = vmatprep.mubr.bf16.mxu1 %v14950_v44  ;;  %v12777_v13 = vcombine.high %v319_v6, %v323_v7  ;;  %v12779_v14 = vcombine.high %v320_v8, %v324_v10  ;;  %v327_v15 = vld [vmem:[%s19704_s1 + $0x980] sm:$0xff]  ;;  %v328_v17 = vld [vmem:[%s19704_s1 + $0x988] sm:$0xff]  ;;  %v12776_v19 = vcombine.low %v319_v6, %v323_v7 }
  0x89   :  { %v331_v16 = vld [vmem:[%s19704_s1 + $0x9a0] sm:$0xff]  ;;  %v332_v18 = vld [vmem:[%s19704_s1 + $0x9a8] sm:$0xff]  ;;  %v12778_v20 = vcombine.low %v320_v8, %v324_v10 }
  0x8a   :  { %9709 = vmatpush1.bf16.msra.mxu0 %v12744_v47  ;;  %10242 = vmatpush1.bf16.msra.mxu1 %v12746_v48  ;;  %v12785_v21 = vcombine.high %v327_v15, %v331_v16  ;;  %v12787_v23 = vcombine.high %v328_v17, %v332_v18  ;;  %v335_v24 = vld [vmem:[%s19704_s1 + $0x9c0] sm:$0xff]  ;;  %v336_v59 = vld [vmem:[%s19704_s1 + $0x9c8] sm:$0xff]  ;;  %v12784_v28 = vcombine.low %v327_v15, %v331_v16 }
  0x8b   :  { %9710 = vmatprep.subr.bf16.mxu0 %v12753_v49  ;;  %10243 = vmatprep.subr.bf16.mxu1 %v12755_v50  ;;  %v339_v25 = vld [vmem:[%s19704_s1 + $0x9e0] sm:$0xff]  ;;  %v340_v26 = vld [vmem:[%s19704_s1 + $0x9e8] sm:$0xff]  ;;  %v12786_v63 = vcombine.low %v328_v17, %v332_v18 }
  0x8c   :  { %v12793_v29 = vcombine.high %v335_v24, %v339_v25  ;;  %v12795_v30 = vcombine.high %v336_v59, %v340_v26  ;;  %v343_v31 = vld [vmem:[%s19704_s1 + $0xa00] sm:$0xff]  ;;  %v344_v34 = vld [vmem:[%s19704_s1 + $0xa08] sm:$0xff]  ;;  %v12792_v37 = vcombine.low %v335_v24, %v339_v25  ;;  %v12794_v38 = vcombine.low %v336_v59, %v340_v26 }
  0x8d   :  { %v347_v33 = vld [vmem:[%s19704_s1 + $0xa20] sm:$0xff]  ;;  %v348_v35 = vld [vmem:[%s19704_s1 + $0xa28] sm:$0xff] }
  0x8e   :  { %9711 = vmatpush1.bf16.msra.mxu0 %v12752_v56  ;;  %10244 = vmatpush1.bf16.msra.mxu1 %v12754_v57  ;;  %v12801_v39 = vcombine.high %v343_v31, %v347_v33  ;;  %v12803_v40 = vcombine.high %v344_v34, %v348_v35  ;;  %v351_v41 = vld [vmem:[%s19704_s1 + $0xa40] sm:$0xff]  ;;  %v352_v43 = vld [vmem:[%s19704_s1 + $0xa48] sm:$0xff]  ;;  %v12800_v46 = vcombine.low %v343_v31, %v347_v33 }
  0x8f   :  { %9712 = vmatprep.subr.bf16.mxu0 %v12761_v58  ;;  %10245 = vmatprep.subr.bf16.mxu1 %v12763_v60  ;;  %v355_v42 = vld [vmem:[%s19704_s1 + $0xa60] sm:$0xff]  ;;  %v356_v45 = vld [vmem:[%s19704_s1 + $0xa68] sm:$0xff]  ;;  %v12802_v47 = vcombine.low %v344_v34, %v348_v35 }
  0x90   :  { %v12809_v48 = vcombine.high %v351_v41, %v355_v42  ;;  %v12811_v49 = vcombine.high %v352_v43, %v356_v45  ;;  %v359_v50 = vld [vmem:[%s19704_s1 + $0xa80] sm:$0xff]  ;;  %v360_v52 = vld [vmem:[%s19704_s1 + $0xa88] sm:$0xff]  ;;  %v12808_v55 = vcombine.low %v351_v41, %v355_v42  ;;  %v12810_v56 = vcombine.low %v352_v43, %v356_v45 }
  0x91   :  { %v363_v51 = vld [vmem:[%s19704_s1 + $0xaa0] sm:$0xff]  ;;  %v364_v54 = vld [vmem:[%s19704_s1 + $0xaa8] sm:$0xff] }
  0x92   :  { %9713 = vmatpush1.bf16.msra.mxu0 %v12760_v2  ;;  %10246 = vmatpush1.bf16.msra.mxu1 %v12762_v3  ;;  %v12817_v57 = vcombine.high %v359_v50, %v363_v51  ;;  %v12819_v58 = vcombine.high %v360_v52, %v364_v54  ;;  %v367_v60 = vld [vmem:[%s19704_s1 + $0xac0] sm:$0xff]  ;;  %v368_v62 = vld [vmem:[%s19704_s1 + $0xac8] sm:$0xff]  ;;  %v12816_v1 = vcombine.low %v359_v50, %v363_v51 }
  0x93   :  { %9714 = vmatprep.subr.bf16.mxu0 %v12769_v4  ;;  %10247 = vmatprep.subr.bf16.mxu1 %v12771_v5  ;;  %v371_v61 = vld [vmem:[%s19704_s1 + $0xae0] sm:$0xff]  ;;  %v372_v0 = vld [vmem:[%s19704_s1 + $0xae8] sm:$0xff]  ;;  %v12818_v2 = vcombine.low %v360_v52, %v364_v54  ;;  %v15138_v51 = vrot.slane %v14923_v27, %v14572_v53 }
  0x94   :  { %v12825_v3 = vcombine.high %v367_v60, %v371_v61  ;;  %v12827_v4 = vcombine.high %v368_v62, %v372_v0  ;;  %v375_v5 = vld [vmem:[%s19704_s1 + $0xb00] sm:$0xff]  ;;  %v376_v7 = vld [vmem:[%s19704_s1 + $0xb08] sm:$0xff]  ;;  %v12824_v10 = vcombine.low %v367_v60, %v371_v61  ;;  %v15154_v61 = vcombine.high %v14950_v44, %v14950_v44 }
  0x95   :  { %v379_v6 = vld [vmem:[%s19704_s1 + $0xb20] sm:$0xff]  ;;  %v380_v8 = vld [vmem:[%s19704_s1 + $0xb28] sm:$0xff] }
  0x96   :  { %9715 = vmatpush1.bf16.msra.mxu0 %v12768_v11  ;;  %10248 = vmatpush1.bf16.msra.mxu1 %v12770_v12  ;;  %v12826_v11 = vcombine.low %v368_v62, %v372_v0  ;;  %v12833_v12 = vcombine.high %v375_v5, %v379_v6  ;;  %v387_v15 = vld [vmem:[%s19704_s1 + $0xb60] sm:$0xff]  ;;  %v384_v16 = vld [vmem:[%s19704_s1 + $0xb48] sm:$0xff]  ;;  %v12832_v18 = vcombine.low %v375_v5, %v379_v6 }
  0x97   :  { %9716 = vmatprep.subr.bf16.mxu0 %v12777_v13  ;;  %10249 = vmatprep.subr.bf16.mxu1 %v12779_v14  ;;  %v12835_v13 = vcombine.high %v376_v7, %v380_v8  ;;  %v383_v14 = vld [vmem:[%s19704_s1 + $0xb40] sm:$0xff]  ;;  %v388_v17 = vld [vmem:[%s19704_s1 + $0xb68] sm:$0xff] }
  0x98   :  { %v395_v24 = vld [vmem:[%s19704_s1 + $0xba0] sm:$0xff]  ;;  %v392_v25 = vld [vmem:[%s19704_s1 + $0xb88] sm:$0xff]  ;;  %v12840_v26 = vcombine.low %v383_v14, %v387_v15 }
  0x99   :  { %v396_v59 = vld [vmem:[%s19704_s1 + $0xba8] sm:$0xff]  ;;  %v403_v31 = vld [vmem:[%s19704_s1 + $0xbe0] sm:$0xff] }
  0x9a   :  { %9717 = vmatpush1.bf16.msra.mxu0 %v12776_v19  ;;  %10250 = vmatpush1.bf16.msra.mxu1 %v12778_v20  ;;  %v12834_v19 = vcombine.low %v376_v7, %v380_v8  ;;  %v12841_v20 = vcombine.high %v383_v14, %v387_v15  ;;  %v400_v33 = vld [vmem:[%s19704_s1 + $0xbc8] sm:$0xff]  ;;  %v411_v41 = vld [vmem:[%s19704_s1 + $0xc20] sm:$0xff] }
  0x9b   :  { %9718 = vmatprep.subr.bf16.mxu0 %v12785_v21  ;;  %10251 = vmatprep.subr.bf16.mxu1 %v12787_v23  ;;  %v12843_v21 = vcombine.high %v384_v16, %v388_v17  ;;  %v391_v23 = vld [vmem:[%s19704_s1 + $0xb80] sm:$0xff]  ;;  %v404_v34 = vld [vmem:[%s19704_s1 + $0xbe8] sm:$0xff] }
  0x9c   :  { %v12848_v35 = vcombine.low %v391_v23, %v395_v24  ;;  %v408_v42 = vld [vmem:[%s19704_s1 + $0xc08] sm:$0xff]  ;;  %v419_v50 = vld [vmem:[%s19704_s1 + $0xc60] sm:$0xff] }
  0x9d   :  { %v412_v43 = vld [vmem:[%s19704_s1 + $0xc28] sm:$0xff]  ;;  %v423_v27 = vld [vmem:[%s19704_s1 + $0xc80] sm:$0xff] }
  0x9e   :  { %9719 = vmatpush1.bf16.msra.mxu0 %v12784_v28  ;;  %10252 = vmatpush1.bf16.msra.mxu1 %v12786_v63  ;;  %v12842_v28 = vcombine.low %v384_v16, %v388_v17  ;;  %v12849_v63 = vcombine.high %v391_v23, %v395_v24  ;;  %v416_v52 = vld [vmem:[%s19704_s1 + $0xc48] sm:$0xff]  ;;  %v427_v60 = vld [vmem:[%s19704_s1 + $0xca0] sm:$0xff] }
  0x9f   :  { %9720 = vmatprep.subr.bf16.mxu0 %v12793_v29  ;;  %10253 = vmatprep.subr.bf16.mxu1 %v12795_v30  ;;  %v12851_v29 = vcombine.high %v392_v25, %v396_v59  ;;  %v399_v30 = vld [vmem:[%s19704_s1 + $0xbc0] sm:$0xff]  ;;  %v420_v54 = vld [vmem:[%s19704_s1 + $0xc68] sm:$0xff] }
  0xa0   :  { %v12856_v45 = vcombine.low %v399_v30, %v403_v31  ;;  %v424_v62 = vld [vmem:[%s19704_s1 + $0xc88] sm:$0xff]  ;;  %v431_v5 = vld [vmem:[%s19704_s1 + $0xcc0] sm:$0xff] }
  0xa1   :  { %v428_v0 = vld [vmem:[%s19704_s1 + $0xca8] sm:$0xff]  ;;  %v435_v6 = vld [vmem:[%s19704_s1 + $0xce0] sm:$0xff] }
  0xa2   :  { %9721 = vmatpush1.bf16.msra.mxu0 %v12792_v37  ;;  %10254 = vmatpush1.bf16.msra.mxu1 %v12794_v38  ;;  %v12850_v37 = vcombine.low %v392_v25, %v396_v59  ;;  %v12857_v38 = vcombine.high %v399_v30, %v403_v31  ;;  %v432_v7 = vld [vmem:[%s19704_s1 + $0xcc8] sm:$0xff]  ;;  %v439_v14 = vld [vmem:[%s19704_s1 + $0xd00] sm:$0xff] }
  0xa3   :  { %9722 = vmatprep.subr.bf16.mxu0 %v12801_v39  ;;  %10255 = vmatprep.subr.bf16.mxu1 %v12803_v40  ;;  %v12859_v39 = vcombine.high %v400_v33, %v404_v34  ;;  %v407_v40 = vld [vmem:[%s19704_s1 + $0xc00] sm:$0xff]  ;;  %v436_v8 = vld [vmem:[%s19704_s1 + $0xce8] sm:$0xff] }
  0xa4   :  { %v443_v15 = vld [vmem:[%s19704_s1 + $0xd20] sm:$0xff]  ;;  %v440_v16 = vld [vmem:[%s19704_s1 + $0xd08] sm:$0xff] }
  0xa5   :  { %v444_v17 = vld [vmem:[%s19704_s1 + $0xd28] sm:$0xff]  ;;  %v447_v23 = vld [vmem:[%s19704_s1 + $0xd40] sm:$0xff] }
  0xa6   :  { %9723 = vmatpush1.bf16.msra.mxu0 %v12800_v46  ;;  %10256 = vmatpush1.bf16.msra.mxu1 %v12802_v47  ;;  %v12858_v46 = vcombine.low %v400_v33, %v404_v34  ;;  %v12865_v47 = vcombine.high %v407_v40, %v411_v41  ;;  %v451_v24 = vld [vmem:[%s19704_s1 + $0xd60] sm:$0xff]  ;;  %v448_v25 = vld [vmem:[%s19704_s1 + $0xd48] sm:$0xff] }
  0xa7   :  { %9724 = vmatprep.subr.bf16.mxu0 %v12809_v48  ;;  %10257 = vmatprep.subr.bf16.mxu1 %v12811_v49  ;;  %v12867_v48 = vcombine.high %v408_v42, %v412_v43  ;;  %v415_v49 = vld [vmem:[%s19704_s1 + $0xc40] sm:$0xff]  ;;  %v452_v59 = vld [vmem:[%s19704_s1 + $0xd68] sm:$0xff] }
  0xa8   :  { %v455_v30 = vld [vmem:[%s19704_s1 + $0xd80] sm:$0xff]  ;;  %v456_v33 = vld [vmem:[%s19704_s1 + $0xd88] sm:$0xff] }
  0xa9   :  { %v459_v31 = vld [vmem:[%s19704_s1 + $0xda0] sm:$0xff]  ;;  %v460_v34 = vld [vmem:[%s19704_s1 + $0xda8] sm:$0xff] }
  0xaa   :  { %9725 = vmatpush1.bf16.msra.mxu0 %v12808_v55  ;;  %10258 = vmatpush1.bf16.msra.mxu1 %v12810_v56  ;;  %v12864_v55 = vcombine.low %v407_v40, %v411_v41  ;;  %v12866_v56 = vcombine.low %v408_v42, %v412_v43  ;;  %v463_v40 = vld [vmem:[%s19704_s1 + $0xdc0] sm:$0xff]  ;;  %v464_v42 = vld [vmem:[%s19704_s1 + $0xdc8] sm:$0xff] }
  0xab   :  { %9726 = vmatprep.subr.bf16.mxu0 %v12817_v57  ;;  %10259 = vmatprep.subr.bf16.mxu1 %v12819_v58  ;;  %v12873_v57 = vcombine.high %v415_v49, %v419_v50  ;;  %v12875_v58 = vcombine.high %v416_v52, %v420_v54  ;;  %v467_v41 = vld [vmem:[%s19704_s1 + $0xde0] sm:$0xff]  ;;  %v468_v43 = vld [vmem:[%s19704_s1 + $0xde8] sm:$0xff] }
  0xae   :  { %9727 = vmatpush1.bf16.msra.mxu0 %v12816_v1  ;;  %10260 = vmatpush1.bf16.msra.mxu1 %v12818_v2  ;;  %v12872_v1 = vcombine.low %v415_v49, %v419_v50  ;;  %v12874_v2 = vcombine.low %v416_v52, %v420_v54  ;;  %v471_v49 = vld [vmem:[%s19704_s1 + $0xe00] sm:$0xff]  ;;  %v472_v52 = vld [vmem:[%s19704_s1 + $0xe08] sm:$0xff] }
  0xaf   :  { %9728 = vmatprep.subr.bf16.mxu0 %v12825_v3  ;;  %10261 = vmatprep.subr.bf16.mxu1 %v12827_v4  ;;  %v12881_v3 = vcombine.high %v423_v27, %v427_v60  ;;  %v12883_v4 = vcombine.high %v424_v62, %v428_v0  ;;  %v475_v50 = vld [vmem:[%s19704_s1 + $0xe20] sm:$0xff]  ;;  %v476_v54 = vld [vmem:[%s19704_s1 + $0xe28] sm:$0xff] }
  0xb2   :  { %9729 = vmatpush1.bf16.msra.mxu0 %v12824_v10  ;;  %10262 = vmatpush1.bf16.msra.mxu1 %v12826_v11  ;;  %v12880_v10 = vcombine.low %v423_v27, %v427_v60  ;;  %v12882_v11 = vcombine.low %v424_v62, %v428_v0  ;;  %v479_v27 = vld [vmem:[%s19704_s1 + $0xe40] sm:$0xff]  ;;  %v480_v62 = vld [vmem:[%s19704_s1 + $0xe48] sm:$0xff] }
  0xb3   :  { %9730 = vmatprep.subr.bf16.mxu0 %v12833_v12  ;;  %10263 = vmatprep.subr.bf16.mxu1 %v12835_v13  ;;  %v12889_v12 = vcombine.high %v431_v5, %v435_v6  ;;  %v12891_v13 = vcombine.high %v432_v7, %v436_v8  ;;  %v483_v60 = vld [vmem:[%s19704_s1 + $0xe60] sm:$0xff]  ;;  %v484_v0 = vld [vmem:[%s19704_s1 + $0xe68] sm:$0xff] }
  0xb6   :  { %9731 = vmatpush1.bf16.msra.mxu0 %v12832_v18  ;;  %10264 = vmatpush1.bf16.msra.mxu1 %v12834_v19  ;;  %v12888_v18 = vcombine.low %v431_v5, %v435_v6  ;;  %v12890_v19 = vcombine.low %v432_v7, %v436_v8  ;;  %v487_v5 = vld [vmem:[%s19704_s1 + $0xe80] sm:$0xff]  ;;  %v488_v7 = vld [vmem:[%s19704_s1 + $0xe88] sm:$0xff] }
  0xb7   :  { %9732 = vmatprep.subr.bf16.mxu0 %v12841_v20  ;;  %10265 = vmatprep.subr.bf16.mxu1 %v12843_v21  ;;  %v12897_v20 = vcombine.high %v439_v14, %v443_v15  ;;  %v12899_v21 = vcombine.high %v440_v16, %v444_v17  ;;  %v491_v6 = vld [vmem:[%s19704_s1 + $0xea0] sm:$0xff]  ;;  %v492_v8 = vld [vmem:[%s19704_s1 + $0xea8] sm:$0xff] }
  0xba   :  { %9733 = vmatpush1.bf16.msra.mxu0 %v12840_v26  ;;  %10266 = vmatpush1.bf16.msra.mxu1 %v12842_v28  ;;  %v12896_v26 = vcombine.low %v439_v14, %v443_v15  ;;  %v12898_v28 = vcombine.low %v440_v16, %v444_v17  ;;  %v495_v14 = vld [vmem:[%s19704_s1 + $0xec0] sm:$0xff]  ;;  %v496_v16 = vld [vmem:[%s19704_s1 + $0xec8] sm:$0xff] }
  0xbb   :  { %9734 = vmatprep.subr.bf16.mxu0 %v12849_v63  ;;  %10267 = vmatprep.subr.bf16.mxu1 %v12851_v29  ;;  %v12905_v63 = vcombine.high %v447_v23, %v451_v24  ;;  %v12907_v29 = vcombine.high %v448_v25, %v452_v59  ;;  %v499_v15 = vld [vmem:[%s19704_s1 + $0xee0] sm:$0xff]  ;;  %v500_v17 = vld [vmem:[%s19704_s1 + $0xee8] sm:$0xff] }
  0xbe   :  { %9735 = vmatpush1.bf16.msra.mxu0 %v12848_v35  ;;  %10268 = vmatpush1.bf16.msra.mxu1 %v12850_v37  ;;  %v12904_v35 = vcombine.low %v447_v23, %v451_v24  ;;  %v12906_v37 = vcombine.low %v448_v25, %v452_v59  ;;  %v503_v23 = vld [vmem:[%s19704_s1 + $0xf00] sm:$0xff]  ;;  %v504_v25 = vld [vmem:[%s19704_s1 + $0xf08] sm:$0xff] }
  0xbf   :  { %9736 = vmatprep.subr.bf16.mxu0 %v12857_v38  ;;  %10269 = vmatprep.subr.bf16.mxu1 %v12859_v39  ;;  %v12913_v38 = vcombine.high %v455_v30, %v459_v31  ;;  %v12915_v39 = vcombine.high %v456_v33, %v460_v34  ;;  %v507_v24 = vld [vmem:[%s19704_s1 + $0xf20] sm:$0xff]  ;;  %v508_v59 = vld [vmem:[%s19704_s1 + $0xf28] sm:$0xff] }
  0xc2   :  { %9737 = vmatpush1.bf16.msra.mxu0 %v12856_v45  ;;  %10270 = vmatpush1.bf16.msra.mxu1 %v12858_v46  ;;  %v12912_v45 = vcombine.low %v455_v30, %v459_v31  ;;  %v12914_v46 = vcombine.low %v456_v33, %v460_v34  ;;  %v511_v30 = vld [vmem:[%s19704_s1 + $0xf40] sm:$0xff]  ;;  %v512_v33 = vld [vmem:[%s19704_s1 + $0xf48] sm:$0xff] }
  0xc3   :  { %9747 = vmatprep.subr.bf16.mxu0 %v12865_v47  ;;  %10280 = vmatprep.subr.bf16.mxu1 %v12867_v48  ;;  %v12921_v47 = vcombine.high %v463_v40, %v467_v41  ;;  %v12923_v48 = vcombine.high %v464_v42, %v468_v43  ;;  %v515_v31 = vld [vmem:[%s19704_s1 + $0xf60] sm:$0xff]  ;;  %v516_v34 = vld [vmem:[%s19704_s1 + $0xf68] sm:$0xff] }
  0xc5   :  { %9739 = vmatmul.mubr.bf16.vlgmr.msra.gmra.mrb[0].mxu0 %v15138_v51  ;;  %10272 = vmatmul.mubr.bf16.vlgmr.msra.gmra.mrb[0].mxu1 %v15138_v51 }
  0xc6   :  { %9748 = vmatpush1.bf16.msra.mxu0 %v12864_v55  ;;  %10281 = vmatpush1.bf16.msra.mxu1 %v12866_v56  ;;  %v12920_v55 = vcombine.low %v463_v40, %v467_v41  ;;  %v12922_v56 = vcombine.low %v464_v42, %v468_v43  ;;  %v519_v40 = vld [vmem:[%s19704_s1 + $0xf80] sm:$0xff]  ;;  %v520_v42 = vld [vmem:[%s19704_s1 + $0xf88] sm:$0xff] }
  0xc7   :  { %9749 = vmatprep.subr.bf16.mxu0 %v12873_v57  ;;  %10282 = vmatprep.subr.bf16.mxu1 %v12875_v58  ;;  %v12929_v57 = vcombine.high %v471_v49, %v475_v50  ;;  %v12931_v58 = vcombine.high %v472_v52, %v476_v54  ;;  %v523_v41 = vld [vmem:[%s19704_s1 + $0xfa0] sm:$0xff]  ;;  %v524_v43 = vld [vmem:[%s19704_s1 + $0xfa8] sm:$0xff] }
  0xc8   :  { %9779 = vmatprep.mubr.bf16.mxu0 %v15154_v61  ;;  %10312 = vmatprep.mubr.bf16.mxu1 %v15154_v61 }
  0xca   :  { %9750 = vmatpush1.bf16.msra.mxu0 %v12872_v1  ;;  %10283 = vmatpush1.bf16.msra.mxu1 %v12874_v2  ;;  %v12928_v1 = vcombine.low %v471_v49, %v475_v50  ;;  %v12930_v2 = vcombine.low %v472_v52, %v476_v54  ;;  %v527_v49 = vld [vmem:[%s19704_s1 + $0xfc0] sm:$0xff]  ;;  %v528_v52 = vld [vmem:[%s19704_s1 + $0xfc8] sm:$0xff] }
  0xcb   :  { %9751 = vmatprep.subr.bf16.mxu0 %v12881_v3  ;;  %10284 = vmatprep.subr.bf16.mxu1 %v12883_v4  ;;  %v12937_v3 = vcombine.high %v479_v27, %v483_v60  ;;  %v12939_v4 = vcombine.high %v480_v62, %v484_v0  ;;  %v531_v50 = vld [vmem:[%s19704_s1 + $0xfe0] sm:$0xff]  ;;  %v532_v54 = vld [vmem:[%s19704_s1 + $0xfe8] sm:$0xff] }
  0xce   :  { %9752 = vmatpush1.bf16.msra.mxu0 %v12880_v10  ;;  %10285 = vmatpush1.bf16.msra.mxu1 %v12882_v11  ;;  %v12936_v10 = vcombine.low %v479_v27, %v483_v60  ;;  %v12938_v11 = vcombine.low %v480_v62, %v484_v0  ;;  %v12987_v27 = vcombine.high %v528_v52, %v532_v54  ;;  %v535_v60 = vld [vmem:[%s19704_s1 + $0x1000] sm:$0xff] }
  0xcf   :  { %9753 = vmatprep.subr.bf16.mxu0 %v12889_v12  ;;  %10286 = vmatprep.subr.bf16.mxu1 %v12891_v13  ;;  %v12945_v12 = vcombine.high %v487_v5, %v491_v6  ;;  %v12947_v13 = vcombine.high %v488_v7, %v492_v8  ;;  %v539_v62 = vld [vmem:[%s19704_s1 + $0x1020] sm:$0xff] }
  0xd2   :  { %9754 = vmatpush1.bf16.msra.mxu0 %v12888_v18  ;;  %10287 = vmatpush1.bf16.msra.mxu1 %v12890_v19  ;;  %v12944_v18 = vcombine.low %v487_v5, %v491_v6  ;;  %v12946_v19 = vcombine.low %v488_v7, %v492_v8  ;;  %v12993_v5 = vcombine.high %v535_v60, %v539_v62  ;;  %v543_v7 = vld [vmem:[%s19704_s1 + $0x1040] sm:$0xff] }
  0xd3   :  { %9755 = vmatprep.subr.bf16.mxu0 %v12897_v20  ;;  %10288 = vmatprep.subr.bf16.mxu1 %v12899_v21  ;;  %v12953_v20 = vcombine.high %v495_v14, %v499_v15  ;;  %v12955_v21 = vcombine.high %v496_v16, %v500_v17  ;;  %v547_v8 = vld [vmem:[%s19704_s1 + $0x1060] sm:$0xff] }
  0xd6   :  { %9756 = vmatpush1.bf16.msra.mxu0 %v12896_v26  ;;  %10289 = vmatpush1.bf16.msra.mxu1 %v12898_v28  ;;  %v12952_v26 = vcombine.low %v495_v14, %v499_v15  ;;  %v12954_v28 = vcombine.low %v496_v16, %v500_v17  ;;  %v12992_v14 = vcombine.low %v535_v60, %v539_v62  ;;  %v588_v60 = vld [vmem:[%s19704_s1 + $0x11a8] sm:$0xff] }
  0xd7   :  { %9757 = vmatprep.subr.bf16.mxu0 %v12905_v63  ;;  %10290 = vmatprep.subr.bf16.mxu1 %v12907_v29  ;;  %v12961_v63 = vcombine.high %v503_v23, %v507_v24  ;;  %v12963_v29 = vcombine.high %v504_v25, %v508_v59  ;;  %v13001_v16 = vcombine.high %v543_v7, %v547_v8 }
  0xda   :  { %9758 = vmatpush1.bf16.msra.mxu0 %v12904_v35  ;;  %10291 = vmatpush1.bf16.msra.mxu1 %v12906_v37  ;;  %v12960_v35 = vcombine.low %v503_v23, %v507_v24  ;;  %v12962_v37 = vcombine.low %v504_v25, %v508_v59  ;;  %v556_v23 = vld [vmem:[%s19704_s1 + $0x10a8] sm:$0xff]  ;;  %v13000_v24 = vcombine.low %v543_v7, %v547_v8 }
  0xdb   :  { %9759 = vmatprep.subr.bf16.mxu0 %v12913_v38  ;;  %10292 = vmatprep.subr.bf16.mxu1 %v12915_v39  ;;  %v12969_v38 = vcombine.high %v511_v30, %v515_v31  ;;  %v12971_v39 = vcombine.high %v512_v33, %v516_v34  ;;  %v596_v7 = vld [vmem:[%s19704_s1 + $0x11e8] sm:$0xff] }
  0xde   :  { %9760 = vmatpush1.bf16.msra.mxu0 %v12912_v45  ;;  %10293 = vmatpush1.bf16.msra.mxu1 %v12914_v46  ;;  %v12968_v45 = vcombine.low %v511_v30, %v515_v31  ;;  %v12970_v46 = vcombine.low %v512_v33, %v516_v34  ;;  %v564_v30 = vld [vmem:[%s19704_s1 + $0x10e8] sm:$0xff] }
  0xdf   :  { %9761 = vmatprep.subr.bf16.mxu0 %v12921_v47  ;;  %10294 = vmatprep.subr.bf16.mxu1 %v12923_v48  ;;  %v12977_v47 = vcombine.high %v519_v40, %v523_v41  ;;  %v12979_v48 = vcombine.high %v520_v42, %v524_v43 }
  0xe2   :  { %9762 = vmatpush1.bf16.msra.mxu0 %v12920_v55  ;;  %10295 = vmatpush1.bf16.msra.mxu1 %v12922_v56  ;;  %v15325_v55 = vld [vmem:[%s19703_s0 + $0x8] sm:$0xff]  ;;  %v12976_v56 = vcombine.low %v519_v40, %v523_v41 }
  0xe3   :  { %9763 = vmatprep.subr.bf16.mxu0 %v12929_v57  ;;  %10296 = vmatprep.subr.bf16.mxu1 %v12931_v58  ;;  %v12978_v57 = vcombine.low %v520_v42, %v524_v43  ;;  %v12985_v58 = vcombine.high %v527_v49, %v531_v50  ;;  %v15335_v0 = vrot.slane %v15325_v55, %v14572_v53  ;;  %v572_v40 = vld [vmem:[%s19704_s1 + $0x1128] sm:$0xff] }
  0xe6   :  { %9764 = vmatpush1.bf16.msra.mxu0 %v12928_v1  ;;  %10297 = vmatpush1.bf16.msra.mxu1 %v12930_v2  ;;  %v536_v1 = vld [vmem:[%s19704_s1 + $0x1008] sm:$0xff] }
  0xe7   :  { %9765 = vmatprep.subr.bf16.mxu0 %v12937_v3  ;;  %10298 = vmatprep.subr.bf16.mxu1 %v12939_v4  ;;  %v540_v2 = vld [vmem:[%s19704_s1 + $0x1028] sm:$0xff]  ;;  %v12984_v3 = vcombine.low %v527_v49, %v531_v50  ;;  %v12986_v4 = vcombine.low %v528_v52, %v532_v54 }
  0xe8   :  { %v12995_v6 = vcombine.high %v536_v1, %v540_v2  ;;  %v12994_v15 = vcombine.low %v536_v1, %v540_v2  ;;  %v580_v49 = vld [vmem:[%s19704_s1 + $0x1168] sm:$0xff] }
  0xea   :  { %9766 = vmatpush1.bf16.msra.mxu0 %v12936_v10  ;;  %10299 = vmatpush1.bf16.msra.mxu1 %v12938_v11  ;;  %v1659_v10 = vcombine.high %v15335_v0, %v15335_v0  ;;  %v15353_v11 = vcombine.high %v15138_v51, %v15138_v51 }
  0xeb   :  { %9767 = vmatprep.subr.bf16.mxu0 %v12945_v12  ;;  %10300 = vmatprep.subr.bf16.mxu1 %v12947_v13  ;;  %v544_v12 = vld [vmem:[%s19704_s1 + $0x1048] sm:$0xff] }
  0xec   :  { %v548_v13 = vld [vmem:[%s19704_s1 + $0x1068] sm:$0xff] }
  0xed   :  { %v13003_v17 = vcombine.high %v544_v12, %v548_v13  ;;  %v13002_v25 = vcombine.low %v544_v12, %v548_v13 }
  0xee   :  { %9768 = vmatpush1.bf16.msra.mxu0 %v12944_v18  ;;  %10301 = vmatpush1.bf16.msra.mxu1 %v12946_v19  ;;  %v551_v18 = vld [vmem:[%s19704_s1 + $0x1080] sm:$0xff] }
  0xef   :  { %9769 = vmatprep.subr.bf16.mxu0 %v12953_v20  ;;  %10302 = vmatprep.subr.bf16.mxu1 %v12955_v21  ;;  %v555_v19 = vld [vmem:[%s19704_s1 + $0x10a0] sm:$0xff]  ;;  %v15368_v20 = vrot.slane %v1659_v10, %v14572_v53  ;;  %v552_v21 = vld [vmem:[%s19704_s1 + $0x1088] sm:$0xff] }
  0xf0   :  { %v13009_v59 = vcombine.high %v551_v18, %v555_v19  ;;  %v13008_v31 = vcombine.low %v551_v18, %v555_v19  ;;  %v13010_v33 = vcombine.low %v552_v21, %v556_v23 }
  0xf2   :  { %9770 = vmatpush1.bf16.msra.mxu0 %v12952_v26  ;;  %10303 = vmatpush1.bf16.msra.mxu1 %v12954_v28  ;;  %v13011_v26 = vcombine.high %v552_v21, %v556_v23  ;;  %v559_v28 = vld [vmem:[%s19704_s1 + $0x10c0] sm:$0xff] }
  0xf3   :  { %9771 = vmatprep.subr.bf16.mxu0 %v12961_v63  ;;  %10304 = vmatprep.subr.bf16.mxu1 %v12963_v29  ;;  %v563_v63 = vld [vmem:[%s19704_s1 + $0x10e0] sm:$0xff]  ;;  %v560_v29 = vld [vmem:[%s19704_s1 + $0x10c8] sm:$0xff] }
  0xf4   :  { %v13017_v34 = vcombine.high %v559_v28, %v563_v63  ;;  %v13016_v41 = vcombine.low %v559_v28, %v563_v63  ;;  %v13018_v42 = vcombine.low %v560_v29, %v564_v30 }
  0xf6   :  { %9772 = vmatpush1.bf16.msra.mxu0 %v12960_v35  ;;  %10305 = vmatpush1.bf16.msra.mxu1 %v12962_v37  ;;  %v13019_v35 = vcombine.high %v560_v29, %v564_v30  ;;  %v567_v37 = vld [vmem:[%s19704_s1 + $0x1100] sm:$0xff] }
  0xf7   :  { %9773 = vmatprep.subr.bf16.mxu0 %v12969_v38  ;;  %10306 = vmatprep.subr.bf16.mxu1 %v12971_v39  ;;  %v571_v38 = vld [vmem:[%s19704_s1 + $0x1120] sm:$0xff]  ;;  %v568_v39 = vld [vmem:[%s19704_s1 + $0x1108] sm:$0xff] }
  0xf8   :  { %v13025_v43 = vcombine.high %v567_v37, %v571_v38  ;;  %v13024_v50 = vcombine.low %v567_v37, %v571_v38  ;;  %v13026_v52 = vcombine.low %v568_v39, %v572_v40 }
  0xfa   :  { %9774 = vmatpush1.bf16.msra.mxu0 %v12968_v45  ;;  %10307 = vmatpush1.bf16.msra.mxu1 %v12970_v46  ;;  %v13027_v45 = vcombine.high %v568_v39, %v572_v40  ;;  %v575_v46 = vld [vmem:[%s19704_s1 + $0x1140] sm:$0xff] }
  0xfb   :  { %9775 = vmatprep.subr.bf16.mxu0 %v12977_v47  ;;  %10308 = vmatprep.subr.bf16.mxu1 %v12979_v48  ;;  %v579_v47 = vld [vmem:[%s19704_s1 + $0x1160] sm:$0xff]  ;;  %v576_v48 = vld [vmem:[%s19704_s1 + $0x1148] sm:$0xff] }
  0xfc   :  { %v13033_v54 = vcombine.high %v575_v46, %v579_v47  ;;  %v13032_v62 = vcombine.low %v575_v46, %v579_v47  ;;  %v13034_v1 = vcombine.low %v576_v48, %v580_v49 }
  0xfe   :  { %9776 = vmatpush1.bf16.msra.mxu0 %v12976_v56  ;;  %10309 = vmatpush1.bf16.msra.mxu1 %v12978_v57  ;;  %v13035_v56 = vcombine.high %v576_v48, %v580_v49  ;;  %v583_v57 = vld [vmem:[%s19704_s1 + $0x1180] sm:$0xff] }
  0xff   :  { %9777 = vmatprep.subr.bf16.mxu0 %v12985_v58  ;;  %10310 = vmatprep.subr.bf16.mxu1 %v12987_v27  ;;  %v587_v58 = vld [vmem:[%s19704_s1 + $0x11a0] sm:$0xff]  ;;  %v584_v27 = vld [vmem:[%s19704_s1 + $0x1188] sm:$0xff] }
 0x100   :  { %v13041_v2 = vcombine.high %v583_v57, %v587_v58  ;;  %v13040_v8 = vcombine.low %v583_v57, %v587_v58  ;;  %v13042_v10 = vcombine.low %v584_v27, %v588_v60 }
 0x102   :  { %9778 = vmatpush1.bf16.msra.mxu0 %v12984_v3  ;;  %10311 = vmatpush1.bf16.msra.mxu1 %v12986_v4  ;;  %v13043_v3 = vcombine.high %v584_v27, %v588_v60  ;;  %v591_v4 = vld [vmem:[%s19704_s1 + $0x11c0] sm:$0xff] }
 0x103   :  { %9788 = vmatprep.subr.bf16.mxu0 %v12993_v5  ;;  %10321 = vmatprep.subr.bf16.mxu1 %v12995_v6  ;;  %v595_v5 = vld [vmem:[%s19704_s1 + $0x11e0] sm:$0xff]  ;;  %v592_v6 = vld [vmem:[%s19704_s1 + $0x11c8] sm:$0xff] }
 0x104   :  { %v13049_v12 = vcombine.high %v591_v4, %v595_v5  ;;  %v13051_v13 = vcombine.high %v592_v6, %v596_v7  ;;  %v13048_v18 = vcombine.low %v591_v4, %v595_v5  ;;  %v13050_v19 = vcombine.low %v592_v6, %v596_v7 }
 0x105   :  { %9780 = vmatmul.mubr.bf16.vlgmr.msra.gmra.mrb[0].mxu0 %v15353_v11  ;;  %10313 = vmatmul.mubr.bf16.vlgmr.msra.gmra.mrb[0].mxu1 %v15353_v11 }
 0x106   :  { %9789 = vmatpush1.bf16.msra.mxu0 %v12992_v14  ;;  %10322 = vmatpush1.bf16.msra.mxu1 %v12994_v15  ;;  %v599_v14 = vld [vmem:[%s19704_s1 + $0x1200] sm:$0xff] }
 0x107   :  { %9790 = vmatprep.subr.bf16.mxu0 %v13001_v16  ;;  %10323 = vmatprep.subr.bf16.mxu1 %v13003_v17  ;;  %v603_v15 = vld [vmem:[%s19704_s1 + $0x1220] sm:$0xff]  ;;  %v600_v16 = vld [vmem:[%s19704_s1 + $0x1208] sm:$0xff] }
 0x108   :  { %9820 = vmatprep.mubr.bf16.mxu0 %v15368_v20  ;;  %10353 = vmatprep.mubr.bf16.mxu1 %v15368_v20  ;;  %v604_v17 = vld [vmem:[%s19704_s1 + $0x1228] sm:$0xff]  ;;  %v13057_v21 = vcombine.high %v599_v14, %v603_v15  ;;  %v13056_v28 = vcombine.low %v599_v14, %v603_v15 }
 0x109   :  { %v13059_v23 = vcombine.high %v600_v16, %v604_v17  ;;  %v13058_v63 = vcombine.low %v600_v16, %v604_v17 }
 0x10a   :  { %9791 = vmatpush1.bf16.msra.mxu0 %v13000_v24  ;;  %10324 = vmatpush1.bf16.msra.mxu1 %v13002_v25  ;;  %v607_v24 = vld [vmem:[%s19704_s1 + $0x1240] sm:$0xff] }
 0x10b   :  { %9792 = vmatprep.subr.bf16.mxu0 %v13009_v59  ;;  %10325 = vmatprep.subr.bf16.mxu1 %v13011_v26  ;;  %v611_v25 = vld [vmem:[%s19704_s1 + $0x1260] sm:$0xff]  ;;  %v608_v59 = vld [vmem:[%s19704_s1 + $0x1248] sm:$0xff] }
 0x10c   :  { %v612_v26 = vld [vmem:[%s19704_s1 + $0x1268] sm:$0xff]  ;;  %v13065_v29 = vcombine.high %v607_v24, %v611_v25  ;;  %v13064_v37 = vcombine.low %v607_v24, %v611_v25 }
 0x10d   :  { %v13067_v30 = vcombine.high %v608_v59, %v612_v26  ;;  %v13066_v38 = vcombine.low %v608_v59, %v612_v26 }
 0x10e   :  { %9793 = vmatpush1.bf16.msra.mxu0 %v13008_v31  ;;  %10326 = vmatpush1.bf16.msra.mxu1 %v13010_v33  ;;  %v615_v31 = vld [vmem:[%s19704_s1 + $0x1280] sm:$0xff] }
 0x10f   :  { %9794 = vmatprep.subr.bf16.mxu0 %v13017_v34  ;;  %10327 = vmatprep.subr.bf16.mxu1 %v13019_v35  ;;  %v619_v33 = vld [vmem:[%s19704_s1 + $0x12a0] sm:$0xff]  ;;  %v616_v34 = vld [vmem:[%s19704_s1 + $0x1288] sm:$0xff] }
 0x110   :  { %v620_v35 = vld [vmem:[%s19704_s1 + $0x12a8] sm:$0xff]  ;;  %v13073_v39 = vcombine.high %v615_v31, %v619_v33  ;;  %v13072_v46 = vcombine.low %v615_v31, %v619_v33 }
 0x111   :  { %v13075_v40 = vcombine.high %v616_v34, %v620_v35  ;;  %v13074_v47 = vcombine.low %v616_v34, %v620_v35 }
 0x112   :  { %9795 = vmatpush1.bf16.msra.mxu0 %v13016_v41  ;;  %10328 = vmatpush1.bf16.msra.mxu1 %v13018_v42  ;;  %v623_v41 = vld [vmem:[%s19704_s1 + $0x12c0] sm:$0xff] }
 0x113   :  { %9796 = vmatprep.subr.bf16.mxu0 %v13025_v43  ;;  %10329 = vmatprep.subr.bf16.mxu1 %v13027_v45  ;;  %v627_v42 = vld [vmem:[%s19704_s1 + $0x12e0] sm:$0xff]  ;;  %v624_v43 = vld [vmem:[%s19704_s1 + $0x12c8] sm:$0xff] }
 0x114   :  { %v628_v45 = vld [vmem:[%s19704_s1 + $0x12e8] sm:$0xff]  ;;  %v13081_v48 = vcombine.high %v623_v41, %v627_v42  ;;  %v13080_v57 = vcombine.low %v623_v41, %v627_v42 }
 0x115   :  { %v13083_v49 = vcombine.high %v624_v43, %v628_v45  ;;  %v13082_v58 = vcombine.low %v624_v43, %v628_v45  ;;  %v676_v41 = vld [vmem:[%s19704_s1 + $0x1468] sm:$0xff] }
 0x116   :  { %9797 = vmatpush1.bf16.msra.mxu0 %v13024_v50  ;;  %10330 = vmatpush1.bf16.msra.mxu1 %v13026_v52  ;;  %v631_v50 = vld [vmem:[%s19704_s1 + $0x1300] sm:$0xff] }
 0x117   :  { %9798 = vmatprep.subr.bf16.mxu0 %v13033_v54  ;;  %10331 = vmatprep.subr.bf16.mxu1 %v13035_v56  ;;  %v635_v52 = vld [vmem:[%s19704_s1 + $0x1320] sm:$0xff]  ;;  %v632_v54 = vld [vmem:[%s19704_s1 + $0x1308] sm:$0xff] }
 0x118   :  { %v636_v56 = vld [vmem:[%s19704_s1 + $0x1328] sm:$0xff]  ;;  %v13089_v27 = vcombine.high %v631_v50, %v635_v52  ;;  %v13088_v4 = vcombine.low %v631_v50, %v635_v52 }
 0x119   :  { %v13091_v60 = vcombine.high %v632_v54, %v636_v56  ;;  %v13090_v5 = vcombine.low %v632_v54, %v636_v56  ;;  %v684_v50 = vld [vmem:[%s19704_s1 + $0x14a8] sm:$0xff] }
 0x11a   :  { %9799 = vmatpush1.bf16.msra.mxu0 %v13032_v62  ;;  %10332 = vmatpush1.bf16.msra.mxu1 %v13034_v1  ;;  %v639_v62 = vld [vmem:[%s19704_s1 + $0x1340] sm:$0xff] }
 0x11b   :  { %9800 = vmatprep.subr.bf16.mxu0 %v13041_v2  ;;  %10333 = vmatprep.subr.bf16.mxu1 %v13043_v3  ;;  %v643_v1 = vld [vmem:[%s19704_s1 + $0x1360] sm:$0xff]  ;;  %v640_v2 = vld [vmem:[%s19704_s1 + $0x1348] sm:$0xff] }
 0x11c   :  { %v644_v3 = vld [vmem:[%s19704_s1 + $0x1368] sm:$0xff]  ;;  %v13097_v6 = vcombine.high %v639_v62, %v643_v1  ;;  %v13096_v14 = vcombine.low %v639_v62, %v643_v1 }
 0x11d   :  { %v13099_v7 = vcombine.high %v640_v2, %v644_v3  ;;  %v13098_v15 = vcombine.low %v640_v2, %v644_v3  ;;  %v692_v62 = vld [vmem:[%s19704_s1 + $0x14e8] sm:$0xff] }
 0x11e   :  { %9801 = vmatpush1.bf16.msra.mxu0 %v13040_v8  ;;  %10334 = vmatpush1.bf16.msra.mxu1 %v13042_v10  ;;  %v647_v8 = vld [vmem:[%s19704_s1 + $0x1380] sm:$0xff] }
 0x11f   :  { %9802 = vmatprep.subr.bf16.mxu0 %v13049_v12  ;;  %10335 = vmatprep.subr.bf16.mxu1 %v13051_v13  ;;  %v651_v10 = vld [vmem:[%s19704_s1 + $0x13a0] sm:$0xff]  ;;  %v648_v12 = vld [vmem:[%s19704_s1 + $0x1388] sm:$0xff] }
 0x120   :  { %v652_v13 = vld [vmem:[%s19704_s1 + $0x13a8] sm:$0xff]  ;;  %v13105_v16 = vcombine.high %v647_v8, %v651_v10  ;;  %v13104_v24 = vcombine.low %v647_v8, %v651_v10 }
 0x121   :  { %v13107_v17 = vcombine.high %v648_v12, %v652_v13  ;;  %v13106_v25 = vcombine.low %v648_v12, %v652_v13  ;;  %v700_v8 = vld [vmem:[%s19704_s1 + $0x1528] sm:$0xff] }
 0x122   :  { %9803 = vmatpush1.bf16.msra.mxu0 %v13048_v18  ;;  %10336 = vmatpush1.bf16.msra.mxu1 %v13050_v19  ;;  %v655_v18 = vld [vmem:[%s19704_s1 + $0x13c0] sm:$0xff] }
 0x123   :  { %9804 = vmatprep.subr.bf16.mxu0 %v13057_v21  ;;  %10337 = vmatprep.subr.bf16.mxu1 %v13059_v23  ;;  %v659_v19 = vld [vmem:[%s19704_s1 + $0x13e0] sm:$0xff]  ;;  %v656_v21 = vld [vmem:[%s19704_s1 + $0x13c8] sm:$0xff] }
 0x124   :  { %v660_v23 = vld [vmem:[%s19704_s1 + $0x13e8] sm:$0xff]  ;;  %v13113_v59 = vcombine.high %v655_v18, %v659_v19  ;;  %v13112_v31 = vcombine.low %v655_v18, %v659_v19 }
 0x125   :  { %v13115_v26 = vcombine.high %v656_v21, %v660_v23  ;;  %v13114_v33 = vcombine.low %v656_v21, %v660_v23  ;;  %v708_v18 = vld [vmem:[%s19704_s1 + $0x1568] sm:$0xff] }
 0x126   :  { %9805 = vmatpush1.bf16.msra.mxu0 %v13056_v28  ;;  %10338 = vmatpush1.bf16.msra.mxu1 %v13058_v63  ;;  %v663_v28 = vld [vmem:[%s19704_s1 + $0x1400] sm:$0xff] }
 0x127   :  { %9806 = vmatprep.subr.bf16.mxu0 %v13065_v29  ;;  %10339 = vmatprep.subr.bf16.mxu1 %v13067_v30  ;;  %v667_v63 = vld [vmem:[%s19704_s1 + $0x1420] sm:$0xff]  ;;  %v664_v29 = vld [vmem:[%s19704_s1 + $0x1408] sm:$0xff] }
 0x128   :  { %v668_v30 = vld [vmem:[%s19704_s1 + $0x1428] sm:$0xff]  ;;  %v13121_v34 = vcombine.high %v663_v28, %v667_v63  ;;  %v13120_v42 = vcombine.low %v663_v28, %v667_v63 }
 0x129   :  { %v13123_v35 = vcombine.high %v664_v29, %v668_v30  ;;  %v13122_v43 = vcombine.low %v664_v29, %v668_v30  ;;  %v716_v28 = vld [vmem:[%s19704_s1 + $0x15a8] sm:$0xff] }
 0x12a   :  { %9807 = vmatpush1.bf16.msra.mxu0 %v13064_v37  ;;  %10340 = vmatpush1.bf16.msra.mxu1 %v13066_v38  ;;  %v671_v37 = vld [vmem:[%s19704_s1 + $0x1440] sm:$0xff] }
 0x12b   :  { %9808 = vmatprep.subr.bf16.mxu0 %v13073_v39  ;;  %10341 = vmatprep.subr.bf16.mxu1 %v13075_v40  ;;  %v675_v38 = vld [vmem:[%s19704_s1 + $0x1460] sm:$0xff]  ;;  %v15556_v39 = vrot.slane %v15335_v0, %v14572_v53  ;;  %v672_v40 = vld [vmem:[%s19704_s1 + $0x1448] sm:$0xff] }
 0x12c   :  { %v13129_v45 = vcombine.high %v671_v37, %v675_v38  ;;  %v679_v0 = vld [vmem:[%s19704_s1 + $0x1480] sm:$0xff]  ;;  %v13128_v52 = vcombine.low %v671_v37, %v675_v38  ;;  %v13130_v54 = vcombine.low %v672_v40, %v676_v41  ;;  %v724_v37 = vld [vmem:[%s19704_s1 + $0x15e8] sm:$0xff] }
 0x12e   :  { %9809 = vmatpush1.bf16.msra.mxu0 %v13072_v46  ;;  %10342 = vmatpush1.bf16.msra.mxu1 %v13074_v47  ;;  %v13131_v46 = vcombine.high %v672_v40, %v676_v41  ;;  %v683_v47 = vld [vmem:[%s19704_s1 + $0x14a0] sm:$0xff] }
 0x12f   :  { %9810 = vmatprep.subr.bf16.mxu0 %v13081_v48  ;;  %10343 = vmatprep.subr.bf16.mxu1 %v13083_v49  ;;  %v15572_v48 = vcombine.high %v15368_v20, %v15368_v20  ;;  %v680_v49 = vld [vmem:[%s19704_s1 + $0x1488] sm:$0xff]  ;;  %v13137_v56 = vcombine.high %v679_v0, %v683_v47  ;;  %v13136_v1 = vcombine.low %v679_v0, %v683_v47 }
 0x130   :  { %v13138_v2 = vcombine.low %v680_v49, %v684_v50  ;;  %v732_v0 = vld [vmem:[%s19704_s1 + $0x1628] sm:$0xff] }
 0x132   :  { %9811 = vmatpush1.bf16.msra.mxu0 %v13080_v57  ;;  %10344 = vmatpush1.bf16.msra.mxu1 %v13082_v58  ;;  %v13139_v57 = vcombine.high %v680_v49, %v684_v50  ;;  %v687_v58 = vld [vmem:[%s19704_s1 + $0x14c0] sm:$0xff] }
 0x133   :  { %9812 = vmatprep.subr.bf16.mxu0 %v13089_v27  ;;  %10345 = vmatprep.subr.bf16.mxu1 %v13091_v60  ;;  %v691_v27 = vld [vmem:[%s19704_s1 + $0x14e0] sm:$0xff]  ;;  %v688_v60 = vld [vmem:[%s19704_s1 + $0x14c8] sm:$0xff] }
 0x134   :  { %v13145_v3 = vcombine.high %v687_v58, %v691_v27  ;;  %v13144_v10 = vcombine.low %v687_v58, %v691_v27  ;;  %v13146_v12 = vcombine.low %v688_v60, %v692_v62  ;;  %v740_v58 = vld [vmem:[%s19704_s1 + $0x1668] sm:$0xff] }
 0x136   :  { %9813 = vmatpush1.bf16.msra.mxu0 %v13088_v4  ;;  %10346 = vmatpush1.bf16.msra.mxu1 %v13090_v5  ;;  %v13147_v4 = vcombine.high %v688_v60, %v692_v62  ;;  %v695_v5 = vld [vmem:[%s19704_s1 + $0x1500] sm:$0xff] }
 0x137   :  { %9814 = vmatprep.subr.bf16.mxu0 %v13097_v6  ;;  %10347 = vmatprep.subr.bf16.mxu1 %v13099_v7  ;;  %v699_v6 = vld [vmem:[%s19704_s1 + $0x1520] sm:$0xff]  ;;  %v696_v7 = vld [vmem:[%s19704_s1 + $0x1508] sm:$0xff] }
 0x138   :  { %v13153_v13 = vcombine.high %v695_v5, %v699_v6  ;;  %v13152_v19 = vcombine.low %v695_v5, %v699_v6  ;;  %v13154_v21 = vcombine.low %v696_v7, %v700_v8  ;;  %v748_v5 = vld [vmem:[%s19704_s1 + $0x16a8] sm:$0xff] }
 0x13a   :  { %9815 = vmatpush1.bf16.msra.mxu0 %v13096_v14  ;;  %10348 = vmatpush1.bf16.msra.mxu1 %v13098_v15  ;;  %v13155_v14 = vcombine.high %v696_v7, %v700_v8  ;;  %v703_v15 = vld [vmem:[%s19704_s1 + $0x1540] sm:$0xff] }
 0x13b   :  { %9816 = vmatprep.subr.bf16.mxu0 %v13105_v16  ;;  %10349 = vmatprep.subr.bf16.mxu1 %v13107_v17  ;;  %v707_v16 = vld [vmem:[%s19704_s1 + $0x1560] sm:$0xff]  ;;  %v704_v17 = vld [vmem:[%s19704_s1 + $0x1548] sm:$0xff] }
 0x13c   :  { %v13161_v23 = vcombine.high %v703_v15, %v707_v16  ;;  %v13160_v63 = vcombine.low %v703_v15, %v707_v16  ;;  %v13162_v29 = vcombine.low %v704_v17, %v708_v18  ;;  %v756_v15 = vld [vmem:[%s19704_s1 + $0x16e8] sm:$0xff] }
 0x13e   :  { %9817 = vmatpush1.bf16.msra.mxu0 %v13104_v24  ;;  %10350 = vmatpush1.bf16.msra.mxu1 %v13106_v25  ;;  %v13163_v24 = vcombine.high %v704_v17, %v708_v18  ;;  %v711_v25 = vld [vmem:[%s19704_s1 + $0x1580] sm:$0xff] }
 0x13f   :  { %9818 = vmatprep.subr.bf16.mxu0 %v13113_v59  ;;  %10351 = vmatprep.subr.bf16.mxu1 %v13115_v26  ;;  %v715_v59 = vld [vmem:[%s19704_s1 + $0x15a0] sm:$0xff]  ;;  %v712_v26 = vld [vmem:[%s19704_s1 + $0x1588] sm:$0xff] }
 0x140   :  { %v13169_v30 = vcombine.high %v711_v25, %v715_v59  ;;  %v13168_v38 = vcombine.low %v711_v25, %v715_v59  ;;  %v13170_v40 = vcombine.low %v712_v26, %v716_v28  ;;  %v764_v25 = vld [vmem:[%s19704_s1 + $0x1728] sm:$0xff] }
 0x142   :  { %9819 = vmatpush1.bf16.msra.mxu0 %v13112_v31  ;;  %10352 = vmatpush1.bf16.msra.mxu1 %v13114_v33  ;;  %v13171_v31 = vcombine.high %v712_v26, %v716_v28  ;;  %v719_v33 = vld [vmem:[%s19704_s1 + $0x15c0] sm:$0xff] }
 0x143   :  { %9829 = vmatprep.subr.bf16.mxu0 %v13121_v34  ;;  %10362 = vmatprep.subr.bf16.mxu1 %v13123_v35  ;;  %v723_v34 = vld [vmem:[%s19704_s1 + $0x15e0] sm:$0xff]  ;;  %v720_v35 = vld [vmem:[%s19704_s1 + $0x15c8] sm:$0xff] }
 0x144   :  { %v13177_v41 = vcombine.high %v719_v33, %v723_v34  ;;  %v13176_v47 = vcombine.low %v719_v33, %v723_v34  ;;  %v13178_v49 = vcombine.low %v720_v35, %v724_v37  ;;  %v772_v33 = vld [vmem:[%s19704_s1 + $0x1768] sm:$0xff] }
 0x145   :  { %9821 = vmatmul.mubr.bf16.vlgmr.msra.gmra.mrb[0].mxu0 %v15556_v39  ;;  %10354 = vmatmul.mubr.bf16.vlgmr.msra.gmra.mrb[0].mxu1 %v15556_v39 }
 0x146   :  { %9830 = vmatpush1.bf16.msra.mxu0 %v13120_v42  ;;  %10363 = vmatpush1.bf16.msra.mxu1 %v13122_v43  ;;  %v13179_v42 = vcombine.high %v720_v35, %v724_v37  ;;  %v727_v43 = vld [vmem:[%s19704_s1 + $0x1600] sm:$0xff] }
 0x147   :  { %9831 = vmatprep.subr.bf16.mxu0 %v13129_v45  ;;  %10364 = vmatprep.subr.bf16.mxu1 %v13131_v46  ;;  %v731_v45 = vld [vmem:[%s19704_s1 + $0x1620] sm:$0xff]  ;;  %v728_v46 = vld [vmem:[%s19704_s1 + $0x1608] sm:$0xff] }
 0x148   :  { %9861 = vmatprep.mubr.bf16.mxu0 %v15572_v48  ;;  %10394 = vmatprep.mubr.bf16.mxu1 %v15572_v48  ;;  %v13185_v50 = vcombine.high %v727_v43, %v731_v45  ;;  %v13184_v27 = vcombine.low %v727_v43, %v731_v45  ;;  %v13186_v60 = vcombine.low %v728_v46, %v732_v0  ;;  %v780_v43 = vld [vmem:[%s19704_s1 + $0x17a8] sm:$0xff] }
 0x14a   :  { %9832 = vmatpush1.bf16.msra.mxu0 %v13128_v52  ;;  %10365 = vmatpush1.bf16.msra.mxu1 %v13130_v54  ;;  %v13187_v52 = vcombine.high %v728_v46, %v732_v0  ;;  %v735_v54 = vld [vmem:[%s19704_s1 + $0x1640] sm:$0xff] }
 0x14b   :  { %9833 = vmatprep.subr.bf16.mxu0 %v13137_v56  ;;  %10366 = vmatprep.subr.bf16.mxu1 %v13139_v57  ;;  %v739_v56 = vld [vmem:[%s19704_s1 + $0x1660] sm:$0xff]  ;;  %v736_v57 = vld [vmem:[%s19704_s1 + $0x1648] sm:$0xff] }
 0x14c   :  { %v13193_v62 = vcombine.high %v735_v54, %v739_v56  ;;  %v13192_v6 = vcombine.low %v735_v54, %v739_v56  ;;  %v13194_v7 = vcombine.low %v736_v57, %v740_v58  ;;  %v784_v54 = vld [vmem:[%s19704_s1 + $0x17c8] sm:$0xff] }
 0x14d   :  { %v788_v56 = vld [vmem:[%s19704_s1 + $0x17e8] sm:$0xff] }
 0x14e   :  { %9834 = vmatpush1.bf16.msra.mxu0 %v13136_v1  ;;  %10367 = vmatpush1.bf16.msra.mxu1 %v13138_v2  ;;  %v13195_v1 = vcombine.high %v736_v57, %v740_v58  ;;  %v743_v2 = vld [vmem:[%s19704_s1 + $0x1680] sm:$0xff] }
 0x14f   :  { %9835 = vmatprep.subr.bf16.mxu0 %v13145_v3  ;;  %10368 = vmatprep.subr.bf16.mxu1 %v13147_v4  ;;  %v747_v3 = vld [vmem:[%s19704_s1 + $0x16a0] sm:$0xff]  ;;  %v744_v4 = vld [vmem:[%s19704_s1 + $0x1688] sm:$0xff] }
 0x150   :  { %v13201_v8 = vcombine.high %v743_v2, %v747_v3  ;;  %v13200_v16 = vcombine.low %v743_v2, %v747_v3  ;;  %v13202_v17 = vcombine.low %v744_v4, %v748_v5  ;;  %v792_v2 = vld [vmem:[%s19704_s1 + $0x1808] sm:$0xff] }
 0x151   :  { %v796_v3 = vld [vmem:[%s19704_s1 + $0x1828] sm:$0xff] }
 0x152   :  { %9836 = vmatpush1.bf16.msra.mxu0 %v13144_v10  ;;  %10369 = vmatpush1.bf16.msra.mxu1 %v13146_v12  ;;  %v13203_v10 = vcombine.high %v744_v4, %v748_v5  ;;  %v751_v12 = vld [vmem:[%s19704_s1 + $0x16c0] sm:$0xff]  ;;  %v13242_v5 = vcombine.low %v784_v54, %v788_v56 }
 0x153   :  { %9837 = vmatprep.subr.bf16.mxu0 %v13153_v13  ;;  %10370 = vmatprep.subr.bf16.mxu1 %v13155_v14  ;;  %v755_v13 = vld [vmem:[%s19704_s1 + $0x16e0] sm:$0xff]  ;;  %v752_v14 = vld [vmem:[%s19704_s1 + $0x16c8] sm:$0xff] }
 0x154   :  { %v13209_v18 = vcombine.high %v751_v12, %v755_v13  ;;  %v13208_v59 = vcombine.low %v751_v12, %v755_v13  ;;  %v13210_v26 = vcombine.low %v752_v14, %v756_v15  ;;  %v15767_v13 = vcombine.high %v15556_v39, %v15556_v39 }
 0x156   :  { %9838 = vmatpush1.bf16.msra.mxu0 %v13152_v19  ;;  %10371 = vmatpush1.bf16.msra.mxu1 %v13154_v21  ;;  %v13211_v19 = vcombine.high %v752_v14, %v756_v15  ;;  %v759_v21 = vld [vmem:[%s19704_s1 + $0x1700] sm:$0xff]  ;;  %v800_v14 = vld [vmem:[%s19704_s1 + $0x1848] sm:$0xff] }
 0x157   :  { %9839 = vmatprep.subr.bf16.mxu0 %v13161_v23  ;;  %10372 = vmatprep.subr.bf16.mxu1 %v13163_v24  ;;  %v763_v23 = vld [vmem:[%s19704_s1 + $0x1720] sm:$0xff]  ;;  %v760_v24 = vld [vmem:[%s19704_s1 + $0x1708] sm:$0xff] }
 0x158   :  { %v13217_v28 = vcombine.high %v759_v21, %v763_v23  ;;  %v13216_v34 = vcombine.low %v759_v21, %v763_v23  ;;  %v13218_v35 = vcombine.low %v760_v24, %v764_v25  ;;  %v804_v15 = vld [vmem:[%s19704_s1 + $0x1868] sm:$0xff]  ;;  %v807_v21 = vld [vmem:[%s19704_s1 + $0x1880] sm:$0xff] }
 0x159   :  { %v811_v23 = vld [vmem:[%s19704_s1 + $0x18a0] sm:$0xff] }
 0x15a   :  { %9840 = vmatpush1.bf16.msra.mxu0 %v13160_v63  ;;  %10373 = vmatpush1.bf16.msra.mxu1 %v13162_v29  ;;  %v13219_v63 = vcombine.high %v760_v24, %v764_v25  ;;  %v767_v29 = vld [vmem:[%s19704_s1 + $0x1740] sm:$0xff]  ;;  %v808_v25 = vld [vmem:[%s19704_s1 + $0x1888] sm:$0xff] }
 0x15b   :  { %9841 = vmatprep.subr.bf16.mxu0 %v13169_v30  ;;  %10374 = vmatprep.subr.bf16.mxu1 %v13171_v31  ;;  %v771_v30 = vld [vmem:[%s19704_s1 + $0x1760] sm:$0xff]  ;;  %v768_v31 = vld [vmem:[%s19704_s1 + $0x1748] sm:$0xff] }
 0x15c   :  { %v13225_v37 = vcombine.high %v767_v29, %v771_v30  ;;  %v13224_v45 = vcombine.low %v767_v29, %v771_v30  ;;  %v13226_v46 = vcombine.low %v768_v31, %v772_v33  ;;  %v815_v30 = vld [vmem:[%s19704_s1 + $0x18c0] sm:$0xff] }
 0x15e   :  { %9842 = vmatpush1.bf16.msra.mxu0 %v13168_v38  ;;  %10375 = vmatpush1.bf16.msra.mxu1 %v13170_v40  ;;  %v13227_v38 = vcombine.high %v768_v31, %v772_v33  ;;  %v775_v40 = vld [vmem:[%s19704_s1 + $0x1780] sm:$0xff]  ;;  %v816_v33 = vld [vmem:[%s19704_s1 + $0x18c8] sm:$0xff] }
 0x15f   :  { %9843 = vmatprep.subr.bf16.mxu0 %v13177_v41  ;;  %10376 = vmatprep.subr.bf16.mxu1 %v13179_v42  ;;  %v779_v41 = vld [vmem:[%s19704_s1 + $0x17a0] sm:$0xff]  ;;  %v776_v42 = vld [vmem:[%s19704_s1 + $0x1788] sm:$0xff] }
 0x160   :  { %v13233_v0 = vcombine.high %v775_v40, %v779_v41  ;;  %v13232_v57 = vcombine.low %v775_v40, %v779_v41  ;;  %v13234_v58 = vcombine.low %v776_v42, %v780_v43  ;;  %v819_v31 = vld [vmem:[%s19704_s1 + $0x18e0] sm:$0xff] }
 0x161   :  { %v823_v41 = vld [vmem:[%s19704_s1 + $0x1900] sm:$0xff] }
 0x162   :  { %9844 = vmatpush1.bf16.msra.mxu0 %v13176_v47  ;;  %10377 = vmatpush1.bf16.msra.mxu1 %v13178_v49  ;;  %v13235_v47 = vcombine.high %v776_v42, %v780_v43  ;;  %v783_v49 = vld [vmem:[%s19704_s1 + $0x17c0] sm:$0xff]  ;;  %v824_v43 = vld [vmem:[%s19704_s1 + $0x1908] sm:$0xff] }
 0x163   :  { %9845 = vmatprep.subr.bf16.mxu0 %v13185_v50  ;;  %10378 = vmatprep.subr.bf16.mxu1 %v13187_v52  ;;  %v787_v50 = vld [vmem:[%s19704_s1 + $0x17e0] sm:$0xff]  ;;  %v1644_v52 = vcombine.high %v15325_v55, %v15325_v55 }
 0x164   :  { %v791_v55 = vld [vmem:[%s19704_s1 + $0x1800] sm:$0xff]  ;;  %v13240_v4 = vcombine.low %v783_v49, %v787_v50 }
 0x165   :  { %v827_v42 = vld [vmem:[%s19704_s1 + $0x1920] sm:$0xff] }
 0x166   :  { %9846 = vmatpush1.bf16.msra.mxu0 %v13184_v27  ;;  %10379 = vmatpush1.bf16.msra.mxu1 %v13186_v60  ;;  %v13241_v27 = vcombine.high %v783_v49, %v787_v50  ;;  %v13243_v60 = vcombine.high %v784_v54, %v788_v56  ;;  %v831_v50 = vld [vmem:[%s19704_s1 + $0x1940] sm:$0xff]  ;;  %v832_v54 = vld [vmem:[%s19704_s1 + $0x1948] sm:$0xff] }
 0x167   :  { %9847 = vmatprep.subr.bf16.mxu0 %v13193_v62  ;;  %10380 = vmatprep.subr.bf16.mxu1 %v13195_v1  ;;  %v795_v62 = vld [vmem:[%s19704_s1 + $0x1820] sm:$0xff]  ;;  %v15749_v1 = vrot.slane %v1644_v52, %v14572_v53  ;;  %v836_v56 = vld [vmem:[%s19704_s1 + $0x1968] sm:$0xff] }
 0x168   :  { %v835_v52 = vld [vmem:[%s19704_s1 + $0x1960] sm:$0xff] }
 0x169   :  { %v1660_v12 = vcombine.high %v15749_v1, %v15749_v1 }
 0x16a   :  { %9848 = vmatpush1.bf16.msra.mxu0 %v13192_v6  ;;  %10381 = vmatpush1.bf16.msra.mxu1 %v13194_v7  ;;  %v13249_v6 = vcombine.high %v791_v55, %v795_v62  ;;  %v13251_v7 = vcombine.high %v792_v2, %v796_v3 }
 0x16b   :  { %9849 = vmatprep.subr.bf16.mxu0 %v13201_v8  ;;  %10382 = vmatprep.subr.bf16.mxu1 %v13203_v10  ;;  %v799_v8 = vld [vmem:[%s19704_s1 + $0x1840] sm:$0xff]  ;;  %v15782_v24 = vrot.slane %v1660_v12, %v14572_v53  ;;  %v848_v12 = vld [vmem:[%s19704_s1 + $0x19c8] sm:$0xff] }
 0x16c   :  { %v803_v10 = vld [vmem:[%s19704_s1 + $0x1860] sm:$0xff] }
 0x16e   :  { %9850 = vmatpush1.bf16.msra.mxu0 %v13200_v16  ;;  %10383 = vmatpush1.bf16.msra.mxu1 %v13202_v17  ;;  %v13248_v16 = vcombine.low %v791_v55, %v795_v62  ;;  %v13250_v17 = vcombine.low %v792_v2, %v796_v3  ;;  %v839_v55 = vld [vmem:[%s19704_s1 + $0x1980] sm:$0xff]  ;;  %v840_v2 = vld [vmem:[%s19704_s1 + $0x1988] sm:$0xff] }
 0x16f   :  { %9851 = vmatprep.subr.bf16.mxu0 %v13209_v18  ;;  %10384 = vmatprep.subr.bf16.mxu1 %v13211_v19  ;;  %v13257_v18 = vcombine.high %v799_v8, %v803_v10  ;;  %v13259_v19 = vcombine.high %v800_v14, %v804_v15  ;;  %v843_v62 = vld [vmem:[%s19704_s1 + $0x19a0] sm:$0xff]  ;;  %v844_v3 = vld [vmem:[%s19704_s1 + $0x19a8] sm:$0xff] }
 0x172   :  { %9852 = vmatpush1.bf16.msra.mxu0 %v13208_v59  ;;  %10385 = vmatpush1.bf16.msra.mxu1 %v13210_v26  ;;  %v812_v59 = vld [vmem:[%s19704_s1 + $0x18a8] sm:$0xff]  ;;  %v13256_v26 = vcombine.low %v799_v8, %v803_v10  ;;  %v847_v8 = vld [vmem:[%s19704_s1 + $0x19c0] sm:$0xff] }
 0x173   :  { %9853 = vmatprep.subr.bf16.mxu0 %v13217_v28  ;;  %10386 = vmatprep.subr.bf16.mxu1 %v13219_v63  ;;  %v13258_v28 = vcombine.low %v800_v14, %v804_v15  ;;  %v13265_v63 = vcombine.high %v807_v21, %v811_v23  ;;  %v13267_v29 = vcombine.high %v808_v25, %v812_v59  ;;  %v851_v10 = vld [vmem:[%s19704_s1 + $0x19e0] sm:$0xff]  ;;  %v852_v14 = vld [vmem:[%s19704_s1 + $0x19e8] sm:$0xff] }
 0x174   :  { %v13296_v15 = vcombine.low %v839_v55, %v843_v62 }
 0x176   :  { %9854 = vmatpush1.bf16.msra.mxu0 %v13216_v34  ;;  %10387 = vmatpush1.bf16.msra.mxu1 %v13218_v35  ;;  %v820_v34 = vld [vmem:[%s19704_s1 + $0x18e8] sm:$0xff]  ;;  %v13264_v35 = vcombine.low %v807_v21, %v811_v23  ;;  %v859_v21 = vld [vmem:[%s19704_s1 + $0x1a20] sm:$0xff] }
 0x177   :  { %9855 = vmatprep.subr.bf16.mxu0 %v13225_v37  ;;  %10388 = vmatprep.subr.bf16.mxu1 %v13227_v38  ;;  %v13266_v37 = vcombine.low %v808_v25, %v812_v59  ;;  %v13273_v38 = vcombine.high %v815_v30, %v819_v31  ;;  %v13275_v40 = vcombine.high %v816_v33, %v820_v34  ;;  %v856_v23 = vld [vmem:[%s19704_s1 + $0x1a08] sm:$0xff] }
 0x178   :  { %v860_v25 = vld [vmem:[%s19704_s1 + $0x1a28] sm:$0xff]  ;;  %v13304_v59 = vcombine.low %v847_v8, %v851_v10 }
 0x17a   :  { %9856 = vmatpush1.bf16.msra.mxu0 %v13224_v45  ;;  %10389 = vmatpush1.bf16.msra.mxu1 %v13226_v46  ;;  %v828_v45 = vld [vmem:[%s19704_s1 + $0x1928] sm:$0xff]  ;;  %v13272_v46 = vcombine.low %v815_v30, %v819_v31  ;;  %v867_v30 = vld [vmem:[%s19704_s1 + $0x1a60] sm:$0xff] }
 0x17b   :  { %9857 = vmatprep.subr.bf16.mxu0 %v13233_v0  ;;  %10390 = vmatprep.subr.bf16.mxu1 %v13235_v47  ;;  %v13274_v0 = vcombine.low %v816_v33, %v820_v34  ;;  %v13281_v47 = vcombine.high %v823_v41, %v827_v42  ;;  %v13283_v49 = vcombine.high %v824_v43, %v828_v45  ;;  %v864_v31 = vld [vmem:[%s19704_s1 + $0x1a48] sm:$0xff] }
 0x17c   :  { %v868_v33 = vld [vmem:[%s19704_s1 + $0x1a68] sm:$0xff] }
 0x17e   :  { %9858 = vmatpush1.bf16.msra.mxu0 %v13232_v57  ;;  %10391 = vmatpush1.bf16.msra.mxu1 %v13234_v58  ;;  %v13280_v57 = vcombine.low %v823_v41, %v827_v42  ;;  %v13282_v58 = vcombine.low %v824_v43, %v828_v45  ;;  %v875_v41 = vld [vmem:[%s19704_s1 + $0x1aa0] sm:$0xff]  ;;  %v872_v42 = vld [vmem:[%s19704_s1 + $0x1a88] sm:$0xff] }
 0x17f   :  { %9859 = vmatprep.subr.bf16.mxu0 %v13241_v27  ;;  %10392 = vmatprep.subr.bf16.mxu1 %v13243_v60  ;;  %v13289_v27 = vcombine.high %v831_v50, %v835_v52  ;;  %v13291_v60 = vcombine.high %v832_v54, %v836_v56  ;;  %v876_v43 = vld [vmem:[%s19704_s1 + $0x1aa8] sm:$0xff] }
 0x182   :  { %9860 = vmatpush1.bf16.msra.mxu0 %v13240_v4  ;;  %10393 = vmatpush1.bf16.msra.mxu1 %v13242_v5  ;;  %v13288_v4 = vcombine.low %v831_v50, %v835_v52  ;;  %v13290_v5 = vcombine.low %v832_v54, %v836_v56  ;;  %v883_v50 = vld [vmem:[%s19704_s1 + $0x1ae0] sm:$0xff]  ;;  %v880_v52 = vld [vmem:[%s19704_s1 + $0x1ac8] sm:$0xff] }
 0x183   :  { %9870 = vmatprep.subr.bf16.mxu0 %v13249_v6  ;;  %10403 = vmatprep.subr.bf16.mxu1 %v13251_v7  ;;  %v13297_v6 = vcombine.high %v839_v55, %v843_v62  ;;  %v13299_v7 = vcombine.high %v840_v2, %v844_v3  ;;  %v884_v54 = vld [vmem:[%s19704_s1 + $0x1ae8] sm:$0xff]  ;;  %v891_v55 = vld [vmem:[%s19704_s1 + $0x1b20] sm:$0xff] }
 0x184   :  { %v888_v62 = vld [vmem:[%s19704_s1 + $0x1b08] sm:$0xff] }
 0x185   :  { %9862 = vmatmul.mubr.bf16.vlgmr.msra.gmra.mrb[0].mxu0 %v15767_v13  ;;  %10395 = vmatmul.mubr.bf16.vlgmr.msra.gmra.mrb[0].mxu1 %v15767_v13 }
 0x186   :  { %9871 = vmatpush1.bf16.msra.mxu0 %v13248_v16  ;;  %10404 = vmatpush1.bf16.msra.mxu1 %v13250_v17  ;;  %v13298_v16 = vcombine.low %v840_v2, %v844_v3  ;;  %v13305_v17 = vcombine.high %v847_v8, %v851_v10  ;;  %v892_v2 = vld [vmem:[%s19704_s1 + $0x1b28] sm:$0xff]  ;;  %v899_v8 = vld [vmem:[%s19704_s1 + $0x1b60] sm:$0xff] }
 0x187   :  { %9872 = vmatprep.subr.bf16.mxu0 %v13257_v18  ;;  %10405 = vmatprep.subr.bf16.mxu1 %v13259_v19  ;;  %v13307_v18 = vcombine.high %v848_v12, %v852_v14  ;;  %v855_v19 = vld [vmem:[%s19704_s1 + $0x1a00] sm:$0xff]  ;;  %v896_v10 = vld [vmem:[%s19704_s1 + $0x1b48] sm:$0xff] }
 0x188   :  { %9902 = vmatprep.mubr.bf16.mxu0 %v15782_v24  ;;  %10435 = vmatprep.mubr.bf16.mxu1 %v15782_v24  ;;  %v13312_v34 = vcombine.low %v855_v19, %v859_v21 }
 0x18a   :  { %9873 = vmatpush1.bf16.msra.mxu0 %v13256_v26  ;;  %10406 = vmatpush1.bf16.msra.mxu1 %v13258_v28  ;;  %v13306_v26 = vcombine.low %v848_v12, %v852_v14  ;;  %v13313_v28 = vcombine.high %v855_v19, %v859_v21  ;;  %v900_v12 = vld [vmem:[%s19704_s1 + $0x1b68] sm:$0xff]  ;;  %v907_v19 = vld [vmem:[%s19704_s1 + $0x1ba0] sm:$0xff] }
 0x18b   :  { %9874 = vmatprep.subr.bf16.mxu0 %v13265_v63  ;;  %10407 = vmatprep.subr.bf16.mxu1 %v13267_v29  ;;  %v13315_v63 = vcombine.high %v856_v23, %v860_v25  ;;  %v863_v29 = vld [vmem:[%s19704_s1 + $0x1a40] sm:$0xff]  ;;  %v904_v21 = vld [vmem:[%s19704_s1 + $0x1b88] sm:$0xff] }
 0x18c   :  { %v13320_v45 = vcombine.low %v863_v29, %v867_v30 }
 0x18e   :  { %9875 = vmatpush1.bf16.msra.mxu0 %v13264_v35  ;;  %10408 = vmatpush1.bf16.msra.mxu1 %v13266_v37  ;;  %v13314_v35 = vcombine.low %v856_v23, %v860_v25  ;;  %v13321_v37 = vcombine.high %v863_v29, %v867_v30  ;;  %v908_v23 = vld [vmem:[%s19704_s1 + $0x1ba8] sm:$0xff]  ;;  %v915_v29 = vld [vmem:[%s19704_s1 + $0x1be0] sm:$0xff] }
 0x18f   :  { %9876 = vmatprep.subr.bf16.mxu0 %v13273_v38  ;;  %10409 = vmatprep.subr.bf16.mxu1 %v13275_v40  ;;  %v13323_v38 = vcombine.high %v864_v31, %v868_v33  ;;  %v871_v40 = vld [vmem:[%s19704_s1 + $0x1a80] sm:$0xff]  ;;  %v912_v30 = vld [vmem:[%s19704_s1 + $0x1bc8] sm:$0xff] }
 0x190   :  { %v13328_v56 = vcombine.low %v871_v40, %v875_v41 }
 0x192   :  { %9877 = vmatpush1.bf16.msra.mxu0 %v13272_v46  ;;  %10410 = vmatpush1.bf16.msra.mxu1 %v13274_v0  ;;  %v13322_v46 = vcombine.low %v864_v31, %v868_v33  ;;  %v13329_v0 = vcombine.high %v871_v40, %v875_v41  ;;  %v916_v31 = vld [vmem:[%s19704_s1 + $0x1be8] sm:$0xff]  ;;  %v923_v40 = vld [vmem:[%s19704_s1 + $0x1c20] sm:$0xff] }
 0x193   :  { %9878 = vmatprep.subr.bf16.mxu0 %v13281_v47  ;;  %10411 = vmatprep.subr.bf16.mxu1 %v13283_v49  ;;  %v13331_v47 = vcombine.high %v872_v42, %v876_v43  ;;  %v879_v49 = vld [vmem:[%s19704_s1 + $0x1ac0] sm:$0xff]  ;;  %v920_v41 = vld [vmem:[%s19704_s1 + $0x1c08] sm:$0xff] }
 0x194   :  { %v13336_v3 = vcombine.low %v879_v49, %v883_v50 }
 0x196   :  { %9879 = vmatpush1.bf16.msra.mxu0 %v13280_v57  ;;  %10412 = vmatpush1.bf16.msra.mxu1 %v13282_v58  ;;  %v13330_v57 = vcombine.low %v872_v42, %v876_v43  ;;  %v13337_v58 = vcombine.high %v879_v49, %v883_v50  ;;  %v924_v42 = vld [vmem:[%s19704_s1 + $0x1c28] sm:$0xff]  ;;  %v931_v49 = vld [vmem:[%s19704_s1 + $0x1c60] sm:$0xff]  ;;  %v15970_v50 = vrot.slane %v15749_v1, %v14572_v53 }
 0x197   :  { %9880 = vmatprep.subr.bf16.mxu0 %v13289_v27  ;;  %10413 = vmatprep.subr.bf16.mxu1 %v13291_v60  ;;  %v13339_v27 = vcombine.high %v880_v52, %v884_v54  ;;  %v887_v60 = vld [vmem:[%s19704_s1 + $0x1b00] sm:$0xff] }
 0x198   :  { %v13344_v14 = vcombine.low %v887_v60, %v891_v55  ;;  %v935_v1 = vld [vmem:[%s19704_s1 + $0x1c80] sm:$0xff] }
 0x19a   :  { %9881 = vmatpush1.bf16.msra.mxu0 %v13288_v4  ;;  %10414 = vmatpush1.bf16.msra.mxu1 %v13290_v5  ;;  %v13338_v4 = vcombine.low %v880_v52, %v884_v54  ;;  %v13345_v5 = vcombine.high %v887_v60, %v891_v55  ;;  %v928_v52 = vld [vmem:[%s19704_s1 + $0x1c48] sm:$0xff]  ;;  %v939_v60 = vld [vmem:[%s19704_s1 + $0x1ca0] sm:$0xff]  ;;  %v15986_v55 = vcombine.high %v15782_v24, %v15782_v24 }
 0x19b   :  { %9882 = vmatprep.subr.bf16.mxu0 %v13297_v6  ;;  %10415 = vmatprep.subr.bf16.mxu1 %v13299_v7  ;;  %v13347_v6 = vcombine.high %v888_v62, %v892_v2  ;;  %v895_v7 = vld [vmem:[%s19704_s1 + $0x1b40] sm:$0xff]  ;;  %v932_v54 = vld [vmem:[%s19704_s1 + $0x1c68] sm:$0xff] }
 0x19c   :  { %v13352_v25 = vcombine.low %v895_v7, %v899_v8 }
 0x19e   :  { %9883 = vmatpush1.bf16.msra.mxu0 %v13296_v15  ;;  %10416 = vmatpush1.bf16.msra.mxu1 %v13298_v16  ;;  %v13346_v15 = vcombine.low %v888_v62, %v892_v2  ;;  %v13353_v16 = vcombine.high %v895_v7, %v899_v8  ;;  %v936_v62 = vld [vmem:[%s19704_s1 + $0x1c88] sm:$0xff]  ;;  %v943_v7 = vld [vmem:[%s19704_s1 + $0x1cc0] sm:$0xff] }
 0x19f   :  { %9884 = vmatprep.subr.bf16.mxu0 %v13305_v17  ;;  %10417 = vmatprep.subr.bf16.mxu1 %v13307_v18  ;;  %v13355_v17 = vcombine.high %v896_v10, %v900_v12  ;;  %v903_v18 = vld [vmem:[%s19704_s1 + $0x1b80] sm:$0xff]  ;;  %v940_v2 = vld [vmem:[%s19704_s1 + $0x1ca8] sm:$0xff] }
 0x1a0   :  { %v13360_v33 = vcombine.low %v903_v18, %v907_v19  ;;  %v947_v8 = vld [vmem:[%s19704_s1 + $0x1ce0] sm:$0xff] }
 0x1a2   :  { %9885 = vmatpush1.bf16.msra.mxu0 %v13304_v59  ;;  %10418 = vmatpush1.bf16.msra.mxu1 %v13306_v26  ;;  %v13354_v59 = vcombine.low %v896_v10, %v900_v12  ;;  %v13361_v26 = vcombine.high %v903_v18, %v907_v19  ;;  %v944_v10 = vld [vmem:[%s19704_s1 + $0x1cc8] sm:$0xff]  ;;  %v951_v18 = vld [vmem:[%s19704_s1 + $0x1d00] sm:$0xff] }
 0x1a3   :  { %9886 = vmatprep.subr.bf16.mxu0 %v13313_v28  ;;  %10419 = vmatprep.subr.bf16.mxu1 %v13315_v63  ;;  %v13363_v28 = vcombine.high %v904_v21, %v908_v23  ;;  %v911_v63 = vld [vmem:[%s19704_s1 + $0x1bc0] sm:$0xff]  ;;  %v948_v12 = vld [vmem:[%s19704_s1 + $0x1ce8] sm:$0xff] }
 0x1a4   :  { %v13368_v43 = vcombine.low %v911_v63, %v915_v29  ;;  %v955_v19 = vld [vmem:[%s19704_s1 + $0x1d20] sm:$0xff] }
 0x1a6   :  { %9887 = vmatpush1.bf16.msra.mxu0 %v13312_v34  ;;  %10420 = vmatpush1.bf16.msra.mxu1 %v13314_v35  ;;  %v13362_v34 = vcombine.low %v904_v21, %v908_v23  ;;  %v13369_v35 = vcombine.high %v911_v63, %v915_v29  ;;  %v952_v21 = vld [vmem:[%s19704_s1 + $0x1d08] sm:$0xff]  ;;  %v959_v63 = vld [vmem:[%s19704_s1 + $0x1d40] sm:$0xff] }
 0x1a7   :  { %9888 = vmatprep.subr.bf16.mxu0 %v13321_v37  ;;  %10421 = vmatprep.subr.bf16.mxu1 %v13323_v38  ;;  %v13371_v37 = vcombine.high %v912_v30, %v916_v31  ;;  %v919_v38 = vld [vmem:[%s19704_s1 + $0x1c00] sm:$0xff]  ;;  %v956_v23 = vld [vmem:[%s19704_s1 + $0x1d28] sm:$0xff] }
 0x1a8   :  { %v963_v29 = vld [vmem:[%s19704_s1 + $0x1d60] sm:$0xff] }
 0x1aa   :  { %9889 = vmatpush1.bf16.msra.mxu0 %v13320_v45  ;;  %10422 = vmatpush1.bf16.msra.mxu1 %v13322_v46  ;;  %v13370_v45 = vcombine.low %v912_v30, %v916_v31  ;;  %v13377_v46 = vcombine.high %v919_v38, %v923_v40  ;;  %v960_v30 = vld [vmem:[%s19704_s1 + $0x1d48] sm:$0xff] }
 0x1ab   :  { %9890 = vmatprep.subr.bf16.mxu0 %v13329_v0  ;;  %10423 = vmatprep.subr.bf16.mxu1 %v13331_v47  ;;  %v13379_v0 = vcombine.high %v920_v41, %v924_v42  ;;  %v927_v47 = vld [vmem:[%s19704_s1 + $0x1c40] sm:$0xff]  ;;  %v964_v31 = vld [vmem:[%s19704_s1 + $0x1d68] sm:$0xff] }
 0x1ae   :  { %9891 = vmatpush1.bf16.msra.mxu0 %v13328_v56  ;;  %10424 = vmatpush1.bf16.msra.mxu1 %v13330_v57  ;;  %v13376_v56 = vcombine.low %v919_v38, %v923_v40  ;;  %v13378_v57 = vcombine.low %v920_v41, %v924_v42  ;;  %v967_v38 = vld [vmem:[%s19704_s1 + $0x1d80] sm:$0xff]  ;;  %v968_v41 = vld [vmem:[%s19704_s1 + $0x1d88] sm:$0xff] }
 0x1af   :  { %9892 = vmatprep.subr.bf16.mxu0 %v13337_v58  ;;  %10425 = vmatprep.subr.bf16.mxu1 %v13339_v27  ;;  %v13385_v58 = vcombine.high %v927_v47, %v931_v49  ;;  %v13387_v27 = vcombine.high %v928_v52, %v932_v54  ;;  %v971_v40 = vld [vmem:[%s19704_s1 + $0x1da0] sm:$0xff]  ;;  %v972_v42 = vld [vmem:[%s19704_s1 + $0x1da8] sm:$0xff] }
 0x1b2   :  { %9893 = vmatpush1.bf16.msra.mxu0 %v13336_v3  ;;  %10426 = vmatpush1.bf16.msra.mxu1 %v13338_v4  ;;  %v13384_v3 = vcombine.low %v927_v47, %v931_v49  ;;  %v13386_v4 = vcombine.low %v928_v52, %v932_v54  ;;  %v975_v47 = vld [vmem:[%s19704_s1 + $0x1dc0] sm:$0xff]  ;;  %v976_v52 = vld [vmem:[%s19704_s1 + $0x1dc8] sm:$0xff] }
 0x1b3   :  { %9894 = vmatprep.subr.bf16.mxu0 %v13345_v5  ;;  %10427 = vmatprep.subr.bf16.mxu1 %v13347_v6  ;;  %v13393_v5 = vcombine.high %v935_v1, %v939_v60  ;;  %v13395_v6 = vcombine.high %v936_v62, %v940_v2  ;;  %v979_v49 = vld [vmem:[%s19704_s1 + $0x1de0] sm:$0xff]  ;;  %v980_v54 = vld [vmem:[%s19704_s1 + $0x1de8] sm:$0xff] }
 0x1b6   :  { %9895 = vmatpush1.bf16.msra.mxu0 %v13344_v14  ;;  %10428 = vmatpush1.bf16.msra.mxu1 %v13346_v15  ;;  %v13392_v14 = vcombine.low %v935_v1, %v939_v60  ;;  %v13394_v15 = vcombine.low %v936_v62, %v940_v2  ;;  %v983_v1 = vld [vmem:[%s19704_s1 + $0x1e00] sm:$0xff]  ;;  %v984_v62 = vld [vmem:[%s19704_s1 + $0x1e08] sm:$0xff] }
 0x1b7   :  { %9896 = vmatprep.subr.bf16.mxu0 %v13353_v16  ;;  %10429 = vmatprep.subr.bf16.mxu1 %v13355_v17  ;;  %v13401_v16 = vcombine.high %v943_v7, %v947_v8  ;;  %v13403_v17 = vcombine.high %v944_v10, %v948_v12  ;;  %v987_v60 = vld [vmem:[%s19704_s1 + $0x1e20] sm:$0xff]  ;;  %v988_v2 = vld [vmem:[%s19704_s1 + $0x1e28] sm:$0xff] }
 0x1ba   :  { %9897 = vmatpush1.bf16.msra.mxu0 %v13352_v25  ;;  %10430 = vmatpush1.bf16.msra.mxu1 %v13354_v59  ;;  %v13400_v25 = vcombine.low %v943_v7, %v947_v8  ;;  %v13402_v59 = vcombine.low %v944_v10, %v948_v12  ;;  %v991_v7 = vld [vmem:[%s19704_s1 + $0x1e40] sm:$0xff]  ;;  %v992_v10 = vld [vmem:[%s19704_s1 + $0x1e48] sm:$0xff] }
 0x1bb   :  { %9898 = vmatprep.subr.bf16.mxu0 %v13361_v26  ;;  %10431 = vmatprep.subr.bf16.mxu1 %v13363_v28  ;;  %v13409_v26 = vcombine.high %v951_v18, %v955_v19  ;;  %v13411_v28 = vcombine.high %v952_v21, %v956_v23  ;;  %v995_v8 = vld [vmem:[%s19704_s1 + $0x1e60] sm:$0xff]  ;;  %v996_v12 = vld [vmem:[%s19704_s1 + $0x1e68] sm:$0xff] }
 0x1be   :  { %9899 = vmatpush1.bf16.msra.mxu0 %v13360_v33  ;;  %10432 = vmatpush1.bf16.msra.mxu1 %v13362_v34  ;;  %v13408_v33 = vcombine.low %v951_v18, %v955_v19  ;;  %v13410_v34 = vcombine.low %v952_v21, %v956_v23  ;;  %v999_v18 = vld [vmem:[%s19704_s1 + $0x1e80] sm:$0xff]  ;;  %v1000_v21 = vld [vmem:[%s19704_s1 + $0x1e88] sm:$0xff] }
 0x1bf   :  { %9900 = vmatprep.subr.bf16.mxu0 %v13369_v35  ;;  %10433 = vmatprep.subr.bf16.mxu1 %v13371_v37  ;;  %v13417_v35 = vcombine.high %v959_v63, %v963_v29  ;;  %v13419_v37 = vcombine.high %v960_v30, %v964_v31  ;;  %v1003_v19 = vld [vmem:[%s19704_s1 + $0x1ea0] sm:$0xff]  ;;  %v1004_v23 = vld [vmem:[%s19704_s1 + $0x1ea8] sm:$0xff] }
 0x1c2   :  { %9901 = vmatpush1.bf16.msra.mxu0 %v13368_v43  ;;  %10434 = vmatpush1.bf16.msra.mxu1 %v13370_v45  ;;  %v13416_v43 = vcombine.low %v959_v63, %v963_v29  ;;  %v13418_v45 = vcombine.low %v960_v30, %v964_v31  ;;  %v1007_v63 = vld [vmem:[%s19704_s1 + $0x1ec0] sm:$0xff]  ;;  %v1008_v30 = vld [vmem:[%s19704_s1 + $0x1ec8] sm:$0xff] }
 0x1c3   :  { %9911 = vmatprep.subr.bf16.mxu0 %v13377_v46  ;;  %10444 = vmatprep.subr.bf16.mxu1 %v13379_v0  ;;  %v13425_v46 = vcombine.high %v967_v38, %v971_v40  ;;  %v13427_v0 = vcombine.high %v968_v41, %v972_v42  ;;  %v1011_v29 = vld [vmem:[%s19704_s1 + $0x1ee0] sm:$0xff]  ;;  %v1012_v31 = vld [vmem:[%s19704_s1 + $0x1ee8] sm:$0xff] }
 0x1c5   :  { %9903 = vmatmul.mubr.bf16.vlgmr.msra.gmra.mrb[0].mxu0 %v15970_v50  ;;  %10436 = vmatmul.mubr.bf16.vlgmr.msra.gmra.mrb[0].mxu1 %v15970_v50 }
 0x1c6   :  { %9912 = vmatpush1.bf16.msra.mxu0 %v13376_v56  ;;  %10445 = vmatpush1.bf16.msra.mxu1 %v13378_v57  ;;  %v13424_v56 = vcombine.low %v967_v38, %v971_v40  ;;  %v13426_v57 = vcombine.low %v968_v41, %v972_v42  ;;  %v1015_v38 = vld [vmem:[%s19704_s1 + $0x1f00] sm:$0xff]  ;;  %v1016_v41 = vld [vmem:[%s19704_s1 + $0x1f08] sm:$0xff] }
 0x1c7   :  { %9913 = vmatprep.subr.bf16.mxu0 %v13385_v58  ;;  %10446 = vmatprep.subr.bf16.mxu1 %v13387_v27  ;;  %v13433_v58 = vcombine.high %v975_v47, %v979_v49  ;;  %v13435_v27 = vcombine.high %v976_v52, %v980_v54  ;;  %v1019_v40 = vld [vmem:[%s19704_s1 + $0x1f20] sm:$0xff]  ;;  %v1020_v42 = vld [vmem:[%s19704_s1 + $0x1f28] sm:$0xff] }
 0x1c8   :  { %9943 = vmatprep.mubr.bf16.mxu0 %v15986_v55  ;;  %10476 = vmatprep.mubr.bf16.mxu1 %v15986_v55 }
 0x1ca   :  { %9914 = vmatpush1.bf16.msra.mxu0 %v13384_v3  ;;  %10447 = vmatpush1.bf16.msra.mxu1 %v13386_v4  ;;  %v13432_v3 = vcombine.low %v975_v47, %v979_v49  ;;  %v13434_v4 = vcombine.low %v976_v52, %v980_v54  ;;  %v1023_v47 = vld [vmem:[%s19704_s1 + $0x1f40] sm:$0xff]  ;;  %v1024_v52 = vld [vmem:[%s19704_s1 + $0x1f48] sm:$0xff] }
 0x1cb   :  { %9915 = vmatprep.subr.bf16.mxu0 %v13393_v5  ;;  %10448 = vmatprep.subr.bf16.mxu1 %v13395_v6  ;;  %v13441_v5 = vcombine.high %v983_v1, %v987_v60  ;;  %v13443_v6 = vcombine.high %v984_v62, %v988_v2  ;;  %v1027_v49 = vld [vmem:[%s19704_s1 + $0x1f60] sm:$0xff]  ;;  %v1028_v54 = vld [vmem:[%s19704_s1 + $0x1f68] sm:$0xff] }
 0x1ce   :  { %9916 = vmatpush1.bf16.msra.mxu0 %v13392_v14  ;;  %10449 = vmatpush1.bf16.msra.mxu1 %v13394_v15  ;;  %v13440_v14 = vcombine.low %v983_v1, %v987_v60  ;;  %v13442_v15 = vcombine.low %v984_v62, %v988_v2  ;;  %v1031_v1 = vld [vmem:[%s19704_s1 + $0x1f80] sm:$0xff]  ;;  %v1032_v62 = vld [vmem:[%s19704_s1 + $0x1f88] sm:$0xff] }
 0x1cf   :  { %9917 = vmatprep.subr.bf16.mxu0 %v13401_v16  ;;  %10450 = vmatprep.subr.bf16.mxu1 %v13403_v17  ;;  %v13449_v16 = vcombine.high %v991_v7, %v995_v8  ;;  %v13451_v17 = vcombine.high %v992_v10, %v996_v12  ;;  %v1035_v60 = vld [vmem:[%s19704_s1 + $0x1fa0] sm:$0xff]  ;;  %v1036_v2 = vld [vmem:[%s19704_s1 + $0x1fa8] sm:$0xff] }
 0x1d2   :  { %9918 = vmatpush1.bf16.msra.mxu0 %v13400_v25  ;;  %10451 = vmatpush1.bf16.msra.mxu1 %v13402_v59  ;;  %v13448_v25 = vcombine.low %v991_v7, %v995_v8  ;;  %v13450_v59 = vcombine.low %v992_v10, %v996_v12  ;;  %v1039_v7 = vld [vmem:[%s19704_s1 + $0x1fc0] sm:$0xff]  ;;  %v1040_v10 = vld [vmem:[%s19704_s1 + $0x1fc8] sm:$0xff] }
 0x1d3   :  { %9919 = vmatprep.subr.bf16.mxu0 %v13409_v26  ;;  %10452 = vmatprep.subr.bf16.mxu1 %v13411_v28  ;;  %v13457_v26 = vcombine.high %v999_v18, %v1003_v19  ;;  %v13459_v28 = vcombine.high %v1000_v21, %v1004_v23  ;;  %v1043_v8 = vld [vmem:[%s19704_s1 + $0x1fe0] sm:$0xff]  ;;  %v1044_v12 = vld [vmem:[%s19704_s1 + $0x1fe8] sm:$0xff] }
 0x1d6   :  { %9920 = vmatpush1.bf16.msra.mxu0 %v13408_v33  ;;  %10453 = vmatpush1.bf16.msra.mxu1 %v13410_v34  ;;  %v13456_v33 = vcombine.low %v999_v18, %v1003_v19  ;;  %v13458_v34 = vcombine.low %v1000_v21, %v1004_v23  ;;  %v13499_v18 = vcombine.high %v1040_v10, %v1044_v12  ;;  %v1047_v19 = vld [vmem:[%s19704_s1 + $0x2000] sm:$0xff] }
 0x1d7   :  { %9921 = vmatprep.subr.bf16.mxu0 %v13417_v35  ;;  %10454 = vmatprep.subr.bf16.mxu1 %v13419_v37  ;;  %v13465_v35 = vcombine.high %v1007_v63, %v1011_v29  ;;  %v13467_v37 = vcombine.high %v1008_v30, %v1012_v31  ;;  %v1051_v21 = vld [vmem:[%s19704_s1 + $0x2020] sm:$0xff] }
 0x1da   :  { %9922 = vmatpush1.bf16.msra.mxu0 %v13416_v43  ;;  %10455 = vmatpush1.bf16.msra.mxu1 %v13418_v45  ;;  %v13464_v43 = vcombine.low %v1007_v63, %v1011_v29  ;;  %v13466_v45 = vcombine.low %v1008_v30, %v1012_v31  ;;  %v13505_v63 = vcombine.high %v1047_v19, %v1051_v21  ;;  %v1055_v30 = vld [vmem:[%s19704_s1 + $0x2040] sm:$0xff] }
 0x1db   :  { %9923 = vmatprep.subr.bf16.mxu0 %v13425_v46  ;;  %10456 = vmatprep.subr.bf16.mxu1 %v13427_v0  ;;  %v13473_v46 = vcombine.high %v1015_v38, %v1019_v40  ;;  %v13475_v0 = vcombine.high %v1016_v41, %v1020_v42  ;;  %v1059_v31 = vld [vmem:[%s19704_s1 + $0x2060] sm:$0xff] }
 0x1de   :  { %9924 = vmatpush1.bf16.msra.mxu0 %v13424_v56  ;;  %10457 = vmatpush1.bf16.msra.mxu1 %v13426_v57  ;;  %v13472_v56 = vcombine.low %v1015_v38, %v1019_v40  ;;  %v13474_v57 = vcombine.low %v1016_v41, %v1020_v42  ;;  %v13504_v38 = vcombine.low %v1047_v19, %v1051_v21  ;;  %v1092_v19 = vld [vmem:[%s19704_s1 + $0x2168] sm:$0xff] }
 0x1df   :  { %9925 = vmatprep.subr.bf16.mxu0 %v13433_v58  ;;  %10458 = vmatprep.subr.bf16.mxu1 %v13435_v27  ;;  %v13481_v58 = vcombine.high %v1023_v47, %v1027_v49  ;;  %v13483_v27 = vcombine.high %v1024_v52, %v1028_v54  ;;  %v13513_v41 = vcombine.high %v1055_v30, %v1059_v31 }
 0x1e2   :  { %9926 = vmatpush1.bf16.msra.mxu0 %v13432_v3  ;;  %10459 = vmatpush1.bf16.msra.mxu1 %v13434_v4  ;;  %v13480_v3 = vcombine.low %v1023_v47, %v1027_v49  ;;  %v13482_v4 = vcombine.low %v1024_v52, %v1028_v54  ;;  %v1068_v47 = vld [vmem:[%s19704_s1 + $0x20a8] sm:$0xff]  ;;  %v13512_v49 = vcombine.low %v1055_v30, %v1059_v31 }
 0x1e3   :  { %9927 = vmatprep.subr.bf16.mxu0 %v13441_v5  ;;  %10460 = vmatprep.subr.bf16.mxu1 %v13443_v6  ;;  %v13489_v5 = vcombine.high %v1031_v1, %v1035_v60  ;;  %v13491_v6 = vcombine.high %v1032_v62, %v1036_v2  ;;  %v1100_v30 = vld [vmem:[%s19704_s1 + $0x21a8] sm:$0xff] }
 0x1e6   :  { %9928 = vmatpush1.bf16.msra.mxu0 %v13440_v14  ;;  %10461 = vmatpush1.bf16.msra.mxu1 %v13442_v15  ;;  %v16157_v14 = vld [vmem:[%s19703_s0 + $0x10] sm:$0xff]  ;;  %v13488_v15 = vcombine.low %v1031_v1, %v1035_v60  ;;  %v1076_v1 = vld [vmem:[%s19704_s1 + $0x20e8] sm:$0xff] }
 0x1e7   :  { %9929 = vmatprep.subr.bf16.mxu0 %v13449_v16  ;;  %10462 = vmatprep.subr.bf16.mxu1 %v13451_v17  ;;  %v13490_v16 = vcombine.low %v1032_v62, %v1036_v2  ;;  %v13497_v17 = vcombine.high %v1039_v7, %v1043_v8  ;;  %v16167_v23 = vrot.slane %v16157_v14, %v14572_v53 }
 0x1ea   :  { %9930 = vmatpush1.bf16.msra.mxu0 %v13448_v25  ;;  %10463 = vmatpush1.bf16.msra.mxu1 %v13450_v59  ;;  %v1048_v25 = vld [vmem:[%s19704_s1 + $0x2008] sm:$0xff] }
 0x1eb   :  { %9931 = vmatprep.subr.bf16.mxu0 %v13457_v26  ;;  %10464 = vmatprep.subr.bf16.mxu1 %v13459_v28  ;;  %v1052_v59 = vld [vmem:[%s19704_s1 + $0x2028] sm:$0xff]  ;;  %v13496_v26 = vcombine.low %v1039_v7, %v1043_v8  ;;  %v13498_v28 = vcombine.low %v1040_v10, %v1044_v12 }
 0x1ec   :  { %v13507_v29 = vcombine.high %v1048_v25, %v1052_v59  ;;  %v13506_v40 = vcombine.low %v1048_v25, %v1052_v59  ;;  %v1084_v7 = vld [vmem:[%s19704_s1 + $0x2128] sm:$0xff] }
 0x1ee   :  { %9932 = vmatpush1.bf16.msra.mxu0 %v13456_v33  ;;  %10465 = vmatpush1.bf16.msra.mxu1 %v13458_v34  ;;  %v1708_v33 = vcombine.high %v16167_v23, %v16167_v23  ;;  %v16185_v34 = vcombine.high %v15970_v50, %v15970_v50 }
 0x1ef   :  { %9933 = vmatprep.subr.bf16.mxu0 %v13465_v35  ;;  %10466 = vmatprep.subr.bf16.mxu1 %v13467_v37  ;;  %v1056_v35 = vld [vmem:[%s19704_s1 + $0x2048] sm:$0xff] }
 0x1f0   :  { %v1060_v37 = vld [vmem:[%s19704_s1 + $0x2068] sm:$0xff] }
 0x1f1   :  { %v13515_v42 = vcombine.high %v1056_v35, %v1060_v37  ;;  %v13514_v52 = vcombine.low %v1056_v35, %v1060_v37 }
 0x1f2   :  { %9934 = vmatpush1.bf16.msra.mxu0 %v13464_v43  ;;  %10467 = vmatpush1.bf16.msra.mxu1 %v13466_v45  ;;  %v1063_v43 = vld [vmem:[%s19704_s1 + $0x2080] sm:$0xff] }
 0x1f3   :  { %9935 = vmatprep.subr.bf16.mxu0 %v13473_v46  ;;  %10468 = vmatprep.subr.bf16.mxu1 %v13475_v0  ;;  %v1067_v45 = vld [vmem:[%s19704_s1 + $0x20a0] sm:$0xff]  ;;  %v16200_v46 = vrot.slane %v1708_v33, %v14572_v53  ;;  %v1064_v0 = vld [vmem:[%s19704_s1 + $0x2088] sm:$0xff] }
 0x1f4   :  { %v13521_v54 = vcombine.high %v1063_v43, %v1067_v45  ;;  %v13520_v60 = vcombine.low %v1063_v43, %v1067_v45  ;;  %v13522_v62 = vcombine.low %v1064_v0, %v1068_v47 }
 0x1f6   :  { %9936 = vmatpush1.bf16.msra.mxu0 %v13472_v56  ;;  %10469 = vmatpush1.bf16.msra.mxu1 %v13474_v57  ;;  %v13523_v56 = vcombine.high %v1064_v0, %v1068_v47  ;;  %v1071_v57 = vld [vmem:[%s19704_s1 + $0x20c0] sm:$0xff] }
 0x1f7   :  { %9937 = vmatprep.subr.bf16.mxu0 %v13481_v58  ;;  %10470 = vmatprep.subr.bf16.mxu1 %v13483_v27  ;;  %v1075_v58 = vld [vmem:[%s19704_s1 + $0x20e0] sm:$0xff]  ;;  %v1072_v27 = vld [vmem:[%s19704_s1 + $0x20c8] sm:$0xff] }
 0x1f8   :  { %v13529_v2 = vcombine.high %v1071_v57, %v1075_v58  ;;  %v13528_v8 = vcombine.low %v1071_v57, %v1075_v58  ;;  %v13530_v10 = vcombine.low %v1072_v27, %v1076_v1 }
 0x1fa   :  { %9938 = vmatpush1.bf16.msra.mxu0 %v13480_v3  ;;  %10471 = vmatpush1.bf16.msra.mxu1 %v13482_v4  ;;  %v13531_v3 = vcombine.high %v1072_v27, %v1076_v1  ;;  %v1079_v4 = vld [vmem:[%s19704_s1 + $0x2100] sm:$0xff] }
 0x1fb   :  { %9939 = vmatprep.subr.bf16.mxu0 %v13489_v5  ;;  %10472 = vmatprep.subr.bf16.mxu1 %v13491_v6  ;;  %v1083_v5 = vld [vmem:[%s19704_s1 + $0x2120] sm:$0xff]  ;;  %v1080_v6 = vld [vmem:[%s19704_s1 + $0x2108] sm:$0xff] }
 0x1fc   :  { %v13537_v12 = vcombine.high %v1079_v4, %v1083_v5  ;;  %v13536_v21 = vcombine.low %v1079_v4, %v1083_v5  ;;  %v13538_v25 = vcombine.low %v1080_v6, %v1084_v7 }
 0x1fe   :  { %9940 = vmatpush1.bf16.msra.mxu0 %v13488_v15  ;;  %10473 = vmatpush1.bf16.msra.mxu1 %v13490_v16  ;;  %v13539_v15 = vcombine.high %v1080_v6, %v1084_v7  ;;  %v1087_v16 = vld [vmem:[%s19704_s1 + $0x2140] sm:$0xff] }
 0x1ff   :  { %9941 = vmatprep.subr.bf16.mxu0 %v13497_v17  ;;  %10474 = vmatprep.subr.bf16.mxu1 %v13499_v18  ;;  %v1091_v17 = vld [vmem:[%s19704_s1 + $0x2160] sm:$0xff]  ;;  %v1088_v18 = vld [vmem:[%s19704_s1 + $0x2148] sm:$0xff] }
 0x200   :  { %v13545_v59 = vcombine.high %v1087_v16, %v1091_v17  ;;  %v13544_v31 = vcombine.low %v1087_v16, %v1091_v17  ;;  %v13546_v33 = vcombine.low %v1088_v18, %v1092_v19 }
 0x202   :  { %9942 = vmatpush1.bf16.msra.mxu0 %v13496_v26  ;;  %10475 = vmatpush1.bf16.msra.mxu1 %v13498_v28  ;;  %v13547_v26 = vcombine.high %v1088_v18, %v1092_v19  ;;  %v1095_v28 = vld [vmem:[%s19704_s1 + $0x2180] sm:$0xff] }
 0x203   :  { %9952 = vmatprep.subr.bf16.mxu0 %v13505_v63  ;;  %10485 = vmatprep.subr.bf16.mxu1 %v13507_v29  ;;  %v1099_v63 = vld [vmem:[%s19704_s1 + $0x21a0] sm:$0xff]  ;;  %v1096_v29 = vld [vmem:[%s19704_s1 + $0x2188] sm:$0xff] }
 0x204   :  { %v13553_v35 = vcombine.high %v1095_v28, %v1099_v63  ;;  %v13555_v37 = vcombine.high %v1096_v29, %v1100_v30  ;;  %v13552_v43 = vcombine.low %v1095_v28, %v1099_v63  ;;  %v13554_v45 = vcombine.low %v1096_v29, %v1100_v30 }
 0x205   :  { %9944 = vmatmul.mubr.bf16.vlgmr.msra.gmra.mrb[0].mxu0 %v16185_v34  ;;  %10477 = vmatmul.mubr.bf16.vlgmr.msra.gmra.mrb[0].mxu1 %v16185_v34 }
 0x206   :  { %9953 = vmatpush1.bf16.msra.mxu0 %v13504_v38  ;;  %10486 = vmatpush1.bf16.msra.mxu1 %v13506_v40  ;;  %v1103_v38 = vld [vmem:[%s19704_s1 + $0x21c0] sm:$0xff] }
 0x207   :  { %9954 = vmatprep.subr.bf16.mxu0 %v13513_v41  ;;  %10487 = vmatprep.subr.bf16.mxu1 %v13515_v42  ;;  %v1107_v40 = vld [vmem:[%s19704_s1 + $0x21e0] sm:$0xff]  ;;  %v1104_v41 = vld [vmem:[%s19704_s1 + $0x21c8] sm:$0xff] }
 0x208   :  { %9984 = vmatprep.mubr.bf16.mxu0 %v16200_v46  ;;  %10517 = vmatprep.mubr.bf16.mxu1 %v16200_v46  ;;  %v1108_v42 = vld [vmem:[%s19704_s1 + $0x21e8] sm:$0xff]  ;;  %v13561_v0 = vcombine.high %v1103_v38, %v1107_v40  ;;  %v13560_v57 = vcombine.low %v1103_v38, %v1107_v40 }
 0x209   :  { %v13563_v47 = vcombine.high %v1104_v41, %v1108_v42  ;;  %v13562_v58 = vcombine.low %v1104_v41, %v1108_v42 }
 0x20a   :  { %9955 = vmatpush1.bf16.msra.mxu0 %v13512_v49  ;;  %10488 = vmatpush1.bf16.msra.mxu1 %v13514_v52  ;;  %v1111_v49 = vld [vmem:[%s19704_s1 + $0x2200] sm:$0xff] }
 0x20b   :  { %9956 = vmatprep.subr.bf16.mxu0 %v13521_v54  ;;  %10489 = vmatprep.subr.bf16.mxu1 %v13523_v56  ;;  %v1115_v52 = vld [vmem:[%s19704_s1 + $0x2220] sm:$0xff]  ;;  %v1112_v54 = vld [vmem:[%s19704_s1 + $0x2208] sm:$0xff] }
 0x20c   :  { %v1116_v56 = vld [vmem:[%s19704_s1 + $0x2228] sm:$0xff]  ;;  %v13569_v27 = vcombine.high %v1111_v49, %v1115_v52  ;;  %v13568_v4 = vcombine.low %v1111_v49, %v1115_v52 }
 0x20d   :  { %v13571_v1 = vcombine.high %v1112_v54, %v1116_v56  ;;  %v13570_v5 = vcombine.low %v1112_v54, %v1116_v56 }
 0x20e   :  { %9957 = vmatpush1.bf16.msra.mxu0 %v13520_v60  ;;  %10490 = vmatpush1.bf16.msra.mxu1 %v13522_v62  ;;  %v1119_v60 = vld [vmem:[%s19704_s1 + $0x2240] sm:$0xff] }
 0x20f   :  { %9958 = vmatprep.subr.bf16.mxu0 %v13529_v2  ;;  %10491 = vmatprep.subr.bf16.mxu1 %v13531_v3  ;;  %v1123_v62 = vld [vmem:[%s19704_s1 + $0x2260] sm:$0xff]  ;;  %v1120_v2 = vld [vmem:[%s19704_s1 + $0x2248] sm:$0xff] }
 0x210   :  { %v1124_v3 = vld [vmem:[%s19704_s1 + $0x2268] sm:$0xff]  ;;  %v13577_v6 = vcombine.high %v1119_v60, %v1123_v62  ;;  %v13576_v16 = vcombine.low %v1119_v60, %v1123_v62 }
 0x211   :  { %v13579_v7 = vcombine.high %v1120_v2, %v1124_v3  ;;  %v13578_v17 = vcombine.low %v1120_v2, %v1124_v3 }
 0x212   :  { %9959 = vmatpush1.bf16.msra.mxu0 %v13528_v8  ;;  %10492 = vmatpush1.bf16.msra.mxu1 %v13530_v10  ;;  %v1127_v8 = vld [vmem:[%s19704_s1 + $0x2280] sm:$0xff] }
 0x213   :  { %9960 = vmatprep.subr.bf16.mxu0 %v13537_v12  ;;  %10493 = vmatprep.subr.bf16.mxu1 %v13539_v15  ;;  %v1131_v10 = vld [vmem:[%s19704_s1 + $0x22a0] sm:$0xff]  ;;  %v1128_v12 = vld [vmem:[%s19704_s1 + $0x2288] sm:$0xff] }
 0x214   :  { %v1132_v15 = vld [vmem:[%s19704_s1 + $0x22a8] sm:$0xff]  ;;  %v13585_v18 = vcombine.high %v1127_v8, %v1131_v10  ;;  %v13584_v28 = vcombine.low %v1127_v8, %v1131_v10 }
 0x215   :  { %v13587_v19 = vcombine.high %v1128_v12, %v1132_v15  ;;  %v13586_v63 = vcombine.low %v1128_v12, %v1132_v15 }
 0x216   :  { %9961 = vmatpush1.bf16.msra.mxu0 %v13536_v21  ;;  %10494 = vmatpush1.bf16.msra.mxu1 %v13538_v25  ;;  %v1135_v21 = vld [vmem:[%s19704_s1 + $0x22c0] sm:$0xff] }
 0x217   :  { %9962 = vmatprep.subr.bf16.mxu0 %v13545_v59  ;;  %10495 = vmatprep.subr.bf16.mxu1 %v13547_v26  ;;  %v1139_v25 = vld [vmem:[%s19704_s1 + $0x22e0] sm:$0xff]  ;;  %v1136_v59 = vld [vmem:[%s19704_s1 + $0x22c8] sm:$0xff] }
 0x218   :  { %v1140_v26 = vld [vmem:[%s19704_s1 + $0x22e8] sm:$0xff]  ;;  %v13593_v29 = vcombine.high %v1135_v21, %v1139_v25  ;;  %v13592_v38 = vcombine.low %v1135_v21, %v1139_v25 }
 0x219   :  { %v13595_v30 = vcombine.high %v1136_v59, %v1140_v26  ;;  %v13594_v40 = vcombine.low %v1136_v59, %v1140_v26 }
 0x21a   :  { %9963 = vmatpush1.bf16.msra.mxu0 %v13544_v31  ;;  %10496 = vmatpush1.bf16.msra.mxu1 %v13546_v33  ;;  %v1143_v31 = vld [vmem:[%s19704_s1 + $0x2300] sm:$0xff] }
 0x21b   :  { %9964 = vmatprep.subr.bf16.mxu0 %v13553_v35  ;;  %10497 = vmatprep.subr.bf16.mxu1 %v13555_v37  ;;  %v1147_v33 = vld [vmem:[%s19704_s1 + $0x2320] sm:$0xff]  ;;  %v1144_v35 = vld [vmem:[%s19704_s1 + $0x2308] sm:$0xff] }
 0x21c   :  { %v1148_v37 = vld [vmem:[%s19704_s1 + $0x2328] sm:$0xff]  ;;  %v13601_v41 = vcombine.high %v1143_v31, %v1147_v33  ;;  %v13600_v49 = vcombine.low %v1143_v31, %v1147_v33 }
 0x21d   :  { %v13603_v42 = vcombine.high %v1144_v35, %v1148_v37  ;;  %v13602_v52 = vcombine.low %v1144_v35, %v1148_v37  ;;  %v1188_v31 = vld [vmem:[%s19704_s1 + $0x2468] sm:$0xff] }
 0x21e   :  { %9965 = vmatpush1.bf16.msra.mxu0 %v13552_v43  ;;  %10498 = vmatpush1.bf16.msra.mxu1 %v13554_v45  ;;  %v1151_v43 = vld [vmem:[%s19704_s1 + $0x2340] sm:$0xff] }
 0x21f   :  { %9966 = vmatprep.subr.bf16.mxu0 %v13561_v0  ;;  %10499 = vmatprep.subr.bf16.mxu1 %v13563_v47  ;;  %v1155_v45 = vld [vmem:[%s19704_s1 + $0x2360] sm:$0xff]  ;;  %v1152_v0 = vld [vmem:[%s19704_s1 + $0x2348] sm:$0xff] }
 0x220   :  { %v1156_v47 = vld [vmem:[%s19704_s1 + $0x2368] sm:$0xff]  ;;  %v13609_v54 = vcombine.high %v1151_v43, %v1155_v45  ;;  %v13608_v60 = vcombine.low %v1151_v43, %v1155_v45 }
 0x221   :  { %v13611_v56 = vcombine.high %v1152_v0, %v1156_v47  ;;  %v13610_v62 = vcombine.low %v1152_v0, %v1156_v47  ;;  %v1196_v43 = vld [vmem:[%s19704_s1 + $0x24a8] sm:$0xff] }
 0x222   :  { %9967 = vmatpush1.bf16.msra.mxu0 %v13560_v57  ;;  %10500 = vmatpush1.bf16.msra.mxu1 %v13562_v58  ;;  %v1159_v57 = vld [vmem:[%s19704_s1 + $0x2380] sm:$0xff] }
 0x223   :  { %9968 = vmatprep.subr.bf16.mxu0 %v13569_v27  ;;  %10501 = vmatprep.subr.bf16.mxu1 %v13571_v1  ;;  %v1163_v58 = vld [vmem:[%s19704_s1 + $0x23a0] sm:$0xff]  ;;  %v1160_v27 = vld [vmem:[%s19704_s1 + $0x2388] sm:$0xff] }
 0x224   :  { %v1164_v1 = vld [vmem:[%s19704_s1 + $0x23a8] sm:$0xff]  ;;  %v13617_v2 = vcombine.high %v1159_v57, %v1163_v58  ;;  %v13616_v8 = vcombine.low %v1159_v57, %v1163_v58 }
 0x225   :  { %v13619_v3 = vcombine.high %v1160_v27, %v1164_v1  ;;  %v13618_v10 = vcombine.low %v1160_v27, %v1164_v1  ;;  %v1204_v57 = vld [vmem:[%s19704_s1 + $0x24e8] sm:$0xff] }
 0x226   :  { %9969 = vmatpush1.bf16.msra.mxu0 %v13568_v4  ;;  %10502 = vmatpush1.bf16.msra.mxu1 %v13570_v5  ;;  %v1167_v4 = vld [vmem:[%s19704_s1 + $0x23c0] sm:$0xff] }
 0x227   :  { %9970 = vmatprep.subr.bf16.mxu0 %v13577_v6  ;;  %10503 = vmatprep.subr.bf16.mxu1 %v13579_v7  ;;  %v1171_v5 = vld [vmem:[%s19704_s1 + $0x23e0] sm:$0xff]  ;;  %v1168_v6 = vld [vmem:[%s19704_s1 + $0x23c8] sm:$0xff] }
 0x228   :  { %v1172_v7 = vld [vmem:[%s19704_s1 + $0x23e8] sm:$0xff]  ;;  %v13625_v12 = vcombine.high %v1167_v4, %v1171_v5  ;;  %v13624_v21 = vcombine.low %v1167_v4, %v1171_v5 }
 0x229   :  { %v13627_v15 = vcombine.high %v1168_v6, %v1172_v7  ;;  %v13626_v25 = vcombine.low %v1168_v6, %v1172_v7  ;;  %v1212_v4 = vld [vmem:[%s19704_s1 + $0x2528] sm:$0xff] }
 0x22a   :  { %9971 = vmatpush1.bf16.msra.mxu0 %v13576_v16  ;;  %10504 = vmatpush1.bf16.msra.mxu1 %v13578_v17  ;;  %v1175_v16 = vld [vmem:[%s19704_s1 + $0x2400] sm:$0xff] }
 0x22b   :  { %9972 = vmatprep.subr.bf16.mxu0 %v13585_v18  ;;  %10505 = vmatprep.subr.bf16.mxu1 %v13587_v19  ;;  %v1179_v17 = vld [vmem:[%s19704_s1 + $0x2420] sm:$0xff]  ;;  %v1176_v18 = vld [vmem:[%s19704_s1 + $0x2408] sm:$0xff] }
 0x22c   :  { %v1180_v19 = vld [vmem:[%s19704_s1 + $0x2428] sm:$0xff]  ;;  %v13633_v59 = vcombine.high %v1175_v16, %v1179_v17  ;;  %v13632_v33 = vcombine.low %v1175_v16, %v1179_v17 }
 0x22d   :  { %v13635_v26 = vcombine.high %v1176_v18, %v1180_v19  ;;  %v13634_v35 = vcombine.low %v1176_v18, %v1180_v19  ;;  %v1220_v16 = vld [vmem:[%s19704_s1 + $0x2568] sm:$0xff] }
 0x22e   :  { %9973 = vmatpush1.bf16.msra.mxu0 %v13584_v28  ;;  %10506 = vmatpush1.bf16.msra.mxu1 %v13586_v63  ;;  %v1183_v28 = vld [vmem:[%s19704_s1 + $0x2440] sm:$0xff] }
 0x22f   :  { %9974 = vmatprep.subr.bf16.mxu0 %v13593_v29  ;;  %10507 = vmatprep.subr.bf16.mxu1 %v13595_v30  ;;  %v1187_v63 = vld [vmem:[%s19704_s1 + $0x2460] sm:$0xff]  ;;  %v16388_v29 = vrot.slane %v16167_v23, %v14572_v53  ;;  %v1184_v30 = vld [vmem:[%s19704_s1 + $0x2448] sm:$0xff] }
 0x230   :  { %v13641_v37 = vcombine.high %v1183_v28, %v1187_v63  ;;  %v1191_v23 = vld [vmem:[%s19704_s1 + $0x2480] sm:$0xff]  ;;  %v13640_v45 = vcombine.low %v1183_v28, %v1187_v63  ;;  %v13642_v0 = vcombine.low %v1184_v30, %v1188_v31  ;;  %v1228_v28 = vld [vmem:[%s19704_s1 + $0x25a8] sm:$0xff] }
 0x232   :  { %9975 = vmatpush1.bf16.msra.mxu0 %v13592_v38  ;;  %10508 = vmatpush1.bf16.msra.mxu1 %v13594_v40  ;;  %v13643_v38 = vcombine.high %v1184_v30, %v1188_v31  ;;  %v1195_v40 = vld [vmem:[%s19704_s1 + $0x24a0] sm:$0xff] }
 0x233   :  { %9976 = vmatprep.subr.bf16.mxu0 %v13601_v41  ;;  %10509 = vmatprep.subr.bf16.mxu1 %v13603_v42  ;;  %v16404_v41 = vcombine.high %v16200_v46, %v16200_v46  ;;  %v1192_v42 = vld [vmem:[%s19704_s1 + $0x2488] sm:$0xff]  ;;  %v13649_v47 = vcombine.high %v1191_v23, %v1195_v40  ;;  %v13648_v58 = vcombine.low %v1191_v23, %v1195_v40 }
 0x234   :  { %v13650_v27 = vcombine.low %v1192_v42, %v1196_v43  ;;  %v1236_v23 = vld [vmem:[%s19704_s1 + $0x25e8] sm:$0xff] }
 0x236   :  { %9977 = vmatpush1.bf16.msra.mxu0 %v13600_v49  ;;  %10510 = vmatpush1.bf16.msra.mxu1 %v13602_v52  ;;  %v13651_v49 = vcombine.high %v1192_v42, %v1196_v43  ;;  %v1199_v52 = vld [vmem:[%s19704_s1 + $0x24c0] sm:$0xff] }
 0x237   :  { %9978 = vmatprep.subr.bf16.mxu0 %v13609_v54  ;;  %10511 = vmatprep.subr.bf16.mxu1 %v13611_v56  ;;  %v1203_v54 = vld [vmem:[%s19704_s1 + $0x24e0] sm:$0xff]  ;;  %v1200_v56 = vld [vmem:[%s19704_s1 + $0x24c8] sm:$0xff] }
 0x238   :  { %v13657_v1 = vcombine.high %v1199_v52, %v1203_v54  ;;  %v13656_v5 = vcombine.low %v1199_v52, %v1203_v54  ;;  %v13658_v6 = vcombine.low %v1200_v56, %v1204_v57  ;;  %v1244_v52 = vld [vmem:[%s19704_s1 + $0x2628] sm:$0xff] }
 0x23a   :  { %9979 = vmatpush1.bf16.msra.mxu0 %v13608_v60  ;;  %10512 = vmatpush1.bf16.msra.mxu1 %v13610_v62  ;;  %v13659_v60 = vcombine.high %v1200_v56, %v1204_v57  ;;  %v1207_v62 = vld [vmem:[%s19704_s1 + $0x2500] sm:$0xff] }
 0x23b   :  { %9980 = vmatprep.subr.bf16.mxu0 %v13617_v2  ;;  %10513 = vmatprep.subr.bf16.mxu1 %v13619_v3  ;;  %v1211_v2 = vld [vmem:[%s19704_s1 + $0x2520] sm:$0xff]  ;;  %v1208_v3 = vld [vmem:[%s19704_s1 + $0x2508] sm:$0xff] }
 0x23c   :  { %v13665_v7 = vcombine.high %v1207_v62, %v1211_v2  ;;  %v13664_v17 = vcombine.low %v1207_v62, %v1211_v2  ;;  %v13666_v18 = vcombine.low %v1208_v3, %v1212_v4  ;;  %v1252_v62 = vld [vmem:[%s19704_s1 + $0x2668] sm:$0xff] }
 0x23e   :  { %9981 = vmatpush1.bf16.msra.mxu0 %v13616_v8  ;;  %10514 = vmatpush1.bf16.msra.mxu1 %v13618_v10  ;;  %v13667_v8 = vcombine.high %v1208_v3, %v1212_v4  ;;  %v1215_v10 = vld [vmem:[%s19704_s1 + $0x2540] sm:$0xff] }
 0x23f   :  { %9982 = vmatprep.subr.bf16.mxu0 %v13625_v12  ;;  %10515 = vmatprep.subr.bf16.mxu1 %v13627_v15  ;;  %v1219_v12 = vld [vmem:[%s19704_s1 + $0x2560] sm:$0xff]  ;;  %v1216_v15 = vld [vmem:[%s19704_s1 + $0x2548] sm:$0xff] }
 0x240   :  { %v13673_v19 = vcombine.high %v1215_v10, %v1219_v12  ;;  %v13672_v63 = vcombine.low %v1215_v10, %v1219_v12  ;;  %v13674_v30 = vcombine.low %v1216_v15, %v1220_v16  ;;  %v1260_v10 = vld [vmem:[%s19704_s1 + $0x26a8] sm:$0xff] }
 0x242   :  { %9983 = vmatpush1.bf16.msra.mxu0 %v13624_v21  ;;  %10516 = vmatpush1.bf16.msra.mxu1 %v13626_v25  ;;  %v13675_v21 = vcombine.high %v1216_v15, %v1220_v16  ;;  %v1223_v25 = vld [vmem:[%s19704_s1 + $0x2580] sm:$0xff] }
 0x243   :  { %9993 = vmatprep.subr.bf16.mxu0 %v13633_v59  ;;  %10526 = vmatprep.subr.bf16.mxu1 %v13635_v26  ;;  %v1227_v59 = vld [vmem:[%s19704_s1 + $0x25a0] sm:$0xff]  ;;  %v1224_v26 = vld [vmem:[%s19704_s1 + $0x2588] sm:$0xff] }
 0x244   :  { %v13681_v31 = vcombine.high %v1223_v25, %v1227_v59  ;;  %v13680_v40 = vcombine.low %v1223_v25, %v1227_v59  ;;  %v13682_v42 = vcombine.low %v1224_v26, %v1228_v28  ;;  %v1268_v25 = vld [vmem:[%s19704_s1 + $0x26e8] sm:$0xff] }
 0x245   :  { %9985 = vmatmul.mubr.bf16.vlgmr.msra.gmra.mrb[0].mxu0 %v16388_v29  ;;  %10518 = vmatmul.mubr.bf16.vlgmr.msra.gmra.mrb[0].mxu1 %v16388_v29 }
 0x246   :  { %9994 = vmatpush1.bf16.msra.mxu0 %v13632_v33  ;;  %10527 = vmatpush1.bf16.msra.mxu1 %v13634_v35  ;;  %v13683_v33 = vcombine.high %v1224_v26, %v1228_v28  ;;  %v1231_v35 = vld [vmem:[%s19704_s1 + $0x25c0] sm:$0xff] }
 0x247   :  { %9995 = vmatprep.subr.bf16.mxu0 %v13641_v37  ;;  %10528 = vmatprep.subr.bf16.mxu1 %v13643_v38  ;;  %v1235_v37 = vld [vmem:[%s19704_s1 + $0x25e0] sm:$0xff]  ;;  %v1232_v38 = vld [vmem:[%s19704_s1 + $0x25c8] sm:$0xff] }
 0x248   :  { %10025 = vmatprep.mubr.bf16.mxu0 %v16404_v41  ;;  %10558 = vmatprep.mubr.bf16.mxu1 %v16404_v41  ;;  %v13689_v43 = vcombine.high %v1231_v35, %v1235_v37  ;;  %v13688_v54 = vcombine.low %v1231_v35, %v1235_v37  ;;  %v13690_v56 = vcombine.low %v1232_v38, %v1236_v23  ;;  %v1276_v35 = vld [vmem:[%s19704_s1 + $0x2728] sm:$0xff] }
 0x24a   :  { %9996 = vmatpush1.bf16.msra.mxu0 %v13640_v45  ;;  %10529 = vmatpush1.bf16.msra.mxu1 %v13642_v0  ;;  %v13691_v45 = vcombine.high %v1232_v38, %v1236_v23  ;;  %v1239_v0 = vld [vmem:[%s19704_s1 + $0x2600] sm:$0xff] }
 0x24b   :  { %9997 = vmatprep.subr.bf16.mxu0 %v13649_v47  ;;  %10530 = vmatprep.subr.bf16.mxu1 %v13651_v49  ;;  %v1243_v47 = vld [vmem:[%s19704_s1 + $0x2620] sm:$0xff]  ;;  %v1240_v49 = vld [vmem:[%s19704_s1 + $0x2608] sm:$0xff] }
 0x24c   :  { %v13697_v57 = vcombine.high %v1239_v0, %v1243_v47  ;;  %v13696_v2 = vcombine.low %v1239_v0, %v1243_v47  ;;  %v13698_v3 = vcombine.low %v1240_v49, %v1244_v52  ;;  %v1284_v0 = vld [vmem:[%s19704_s1 + $0x2768] sm:$0xff] }
 0x24e   :  { %9998 = vmatpush1.bf16.msra.mxu0 %v13648_v58  ;;  %10531 = vmatpush1.bf16.msra.mxu1 %v13650_v27  ;;  %v13699_v58 = vcombine.high %v1240_v49, %v1244_v52  ;;  %v1247_v27 = vld [vmem:[%s19704_s1 + $0x2640] sm:$0xff] }
 0x24f   :  { %9999 = vmatprep.subr.bf16.mxu0 %v13657_v1  ;;  %10532 = vmatprep.subr.bf16.mxu1 %v13659_v60  ;;  %v1251_v1 = vld [vmem:[%s19704_s1 + $0x2660] sm:$0xff]  ;;  %v1248_v60 = vld [vmem:[%s19704_s1 + $0x2648] sm:$0xff] }
 0x250   :  { %v13705_v4 = vcombine.high %v1247_v27, %v1251_v1  ;;  %v13704_v12 = vcombine.low %v1247_v27, %v1251_v1  ;;  %v13706_v15 = vcombine.low %v1248_v60, %v1252_v62  ;;  %v1292_v27 = vld [vmem:[%s19704_s1 + $0x27a8] sm:$0xff] }
 0x252   :  { %10000 = vmatpush1.bf16.msra.mxu0 %v13656_v5  ;;  %10533 = vmatpush1.bf16.msra.mxu1 %v13658_v6  ;;  %v13707_v5 = vcombine.high %v1248_v60, %v1252_v62  ;;  %v1255_v6 = vld [vmem:[%s19704_s1 + $0x2680] sm:$0xff] }
 0x253   :  { %10001 = vmatprep.subr.bf16.mxu0 %v13665_v7  ;;  %10534 = vmatprep.subr.bf16.mxu1 %v13667_v8  ;;  %v1259_v7 = vld [vmem:[%s19704_s1 + $0x26a0] sm:$0xff]  ;;  %v1256_v8 = vld [vmem:[%s19704_s1 + $0x2688] sm:$0xff] }
 0x254   :  { %v13713_v16 = vcombine.high %v1255_v6, %v1259_v7  ;;  %v13712_v59 = vcombine.low %v1255_v6, %v1259_v7  ;;  %v13714_v26 = vcombine.low %v1256_v8, %v1260_v10  ;;  %v1296_v6 = vld [vmem:[%s19704_s1 + $0x27c8] sm:$0xff] }
 0x255   :  { %v1300_v7 = vld [vmem:[%s19704_s1 + $0x27e8] sm:$0xff] }
 0x256   :  { %10002 = vmatpush1.bf16.msra.mxu0 %v13664_v17  ;;  %10535 = vmatpush1.bf16.msra.mxu1 %v13666_v18  ;;  %v13715_v17 = vcombine.high %v1256_v8, %v1260_v10  ;;  %v1263_v18 = vld [vmem:[%s19704_s1 + $0x26c0] sm:$0xff] }
 0x257   :  { %10003 = vmatprep.subr.bf16.mxu0 %v13673_v19  ;;  %10536 = vmatprep.subr.bf16.mxu1 %v13675_v21  ;;  %v1267_v19 = vld [vmem:[%s19704_s1 + $0x26e0] sm:$0xff]  ;;  %v1264_v21 = vld [vmem:[%s19704_s1 + $0x26c8] sm:$0xff] }
 0x258   :  { %v13721_v28 = vcombine.high %v1263_v18, %v1267_v19  ;;  %v13720_v37 = vcombine.low %v1263_v18, %v1267_v19  ;;  %v13722_v38 = vcombine.low %v1264_v21, %v1268_v25  ;;  %v1304_v18 = vld [vmem:[%s19704_s1 + $0x2808] sm:$0xff] }
 0x259   :  { %v1308_v19 = vld [vmem:[%s19704_s1 + $0x2828] sm:$0xff] }
 0x25a   :  { %10004 = vmatpush1.bf16.msra.mxu0 %v13672_v63  ;;  %10537 = vmatpush1.bf16.msra.mxu1 %v13674_v30  ;;  %v13723_v63 = vcombine.high %v1264_v21, %v1268_v25  ;;  %v1271_v30 = vld [vmem:[%s19704_s1 + $0x2700] sm:$0xff]  ;;  %v13754_v25 = vcombine.low %v1296_v6, %v1300_v7 }
 0x25b   :  { %10005 = vmatprep.subr.bf16.mxu0 %v13681_v31  ;;  %10538 = vmatprep.subr.bf16.mxu1 %v13683_v33  ;;  %v1275_v31 = vld [vmem:[%s19704_s1 + $0x2720] sm:$0xff]  ;;  %v1272_v33 = vld [vmem:[%s19704_s1 + $0x2708] sm:$0xff] }
 0x25c   :  { %v13729_v23 = vcombine.high %v1271_v30, %v1275_v31  ;;  %v13728_v47 = vcombine.low %v1271_v30, %v1275_v31  ;;  %v13730_v49 = vcombine.low %v1272_v33, %v1276_v35  ;;  %v16599_v31 = vcombine.high %v16388_v29, %v16388_v29 }
 0x25e   :  { %10006 = vmatpush1.bf16.msra.mxu0 %v13680_v40  ;;  %10539 = vmatpush1.bf16.msra.mxu1 %v13682_v42  ;;  %v13731_v40 = vcombine.high %v1272_v33, %v1276_v35  ;;  %v1279_v42 = vld [vmem:[%s19704_s1 + $0x2740] sm:$0xff]  ;;  %v1312_v33 = vld [vmem:[%s19704_s1 + $0x2848] sm:$0xff] }
 0x25f   :  { %10007 = vmatprep.subr.bf16.mxu0 %v13689_v43  ;;  %10540 = vmatprep.subr.bf16.mxu1 %v13691_v45  ;;  %v1283_v43 = vld [vmem:[%s19704_s1 + $0x2760] sm:$0xff]  ;;  %v1280_v45 = vld [vmem:[%s19704_s1 + $0x2748] sm:$0xff] }
 0x260   :  { %v13737_v52 = vcombine.high %v1279_v42, %v1283_v43  ;;  %v13736_v1 = vcombine.low %v1279_v42, %v1283_v43  ;;  %v13738_v60 = vcombine.low %v1280_v45, %v1284_v0  ;;  %v1316_v35 = vld [vmem:[%s19704_s1 + $0x2868] sm:$0xff]  ;;  %v1319_v42 = vld [vmem:[%s19704_s1 + $0x2880] sm:$0xff] }
 0x261   :  { %v1323_v43 = vld [vmem:[%s19704_s1 + $0x28a0] sm:$0xff] }
 0x262   :  { %10008 = vmatpush1.bf16.msra.mxu0 %v13688_v54  ;;  %10541 = vmatpush1.bf16.msra.mxu1 %v13690_v56  ;;  %v13739_v54 = vcombine.high %v1280_v45, %v1284_v0  ;;  %v1287_v56 = vld [vmem:[%s19704_s1 + $0x2780] sm:$0xff]  ;;  %v1320_v0 = vld [vmem:[%s19704_s1 + $0x2888] sm:$0xff] }
 0x263   :  { %10009 = vmatprep.subr.bf16.mxu0 %v13697_v57  ;;  %10542 = vmatprep.subr.bf16.mxu1 %v13699_v58  ;;  %v1291_v57 = vld [vmem:[%s19704_s1 + $0x27a0] sm:$0xff]  ;;  %v1288_v58 = vld [vmem:[%s19704_s1 + $0x2788] sm:$0xff] }
 0x264   :  { %v13745_v62 = vcombine.high %v1287_v56, %v1291_v57  ;;  %v13744_v8 = vcombine.low %v1287_v56, %v1291_v57  ;;  %v13746_v10 = vcombine.low %v1288_v58, %v1292_v27  ;;  %v1327_v57 = vld [vmem:[%s19704_s1 + $0x28c0] sm:$0xff] }
 0x266   :  { %10010 = vmatpush1.bf16.msra.mxu0 %v13696_v2  ;;  %10543 = vmatpush1.bf16.msra.mxu1 %v13698_v3  ;;  %v13747_v2 = vcombine.high %v1288_v58, %v1292_v27  ;;  %v1295_v3 = vld [vmem:[%s19704_s1 + $0x27c0] sm:$0xff]  ;;  %v1328_v27 = vld [vmem:[%s19704_s1 + $0x28c8] sm:$0xff] }
 0x267   :  { %10011 = vmatprep.subr.bf16.mxu0 %v13705_v4  ;;  %10544 = vmatprep.subr.bf16.mxu1 %v13707_v5  ;;  %v1299_v4 = vld [vmem:[%s19704_s1 + $0x27e0] sm:$0xff]  ;;  %v1693_v5 = vcombine.high %v16157_v14, %v16157_v14 }
 0x268   :  { %v1303_v14 = vld [vmem:[%s19704_s1 + $0x2800] sm:$0xff]  ;;  %v13752_v21 = vcombine.low %v1295_v3, %v1299_v4 }
 0x269   :  { %v1331_v58 = vld [vmem:[%s19704_s1 + $0x28e0] sm:$0xff] }
 0x26a   :  { %10012 = vmatpush1.bf16.msra.mxu0 %v13704_v12  ;;  %10545 = vmatpush1.bf16.msra.mxu1 %v13706_v15  ;;  %v13753_v12 = vcombine.high %v1295_v3, %v1299_v4  ;;  %v13755_v15 = vcombine.high %v1296_v6, %v1300_v7  ;;  %v1335_v4 = vld [vmem:[%s19704_s1 + $0x2900] sm:$0xff]  ;;  %v1336_v6 = vld [vmem:[%s19704_s1 + $0x2908] sm:$0xff] }
 0x26b   :  { %10013 = vmatprep.subr.bf16.mxu0 %v13713_v16  ;;  %10546 = vmatprep.subr.bf16.mxu1 %v13715_v17  ;;  %v1307_v16 = vld [vmem:[%s19704_s1 + $0x2820] sm:$0xff]  ;;  %v16581_v17 = vrot.slane %v1693_v5, %v14572_v53  ;;  %v1340_v7 = vld [vmem:[%s19704_s1 + $0x2928] sm:$0xff] }
 0x26c   :  { %v1339_v5 = vld [vmem:[%s19704_s1 + $0x2920] sm:$0xff] }
 0x26d   :  { %v1709_v30 = vcombine.high %v16581_v17, %v16581_v17 }
 0x26e   :  { %10014 = vmatpush1.bf16.msra.mxu0 %v13712_v59  ;;  %10547 = vmatpush1.bf16.msra.mxu1 %v13714_v26  ;;  %v13761_v59 = vcombine.high %v1303_v14, %v1307_v16  ;;  %v13763_v26 = vcombine.high %v1304_v18, %v1308_v19 }
 0x26f   :  { %10015 = vmatprep.subr.bf16.mxu0 %v13721_v28  ;;  %10548 = vmatprep.subr.bf16.mxu1 %v13723_v63  ;;  %v1311_v28 = vld [vmem:[%s19704_s1 + $0x2840] sm:$0xff]  ;;  %v16614_v45 = vrot.slane %v1709_v30, %v14572_v53  ;;  %v1352_v30 = vld [vmem:[%s19704_s1 + $0x2988] sm:$0xff] }
 0x270   :  { %v1315_v63 = vld [vmem:[%s19704_s1 + $0x2860] sm:$0xff] }
 0x272   :  { %10016 = vmatpush1.bf16.msra.mxu0 %v13720_v37  ;;  %10549 = vmatpush1.bf16.msra.mxu1 %v13722_v38  ;;  %v13760_v37 = vcombine.low %v1303_v14, %v1307_v16  ;;  %v13762_v38 = vcombine.low %v1304_v18, %v1308_v19  ;;  %v1343_v14 = vld [vmem:[%s19704_s1 + $0x2940] sm:$0xff]  ;;  %v1344_v18 = vld [vmem:[%s19704_s1 + $0x2948] sm:$0xff] }
 0x273   :  { %10017 = vmatprep.subr.bf16.mxu0 %v13729_v23  ;;  %10550 = vmatprep.subr.bf16.mxu1 %v13731_v40  ;;  %v13769_v23 = vcombine.high %v1311_v28, %v1315_v63  ;;  %v13771_v40 = vcombine.high %v1312_v33, %v1316_v35  ;;  %v1347_v16 = vld [vmem:[%s19704_s1 + $0x2960] sm:$0xff]  ;;  %v1348_v19 = vld [vmem:[%s19704_s1 + $0x2968] sm:$0xff] }
 0x276   :  { %10018 = vmatpush1.bf16.msra.mxu0 %v13728_v47  ;;  %10551 = vmatpush1.bf16.msra.mxu1 %v13730_v49  ;;  %v1324_v47 = vld [vmem:[%s19704_s1 + $0x28a8] sm:$0xff]  ;;  %v13768_v49 = vcombine.low %v1311_v28, %v1315_v63  ;;  %v1351_v28 = vld [vmem:[%s19704_s1 + $0x2980] sm:$0xff] }
 0x277   :  { %10019 = vmatprep.subr.bf16.mxu0 %v13737_v52  ;;  %10552 = vmatprep.subr.bf16.mxu1 %v13739_v54  ;;  %v13770_v52 = vcombine.low %v1312_v33, %v1316_v35  ;;  %v13777_v54 = vcombine.high %v1319_v42, %v1323_v43  ;;  %v13779_v56 = vcombine.high %v1320_v0, %v1324_v47  ;;  %v1355_v63 = vld [vmem:[%s19704_s1 + $0x29a0] sm:$0xff]  ;;  %v1356_v33 = vld [vmem:[%s19704_s1 + $0x29a8] sm:$0xff] }
 0x278   :  { %v13800_v35 = vcombine.low %v1343_v14, %v1347_v16 }
 0x27a   :  { %10020 = vmatpush1.bf16.msra.mxu0 %v13736_v1  ;;  %10553 = vmatpush1.bf16.msra.mxu1 %v13738_v60  ;;  %v1332_v1 = vld [vmem:[%s19704_s1 + $0x28e8] sm:$0xff]  ;;  %v13776_v60 = vcombine.low %v1319_v42, %v1323_v43  ;;  %v1363_v42 = vld [vmem:[%s19704_s1 + $0x29e0] sm:$0xff] }
 0x27b   :  { %10021 = vmatprep.subr.bf16.mxu0 %v13745_v62  ;;  %10554 = vmatprep.subr.bf16.mxu1 %v13747_v2  ;;  %v13778_v62 = vcombine.low %v1320_v0, %v1324_v47  ;;  %v13785_v2 = vcombine.high %v1327_v57, %v1331_v58  ;;  %v13787_v3 = vcombine.high %v1328_v27, %v1332_v1  ;;  %v1360_v43 = vld [vmem:[%s19704_s1 + $0x29c8] sm:$0xff] }
 0x27c   :  { %v1364_v0 = vld [vmem:[%s19704_s1 + $0x29e8] sm:$0xff]  ;;  %v13808_v47 = vcombine.low %v1351_v28, %v1355_v63 }
 0x27e   :  { %10022 = vmatpush1.bf16.msra.mxu0 %v13744_v8  ;;  %10555 = vmatpush1.bf16.msra.mxu1 %v13746_v10  ;;  %v13784_v8 = vcombine.low %v1327_v57, %v1331_v58  ;;  %v13786_v10 = vcombine.low %v1328_v27, %v1332_v1  ;;  %v1371_v57 = vld [vmem:[%s19704_s1 + $0x2a20] sm:$0xff]  ;;  %v1368_v58 = vld [vmem:[%s19704_s1 + $0x2a08] sm:$0xff] }
 0x27f   :  { %10023 = vmatprep.subr.bf16.mxu0 %v13753_v12  ;;  %10556 = vmatprep.subr.bf16.mxu1 %v13755_v15  ;;  %v13793_v12 = vcombine.high %v1335_v4, %v1339_v5  ;;  %v13795_v15 = vcombine.high %v1336_v6, %v1340_v7  ;;  %v1372_v27 = vld [vmem:[%s19704_s1 + $0x2a28] sm:$0xff] }
 0x282   :  { %10024 = vmatpush1.bf16.msra.mxu0 %v13752_v21  ;;  %10557 = vmatpush1.bf16.msra.mxu1 %v13754_v25  ;;  %v13792_v21 = vcombine.low %v1335_v4, %v1339_v5  ;;  %v13794_v25 = vcombine.low %v1336_v6, %v1340_v7  ;;  %v1379_v4 = vld [vmem:[%s19704_s1 + $0x2a60] sm:$0xff]  ;;  %v1376_v5 = vld [vmem:[%s19704_s1 + $0x2a48] sm:$0xff] }
 0x283   :  { %10034 = vmatprep.subr.bf16.mxu0 %v13761_v59  ;;  %10567 = vmatprep.subr.bf16.mxu1 %v13763_v26  ;;  %v13801_v59 = vcombine.high %v1343_v14, %v1347_v16  ;;  %v13803_v26 = vcombine.high %v1344_v18, %v1348_v19  ;;  %v1380_v6 = vld [vmem:[%s19704_s1 + $0x2a68] sm:$0xff]  ;;  %v1387_v14 = vld [vmem:[%s19704_s1 + $0x2aa0] sm:$0xff] }
 0x284   :  { %v1384_v16 = vld [vmem:[%s19704_s1 + $0x2a88] sm:$0xff] }
 0x285   :  { %10026 = vmatmul.mubr.bf16.vlgmr.msra.gmra.mrb[0].mxu0 %v16599_v31  ;;  %10559 = vmatmul.mubr.bf16.vlgmr.msra.gmra.mrb[0].mxu1 %v16599_v31 }
 0x286   :  { %10035 = vmatpush1.bf16.msra.mxu0 %v13760_v37  ;;  %10568 = vmatpush1.bf16.msra.mxu1 %v13762_v38  ;;  %v13802_v37 = vcombine.low %v1344_v18, %v1348_v19  ;;  %v13809_v38 = vcombine.high %v1351_v28, %v1355_v63  ;;  %v1388_v18 = vld [vmem:[%s19704_s1 + $0x2aa8] sm:$0xff]  ;;  %v1395_v28 = vld [vmem:[%s19704_s1 + $0x2ae0] sm:$0xff] }
 0x287   :  { %10036 = vmatprep.subr.bf16.mxu0 %v13769_v23  ;;  %10569 = vmatprep.subr.bf16.mxu1 %v13771_v40  ;;  %v13811_v23 = vcombine.high %v1352_v30, %v1356_v33  ;;  %v1359_v40 = vld [vmem:[%s19704_s1 + $0x29c0] sm:$0xff]  ;;  %v1392_v63 = vld [vmem:[%s19704_s1 + $0x2ac8] sm:$0xff] }
 0x288   :  { %10066 = vmatprep.mubr.bf16.mxu0 %v16614_v45  ;;  %10599 = vmatprep.mubr.bf16.mxu1 %v16614_v45  ;;  %v13816_v1 = vcombine.low %v1359_v40, %v1363_v42 }
 0x28a   :  { %10037 = vmatpush1.bf16.msra.mxu0 %v13768_v49  ;;  %10570 = vmatpush1.bf16.msra.mxu1 %v13770_v52  ;;  %v13810_v49 = vcombine.low %v1352_v30, %v1356_v33  ;;  %v13817_v52 = vcombine.high %v1359_v40, %v1363_v42  ;;  %v1396_v30 = vld [vmem:[%s19704_s1 + $0x2ae8] sm:$0xff]  ;;  %v1403_v40 = vld [vmem:[%s19704_s1 + $0x2b20] sm:$0xff] }
 0x28b   :  { %10038 = vmatprep.subr.bf16.mxu0 %v13777_v54  ;;  %10571 = vmatprep.subr.bf16.mxu1 %v13779_v56  ;;  %v13819_v54 = vcombine.high %v1360_v43, %v1364_v0  ;;  %v1367_v56 = vld [vmem:[%s19704_s1 + $0x2a00] sm:$0xff]  ;;  %v1400_v42 = vld [vmem:[%s19704_s1 + $0x2b08] sm:$0xff] }
 0x28c   :  { %v13824_v7 = vcombine.low %v1367_v56, %v1371_v57 }
 0x28e   :  { %10039 = vmatpush1.bf16.msra.mxu0 %v13776_v60  ;;  %10572 = vmatpush1.bf16.msra.mxu1 %v13778_v62  ;;  %v13818_v60 = vcombine.low %v1360_v43, %v1364_v0  ;;  %v13825_v62 = vcombine.high %v1367_v56, %v1371_v57  ;;  %v1404_v43 = vld [vmem:[%s19704_s1 + $0x2b28] sm:$0xff]  ;;  %v1411_v56 = vld [vmem:[%s19704_s1 + $0x2b60] sm:$0xff] }
 0x28f   :  { %10040 = vmatprep.subr.bf16.mxu0 %v13785_v2  ;;  %10573 = vmatprep.subr.bf16.mxu1 %v13787_v3  ;;  %v13827_v2 = vcombine.high %v1368_v58, %v1372_v27  ;;  %v1375_v3 = vld [vmem:[%s19704_s1 + $0x2a40] sm:$0xff]  ;;  %v1408_v57 = vld [vmem:[%s19704_s1 + $0x2b48] sm:$0xff] }
 0x290   :  { %v13832_v19 = vcombine.low %v1375_v3, %v1379_v4 }
 0x292   :  { %10041 = vmatpush1.bf16.msra.mxu0 %v13784_v8  ;;  %10574 = vmatpush1.bf16.msra.mxu1 %v13786_v10  ;;  %v13826_v8 = vcombine.low %v1368_v58, %v1372_v27  ;;  %v13833_v10 = vcombine.high %v1375_v3, %v1379_v4  ;;  %v1412_v58 = vld [vmem:[%s19704_s1 + $0x2b68] sm:$0xff]  ;;  %v1419_v3 = vld [vmem:[%s19704_s1 + $0x2ba0] sm:$0xff] }
 0x293   :  { %10042 = vmatprep.subr.bf16.mxu0 %v13793_v12  ;;  %10575 = vmatprep.subr.bf16.mxu1 %v13795_v15  ;;  %v13835_v12 = vcombine.high %v1376_v5, %v1380_v6  ;;  %v1383_v15 = vld [vmem:[%s19704_s1 + $0x2a80] sm:$0xff]  ;;  %v1416_v4 = vld [vmem:[%s19704_s1 + $0x2b88] sm:$0xff] }
 0x294   :  { %v13840_v33 = vcombine.low %v1383_v15, %v1387_v14 }
 0x296   :  { %10043 = vmatpush1.bf16.msra.mxu0 %v13792_v21  ;;  %10576 = vmatpush1.bf16.msra.mxu1 %v13794_v25  ;;  %v13834_v21 = vcombine.low %v1376_v5, %v1380_v6  ;;  %v13841_v25 = vcombine.high %v1383_v15, %v1387_v14  ;;  %v1420_v5 = vld [vmem:[%s19704_s1 + $0x2ba8] sm:$0xff]  ;;  %v1427_v15 = vld [vmem:[%s19704_s1 + $0x2be0] sm:$0xff] }
 0x297   :  { %10044 = vmatprep.subr.bf16.mxu0 %v13801_v59  ;;  %10577 = vmatprep.subr.bf16.mxu1 %v13803_v26  ;;  %v13843_v59 = vcombine.high %v1384_v16, %v1388_v18  ;;  %v1391_v26 = vld [vmem:[%s19704_s1 + $0x2ac0] sm:$0xff]  ;;  %v1424_v14 = vld [vmem:[%s19704_s1 + $0x2bc8] sm:$0xff] }
 0x298   :  { %v13848_v0 = vcombine.low %v1391_v26, %v1395_v28 }
 0x29a   :  { %10045 = vmatpush1.bf16.msra.mxu0 %v13800_v35  ;;  %10578 = vmatpush1.bf16.msra.mxu1 %v13802_v37  ;;  %v13842_v35 = vcombine.low %v1384_v16, %v1388_v18  ;;  %v13849_v37 = vcombine.high %v1391_v26, %v1395_v28  ;;  %v1428_v16 = vld [vmem:[%s19704_s1 + $0x2be8] sm:$0xff]  ;;  %v1435_v26 = vld [vmem:[%s19704_s1 + $0x2c20] sm:$0xff] }
 0x29b   :  { %10046 = vmatprep.subr.bf16.mxu0 %v13809_v38  ;;  %10579 = vmatprep.subr.bf16.mxu1 %v13811_v23  ;;  %v13851_v38 = vcombine.high %v1392_v63, %v1396_v30  ;;  %v1399_v23 = vld [vmem:[%s19704_s1 + $0x2b00] sm:$0xff]  ;;  %v1432_v28 = vld [vmem:[%s19704_s1 + $0x2c08] sm:$0xff] }
 0x29c   :  { %v13856_v27 = vcombine.low %v1399_v23, %v1403_v40 }
 0x29e   :  { %10047 = vmatpush1.bf16.msra.mxu0 %v13808_v47  ;;  %10580 = vmatpush1.bf16.msra.mxu1 %v13810_v49  ;;  %v13850_v47 = vcombine.low %v1392_v63, %v1396_v30  ;;  %v13857_v49 = vcombine.high %v1399_v23, %v1403_v40  ;;  %v1436_v63 = vld [vmem:[%s19704_s1 + $0x2c28] sm:$0xff]  ;;  %v1443_v23 = vld [vmem:[%s19704_s1 + $0x2c60] sm:$0xff]  ;;  %v16802_v40 = vrot.slane %v16581_v17, %v14572_v53 }
 0x29f   :  { %10048 = vmatprep.subr.bf16.mxu0 %v13817_v52  ;;  %10581 = vmatprep.subr.bf16.mxu1 %v13819_v54  ;;  %v13859_v52 = vcombine.high %v1400_v42, %v1404_v43  ;;  %v1407_v54 = vld [vmem:[%s19704_s1 + $0x2b40] sm:$0xff] }
 0x2a0   :  { %v13864_v6 = vcombine.low %v1407_v54, %v1411_v56  ;;  %v1447_v17 = vld [vmem:[%s19704_s1 + $0x2c80] sm:$0xff] }
 0x2a2   :  { %10049 = vmatpush1.bf16.msra.mxu0 %v13816_v1  ;;  %10582 = vmatpush1.bf16.msra.mxu1 %v13818_v60  ;;  %v13858_v1 = vcombine.low %v1400_v42, %v1404_v43  ;;  %v13865_v60 = vcombine.high %v1407_v54, %v1411_v56  ;;  %v1440_v42 = vld [vmem:[%s19704_s1 + $0x2c48] sm:$0xff]  ;;  %v1451_v54 = vld [vmem:[%s19704_s1 + $0x2ca0] sm:$0xff]  ;;  %v16818_v56 = vcombine.high %v16614_v45, %v16614_v45 }
 0x2a3   :  { %10050 = vmatprep.subr.bf16.mxu0 %v13825_v62  ;;  %10583 = vmatprep.subr.bf16.mxu1 %v13827_v2  ;;  %v13867_v62 = vcombine.high %v1408_v57, %v1412_v58  ;;  %v1415_v2 = vld [vmem:[%s19704_s1 + $0x2b80] sm:$0xff]  ;;  %v1444_v43 = vld [vmem:[%s19704_s1 + $0x2c68] sm:$0xff] }
 0x2a4   :  { %v13872_v18 = vcombine.low %v1415_v2, %v1419_v3 }
 0x2a6   :  { %10051 = vmatpush1.bf16.msra.mxu0 %v13824_v7  ;;  %10584 = vmatpush1.bf16.msra.mxu1 %v13826_v8  ;;  %v13866_v7 = vcombine.low %v1408_v57, %v1412_v58  ;;  %v13873_v8 = vcombine.high %v1415_v2, %v1419_v3  ;;  %v1448_v57 = vld [vmem:[%s19704_s1 + $0x2c88] sm:$0xff]  ;;  %v1455_v2 = vld [vmem:[%s19704_s1 + $0x2cc0] sm:$0xff] }
 0x2a7   :  { %10052 = vmatprep.subr.bf16.mxu0 %v13833_v10  ;;  %10585 = vmatprep.subr.bf16.mxu1 %v13835_v12  ;;  %v13875_v10 = vcombine.high %v1416_v4, %v1420_v5  ;;  %v1423_v12 = vld [vmem:[%s19704_s1 + $0x2bc0] sm:$0xff]  ;;  %v1452_v58 = vld [vmem:[%s19704_s1 + $0x2ca8] sm:$0xff] }
 0x2a8   :  { %v13880_v30 = vcombine.low %v1423_v12, %v1427_v15  ;;  %v1459_v3 = vld [vmem:[%s19704_s1 + $0x2ce0] sm:$0xff] }
 0x2aa   :  { %10053 = vmatpush1.bf16.msra.mxu0 %v13832_v19  ;;  %10586 = vmatpush1.bf16.msra.mxu1 %v13834_v21  ;;  %v13874_v19 = vcombine.low %v1416_v4, %v1420_v5  ;;  %v13881_v21 = vcombine.high %v1423_v12, %v1427_v15  ;;  %v1456_v4 = vld [vmem:[%s19704_s1 + $0x2cc8] sm:$0xff]  ;;  %v1463_v12 = vld [vmem:[%s19704_s1 + $0x2d00] sm:$0xff] }
 0x2ab   :  { %10054 = vmatprep.subr.bf16.mxu0 %v13841_v25  ;;  %10587 = vmatprep.subr.bf16.mxu1 %v13843_v59  ;;  %v13883_v25 = vcombine.high %v1424_v14, %v1428_v16  ;;  %v1431_v59 = vld [vmem:[%s19704_s1 + $0x2c00] sm:$0xff]  ;;  %v1460_v5 = vld [vmem:[%s19704_s1 + $0x2ce8] sm:$0xff] }
 0x2ac   :  { %v1467_v15 = vld [vmem:[%s19704_s1 + $0x2d20] sm:$0xff] }
 0x2ae   :  { %10055 = vmatpush1.bf16.msra.mxu0 %v13840_v33  ;;  %10588 = vmatpush1.bf16.msra.mxu1 %v13842_v35  ;;  %v13882_v33 = vcombine.low %v1424_v14, %v1428_v16  ;;  %v13889_v35 = vcombine.high %v1431_v59, %v1435_v26  ;;  %v1464_v14 = vld [vmem:[%s19704_s1 + $0x2d08] sm:$0xff] }
 0x2af   :  { %10056 = vmatprep.subr.bf16.mxu0 %v13849_v37  ;;  %10589 = vmatprep.subr.bf16.mxu1 %v13851_v38  ;;  %v13891_v37 = vcombine.high %v1432_v28, %v1436_v63  ;;  %v1439_v38 = vld [vmem:[%s19704_s1 + $0x2c40] sm:$0xff]  ;;  %v1468_v16 = vld [vmem:[%s19704_s1 + $0x2d28] sm:$0xff] }
 0x2b2   :  { %10057 = vmatpush1.bf16.msra.mxu0 %v13848_v0  ;;  %10590 = vmatpush1.bf16.msra.mxu1 %v13850_v47  ;;  %v13888_v0 = vcombine.low %v1431_v59, %v1435_v26  ;;  %v13890_v47 = vcombine.low %v1432_v28, %v1436_v63  ;;  %v1471_v59 = vld [vmem:[%s19704_s1 + $0x2d40] sm:$0xff]  ;;  %v1472_v28 = vld [vmem:[%s19704_s1 + $0x2d48] sm:$0xff] }
 0x2b3   :  { %10058 = vmatprep.subr.bf16.mxu0 %v13857_v49  ;;  %10591 = vmatprep.subr.bf16.mxu1 %v13859_v52  ;;  %v13897_v49 = vcombine.high %v1439_v38, %v1443_v23  ;;  %v13899_v52 = vcombine.high %v1440_v42, %v1444_v43  ;;  %v1475_v26 = vld [vmem:[%s19704_s1 + $0x2d60] sm:$0xff]  ;;  %v1476_v63 = vld [vmem:[%s19704_s1 + $0x2d68] sm:$0xff] }
 0x2b6   :  { %10059 = vmatpush1.bf16.msra.mxu0 %v13856_v27  ;;  %10592 = vmatpush1.bf16.msra.mxu1 %v13858_v1  ;;  %v13896_v27 = vcombine.low %v1439_v38, %v1443_v23  ;;  %v13898_v1 = vcombine.low %v1440_v42, %v1444_v43  ;;  %v1479_v38 = vld [vmem:[%s19704_s1 + $0x2d80] sm:$0xff]  ;;  %v1480_v42 = vld [vmem:[%s19704_s1 + $0x2d88] sm:$0xff] }
 0x2b7   :  { %10060 = vmatprep.subr.bf16.mxu0 %v13865_v60  ;;  %10593 = vmatprep.subr.bf16.mxu1 %v13867_v62  ;;  %v13905_v60 = vcombine.high %v1447_v17, %v1451_v54  ;;  %v13907_v62 = vcombine.high %v1448_v57, %v1452_v58  ;;  %v1483_v23 = vld [vmem:[%s19704_s1 + $0x2da0] sm:$0xff]  ;;  %v1484_v43 = vld [vmem:[%s19704_s1 + $0x2da8] sm:$0xff] }
 0x2ba   :  { %10061 = vmatpush1.bf16.msra.mxu0 %v13864_v6  ;;  %10594 = vmatpush1.bf16.msra.mxu1 %v13866_v7  ;;  %v13904_v6 = vcombine.low %v1447_v17, %v1451_v54  ;;  %v13906_v7 = vcombine.low %v1448_v57, %v1452_v58  ;;  %v1487_v17 = vld [vmem:[%s19704_s1 + $0x2dc0] sm:$0xff]  ;;  %v1488_v57 = vld [vmem:[%s19704_s1 + $0x2dc8] sm:$0xff] }
 0x2bb   :  { %10062 = vmatprep.subr.bf16.mxu0 %v13873_v8  ;;  %10595 = vmatprep.subr.bf16.mxu1 %v13875_v10  ;;  %v13913_v8 = vcombine.high %v1455_v2, %v1459_v3  ;;  %v13915_v10 = vcombine.high %v1456_v4, %v1460_v5  ;;  %v1491_v54 = vld [vmem:[%s19704_s1 + $0x2de0] sm:$0xff]  ;;  %v1492_v58 = vld [vmem:[%s19704_s1 + $0x2de8] sm:$0xff] }
 0x2be   :  { %10063 = vmatpush1.bf16.msra.mxu0 %v13872_v18  ;;  %10596 = vmatpush1.bf16.msra.mxu1 %v13874_v19  ;;  %v13912_v18 = vcombine.low %v1455_v2, %v1459_v3  ;;  %v13914_v19 = vcombine.low %v1456_v4, %v1460_v5  ;;  %v1495_v2 = vld [vmem:[%s19704_s1 + $0x2e00] sm:$0xff]  ;;  %v1496_v4 = vld [vmem:[%s19704_s1 + $0x2e08] sm:$0xff] }
 0x2bf   :  { %10064 = vmatprep.subr.bf16.mxu0 %v13881_v21  ;;  %10597 = vmatprep.subr.bf16.mxu1 %v13883_v25  ;;  %v13921_v21 = vcombine.high %v1463_v12, %v1467_v15  ;;  %v13923_v25 = vcombine.high %v1464_v14, %v1468_v16  ;;  %v1499_v3 = vld [vmem:[%s19704_s1 + $0x2e20] sm:$0xff]  ;;  %v1500_v5 = vld [vmem:[%s19704_s1 + $0x2e28] sm:$0xff] }
 0x2c2   :  { %10065 = vmatpush1.bf16.msra.mxu0 %v13880_v30  ;;  %10598 = vmatpush1.bf16.msra.mxu1 %v13882_v33  ;;  %v13920_v30 = vcombine.low %v1463_v12, %v1467_v15  ;;  %v13922_v33 = vcombine.low %v1464_v14, %v1468_v16  ;;  %v1503_v12 = vld [vmem:[%s19704_s1 + $0x2e40] sm:$0xff]  ;;  %v1504_v14 = vld [vmem:[%s19704_s1 + $0x2e48] sm:$0xff] }
 0x2c3   :  { %10075 = vmatprep.subr.bf16.mxu0 %v13889_v35  ;;  %10608 = vmatprep.subr.bf16.mxu1 %v13891_v37  ;;  %v13929_v35 = vcombine.high %v1471_v59, %v1475_v26  ;;  %v13931_v37 = vcombine.high %v1472_v28, %v1476_v63  ;;  %v1507_v15 = vld [vmem:[%s19704_s1 + $0x2e60] sm:$0xff]  ;;  %v1508_v16 = vld [vmem:[%s19704_s1 + $0x2e68] sm:$0xff] }
 0x2c5   :  { %10067 = vmatmul.mubr.bf16.vlgmr.msra.gmra.mrb[0].mxu0 %v16802_v40  ;;  %10600 = vmatmul.mubr.bf16.vlgmr.msra.gmra.mrb[0].mxu1 %v16802_v40 }
 0x2c6   :  { %10076 = vmatpush1.bf16.msra.mxu0 %v13888_v0  ;;  %10609 = vmatpush1.bf16.msra.mxu1 %v13890_v47  ;;  %v13928_v0 = vcombine.low %v1471_v59, %v1475_v26  ;;  %v13930_v47 = vcombine.low %v1472_v28, %v1476_v63  ;;  %v1511_v59 = vld [vmem:[%s19704_s1 + $0x2e80] sm:$0xff]  ;;  %v1512_v28 = vld [vmem:[%s19704_s1 + $0x2e88] sm:$0xff] }
 0x2c7   :  { %10077 = vmatprep.subr.bf16.mxu0 %v13897_v49  ;;  %10610 = vmatprep.subr.bf16.mxu1 %v13899_v52  ;;  %v13937_v49 = vcombine.high %v1479_v38, %v1483_v23  ;;  %v13939_v52 = vcombine.high %v1480_v42, %v1484_v43  ;;  %v1515_v26 = vld [vmem:[%s19704_s1 + $0x2ea0] sm:$0xff]  ;;  %v1516_v63 = vld [vmem:[%s19704_s1 + $0x2ea8] sm:$0xff] }
 0x2c8   :  { %10640 = vmatprep.mubr.bf16.mxu1 %v16818_v56  ;;  %10107 = vmatprep.mubr.bf16.mxu0 %v16818_v56 }
 0x2ca   :  { %10078 = vmatpush1.bf16.msra.mxu0 %v13896_v27  ;;  %10611 = vmatpush1.bf16.msra.mxu1 %v13898_v1  ;;  %v13936_v27 = vcombine.low %v1479_v38, %v1483_v23  ;;  %v13938_v1 = vcombine.low %v1480_v42, %v1484_v43  ;;  %v1519_v38 = vld [vmem:[%s19704_s1 + $0x2ec0] sm:$0xff]  ;;  %v1520_v42 = vld [vmem:[%s19704_s1 + $0x2ec8] sm:$0xff] }
 0x2cb   :  { %10079 = vmatprep.subr.bf16.mxu0 %v13905_v60  ;;  %10612 = vmatprep.subr.bf16.mxu1 %v13907_v62  ;;  %v13945_v60 = vcombine.high %v1487_v17, %v1491_v54  ;;  %v13947_v62 = vcombine.high %v1488_v57, %v1492_v58  ;;  %v1523_v23 = vld [vmem:[%s19704_s1 + $0x2ee0] sm:$0xff]  ;;  %v1524_v43 = vld [vmem:[%s19704_s1 + $0x2ee8] sm:$0xff] }
 0x2ce   :  { %10080 = vmatpush1.bf16.msra.mxu0 %v13904_v6  ;;  %10613 = vmatpush1.bf16.msra.mxu1 %v13906_v7  ;;  %v13944_v6 = vcombine.low %v1487_v17, %v1491_v54  ;;  %v13946_v7 = vcombine.low %v1488_v57, %v1492_v58  ;;  %v1527_v17 = vld [vmem:[%s19704_s1 + $0x2f00] sm:$0xff]  ;;  %v1528_v57 = vld [vmem:[%s19704_s1 + $0x2f08] sm:$0xff] }
 0x2cf   :  { %10081 = vmatprep.subr.bf16.mxu0 %v13913_v8  ;;  %10614 = vmatprep.subr.bf16.mxu1 %v13915_v10  ;;  %v13953_v8 = vcombine.high %v1495_v2, %v1499_v3  ;;  %v13955_v10 = vcombine.high %v1496_v4, %v1500_v5  ;;  %v1531_v54 = vld [vmem:[%s19704_s1 + $0x2f20] sm:$0xff]  ;;  %v1532_v58 = vld [vmem:[%s19704_s1 + $0x2f28] sm:$0xff] }
 0x2d2   :  { %10082 = vmatpush1.bf16.msra.mxu0 %v13912_v18  ;;  %10615 = vmatpush1.bf16.msra.mxu1 %v13914_v19  ;;  %v13952_v18 = vcombine.low %v1495_v2, %v1499_v3  ;;  %v13954_v19 = vcombine.low %v1496_v4, %v1500_v5  ;;  %v1535_v2 = vld [vmem:[%s19704_s1 + $0x2f40] sm:$0xff]  ;;  %v1536_v4 = vld [vmem:[%s19704_s1 + $0x2f48] sm:$0xff] }
 0x2d3   :  { %10083 = vmatprep.subr.bf16.mxu0 %v13921_v21  ;;  %10616 = vmatprep.subr.bf16.mxu1 %v13923_v25  ;;  %v13961_v21 = vcombine.high %v1503_v12, %v1507_v15  ;;  %v13963_v25 = vcombine.high %v1504_v14, %v1508_v16  ;;  %v1539_v3 = vld [vmem:[%s19704_s1 + $0x2f60] sm:$0xff]  ;;  %v1540_v5 = vld [vmem:[%s19704_s1 + $0x2f68] sm:$0xff] }
 0x2d6   :  { %10084 = vmatpush1.bf16.msra.mxu0 %v13920_v30  ;;  %10617 = vmatpush1.bf16.msra.mxu1 %v13922_v33  ;;  %v13960_v30 = vcombine.low %v1503_v12, %v1507_v15  ;;  %v13962_v33 = vcombine.low %v1504_v14, %v1508_v16  ;;  %v1543_v12 = vld [vmem:[%s19704_s1 + $0x2f80] sm:$0xff]  ;;  %v1544_v14 = vld [vmem:[%s19704_s1 + $0x2f88] sm:$0xff] }
 0x2d7   :  { %10085 = vmatprep.subr.bf16.mxu0 %v13929_v35  ;;  %10618 = vmatprep.subr.bf16.mxu1 %v13931_v37  ;;  %v13969_v35 = vcombine.high %v1511_v59, %v1515_v26  ;;  %v13971_v37 = vcombine.high %v1512_v28, %v1516_v63  ;;  %v1547_v15 = vld [vmem:[%s19704_s1 + $0x2fa0] sm:$0xff]  ;;  %v1548_v16 = vld [vmem:[%s19704_s1 + $0x2fa8] sm:$0xff] }
 0x2da   :  { %10086 = vmatpush1.bf16.msra.mxu0 %v13928_v0  ;;  %10619 = vmatpush1.bf16.msra.mxu1 %v13930_v47  ;;  %v13968_v0 = vcombine.low %v1511_v59, %v1515_v26  ;;  %v13970_v47 = vcombine.low %v1512_v28, %v1516_v63  ;;  %v1551_v59 = vld [vmem:[%s19704_s1 + $0x2fc0] sm:$0xff]  ;;  %v1552_v28 = vld [vmem:[%s19704_s1 + $0x2fc8] sm:$0xff] }
 0x2db   :  { %10087 = vmatprep.subr.bf16.mxu0 %v13937_v49  ;;  %10620 = vmatprep.subr.bf16.mxu1 %v13939_v52  ;;  %v13977_v49 = vcombine.high %v1519_v38, %v1523_v23  ;;  %v13979_v52 = vcombine.high %v1520_v42, %v1524_v43  ;;  %v1555_v26 = vld [vmem:[%s19704_s1 + $0x2fe0] sm:$0xff]  ;;  %v1556_v63 = vld [vmem:[%s19704_s1 + $0x2fe8] sm:$0xff] }
 0x2de   :  { %10088 = vmatpush1.bf16.msra.mxu0 %v13936_v27  ;;  %10621 = vmatpush1.bf16.msra.mxu1 %v13938_v1  ;;  %v13976_v27 = vcombine.low %v1519_v38, %v1523_v23  ;;  %v13978_v1 = vcombine.low %v1520_v42, %v1524_v43  ;;  %v1559_v38 = vld [vmem:[%s19704_s1 + $0x3000] sm:$0xff]  ;;  %v26_v42 = vld [vmem:[%s19704_s1 + $0x18] sm:$0xff] }
 0x2df   :  { %10089 = vmatprep.subr.bf16.mxu0 %v13945_v60  ;;  %10622 = vmatprep.subr.bf16.mxu1 %v13947_v62  ;;  %v13985_v60 = vcombine.high %v1527_v17, %v1531_v54  ;;  %v13987_v62 = vcombine.high %v1528_v57, %v1532_v58  ;;  %v1563_v23 = vld [vmem:[%s19704_s1 + $0x3020] sm:$0xff]  ;;  %v30_v43 = vld [vmem:[%s19704_s1 + $0x38] sm:$0xff] }
 0x2e2   :  { %10090 = vmatpush1.bf16.msra.mxu0 %v13944_v6  ;;  %10623 = vmatpush1.bf16.msra.mxu1 %v13946_v7  ;;  %v13984_v6 = vcombine.low %v1527_v17, %v1531_v54  ;;  %v13986_v7 = vcombine.low %v1528_v57, %v1532_v58  ;;  %v1567_v17 = vld [vmem:[%s19704_s1 + $0x3040] sm:$0xff]  ;;  %v17006_v57 = vcombine.high %v16802_v40, %v16802_v40  ;;  %v34_v58 = vld [vmem:[%s19704_s1 + $0x58] sm:$0xff] }
 0x2e3   :  { %10091 = vmatprep.subr.bf16.mxu0 %v13953_v8  ;;  %10624 = vmatprep.subr.bf16.mxu1 %v13955_v10  ;;  %v13993_v8 = vcombine.high %v1535_v2, %v1539_v3  ;;  %v13995_v10 = vcombine.high %v1536_v4, %v1540_v5  ;;  %v1571_v54 = vld [vmem:[%s19704_s1 + $0x3060] sm:$0xff] }
 0x2e6   :  { %10092 = vmatpush1.bf16.msra.mxu0 %v13952_v18  ;;  %10625 = vmatpush1.bf16.msra.mxu1 %v13954_v19  ;;  %v13992_v18 = vcombine.low %v1535_v2, %v1539_v3  ;;  %v13994_v19 = vcombine.low %v1536_v4, %v1540_v5  ;;  %v1575_v3 = vld [vmem:[%s19704_s1 + $0x3080] sm:$0xff]  ;;  %v42_v5 = vld [vmem:[%s19704_s1 + $0x98] sm:$0xff] }
 0x2e7   :  { %10093 = vmatprep.subr.bf16.mxu0 %v13961_v21  ;;  %10626 = vmatprep.subr.bf16.mxu1 %v13963_v25  ;;  %v14001_v21 = vcombine.high %v1543_v12, %v1547_v15  ;;  %v14003_v25 = vcombine.high %v1544_v14, %v1548_v16  ;;  %v1579_v4 = vld [vmem:[%s19704_s1 + $0x30a0] sm:$0xff] }
 0x2ea   :  { %10094 = vmatpush1.bf16.msra.mxu0 %v13960_v30  ;;  %10627 = vmatpush1.bf16.msra.mxu1 %v13962_v33  ;;  %v14000_v30 = vcombine.low %v1543_v12, %v1547_v15  ;;  %v14002_v33 = vcombine.low %v1544_v14, %v1548_v16  ;;  %v1583_v15 = vld [vmem:[%s19704_s1 + $0x30c0] sm:$0xff]  ;;  %v14467_v16 = vmov 0  }
 0x2eb   :  { %10095 = vmatprep.subr.bf16.mxu0 %v13969_v35  ;;  %10628 = vmatprep.subr.bf16.mxu1 %v13971_v37  ;;  %v14009_v35 = vcombine.high %v1551_v59, %v1555_v26  ;;  %v14011_v37 = vcombine.high %v1552_v28, %v1556_v63  ;;  %v1587_v14 = vld [vmem:[%s19704_s1 + $0x30e0] sm:$0xff] }
 0x2ee   :  { %10096 = vmatpush1.bf16.msra.mxu0 %v13968_v0  ;;  %10629 = vmatpush1.bf16.msra.mxu1 %v13970_v47  ;;  %v14008_v0 = vcombine.low %v1551_v59, %v1555_v26  ;;  %v14010_v47 = vcombine.low %v1552_v28, %v1556_v63  ;;  %v14041_v59 = vcombine.high %v1583_v15, %v1587_v14  ;;  %v1560_v28 = vld [vmem:[%s19704_s1 + $0x3008] sm:$0xff] }
 0x2ef   :  { %10097 = vmatprep.subr.bf16.mxu0 %v13977_v49  ;;  %10630 = vmatprep.subr.bf16.mxu1 %v13979_v52  ;;  %v14017_v49 = vcombine.high %v1559_v38, %v1563_v23  ;;  %v12487_v52 = vcombine.high %v26_v42, %v30_v43  ;;  %v1564_v63 = vld [vmem:[%s19704_s1 + $0x3028] sm:$0xff] }
 0x2f2   :  { %10098 = vmatpush1.bf16.msra.mxu0 %v13976_v27  ;;  %10631 = vmatpush1.bf16.msra.mxu1 %v13978_v1  ;;  %v38_v27 = vld [vmem:[%s19704_s1 + $0x78] sm:$0xff]  ;;  %v14016_v1 = vcombine.low %v1559_v38, %v1563_v23  ;;  %v14019_v23 = vcombine.high %v1560_v28, %v1564_v63 }
 0x2f3   :  { %10099 = vmatprep.subr.bf16.mxu0 %v13985_v60  ;;  %10632 = vmatprep.subr.bf16.mxu1 %v13987_v62  ;;  %v12486_v60 = vcombine.low %v26_v42, %v30_v43  ;;  %v14025_v62 = vcombine.high %v1567_v17, %v1571_v54  ;;  %v12495_v2 = vcombine.high %v34_v58, %v38_v27  ;;  %v1568_v43 = vld [vmem:[%s19704_s1 + $0x3048] sm:$0xff] }
 0x2f6   :  { %10100 = vmatpush1.bf16.msra.mxu0 %v13984_v6  ;;  %10633 = vmatpush1.bf16.msra.mxu1 %v13986_v7  ;;  %v46_v6 = vld [vmem:[%s19704_s1 + $0xb8] sm:$0xff]  ;;  %v14024_v7 = vcombine.low %v1567_v17, %v1571_v54  ;;  %v14018_v17 = vcombine.low %v1560_v28, %v1564_v63 }
 0x2f7   :  { %10101 = vmatprep.subr.bf16.mxu0 %v13993_v8  ;;  %10634 = vmatprep.subr.bf16.mxu1 %v13995_v10  ;;  %v12494_v8 = vcombine.low %v34_v58, %v38_v27  ;;  %v14033_v10 = vcombine.high %v1575_v3, %v1579_v4  ;;  %v12503_v12 = vcombine.high %v42_v5, %v46_v6 }
 0x2fa   :  { %10102 = vmatpush1.bf16.msra.mxu0 %v13992_v18  ;;  %10635 = vmatpush1.bf16.msra.mxu1 %v13994_v19  ;;  %v50_v18 = vld [vmem:[%s19704_s1 + $0xd8] sm:$0xff] }
 0x2fb   :  { %10103 = vmatprep.subr.bf16.mxu0 %v14001_v21  ;;  %10636 = vmatprep.subr.bf16.mxu1 %v14003_v25  ;;  %v54_v19 = vld [vmem:[%s19704_s1 + $0xf8] sm:$0xff]  ;;  %v14032_v21 = vcombine.low %v1575_v3, %v1579_v4  ;;  %v12502_v25 = vcombine.low %v42_v5, %v46_v6  ;;  %v1584_v6 = vld [vmem:[%s19704_s1 + $0x30c8] sm:$0xff] }
 0x2fc   :  { %v12511_v26 = vcombine.high %v50_v18, %v54_v19  ;;  %v12510_v38 = vcombine.low %v50_v18, %v54_v19  ;;  %v25_v19 = vld [vmem:[%s19704_s1 + $0x10] sm:$0xff] }
 0x2fe   :  { %10104 = vmatpush1.bf16.msra.mxu0 %v14000_v30  ;;  %10637 = vmatpush1.bf16.msra.mxu1 %v14002_v33  ;;  %v58_v30 = vld [vmem:[%s19704_s1 + $0x118] sm:$0xff] }
 0x2ff   :  { %10105 = vmatprep.subr.bf16.mxu0 %v14009_v35  ;;  %10638 = vmatprep.subr.bf16.mxu1 %v14011_v37  ;;  %v62_v33 = vld [vmem:[%s19704_s1 + $0x138] sm:$0xff]  ;;  %v14040_v35 = vcombine.low %v1583_v15, %v1587_v14 }
 0x300   :  { %v12479_v37 = vld.sshfl [vmem:[%s19703_s0 + $0x18] sm:$0x1 pattern:$0x75316420]  ;;  %v12519_v42 = vcombine.high %v58_v30, %v62_v33  ;;  %v12518_v54 = vcombine.low %v58_v30, %v62_v33  ;;  %v33_v33 = vld [vmem:[%s19704_s1 + $0x50] sm:$0xff] }
 0x302   :  { %10106 = vmatpush1.bf16.msra.mxu0 %v14008_v0  ;;  %10639 = vmatpush1.bf16.msra.mxu1 %v14010_v47  ;;  %v1572_v0 = vld [vmem:[%s19704_s1 + $0x3068] sm:$0xff]  ;;  %v17064_v47 = vrot.slane %v12479_v37, %v14572_v53  ;;  %v98_v37 = vld [vmem:[%s19704_s1 + $0x258] sm:$0xff] }
 0x303   :  { %10116 = vmatprep.subr.bf16.mxu0 %v14017_v49  ;;  %11223 = vmatprep.subr.bf16.mxu1 %v12487_v52  ;;  %v66_v49 = vld [vmem:[%s19704_s1 + $0x158] sm:$0xff]  ;;  %v14027_v58 = vcombine.high %v1568_v43, %v1572_v0  ;;  %v1576_v53 = vld [vmem:[%s19704_s1 + $0x3088] sm:$0xff] }
 0x304   :  { %v70_v52 = vld [vmem:[%s19704_s1 + $0x178] sm:$0xff] }
 0x305   :  { %10108 = vmatmul.mubr.bf16.vlgmr.msra.gmra.mrb[0].mxu0 %v17006_v57  ;;  %10641 = vmatmul.mubr.bf16.vlgmr.msra.gmra.mrb[0].mxu1 %v17006_v57  ;;  %v12527_v27 = vcombine.high %v66_v49, %v70_v52  ;;  %v12526_v3 = vcombine.low %v66_v49, %v70_v52  ;;  %v41_v49 = vld [vmem:[%s19704_s1 + $0x90] sm:$0xff] }
 0x306   :  { %10117 = vmatpush1.bf16.msra.mxu0 %v14016_v1  ;;  %11224 = vmatpush1.bf16.msra.mxu1 %v12486_v60  ;;  %v1580_v1 = vld [vmem:[%s19704_s1 + $0x30a8] sm:$0xff]  ;;  %v74_v60 = vld [vmem:[%s19704_s1 + $0x198] sm:$0xff]  ;;  %v45_v52 = vld [vmem:[%s19704_s1 + $0xb0] sm:$0xff] }
 0x307   :  { %10118 = vmatprep.subr.bf16.mxu0 %v14025_v62  ;;  %11225 = vmatprep.subr.bf16.mxu1 %v12495_v2  ;;  %v78_v62 = vld [vmem:[%s19704_s1 + $0x1b8] sm:$0xff]  ;;  %v14026_v2 = vcombine.low %v1568_v43, %v1572_v0  ;;  %v14035_v4 = vcombine.high %v1576_v53, %v1580_v1 }
 0x308   :  { %10148 = vmatprep.mubr.bf16.mxu0 %v14467_v16  ;;  %11255 = vmatprep.mubr.bf16.mxu1 %v14610_v9  ;;  %v12535_v5 = vcombine.high %v74_v60, %v78_v62  ;;  %v12534_v15 = vcombine.low %v74_v60, %v78_v62  ;;  %v49_v60 = vld [vmem:[%s19704_s1 + $0xd0] sm:$0xff] }
 0x309   :  { %v53_v62 = vld [vmem:[%s19704_s1 + $0xf0] sm:$0xff] }
 0x30a   :  { %10119 = vmatpush1.bf16.msra.mxu0 %v14024_v7  ;;  %11226 = vmatpush1.bf16.msra.mxu1 %v12494_v8  ;;  %v1588_v7 = vld [vmem:[%s19704_s1 + $0x30e8] sm:$0xff]  ;;  %v82_v8 = vld [vmem:[%s19704_s1 + $0x1d8] sm:$0xff] }
 0x30b   :  { %10120 = vmatprep.subr.bf16.mxu0 %v14033_v10  ;;  %11227 = vmatprep.subr.bf16.mxu1 %v12503_v12  ;;  %v86_v10 = vld [vmem:[%s19704_s1 + $0x1f8] sm:$0xff]  ;;  %v14034_v12 = vcombine.low %v1576_v53, %v1580_v1  ;;  %v14043_v14 = vcombine.high %v1584_v6, %v1588_v7  ;;  %v12501_v53 = vcombine.high %v41_v49, %v45_v52 }
 0x30c   :  { %v12543_v18 = vcombine.high %v82_v8, %v86_v10  ;;  %v12542_v28 = vcombine.low %v82_v8, %v86_v10  ;;  %v61_v8 = vld [vmem:[%s19704_s1 + $0x130] sm:$0xff]  ;;  %v122_v10 = vld [vmem:[%s19704_s1 + $0x318] sm:$0xff] }
 0x30e   :  { %10121 = vmatpush1.bf16.msra.mxu0 %v14032_v21  ;;  %11228 = vmatpush1.bf16.msra.mxu1 %v12502_v25  ;;  %v29_v21 = vld [vmem:[%s19704_s1 + $0x30] sm:$0xff]  ;;  %v90_v25 = vld [vmem:[%s19704_s1 + $0x218] sm:$0xff] }
 0x30f   :  { %10122 = vmatprep.subr.bf16.mxu0 %v14041_v59  ;;  %11229 = vmatprep.subr.bf16.mxu1 %v12511_v26  ;;  %v94_v59 = vld [vmem:[%s19704_s1 + $0x238] sm:$0xff]  ;;  %v14042_v26 = vcombine.low %v1584_v6, %v1588_v7  ;;  %v12485_v63 = vcombine.high %v25_v19, %v29_v21  ;;  %v57_v7 = vld [vmem:[%s19704_s1 + $0x110] sm:$0xff] }
 0x310   :  { %v12551_v30 = vcombine.high %v90_v25, %v94_v59 }
 0x312   :  { %10123 = vmatpush1.bf16.msra.mxu0 %v14040_v35  ;;  %11230 = vmatpush1.bf16.msra.mxu1 %v12510_v38  ;;  %v37_v35 = vld [vmem:[%s19704_s1 + $0x70] sm:$0xff]  ;;  %v102_v38 = vld [vmem:[%s19704_s1 + $0x278] sm:$0xff] }
 0x313   :  { %10649 = vmatprep.subr.bf16.mxu0 %v14019_v23  ;;  %11231 = vmatprep.subr.bf16.mxu1 %v12519_v42  ;;  %v12484_v23 = vcombine.low %v25_v19, %v29_v21  ;;  %v12550_v42 = vcombine.low %v90_v25, %v94_v59  ;;  %v12493_v43 = vcombine.high %v33_v33, %v37_v35  ;;  %v65_v21 = vld [vmem:[%s19704_s1 + $0x150] sm:$0xff]  ;;  %v130_v59 = vld [vmem:[%s19704_s1 + $0x358] sm:$0xff] }
 0x314   :  { %v12559_v0 = vcombine.high %v98_v37, %v102_v38  ;;  %v69_v25 = vld [vmem:[%s19704_s1 + $0x170] sm:$0xff] }
 0x315   :  { %14048 = vmatmul.mubr.msk.bf16.vlgmr.msra.gmra.mrb[0].mxu0 %vm9620_vm0, %v17064_v47 }
 0x316   :  { %10650 = vmatpush1.bf16.msra.mxu0 %v14018_v17  ;;  %10681 = vmatprep.mubr.bf16.mxu0 %v14467_v16  ;;  %v106_v17 = vld [vmem:[%s19704_s1 + $0x298] sm:$0xff] }
 0x317   :  { %11232 = vmatpush1.bf16.msra.mxu1 %v12518_v54  ;;  %10651 = vmatprep.subr.bf16.mxu0 %v14027_v58  ;;  %v110_v54 = vld [vmem:[%s19704_s1 + $0x2b8] sm:$0xff]  ;;  %v12492_v58 = vcombine.low %v33_v33, %v37_v35  ;;  %v73_v35 = vld [vmem:[%s19704_s1 + $0x190] sm:$0xff] }
 0x318   :  { %11233 = vmatprep.subr.bf16.mxu1 %v12527_v27  ;;  %v12558_v27 = vcombine.low %v98_v37, %v102_v38  ;;  %v12567_v1 = vcombine.high %v106_v17, %v110_v54  ;;  %v77_v37 = vld [vmem:[%s19704_s1 + $0x1b0] sm:$0xff]  ;;  %v138_v38 = vld [vmem:[%s19704_s1 + $0x398] sm:$0xff] }
 0x31a   :  { %10652 = vmatpush1.bf16.msra.mxu0 %v14026_v2  ;;  %v114_v2 = vld [vmem:[%s19704_s1 + $0x2d8] sm:$0xff] }
 0x31b   :  { %11234 = vmatpush1.bf16.msra.mxu1 %v12526_v3  ;;  %10653 = vmatprep.subr.bf16.mxu0 %v14035_v4  ;;  %v12500_v3 = vcombine.low %v41_v49, %v45_v52  ;;  %v12566_v4 = vcombine.low %v106_v17, %v110_v54  ;;  %v81_v52 = vld [vmem:[%s19704_s1 + $0x1d0] sm:$0xff]  ;;  %v146_v54 = vld [vmem:[%s19704_s1 + $0x3d8] sm:$0xff] }
 0x31c   :  { %11235 = vmatprep.subr.bf16.mxu1 %v12535_v5  ;;  %v12509_v5 = vcombine.high %v49_v60, %v53_v62  ;;  %v85_v17 = vld [vmem:[%s19704_s1 + $0x1f0] sm:$0xff] }
 0x31e   :  { %10654 = vmatpush1.bf16.msra.mxu0 %v14034_v12  ;;  %v126_v12 = vld [vmem:[%s19704_s1 + $0x338] sm:$0xff] }
 0x31f   :  { %11236 = vmatpush1.bf16.msra.mxu1 %v12534_v15  ;;  %10655 = vmatprep.subr.bf16.mxu0 %v14043_v14  ;;  %v12508_v15 = vcombine.low %v49_v60, %v53_v62  ;;  %v12583_v19 = vcombine.high %v122_v10, %v126_v12  ;;  %v89_v62 = vld [vmem:[%s19704_s1 + $0x210] sm:$0xff] }
 0x320   :  { %11237 = vmatprep.subr.bf16.mxu1 %v12543_v18  ;;  %v12517_v18 = vcombine.high %v57_v7, %v61_v8 }
 0x322   :  { %10656 = vmatpush1.bf16.msra.mxu0 %v14042_v26  ;;  %v134_v26 = vld [vmem:[%s19704_s1 + $0x378] sm:$0xff] }
 0x323   :  { %11238 = vmatpush1.bf16.msra.mxu1 %v12542_v28  ;;  %10690 = vmatprep.subr.bf16.mxu0 %v12485_v63  ;;  %v12516_v28 = vcombine.low %v57_v7, %v61_v8  ;;  %v12582_v63 = vcombine.low %v122_v10, %v126_v12  ;;  %v12591_v33 = vcombine.high %v130_v59, %v134_v26  ;;  %v97_v8 = vld [vmem:[%s19704_s1 + $0x250] sm:$0xff]  ;;  %v162_v12 = vld [vmem:[%s19704_s1 + $0x458] sm:$0xff] }
 0x324   :  { %11239 = vmatprep.subr.bf16.mxu1 %v12551_v30  ;;  %v12525_v30 = vcombine.high %v65_v21, %v69_v25  ;;  %v101_v10 = vld [vmem:[%s19704_s1 + $0x270] sm:$0xff] }
 0x325   :  { %14049 = vmatmul.mubr.msk.bf16.vlgmr.msra.gmra.mrb[4].mxu0 %vm9620_vm0, %v17064_v47 }
 0x326   :  { %10691 = vmatpush1.bf16.msra.mxu0 %v12484_v23  ;;  %10722 = vmatprep.mubr.bf16.mxu0 %v14610_v9  ;;  %v118_v9 = vld [vmem:[%s19704_s1 + $0x2f8] sm:$0xff] }
 0x327   :  { %11240 = vmatpush1.bf16.msra.mxu1 %v12550_v42  ;;  %10692 = vmatprep.subr.bf16.mxu0 %v12493_v43  ;;  %v12575_v6 = vcombine.high %v114_v2, %v118_v9  ;;  %v12574_v14 = vcombine.low %v114_v2, %v118_v9  ;;  %v142_v23 = vld [vmem:[%s19704_s1 + $0x3b8] sm:$0xff]  ;;  %v12524_v42 = vcombine.low %v65_v21, %v69_v25  ;;  %v93_v2 = vld [vmem:[%s19704_s1 + $0x230] sm:$0xff] }
 0x328   :  { %11241 = vmatprep.subr.bf16.mxu1 %v12559_v0  ;;  %v12590_v43 = vcombine.low %v130_v59, %v134_v26  ;;  %v12533_v0 = vcombine.high %v73_v35, %v77_v37  ;;  %v12599_v49 = vcombine.high %v138_v38, %v142_v23  ;;  %v154_v9 = vld [vmem:[%s19704_s1 + $0x418] sm:$0xff]  ;;  %v105_v25 = vld [vmem:[%s19704_s1 + $0x290] sm:$0xff] }
 0x329   :  { %v109_v59 = vld [vmem:[%s19704_s1 + $0x2b0] sm:$0xff]  ;;  %v170_v26 = vld [vmem:[%s19704_s1 + $0x498] sm:$0xff] }
 0x32a   :  { %10693 = vmatpush1.bf16.msra.mxu0 %v12492_v58  ;;  %v150_v58 = vld [vmem:[%s19704_s1 + $0x3f8] sm:$0xff] }
 0x32b   :  { %11242 = vmatpush1.bf16.msra.mxu1 %v12558_v27  ;;  %10694 = vmatprep.subr.bf16.mxu0 %v12501_v53  ;;  %v12532_v27 = vcombine.low %v73_v35, %v77_v37  ;;  %v12598_v53 = vcombine.low %v138_v38, %v142_v23  ;;  %v12607_v60 = vcombine.high %v146_v54, %v150_v58  ;;  %v113_v37 = vld [vmem:[%s19704_s1 + $0x2d0] sm:$0xff]  ;;  %v178_v23 = vld [vmem:[%s19704_s1 + $0x4d8] sm:$0xff] }
 0x32c   :  { %11243 = vmatprep.subr.bf16.mxu1 %v12567_v1  ;;  %v12541_v1 = vcombine.high %v81_v52, %v85_v17  ;;  %v117_v38 = vld [vmem:[%s19704_s1 + $0x2f0] sm:$0xff] }
 0x32e   :  { %10695 = vmatpush1.bf16.msra.mxu0 %v12500_v3  ;;  %v158_v3 = vld [vmem:[%s19704_s1 + $0x438] sm:$0xff] }
 0x32f   :  { %11244 = vmatpush1.bf16.msra.mxu1 %v12566_v4  ;;  %10696 = vmatprep.subr.bf16.mxu0 %v12509_v5  ;;  %v12540_v4 = vcombine.low %v81_v52, %v85_v17  ;;  %v12606_v5 = vcombine.low %v146_v54, %v150_v58  ;;  %v12615_v7 = vcombine.high %v154_v9, %v158_v3  ;;  %v121_v17 = vld [vmem:[%s19704_s1 + $0x310] sm:$0xff]  ;;  %v186_v58 = vld [vmem:[%s19704_s1 + $0x518] sm:$0xff] }
 0x330   :  { %11245 = vmatprep.subr.bf16.mxu1 %v12575_v6  ;;  %v12549_v6 = vcombine.high %v89_v62, %v93_v2  ;;  %v125_v54 = vld [vmem:[%s19704_s1 + $0x330] sm:$0xff] }
 0x332   :  { %10697 = vmatpush1.bf16.msra.mxu0 %v12508_v15  ;;  %v166_v15 = vld [vmem:[%s19704_s1 + $0x478] sm:$0xff] }
 0x333   :  { %11246 = vmatpush1.bf16.msra.mxu1 %v12574_v14  ;;  %10698 = vmatprep.subr.bf16.mxu0 %v12517_v18  ;;  %v12548_v14 = vcombine.low %v89_v62, %v93_v2  ;;  %v12614_v18 = vcombine.low %v154_v9, %v158_v3  ;;  %v12623_v21 = vcombine.high %v162_v12, %v166_v15  ;;  %v129_v2 = vld [vmem:[%s19704_s1 + $0x350] sm:$0xff]  ;;  %v194_v3 = vld [vmem:[%s19704_s1 + $0x558] sm:$0xff] }
 0x334   :  { %11247 = vmatprep.subr.bf16.mxu1 %v12583_v19  ;;  %v12557_v19 = vcombine.high %v97_v8, %v101_v10  ;;  %v133_v9 = vld [vmem:[%s19704_s1 + $0x370] sm:$0xff] }
 0x336   :  { %10699 = vmatpush1.bf16.msra.mxu0 %v12516_v28  ;;  %v174_v28 = vld [vmem:[%s19704_s1 + $0x4b8] sm:$0xff] }
 0x337   :  { %11248 = vmatpush1.bf16.msra.mxu1 %v12582_v63  ;;  %10700 = vmatprep.subr.bf16.mxu0 %v12525_v30  ;;  %v12556_v63 = vcombine.low %v97_v8, %v101_v10  ;;  %v12622_v30 = vcombine.low %v162_v12, %v166_v15  ;;  %v12631_v35 = vcombine.high %v170_v26, %v174_v28  ;;  %v137_v10 = vld [vmem:[%s19704_s1 + $0x390] sm:$0xff]  ;;  %v202_v15 = vld [vmem:[%s19704_s1 + $0x598] sm:$0xff] }
 0x338   :  { %11249 = vmatprep.subr.bf16.mxu1 %v12591_v33  ;;  %v12565_v33 = vcombine.high %v105_v25, %v109_v59  ;;  %v141_v12 = vld [vmem:[%s19704_s1 + $0x3b0] sm:$0xff] }
 0x33a   :  { %10701 = vmatpush1.bf16.msra.mxu0 %v12524_v42  ;;  %v182_v42 = vld [vmem:[%s19704_s1 + $0x4f8] sm:$0xff] }
 0x33b   :  { %11250 = vmatpush1.bf16.msra.mxu1 %v12590_v43  ;;  %10702 = vmatprep.subr.bf16.mxu0 %v12533_v0  ;;  %v12564_v43 = vcombine.low %v105_v25, %v109_v59  ;;  %v12630_v0 = vcombine.low %v170_v26, %v174_v28  ;;  %v12639_v52 = vcombine.high %v178_v23, %v182_v42  ;;  %v145_v59 = vld [vmem:[%s19704_s1 + $0x3d0] sm:$0xff]  ;;  %v210_v28 = vld [vmem:[%s19704_s1 + $0x5d8] sm:$0xff] }
 0x33c   :  { %11251 = vmatprep.subr.bf16.mxu1 %v12599_v49  ;;  %v12573_v49 = vcombine.high %v113_v37, %v117_v38  ;;  %v149_v26 = vld [vmem:[%s19704_s1 + $0x3f0] sm:$0xff] }
 0x33e   :  { %10703 = vmatpush1.bf16.msra.mxu0 %v12532_v27  ;;  %v190_v27 = vld [vmem:[%s19704_s1 + $0x538] sm:$0xff] }
 0x33f   :  { %11252 = vmatpush1.bf16.msra.mxu1 %v12598_v53  ;;  %10704 = vmatprep.subr.bf16.mxu0 %v12541_v1  ;;  %v12572_v53 = vcombine.low %v113_v37, %v117_v38  ;;  %v12638_v1 = vcombine.low %v178_v23, %v182_v42  ;;  %v12647_v62 = vcombine.high %v186_v58, %v190_v27  ;;  %v153_v38 = vld [vmem:[%s19704_s1 + $0x410] sm:$0xff]  ;;  %v218_v42 = vld [vmem:[%s19704_s1 + $0x618] sm:$0xff] }
 0x340   :  { %11253 = vmatprep.subr.bf16.mxu1 %v12607_v60  ;;  %v12581_v60 = vcombine.high %v121_v17, %v125_v54  ;;  %v157_v23 = vld [vmem:[%s19704_s1 + $0x430] sm:$0xff] }
 0x342   :  { %10705 = vmatpush1.bf16.msra.mxu0 %v12540_v4  ;;  %v198_v4 = vld [vmem:[%s19704_s1 + $0x578] sm:$0xff] }
 0x343   :  { %11254 = vmatpush1.bf16.msra.mxu1 %v12606_v5  ;;  %10706 = vmatprep.subr.bf16.mxu0 %v12549_v6  ;;  %v12580_v5 = vcombine.low %v121_v17, %v125_v54  ;;  %v12646_v6 = vcombine.low %v186_v58, %v190_v27  ;;  %v12655_v8 = vcombine.high %v194_v3, %v198_v4  ;;  %v161_v54 = vld [vmem:[%s19704_s1 + $0x450] sm:$0xff]  ;;  %v226_v27 = vld [vmem:[%s19704_s1 + $0x658] sm:$0xff] }
 0x344   :  { %11264 = vmatprep.subr.bf16.mxu1 %v12615_v7  ;;  %v12589_v7 = vcombine.high %v129_v2, %v133_v9  ;;  %v165_v58 = vld [vmem:[%s19704_s1 + $0x470] sm:$0xff] }
 0x346   :  { %10707 = vmatpush1.bf16.msra.mxu0 %v12548_v14  ;;  %11256 = vmatmul.mubr.bf16.vlgmr.msra.gmra.mrb[4].mxu1 %v14724_v22  ;;  %v206_v14 = vld [vmem:[%s19704_s1 + $0x5b8] sm:$0xff] }
 0x347   :  { %11265 = vmatpush1.bf16.msra.mxu1 %v12614_v18  ;;  %10708 = vmatprep.subr.bf16.mxu0 %v12557_v19  ;;  %v12588_v18 = vcombine.low %v129_v2, %v133_v9  ;;  %v12654_v19 = vcombine.low %v194_v3, %v198_v4  ;;  %v12663_v25 = vcombine.high %v202_v15, %v206_v14  ;;  %v169_v9 = vld [vmem:[%s19704_s1 + $0x490] sm:$0xff]  ;;  %v234_v4 = vld [vmem:[%s19704_s1 + $0x698] sm:$0xff] }
 0x348   :  { %11266 = vmatprep.subr.bf16.mxu1 %v12623_v21  ;;  %11296 = vmatprep.mubr.bf16.mxu1 %v14746_v32  ;;  %v12597_v21 = vcombine.high %v137_v10, %v141_v12  ;;  %v173_v3 = vld [vmem:[%s19704_s1 + $0x4b0] sm:$0xff] }
 0x34a   :  { %10709 = vmatpush1.bf16.msra.mxu0 %v12556_v63  ;;  %v214_v63 = vld [vmem:[%s19704_s1 + $0x5f8] sm:$0xff] }
 0x34b   :  { %11267 = vmatpush1.bf16.msra.mxu1 %v12622_v30  ;;  %10710 = vmatprep.subr.bf16.mxu0 %v12565_v33  ;;  %v12596_v30 = vcombine.low %v137_v10, %v141_v12  ;;  %v12662_v33 = vcombine.low %v202_v15, %v206_v14  ;;  %v12671_v37 = vcombine.high %v210_v28, %v214_v63  ;;  %v181_v12 = vld [vmem:[%s19704_s1 + $0x4f0] sm:$0xff]  ;;  %v242_v15 = vld [vmem:[%s19704_s1 + $0x6d8] sm:$0xff] }
 0x34c   :  { %11268 = vmatprep.subr.bf16.mxu1 %v12631_v35  ;;  %v12605_v35 = vcombine.high %v145_v59, %v149_v26  ;;  %v12628_v14 = vcombine.low %v169_v9, %v173_v3 }
 0x34e   :  { %10711 = vmatpush1.bf16.msra.mxu0 %v12564_v43  ;;  %v222_v43 = vld [vmem:[%s19704_s1 + $0x638] sm:$0xff] }
 0x34f   :  { %11269 = vmatpush1.bf16.msra.mxu1 %v12630_v0  ;;  %10712 = vmatprep.subr.bf16.mxu0 %v12573_v49  ;;  %v12604_v0 = vcombine.low %v145_v59, %v149_v26  ;;  %v12670_v49 = vcombine.low %v210_v28, %v214_v63  ;;  %v12679_v17 = vcombine.high %v218_v42, %v222_v43  ;;  %v189_v59 = vld [vmem:[%s19704_s1 + $0x530] sm:$0xff]  ;;  %v250_v26 = vld [vmem:[%s19704_s1 + $0x718] sm:$0xff] }
 0x350   :  { %11270 = vmatprep.subr.bf16.mxu1 %v12639_v52  ;;  %v12613_v52 = vcombine.high %v153_v38, %v157_v23  ;;  %v254_v28 = vld [vmem:[%s19704_s1 + $0x738] sm:$0xff] }
 0x352   :  { %10713 = vmatpush1.bf16.msra.mxu0 %v12572_v53  ;;  %v230_v53 = vld [vmem:[%s19704_s1 + $0x678] sm:$0xff] }
 0x353   :  { %11271 = vmatpush1.bf16.msra.mxu1 %v12638_v1  ;;  %10714 = vmatprep.subr.bf16.mxu0 %v12581_v60  ;;  %v12612_v1 = vcombine.low %v153_v38, %v157_v23  ;;  %v12678_v60 = vcombine.low %v218_v42, %v222_v43  ;;  %v12687_v2 = vcombine.high %v226_v27, %v230_v53  ;;  %v197_v38 = vld [vmem:[%s19704_s1 + $0x570] sm:$0xff]  ;;  %v258_v23 = vld [vmem:[%s19704_s1 + $0x758] sm:$0xff] }
 0x354   :  { %11272 = vmatprep.subr.bf16.mxu1 %v12647_v62  ;;  %v12621_v62 = vcombine.high %v161_v54, %v165_v58  ;;  %v262_v42 = vld [vmem:[%s19704_s1 + $0x778] sm:$0xff] }
 0x356   :  { %10715 = vmatpush1.bf16.msra.mxu0 %v12580_v5  ;;  %v238_v5 = vld [vmem:[%s19704_s1 + $0x6b8] sm:$0xff] }
 0x357   :  { %11273 = vmatpush1.bf16.msra.mxu1 %v12646_v6  ;;  %10716 = vmatprep.subr.bf16.mxu0 %v12589_v7  ;;  %v12620_v6 = vcombine.low %v161_v54, %v165_v58  ;;  %v12686_v7 = vcombine.low %v226_v27, %v230_v53  ;;  %v12695_v10 = vcombine.high %v234_v4, %v238_v5  ;;  %v205_v54 = vld [vmem:[%s19704_s1 + $0x5b0] sm:$0xff]  ;;  %v266_v58 = vld [vmem:[%s19704_s1 + $0x798] sm:$0xff] }
 0x358   :  { %11274 = vmatprep.subr.bf16.mxu1 %v12655_v8  ;;  %v12629_v8 = vcombine.high %v169_v9, %v173_v3  ;;  %v270_v27 = vld [vmem:[%s19704_s1 + $0x7b8] sm:$0xff]  ;;  %v213_v9 = vld [vmem:[%s19704_s1 + $0x5f0] sm:$0xff] }
 0x359   :  { %v274_v3 = vld [vmem:[%s19704_s1 + $0x7d8] sm:$0xff] }
 0x35a   :  { %10717 = vmatpush1.bf16.msra.mxu0 %v12588_v18  ;;  %v12694_v18 = vcombine.low %v234_v4, %v238_v5  ;;  %v278_v4 = vld [vmem:[%s19704_s1 + $0x7f8] sm:$0xff] }
 0x35b   :  { %11275 = vmatpush1.bf16.msra.mxu1 %v12654_v19  ;;  %10718 = vmatprep.subr.bf16.mxu0 %v12597_v21 }
 0x35c   :  { %11276 = vmatprep.subr.bf16.mxu1 %v12663_v25  ;;  %v185_v25 = vld [vmem:[%s19704_s1 + $0x510] sm:$0xff] }
 0x35d   :  { %v12644_v43 = vcombine.low %v185_v25, %v189_v59 }
 0x35e   :  { %10719 = vmatpush1.bf16.msra.mxu0 %v12596_v30 }
 0x35f   :  { %11277 = vmatpush1.bf16.msra.mxu1 %v12662_v33  ;;  %10720 = vmatprep.subr.bf16.mxu0 %v12605_v35  ;;  %v12645_v33 = vcombine.high %v185_v25, %v189_v59  ;;  %v12711_v35 = vcombine.high %v250_v26, %v254_v28  ;;  %v229_v25 = vld [vmem:[%s19704_s1 + $0x670] sm:$0xff]  ;;  %v290_v59 = vld [vmem:[%s19704_s1 + $0x858] sm:$0xff] }
 0x360   :  { %11278 = vmatprep.subr.bf16.mxu1 %v12671_v37  ;;  %v193_v37 = vld [vmem:[%s19704_s1 + $0x550] sm:$0xff] }
 0x361   :  { %v12652_v53 = vcombine.low %v193_v37, %v197_v38 }
 0x362   :  { %10721 = vmatpush1.bf16.msra.mxu0 %v12604_v0  ;;  %v12710_v0 = vcombine.low %v250_v26, %v254_v28  ;;  %v294_v26 = vld [vmem:[%s19704_s1 + $0x878] sm:$0xff] }
 0x363   :  { %11279 = vmatpush1.bf16.msra.mxu1 %v12670_v49  ;;  %10731 = vmatprep.subr.bf16.mxu0 %v12613_v52  ;;  %v12653_v49 = vcombine.high %v193_v37, %v197_v38  ;;  %v12719_v52 = vcombine.high %v258_v23, %v262_v42  ;;  %v237_v37 = vld [vmem:[%s19704_s1 + $0x6b0] sm:$0xff]  ;;  %v298_v38 = vld [vmem:[%s19704_s1 + $0x898] sm:$0xff] }
 0x364   :  { %11280 = vmatprep.subr.bf16.mxu1 %v12679_v17  ;;  %v201_v17 = vld [vmem:[%s19704_s1 + $0x590] sm:$0xff] }
 0x365   :  { %10723 = vmatmul.mubr.bf16.vlgmr.msra.gmra.mrb[8].mxu0 %v14724_v22  ;;  %v177_v22 = vld [vmem:[%s19704_s1 + $0x4d0] sm:$0xff]  ;;  %v12660_v5 = vcombine.low %v201_v17, %v205_v54 }
 0x366   :  { %10732 = vmatpush1.bf16.msra.mxu0 %v12612_v1  ;;  %10763 = vmatprep.mubr.bf16.mxu0 %v14746_v32  ;;  %v246_v32 = vld [vmem:[%s19704_s1 + $0x6f8] sm:$0xff]  ;;  %v12637_v19 = vcombine.high %v177_v22, %v181_v12  ;;  %v12636_v63 = vcombine.low %v177_v22, %v181_v12  ;;  %v12718_v1 = vcombine.low %v258_v23, %v262_v42  ;;  %v221_v22 = vld [vmem:[%s19704_s1 + $0x630] sm:$0xff] }
 0x367   :  { %11281 = vmatpush1.bf16.msra.mxu1 %v12678_v60  ;;  %10733 = vmatprep.subr.bf16.mxu0 %v12621_v62  ;;  %v12703_v21 = vcombine.high %v242_v15, %v246_v32  ;;  %v12702_v30 = vcombine.low %v242_v15, %v246_v32  ;;  %v12661_v60 = vcombine.high %v201_v17, %v205_v54  ;;  %v282_v12 = vld [vmem:[%s19704_s1 + $0x818] sm:$0xff]  ;;  %v245_v17 = vld [vmem:[%s19704_s1 + $0x6f0] sm:$0xff] }
 0x368   :  { %11282 = vmatprep.subr.bf16.mxu1 %v12687_v2  ;;  %v12727_v62 = vcombine.high %v266_v58, %v270_v27  ;;  %v209_v2 = vld [vmem:[%s19704_s1 + $0x5d0] sm:$0xff]  ;;  %v286_v15 = vld [vmem:[%s19704_s1 + $0x838] sm:$0xff] }
 0x369   :  { %v12668_v32 = vcombine.low %v209_v2, %v213_v9  ;;  %v302_v23 = vld [vmem:[%s19704_s1 + $0x8b8] sm:$0xff] }
 0x36a   :  { %10734 = vmatpush1.bf16.msra.mxu0 %v12620_v6  ;;  %v12726_v6 = vcombine.low %v266_v58, %v270_v27  ;;  %v306_v54 = vld [vmem:[%s19704_s1 + $0x8d8] sm:$0xff] }
 0x36b   :  { %11283 = vmatpush1.bf16.msra.mxu1 %v12686_v7  ;;  %10735 = vmatprep.subr.bf16.mxu0 %v12629_v8  ;;  %v12669_v7 = vcombine.high %v209_v2, %v213_v9  ;;  %v12735_v8 = vcombine.high %v274_v3, %v278_v4  ;;  %v310_v58 = vld [vmem:[%s19704_s1 + $0x8f8] sm:$0xff]  ;;  %v253_v2 = vld [vmem:[%s19704_s1 + $0x730] sm:$0xff] }
 0x36c   :  { %11284 = vmatprep.subr.bf16.mxu1 %v12695_v10  ;;  %v217_v10 = vld [vmem:[%s19704_s1 + $0x610] sm:$0xff]  ;;  %v314_v9 = vld [vmem:[%s19704_s1 + $0x918] sm:$0xff] }
 0x36d   :  { %v12676_v28 = vcombine.low %v217_v10, %v221_v22 }
 0x36e   :  { %10736 = vmatpush1.bf16.msra.mxu0 %v12628_v14  ;;  %v12734_v14 = vcombine.low %v274_v3, %v278_v4  ;;  %v318_v3 = vld [vmem:[%s19704_s1 + $0x938] sm:$0xff] }
 0x36f   :  { %11285 = vmatpush1.bf16.msra.mxu1 %v12694_v18  ;;  %10737 = vmatprep.subr.bf16.mxu0 %v12637_v19  ;;  %v12677_v18 = vcombine.high %v217_v10, %v221_v22  ;;  %v12743_v19 = vcombine.high %v282_v12, %v286_v15  ;;  %v261_v10 = vld [vmem:[%s19704_s1 + $0x770] sm:$0xff]  ;;  %v322_v22 = vld [vmem:[%s19704_s1 + $0x958] sm:$0xff] }
 0x370   :  { %11286 = vmatprep.subr.bf16.mxu1 %v12703_v21  ;;  %v225_v21 = vld [vmem:[%s19704_s1 + $0x650] sm:$0xff] }
 0x371   :  { %v12684_v42 = vcombine.low %v225_v21, %v229_v25 }
 0x372   :  { %10738 = vmatpush1.bf16.msra.mxu0 %v12636_v63  ;;  %v12742_v63 = vcombine.low %v282_v12, %v286_v15  ;;  %v326_v12 = vld [vmem:[%s19704_s1 + $0x978] sm:$0xff] }
 0x373   :  { %11287 = vmatpush1.bf16.msra.mxu1 %v12702_v30  ;;  %10739 = vmatprep.subr.bf16.mxu0 %v12645_v33  ;;  %v12685_v30 = vcombine.high %v225_v21, %v229_v25  ;;  %v12751_v33 = vcombine.high %v290_v59, %v294_v26  ;;  %v269_v21 = vld [vmem:[%s19704_s1 + $0x7b0] sm:$0xff]  ;;  %v330_v25 = vld [vmem:[%s19704_s1 + $0x998] sm:$0xff] }
 0x374   :  { %11288 = vmatprep.subr.bf16.mxu1 %v12711_v35  ;;  %v233_v35 = vld [vmem:[%s19704_s1 + $0x690] sm:$0xff] }
 0x375   :  { %v12692_v27 = vcombine.low %v233_v35, %v237_v37 }
 0x376   :  { %10740 = vmatpush1.bf16.msra.mxu0 %v12644_v43  ;;  %v12750_v43 = vcombine.low %v290_v59, %v294_v26  ;;  %v334_v59 = vld [vmem:[%s19704_s1 + $0x9b8] sm:$0xff] }
 0x377   :  { %11289 = vmatpush1.bf16.msra.mxu1 %v12710_v0  ;;  %10741 = vmatprep.subr.bf16.mxu0 %v12653_v49  ;;  %v12693_v0 = vcombine.high %v233_v35, %v237_v37  ;;  %v12759_v49 = vcombine.high %v298_v38, %v302_v23  ;;  %v277_v35 = vld [vmem:[%s19704_s1 + $0x7f0] sm:$0xff]  ;;  %v338_v37 = vld [vmem:[%s19704_s1 + $0x9d8] sm:$0xff] }
 0x378   :  { %11290 = vmatprep.subr.bf16.mxu1 %v12719_v52  ;;  %v241_v52 = vld [vmem:[%s19704_s1 + $0x6d0] sm:$0xff] }
 0x379   :  { %v12700_v4 = vcombine.low %v241_v52, %v245_v17 }
 0x37a   :  { %10742 = vmatpush1.bf16.msra.mxu0 %v12652_v53  ;;  %v12758_v53 = vcombine.low %v298_v38, %v302_v23  ;;  %v342_v38 = vld [vmem:[%s19704_s1 + $0x9f8] sm:$0xff] }
 0x37b   :  { %11291 = vmatpush1.bf16.msra.mxu1 %v12718_v1  ;;  %10743 = vmatprep.subr.bf16.mxu0 %v12661_v60  ;;  %v12701_v1 = vcombine.high %v241_v52, %v245_v17  ;;  %v12767_v60 = vcombine.high %v306_v54, %v310_v58  ;;  %v285_v52 = vld [vmem:[%s19704_s1 + $0x830] sm:$0xff]  ;;  %v346_v17 = vld [vmem:[%s19704_s1 + $0xa18] sm:$0xff] }
 0x37c   :  { %11292 = vmatprep.subr.bf16.mxu1 %v12727_v62  ;;  %v249_v62 = vld [vmem:[%s19704_s1 + $0x710] sm:$0xff] }
 0x37d   :  { %v12708_v15 = vcombine.low %v249_v62, %v253_v2 }
 0x37e   :  { %10744 = vmatpush1.bf16.msra.mxu0 %v12660_v5  ;;  %v12766_v5 = vcombine.low %v306_v54, %v310_v58  ;;  %v350_v54 = vld [vmem:[%s19704_s1 + $0xa38] sm:$0xff] }
 0x37f   :  { %11293 = vmatpush1.bf16.msra.mxu1 %v12726_v6  ;;  %10745 = vmatprep.subr.bf16.mxu0 %v12669_v7  ;;  %v12709_v6 = vcombine.high %v249_v62, %v253_v2  ;;  %v12775_v7 = vcombine.high %v314_v9, %v318_v3  ;;  %v293_v62 = vld [vmem:[%s19704_s1 + $0x870] sm:$0xff]  ;;  %v354_v2 = vld [vmem:[%s19704_s1 + $0xa58] sm:$0xff] }
 0x380   :  { %11294 = vmatprep.subr.bf16.mxu1 %v12735_v8  ;;  %v257_v8 = vld [vmem:[%s19704_s1 + $0x750] sm:$0xff] }
 0x381   :  { %v12716_v26 = vcombine.low %v257_v8, %v261_v10 }
 0x382   :  { %10746 = vmatpush1.bf16.msra.mxu0 %v12668_v32  ;;  %v12774_v32 = vcombine.low %v314_v9, %v318_v3  ;;  %v358_v9 = vld [vmem:[%s19704_s1 + $0xa78] sm:$0xff] }
 0x383   :  { %11295 = vmatpush1.bf16.msra.mxu1 %v12734_v14  ;;  %10747 = vmatprep.subr.bf16.mxu0 %v12677_v18  ;;  %v12717_v14 = vcombine.high %v257_v8, %v261_v10  ;;  %v12783_v18 = vcombine.high %v322_v22, %v326_v12  ;;  %v301_v8 = vld [vmem:[%s19704_s1 + $0x8b0] sm:$0xff]  ;;  %v362_v10 = vld [vmem:[%s19704_s1 + $0xa98] sm:$0xff] }
 0x384   :  { %11305 = vmatprep.subr.bf16.mxu1 %v12743_v19  ;;  %v265_v19 = vld [vmem:[%s19704_s1 + $0x790] sm:$0xff] }
 0x385   :  { %v12724_v23 = vcombine.low %v265_v19, %v269_v21 }
 0x386   :  { %10748 = vmatpush1.bf16.msra.mxu0 %v12676_v28  ;;  %11297 = vmatmul.mubr.bf16.vlgmr.msra.gmra.mrb[4].mxu1 %v14938_v36  ;;  %v12782_v28 = vcombine.low %v322_v22, %v326_v12  ;;  %v366_v22 = vld [vmem:[%s19704_s1 + $0xab8] sm:$0xff] }
 0x387   :  { %11306 = vmatpush1.bf16.msra.mxu1 %v12742_v63  ;;  %10749 = vmatprep.subr.bf16.mxu0 %v12685_v30  ;;  %v12725_v63 = vcombine.high %v265_v19, %v269_v21  ;;  %v12791_v30 = vcombine.high %v330_v25, %v334_v59  ;;  %v370_v19 = vld [vmem:[%s19704_s1 + $0xad8] sm:$0xff] }
 0x388   :  { %11307 = vmatprep.subr.bf16.mxu1 %v12751_v33  ;;  %11337 = vmatprep.mubr.bf16.mxu1 %v14950_v44  ;;  %v273_v33 = vld [vmem:[%s19704_s1 + $0x7d0] sm:$0xff] }
 0x389   :  { %v12732_v58 = vcombine.low %v273_v33, %v277_v35 }
 0x38a   :  { %10750 = vmatpush1.bf16.msra.mxu0 %v12684_v42  ;;  %v12790_v42 = vcombine.low %v330_v25, %v334_v59  ;;  %v12822_v25 = vcombine.low %v362_v10, %v366_v22 }
 0x38b   :  { %11308 = vmatpush1.bf16.msra.mxu1 %v12750_v43  ;;  %10751 = vmatprep.subr.bf16.mxu0 %v12693_v0  ;;  %v12733_v43 = vcombine.high %v273_v33, %v277_v35  ;;  %v12799_v0 = vcombine.high %v338_v37, %v342_v38  ;;  %v382_v33 = vld [vmem:[%s19704_s1 + $0xb38] sm:$0xff] }
 0x38c   :  { %11309 = vmatprep.subr.bf16.mxu1 %v12759_v49  ;;  %v281_v49 = vld [vmem:[%s19704_s1 + $0x810] sm:$0xff] }
 0x38d   :  { %v12740_v3 = vcombine.low %v281_v49, %v285_v52 }
 0x38e   :  { %10752 = vmatpush1.bf16.msra.mxu0 %v12692_v27  ;;  %v12798_v27 = vcombine.low %v338_v37, %v342_v38 }
 0x38f   :  { %11310 = vmatpush1.bf16.msra.mxu1 %v12758_v53  ;;  %10753 = vmatprep.subr.bf16.mxu0 %v12701_v1  ;;  %v12741_v53 = vcombine.high %v281_v49, %v285_v52  ;;  %v12807_v1 = vcombine.high %v346_v17, %v350_v54  ;;  %v390_v49 = vld [vmem:[%s19704_s1 + $0xb78] sm:$0xff] }
 0x390   :  { %11311 = vmatprep.subr.bf16.mxu1 %v12767_v60  ;;  %v289_v60 = vld [vmem:[%s19704_s1 + $0x850] sm:$0xff] }
 0x391   :  { %v12748_v12 = vcombine.low %v289_v60, %v293_v62 }
 0x392   :  { %10754 = vmatpush1.bf16.msra.mxu0 %v12700_v4  ;;  %v12806_v4 = vcombine.low %v346_v17, %v350_v54 }
 0x393   :  { %11312 = vmatpush1.bf16.msra.mxu1 %v12766_v5  ;;  %10755 = vmatprep.subr.bf16.mxu0 %v12709_v6  ;;  %v12749_v5 = vcombine.high %v289_v60, %v293_v62  ;;  %v12815_v6 = vcombine.high %v354_v2, %v358_v9  ;;  %v398_v60 = vld [vmem:[%s19704_s1 + $0xbb8] sm:$0xff] }
 0x394   :  { %11313 = vmatprep.subr.bf16.mxu1 %v12775_v7  ;;  %v297_v7 = vld [vmem:[%s19704_s1 + $0x890] sm:$0xff] }
 0x395   :  { %v12756_v21 = vcombine.low %v297_v7, %v301_v8 }
 0x396   :  { %10756 = vmatpush1.bf16.msra.mxu0 %v12708_v15  ;;  %v12814_v15 = vcombine.low %v354_v2, %v358_v9 }
 0x397   :  { %11314 = vmatpush1.bf16.msra.mxu1 %v12774_v32  ;;  %10757 = vmatprep.subr.bf16.mxu0 %v12717_v14  ;;  %v12757_v32 = vcombine.high %v297_v7, %v301_v8  ;;  %v12823_v14 = vcombine.high %v362_v10, %v366_v22  ;;  %v406_v7 = vld [vmem:[%s19704_s1 + $0xbf8] sm:$0xff] }
 0x398   :  { %11315 = vmatprep.subr.bf16.mxu1 %v12783_v18  ;;  %v309_v18 = vld [vmem:[%s19704_s1 + $0x8f0] sm:$0xff] }
 0x39a   :  { %10758 = vmatpush1.bf16.msra.mxu0 %v12716_v26 }
 0x39b   :  { %11316 = vmatpush1.bf16.msra.mxu1 %v12782_v28  ;;  %10759 = vmatprep.subr.bf16.mxu0 %v12725_v63  ;;  %v313_v28 = vld [vmem:[%s19704_s1 + $0x910] sm:$0xff] }
 0x39c   :  { %11317 = vmatprep.subr.bf16.mxu1 %v12791_v30  ;;  %v317_v63 = vld [vmem:[%s19704_s1 + $0x930] sm:$0xff]  ;;  %v378_v30 = vld [vmem:[%s19704_s1 + $0xb18] sm:$0xff] }
 0x39d   :  { %v12773_v38 = vcombine.high %v313_v28, %v317_v63  ;;  %v12772_v52 = vcombine.low %v313_v28, %v317_v63  ;;  %v12838_v17 = vcombine.low %v378_v30, %v382_v33  ;;  %v422_v28 = vld [vmem:[%s19704_s1 + $0xc78] sm:$0xff] }
 0x39e   :  { %10760 = vmatpush1.bf16.msra.mxu0 %v12724_v23  ;;  %v12839_v23 = vcombine.high %v378_v30, %v382_v33 }
 0x39f   :  { %11318 = vmatpush1.bf16.msra.mxu1 %v12790_v42  ;;  %10761 = vmatprep.subr.bf16.mxu0 %v12733_v43  ;;  %v321_v42 = vld [vmem:[%s19704_s1 + $0x950] sm:$0xff] }
 0x3a0   :  { %11319 = vmatprep.subr.bf16.mxu1 %v12799_v0  ;;  %v325_v43 = vld [vmem:[%s19704_s1 + $0x970] sm:$0xff]  ;;  %v386_v0 = vld [vmem:[%s19704_s1 + $0xb58] sm:$0xff] }
 0x3a1   :  { %v12781_v54 = vcombine.high %v321_v42, %v325_v43  ;;  %v12780_v62 = vcombine.low %v321_v42, %v325_v43  ;;  %v12846_v2 = vcombine.low %v386_v0, %v390_v49  ;;  %v430_v42 = vld [vmem:[%s19704_s1 + $0xcb8] sm:$0xff] }
 0x3a2   :  { %10762 = vmatpush1.bf16.msra.mxu0 %v12732_v58  ;;  %v12847_v58 = vcombine.high %v386_v0, %v390_v49 }
 0x3a3   :  { %11320 = vmatpush1.bf16.msra.mxu1 %v12798_v27  ;;  %10772 = vmatprep.subr.bf16.mxu0 %v12741_v53  ;;  %v329_v27 = vld [vmem:[%s19704_s1 + $0x990] sm:$0xff] }
 0x3a4   :  { %11321 = vmatprep.subr.bf16.mxu1 %v12807_v1  ;;  %v333_v53 = vld [vmem:[%s19704_s1 + $0x9b0] sm:$0xff]  ;;  %v394_v1 = vld [vmem:[%s19704_s1 + $0xb98] sm:$0xff] }
 0x3a5   :  { %10764 = vmatmul.mubr.bf16.vlgmr.msra.gmra.mrb[8].mxu0 %v14938_v36  ;;  %v305_v36 = vld [vmem:[%s19704_s1 + $0x8d0] sm:$0xff]  ;;  %v12789_v9 = vcombine.high %v329_v27, %v333_v53  ;;  %v12788_v8 = vcombine.low %v329_v27, %v333_v53  ;;  %v12854_v10 = vcombine.low %v394_v1, %v398_v60  ;;  %v438_v27 = vld [vmem:[%s19704_s1 + $0xcf8] sm:$0xff] }
 0x3a6   :  { %10773 = vmatpush1.bf16.msra.mxu0 %v12740_v3  ;;  %10804 = vmatprep.mubr.bf16.mxu0 %v14950_v44  ;;  %v374_v44 = vld [vmem:[%s19704_s1 + $0xaf8] sm:$0xff]  ;;  %v12765_v59 = vcombine.high %v305_v36, %v309_v18  ;;  %v12764_v35 = vcombine.low %v305_v36, %v309_v18  ;;  %v12855_v3 = vcombine.high %v394_v1, %v398_v60 }
 0x3a7   :  { %11322 = vmatpush1.bf16.msra.mxu1 %v12806_v4  ;;  %10774 = vmatprep.subr.bf16.mxu0 %v12749_v5  ;;  %v12831_v26 = vcombine.high %v370_v19, %v374_v44  ;;  %v12830_v37 = vcombine.low %v370_v19, %v374_v44  ;;  %v337_v4 = vld [vmem:[%s19704_s1 + $0x9d0] sm:$0xff]  ;;  %v414_v36 = vld [vmem:[%s19704_s1 + $0xc38] sm:$0xff] }
 0x3a8   :  { %11323 = vmatprep.subr.bf16.mxu1 %v12815_v6  ;;  %v341_v5 = vld [vmem:[%s19704_s1 + $0x9f0] sm:$0xff]  ;;  %v402_v6 = vld [vmem:[%s19704_s1 + $0xbd8] sm:$0xff] }
 0x3a9   :  { %v12797_v22 = vcombine.high %v337_v4, %v341_v5  ;;  %v12796_v18 = vcombine.low %v337_v4, %v341_v5  ;;  %v12862_v19 = vcombine.low %v402_v6, %v406_v7  ;;  %v446_v4 = vld [vmem:[%s19704_s1 + $0xd38] sm:$0xff] }
 0x3aa   :  { %10775 = vmatpush1.bf16.msra.mxu0 %v12748_v12  ;;  %v12863_v12 = vcombine.high %v402_v6, %v406_v7 }
 0x3ab   :  { %11324 = vmatpush1.bf16.msra.mxu1 %v12814_v15  ;;  %10776 = vmatprep.subr.bf16.mxu0 %v12757_v32  ;;  %v345_v15 = vld [vmem:[%s19704_s1 + $0xa10] sm:$0xff] }
 0x3ac   :  { %11325 = vmatprep.subr.bf16.mxu1 %v12823_v14  ;;  %v349_v32 = vld [vmem:[%s19704_s1 + $0xa30] sm:$0xff]  ;;  %v410_v14 = vld [vmem:[%s19704_s1 + $0xc18] sm:$0xff] }
 0x3ad   :  { %v12805_v44 = vcombine.high %v345_v15, %v349_v32  ;;  %v12804_v63 = vcombine.low %v345_v15, %v349_v32  ;;  %v12870_v30 = vcombine.low %v410_v14, %v414_v36  ;;  %v454_v15 = vld [vmem:[%s19704_s1 + $0xd78] sm:$0xff] }
 0x3ae   :  { %10777 = vmatpush1.bf16.msra.mxu0 %v12756_v21  ;;  %v12871_v21 = vcombine.high %v410_v14, %v414_v36 }
 0x3af   :  { %11326 = vmatpush1.bf16.msra.mxu1 %v12822_v25  ;;  %10778 = vmatprep.subr.bf16.mxu0 %v12765_v59  ;;  %v353_v25 = vld [vmem:[%s19704_s1 + $0xa50] sm:$0xff] }
 0x3b0   :  { %11327 = vmatprep.subr.bf16.mxu1 %v12831_v26  ;;  %v357_v59 = vld [vmem:[%s19704_s1 + $0xa70] sm:$0xff]  ;;  %v418_v26 = vld [vmem:[%s19704_s1 + $0xc58] sm:$0xff] }
 0x3b1   :  { %v12813_v33 = vcombine.high %v353_v25, %v357_v59  ;;  %v12812_v43 = vcombine.low %v353_v25, %v357_v59  ;;  %v12878_v0 = vcombine.low %v418_v26, %v422_v28  ;;  %v462_v25 = vld [vmem:[%s19704_s1 + $0xdb8] sm:$0xff] }
 0x3b2   :  { %10779 = vmatpush1.bf16.msra.mxu0 %v12764_v35  ;;  %v12879_v35 = vcombine.high %v418_v26, %v422_v28 }
 0x3b3   :  { %11328 = vmatpush1.bf16.msra.mxu1 %v12830_v37  ;;  %10780 = vmatprep.subr.bf16.mxu0 %v12773_v38  ;;  %v361_v37 = vld [vmem:[%s19704_s1 + $0xa90] sm:$0xff] }
 0x3b4   :  { %11329 = vmatprep.subr.bf16.mxu1 %v12839_v23  ;;  %v365_v38 = vld [vmem:[%s19704_s1 + $0xab0] sm:$0xff]  ;;  %v426_v23 = vld [vmem:[%s19704_s1 + $0xc98] sm:$0xff] }
 0x3b5   :  { %v12821_v49 = vcombine.high %v361_v37, %v365_v38  ;;  %v12820_v53 = vcombine.low %v361_v37, %v365_v38  ;;  %v12886_v1 = vcombine.low %v426_v23, %v430_v42  ;;  %v466_v37 = vld [vmem:[%s19704_s1 + $0xdd8] sm:$0xff] }
 0x3b6   :  { %10781 = vmatpush1.bf16.msra.mxu0 %v12772_v52  ;;  %v12887_v52 = vcombine.high %v426_v23, %v430_v42  ;;  %v470_v38 = vld [vmem:[%s19704_s1 + $0xdf8] sm:$0xff] }
 0x3b7   :  { %11330 = vmatpush1.bf16.msra.mxu1 %v12838_v17  ;;  %10782 = vmatprep.subr.bf16.mxu0 %v12781_v54  ;;  %v369_v17 = vld [vmem:[%s19704_s1 + $0xad0] sm:$0xff] }
 0x3b8   :  { %11331 = vmatprep.subr.bf16.mxu1 %v12847_v58  ;;  %v373_v54 = vld [vmem:[%s19704_s1 + $0xaf0] sm:$0xff]  ;;  %v434_v58 = vld [vmem:[%s19704_s1 + $0xcd8] sm:$0xff] }
 0x3b9   :  { %v12829_v60 = vcombine.high %v369_v17, %v373_v54  ;;  %v12828_v5 = vcombine.low %v369_v17, %v373_v54  ;;  %v12894_v6 = vcombine.low %v434_v58, %v438_v27  ;;  %v12927_v17 = vcombine.high %v466_v37, %v470_v38  ;;  %v409_v54 = vld [vmem:[%s19704_s1 + $0xc10] sm:$0xff] }
 0x3ba   :  { %10783 = vmatpush1.bf16.msra.mxu0 %v12780_v62  ;;  %v12895_v62 = vcombine.high %v434_v58, %v438_v27  ;;  %v413_v58 = vld [vmem:[%s19704_s1 + $0xc30] sm:$0xff]  ;;  %v474_v27 = vld [vmem:[%s19704_s1 + $0xe18] sm:$0xff] }
 0x3bb   :  { %11332 = vmatpush1.bf16.msra.mxu1 %v12846_v2  ;;  %10784 = vmatprep.subr.bf16.mxu0 %v12789_v9  ;;  %v377_v2 = vld [vmem:[%s19704_s1 + $0xb10] sm:$0xff] }
 0x3bc   :  { %11333 = vmatprep.subr.bf16.mxu1 %v12855_v3  ;;  %v381_v9 = vld [vmem:[%s19704_s1 + $0xb30] sm:$0xff]  ;;  %v442_v3 = vld [vmem:[%s19704_s1 + $0xd18] sm:$0xff] }
 0x3bd   :  { %v12837_v7 = vcombine.high %v377_v2, %v381_v9  ;;  %v12836_v32 = vcombine.low %v377_v2, %v381_v9  ;;  %v12902_v14 = vcombine.low %v442_v3, %v446_v4  ;;  %v417_v9 = vld [vmem:[%s19704_s1 + $0xc50] sm:$0xff] }
 0x3be   :  { %10785 = vmatpush1.bf16.msra.mxu0 %v12788_v8  ;;  %v12903_v8 = vcombine.high %v442_v3, %v446_v4  ;;  %v421_v3 = vld [vmem:[%s19704_s1 + $0xc70] sm:$0xff]  ;;  %v482_v4 = vld [vmem:[%s19704_s1 + $0xe58] sm:$0xff] }
 0x3bf   :  { %11334 = vmatpush1.bf16.msra.mxu1 %v12854_v10  ;;  %10786 = vmatprep.subr.bf16.mxu0 %v12797_v22  ;;  %v385_v10 = vld [vmem:[%s19704_s1 + $0xb50] sm:$0xff] }
 0x3c0   :  { %11335 = vmatprep.subr.bf16.mxu1 %v12863_v12  ;;  %v389_v22 = vld [vmem:[%s19704_s1 + $0xb70] sm:$0xff]  ;;  %v450_v12 = vld [vmem:[%s19704_s1 + $0xd58] sm:$0xff] }
 0x3c1   :  { %v12845_v36 = vcombine.high %v385_v10, %v389_v22  ;;  %v12844_v59 = vcombine.low %v385_v10, %v389_v22  ;;  %v12910_v26 = vcombine.low %v450_v12, %v454_v15  ;;  %v425_v22 = vld [vmem:[%s19704_s1 + $0xc90] sm:$0xff] }
 0x3c2   :  { %10787 = vmatpush1.bf16.msra.mxu0 %v12796_v18  ;;  %v12911_v18 = vcombine.high %v450_v12, %v454_v15  ;;  %v429_v12 = vld [vmem:[%s19704_s1 + $0xcb0] sm:$0xff]  ;;  %v490_v15 = vld [vmem:[%s19704_s1 + $0xe98] sm:$0xff] }
 0x3c3   :  { %11336 = vmatpush1.bf16.msra.mxu1 %v12862_v19  ;;  %10788 = vmatprep.subr.bf16.mxu0 %v12805_v44  ;;  %v393_v19 = vld [vmem:[%s19704_s1 + $0xb90] sm:$0xff] }
 0x3c4   :  { %11346 = vmatprep.subr.bf16.mxu1 %v12871_v21  ;;  %v397_v44 = vld [vmem:[%s19704_s1 + $0xbb0] sm:$0xff]  ;;  %v458_v21 = vld [vmem:[%s19704_s1 + $0xd98] sm:$0xff] }
 0x3c5   :  { %v12853_v28 = vcombine.high %v393_v19, %v397_v44  ;;  %v12852_v42 = vcombine.low %v393_v19, %v397_v44  ;;  %v433_v44 = vld [vmem:[%s19704_s1 + $0xcd0] sm:$0xff] }
 0x3c6   :  { %10789 = vmatpush1.bf16.msra.mxu0 %v12804_v63  ;;  %11338 = vmatmul.mubr.bf16.vlgmr.msra.gmra.mrb[4].mxu1 %v15138_v51  ;;  %v12919_v63 = vcombine.high %v458_v21, %v462_v25 }
 0x3c7   :  { %11347 = vmatpush1.bf16.msra.mxu1 %v12870_v30  ;;  %10790 = vmatprep.subr.bf16.mxu0 %v12813_v33  ;;  %v401_v30 = vld [vmem:[%s19704_s1 + $0xbd0] sm:$0xff] }
 0x3c8   :  { %11348 = vmatprep.subr.bf16.mxu1 %v12879_v35  ;;  %11378 = vmatprep.mubr.bf16.mxu1 %v15154_v61  ;;  %v405_v33 = vld [vmem:[%s19704_s1 + $0xbf0] sm:$0xff] }
 0x3ca   :  { %10791 = vmatpush1.bf16.msra.mxu0 %v12812_v43 }
 0x3cb   :  { %11349 = vmatpush1.bf16.msra.mxu1 %v12878_v0  ;;  %10792 = vmatprep.subr.bf16.mxu0 %v12821_v49  ;;  %v12918_v0 = vcombine.low %v458_v21, %v462_v25  ;;  %v12861_v49 = vcombine.high %v401_v30, %v405_v33  ;;  %v437_v21 = vld [vmem:[%s19704_s1 + $0xcf0] sm:$0xff] }
 0x3cc   :  { %11350 = vmatprep.subr.bf16.mxu1 %v12887_v52 }
 0x3ce   :  { %10793 = vmatpush1.bf16.msra.mxu0 %v12820_v53  ;;  %v478_v53 = vld [vmem:[%s19704_s1 + $0xe38] sm:$0xff] }
 0x3cf   :  { %11351 = vmatpush1.bf16.msra.mxu1 %v12886_v1  ;;  %10794 = vmatprep.subr.bf16.mxu0 %v12829_v60  ;;  %v12860_v1 = vcombine.low %v401_v30, %v405_v33  ;;  %v12926_v60 = vcombine.low %v466_v37, %v470_v38  ;;  %v12935_v2 = vcombine.high %v474_v27, %v478_v53  ;;  %v441_v38 = vld [vmem:[%s19704_s1 + $0xd10] sm:$0xff] }
 0x3d0   :  { %11352 = vmatprep.subr.bf16.mxu1 %v12895_v62  ;;  %v12869_v62 = vcombine.high %v409_v54, %v413_v58  ;;  %v12893_v33 = vcombine.high %v433_v44, %v437_v21 }
 0x3d2   :  { %10795 = vmatpush1.bf16.msra.mxu0 %v12828_v5  ;;  %v486_v5 = vld [vmem:[%s19704_s1 + $0xe78] sm:$0xff] }
 0x3d3   :  { %11353 = vmatpush1.bf16.msra.mxu1 %v12894_v6  ;;  %10796 = vmatprep.subr.bf16.mxu0 %v12837_v7  ;;  %v12868_v6 = vcombine.low %v409_v54, %v413_v58  ;;  %v12934_v7 = vcombine.low %v474_v27, %v478_v53  ;;  %v12943_v10 = vcombine.high %v482_v4, %v486_v5  ;;  %v449_v58 = vld [vmem:[%s19704_s1 + $0xd50] sm:$0xff]  ;;  %v514_v53 = vld [vmem:[%s19704_s1 + $0xf58] sm:$0xff] }
 0x3d4   :  { %11354 = vmatprep.subr.bf16.mxu1 %v12903_v8  ;;  %v12877_v8 = vcombine.high %v417_v9, %v421_v3  ;;  %v453_v27 = vld [vmem:[%s19704_s1 + $0xd70] sm:$0xff] }
 0x3d6   :  { %10797 = vmatpush1.bf16.msra.mxu0 %v12836_v32  ;;  %v494_v32 = vld [vmem:[%s19704_s1 + $0xeb8] sm:$0xff] }
 0x3d7   :  { %11355 = vmatpush1.bf16.msra.mxu1 %v12902_v14  ;;  %10798 = vmatprep.subr.bf16.mxu0 %v12845_v36  ;;  %v12876_v14 = vcombine.low %v417_v9, %v421_v3  ;;  %v12942_v36 = vcombine.low %v482_v4, %v486_v5  ;;  %v12950_v30 = vcombine.low %v490_v15, %v494_v32  ;;  %v457_v3 = vld [vmem:[%s19704_s1 + $0xd90] sm:$0xff]  ;;  %v522_v5 = vld [vmem:[%s19704_s1 + $0xf98] sm:$0xff] }
 0x3d8   :  { %11356 = vmatprep.subr.bf16.mxu1 %v12911_v18  ;;  %v17682_v35 = vpop.f32.mrb[0].mxu1  ;;  %v12885_v18 = vcombine.high %v425_v22, %v429_v12  ;;  %v461_v4 = vld [vmem:[%s19704_s1 + $0xdb0] sm:$0xff] }
 0x3d9   :  { %v17690_v23 = vpop.f32.mrb[1].mxu1 }
 0x3da   :  { %10799 = vmatpush1.bf16.msra.mxu0 %v12844_v59  ;;  %v10646_v43 = vpop.f32.mrb[2].mxu1  ;;  %v502_v59 = vld [vmem:[%s19704_s1 + $0xef8] sm:$0xff] }
 0x3db   :  { %11357 = vmatpush1.bf16.msra.mxu1 %v12910_v26  ;;  %10800 = vmatprep.subr.bf16.mxu0 %v12853_v28  ;;  %v10647_v52 = vpop.f32.mrb[3].mxu1  ;;  %v12884_v28 = vcombine.low %v425_v22, %v429_v12  ;;  %v506_v43 = vld [vmem:[%s19704_s1 + $0xf18] sm:$0xff] }
 0x3dc   :  { %11358 = vmatprep.subr.bf16.mxu1 %v12919_v63 }
 0x3de   :  { %10801 = vmatpush1.bf16.msra.mxu0 %v12852_v42  ;;  %v445_v42 = vld [vmem:[%s19704_s1 + $0xd30] sm:$0xff] }
 0x3df   :  { %11359 = vmatpush1.bf16.msra.mxu1 %v12918_v0  ;;  %10802 = vmatprep.subr.bf16.mxu0 %v12861_v49  ;;  %v510_v0 = vld [vmem:[%s19704_s1 + $0xf38] sm:$0xff]  ;;  %v12892_v49 = vcombine.low %v433_v44, %v437_v21 }
 0x3e0   :  { %11360 = vmatprep.subr.bf16.mxu1 %v12927_v17  ;;  %v12901_v17 = vcombine.high %v441_v38, %v445_v42  ;;  %v12967_v54 = vcombine.high %v506_v43, %v510_v0 }
 0x3e2   :  { %10803 = vmatpush1.bf16.msra.mxu0 %v12860_v1  ;;  %v518_v1 = vld [vmem:[%s19704_s1 + $0xf78] sm:$0xff] }
 0x3e3   :  { %11361 = vmatpush1.bf16.msra.mxu1 %v12926_v60  ;;  %10813 = vmatprep.subr.bf16.mxu0 %v12869_v62  ;;  %v12900_v60 = vcombine.low %v441_v38, %v445_v42  ;;  %v12966_v62 = vcombine.low %v506_v43, %v510_v0  ;;  %v12975_v9 = vcombine.high %v514_v53, %v518_v1  ;;  %v481_v0 = vld [vmem:[%s19704_s1 + $0xe50] sm:$0xff] }
 0x3e4   :  { %11362 = vmatprep.subr.bf16.mxu1 %v12935_v2  ;;  %v12909_v2 = vcombine.high %v449_v58, %v453_v27 }
 0x3e5   :  { %10805 = vmatmul.mubr.bf16.vlgmr.msra.gmra.mrb[8].mxu0 %v15138_v51  ;;  %v12951_v51 = vcombine.high %v490_v15, %v494_v32  ;;  %v465_v15 = vld [vmem:[%s19704_s1 + $0xdd0] sm:$0xff] }
 0x3e6   :  { %10814 = vmatpush1.bf16.msra.mxu0 %v12868_v6  ;;  %10845 = vmatprep.mubr.bf16.mxu0 %v15154_v61  ;;  %v498_v61 = vld [vmem:[%s19704_s1 + $0xed8] sm:$0xff]  ;;  %v469_v32 = vld [vmem:[%s19704_s1 + $0xdf0] sm:$0xff] }
 0x3e7   :  { %11363 = vmatpush1.bf16.msra.mxu1 %v12934_v7  ;;  %10815 = vmatprep.subr.bf16.mxu0 %v12877_v8  ;;  %v12959_v37 = vcombine.high %v498_v61, %v502_v59  ;;  %v12958_v52 = vcombine.low %v498_v61, %v502_v59  ;;  %v526_v6 = vld [vmem:[%s19704_s1 + $0xfb8] sm:$0xff]  ;;  %v12908_v7 = vcombine.low %v449_v58, %v453_v27 }
 0x3e8   :  { %v17730_v19 = vpop.f32.mrb[0].mxu0  ;;  %11364 = vmatprep.subr.bf16.mxu1 %v12943_v10  ;;  %v12974_v8 = vcombine.low %v514_v53, %v518_v1  ;;  %v12917_v10 = vcombine.high %v457_v3, %v461_v4  ;;  %v12983_v12 = vcombine.high %v522_v5, %v526_v6  ;;  %v12916_v61 = vcombine.low %v457_v3, %v461_v4  ;;  %v489_v1 = vld [vmem:[%s19704_s1 + $0xe90] sm:$0xff] }
 0x3e9   :  { %v17738_v25 = vpop.f32.mrb[1].mxu0  ;;  %vm11756_vm4 = vcmp.ge.f32.partialorder %v17730_v19, 0.0 }
 0x3ea   :  { %v10154_v26 = vpop.f32.mrb[2].mxu0  ;;  %10816 = vmatpush1.bf16.msra.mxu0 %v12876_v14  ;;  %vm11757_vm3 = vcmp.ge.f32.partialorder %v17738_v25, 0.0 }
 0x3eb   :  { %11365 = vmatpush1.bf16.msra.mxu1 %v12942_v36  ;;  %v10155_v63 = vpop.f32.mrb[3].mxu0  ;;  %10817 = vmatprep.subr.bf16.mxu0 %v12885_v18  ;;  %v530_v18 = vld [vmem:[%s19704_s1 + $0xfd8] sm:$0xff]  ;;  %v12925_v26 = vcombine.high %v465_v15, %v469_v32 }
 0x3ec   :  { %11366 = vmatprep.subr.bf16.mxu1 %v12951_v51  ;;  %v534_v51 = vld [vmem:[%s19704_s1 + $0xff8] sm:$0xff]  ;;  %v473_v63 = vld [vmem:[%s19704_s1 + $0xe10] sm:$0xff] }
 0x3ed   :  { %v12990_v38 = vcombine.low %v530_v18, %v534_v51 }
 0x3ee   :  { %10818 = vmatpush1.bf16.msra.mxu0 %v12884_v28  ;;  %v12991_v28 = vcombine.high %v530_v18, %v534_v51  ;;  %v509_v18 = vld [vmem:[%s19704_s1 + $0xf30] sm:$0xff]  ;;  %v570_v51 = vld [vmem:[%s19704_s1 + $0x1118] sm:$0xff] }
 0x3ef   :  { %11367 = vmatpush1.bf16.msra.mxu1 %v12950_v30  ;;  %10819 = vmatprep.subr.bf16.mxu0 %v12893_v33  ;;  %v477_v30 = vld [vmem:[%s19704_s1 + $0xe30] sm:$0xff]  ;;  %v542_v33 = vld [vmem:[%s19704_s1 + $0x1038] sm:$0xff] }
 0x3f0   :  { %11368 = vmatprep.subr.bf16.mxu1 %v12959_v37  ;;  %v12924_v37 = vcombine.low %v465_v15, %v469_v32  ;;  %v12933_v42 = vcombine.high %v473_v63, %v477_v30 }
 0x3f2   :  { %10820 = vmatpush1.bf16.msra.mxu0 %v12892_v49  ;;  %v485_v49 = vld [vmem:[%s19704_s1 + $0xe70] sm:$0xff] }
 0x3f3   :  { %11369 = vmatpush1.bf16.msra.mxu1 %v12958_v52  ;;  %10821 = vmatprep.subr.bf16.mxu0 %v12901_v17  ;;  %v546_v52 = vld [vmem:[%s19704_s1 + $0x1058] sm:$0xff]  ;;  %v12941_v27 = vcombine.high %v481_v0, %v485_v49 }
 0x3f4   :  { %11370 = vmatprep.subr.bf16.mxu1 %v12967_v54  ;;  %v550_v17 = vld [vmem:[%s19704_s1 + $0x1078] sm:$0xff]  ;;  %v12932_v54 = vcombine.low %v473_v63, %v477_v30  ;;  %v517_v63 = vld [vmem:[%s19704_s1 + $0xf70] sm:$0xff] }
 0x3f5   :  { %v13007_v53 = vcombine.high %v546_v52, %v550_v17  ;;  %v13006_v3 = vcombine.low %v546_v52, %v550_v17  ;;  %v578_v30 = vld [vmem:[%s19704_s1 + $0x1158] sm:$0xff] }
 0x3f6   :  { %10822 = vmatpush1.bf16.msra.mxu0 %v12900_v60  ;;  %v493_v60 = vld [vmem:[%s19704_s1 + $0xeb0] sm:$0xff]  ;;  %v590_v52 = vld [vmem:[%s19704_s1 + $0x11b8] sm:$0xff] }
 0x3f7   :  { %11371 = vmatpush1.bf16.msra.mxu1 %v12966_v62  ;;  %10823 = vmatprep.subr.bf16.mxu0 %v12909_v2  ;;  %v554_v62 = vld [vmem:[%s19704_s1 + $0x1098] sm:$0xff]  ;;  %v12949_v4 = vcombine.high %v489_v1, %v493_v60 }
 0x3f8   :  { %v10683_v22 = vpop.f32.mrb[4].mxu0  ;;  %11372 = vmatprep.subr.bf16.mxu1 %v12975_v9  ;;  %v558_v2 = vld [vmem:[%s19704_s1 + $0x10b8] sm:$0xff]  ;;  %v12940_v9 = vcombine.low %v481_v0, %v485_v49  ;;  %v525_v0 = vld [vmem:[%s19704_s1 + $0xfb0] sm:$0xff] }
 0x3f9   :  { %v17789_v14 = vadd.f32 %v10683_v22, %v17682_v35  ;;  %v10685_v36 = vpop.f32.mrb[5].mxu0  ;;  %v12982_v35 = vcombine.low %v522_v5, %v526_v6  ;;  %v13015_v5 = vcombine.high %v554_v62, %v558_v2  ;;  %v497_v6 = vld [vmem:[%s19704_s1 + $0xed0] sm:$0xff]  ;;  %v12948_v22 = vcombine.low %v489_v1, %v493_v60  ;;  %v586_v49 = vld [vmem:[%s19704_s1 + $0x1198] sm:$0xff] }
 0x3fa   :  { %v17798_v44 = vadd.f32 %v10685_v36, %v17690_v23  ;;  %v10687_v21 = vpop.f32.mrb[6].mxu0  ;;  %10824 = vmatpush1.bf16.msra.mxu0 %v12908_v7  ;;  %v538_v23 = vld [vmem:[%s19704_s1 + $0x1018] sm:$0xff]  ;;  %v501_v7 = vld [vmem:[%s19704_s1 + $0xef0] sm:$0xff] }
 0x3fb   :  { %11373 = vmatpush1.bf16.msra.mxu1 %v12974_v8  ;;  %v10688_v59 = vpop.f32.mrb[7].mxu0  ;;  %10825 = vmatprep.subr.bf16.mxu0 %v12917_v10  ;;  %v12999_v43 = vcombine.high %v538_v23, %v542_v33  ;;  %v12998_v58 = vcombine.low %v538_v23, %v542_v33  ;;  %v562_v8 = vld [vmem:[%s19704_s1 + $0x10d8] sm:$0xff]  ;;  %v12957_v15 = vcombine.high %v497_v6, %v501_v7  ;;  %v505_v36 = vld [vmem:[%s19704_s1 + $0xf10] sm:$0xff]  ;;  %vm11758_vm2 = vcmp.ge.f32.partialorder %v17789_v14, 0.0 }
 0x3fc   :  { %11374 = vmatprep.subr.bf16.mxu1 %v12983_v12  ;;  %v566_v10 = vld [vmem:[%s19704_s1 + $0x10f8] sm:$0xff]  ;;  %v13014_v12 = vcombine.low %v554_v62, %v558_v2  ;;  %v12964_v33 = vcombine.low %v505_v36, %v509_v18  ;;  %v533_v1 = vld [vmem:[%s19704_s1 + $0xff0] sm:$0xff]  ;;  %vm11759_vm1 = vcmp.ge.f32.partialorder %v17798_v44, 0.0 }
 0x3fd   :  { %v13023_v32 = vcombine.high %v562_v8, %v566_v10  ;;  %v574_v21 = vld [vmem:[%s19704_s1 + $0x1138] sm:$0xff]  ;;  %v13022_v59 = vcombine.low %v562_v8, %v566_v10 }
 0x3fe   :  { %10826 = vmatpush1.bf16.msra.mxu0 %v12916_v61  ;;  %v12956_v61 = vcombine.low %v497_v6, %v501_v7  ;;  %v582_v23 = vld [vmem:[%s19704_s1 + $0x1178] sm:$0xff]  ;;  %v541_v6 = vld [vmem:[%s19704_s1 + $0x1030] sm:$0xff] }
 0x3ff   :  { %11375 = vmatpush1.bf16.msra.mxu1 %v12982_v35  ;;  %10827 = vmatprep.subr.bf16.mxu0 %v12925_v26  ;;  %v12965_v35 = vcombine.high %v505_v36, %v509_v18  ;;  %v13031_v26 = vcombine.high %v570_v51, %v574_v21  ;;  %v594_v60 = vld [vmem:[%s19704_s1 + $0x11d8] sm:$0xff]  ;;  %v549_v36 = vld [vmem:[%s19704_s1 + $0x1070] sm:$0xff] }
 0x400   :  { %11376 = vmatprep.subr.bf16.mxu1 %v12991_v28  ;;  %v513_v28 = vld [vmem:[%s19704_s1 + $0xf50] sm:$0xff]  ;;  %v598_v62 = vld [vmem:[%s19704_s1 + $0x11f8] sm:$0xff] }
 0x401   :  { %v12972_v17 = vcombine.low %v513_v28, %v517_v63  ;;  %v602_v7 = vld [vmem:[%s19704_s1 + $0x1218] sm:$0xff] }
 0x402   :  { %10828 = vmatpush1.bf16.msra.mxu0 %v12924_v37  ;;  %v13030_v37 = vcombine.low %v570_v51, %v574_v21  ;;  %v606_v8 = vld [vmem:[%s19704_s1 + $0x1238] sm:$0xff] }
 0x403   :  { %11377 = vmatpush1.bf16.msra.mxu1 %v12990_v38  ;;  %10829 = vmatprep.subr.bf16.mxu0 %v12933_v42  ;;  %v12973_v38 = vcombine.high %v513_v28, %v517_v63  ;;  %v13039_v42 = vcombine.high %v578_v30, %v582_v23  ;;  %v610_v18 = vld [vmem:[%s19704_s1 + $0x1258] sm:$0xff]  ;;  %v557_v28 = vld [vmem:[%s19704_s1 + $0x10b0] sm:$0xff] }
 0x404   :  { %11387 = vmatprep.subr.bf16.mxu1 %v12999_v43  ;;  %v521_v43 = vld [vmem:[%s19704_s1 + $0xf90] sm:$0xff]  ;;  %v614_v51 = vld [vmem:[%s19704_s1 + $0x1278] sm:$0xff] }
 0x405   :  { %v12980_v2 = vcombine.low %v521_v43, %v525_v0  ;;  %v618_v63 = vld [vmem:[%s19704_s1 + $0x1298] sm:$0xff] }
 0x406   :  { %10830 = vmatpush1.bf16.msra.mxu0 %v12932_v54  ;;  %11379 = vmatmul.mubr.bf16.vlgmr.msra.gmra.mrb[4].mxu1 %v15353_v11  ;;  %v13038_v54 = vcombine.low %v578_v30, %v582_v23  ;;  %v622_v30 = vld [vmem:[%s19704_s1 + $0x12b8] sm:$0xff] }
 0x407   :  { %11388 = vmatpush1.bf16.msra.mxu1 %v12998_v58  ;;  %10831 = vmatprep.subr.bf16.mxu0 %v12941_v27  ;;  %v12981_v58 = vcombine.high %v521_v43, %v525_v0  ;;  %v13047_v27 = vcombine.high %v586_v49, %v590_v52  ;;  %v626_v43 = vld [vmem:[%s19704_s1 + $0x12d8] sm:$0xff] }
 0x408   :  { %11389 = vmatprep.subr.bf16.mxu1 %v13007_v53  ;;  %11419 = vmatprep.mubr.bf16.mxu1 %v15368_v20  ;;  %v529_v53 = vld [vmem:[%s19704_s1 + $0xfd0] sm:$0xff] }
 0x409   :  { %v12988_v10 = vcombine.low %v529_v53, %v533_v1 }
 0x40a   :  { %10832 = vmatpush1.bf16.msra.mxu0 %v12940_v9  ;;  %v13046_v9 = vcombine.low %v586_v49, %v590_v52  ;;  %v13078_v49 = vcombine.low %v618_v63, %v622_v30 }
 0x40b   :  { %11390 = vmatpush1.bf16.msra.mxu1 %v13006_v3  ;;  %10833 = vmatprep.subr.bf16.mxu0 %v12949_v4  ;;  %v12989_v3 = vcombine.high %v529_v53, %v533_v1  ;;  %v13055_v4 = vcombine.high %v594_v60, %v598_v62  ;;  %v638_v53 = vld [vmem:[%s19704_s1 + $0x1338] sm:$0xff] }
 0x40c   :  { %11391 = vmatprep.subr.bf16.mxu1 %v13015_v5  ;;  %v537_v5 = vld [vmem:[%s19704_s1 + $0x1010] sm:$0xff] }
 0x40d   :  { %v12996_v21 = vcombine.low %v537_v5, %v541_v6 }
 0x40e   :  { %10834 = vmatpush1.bf16.msra.mxu0 %v12948_v22  ;;  %v13054_v22 = vcombine.low %v594_v60, %v598_v62 }
 0x40f   :  { %11392 = vmatpush1.bf16.msra.mxu1 %v13014_v12  ;;  %10835 = vmatprep.subr.bf16.mxu0 %v12957_v15  ;;  %v12997_v12 = vcombine.high %v537_v5, %v541_v6  ;;  %v13063_v15 = vcombine.high %v602_v7, %v606_v8  ;;  %v646_v5 = vld [vmem:[%s19704_s1 + $0x1378] sm:$0xff] }
 0x410   :  { %11393 = vmatprep.subr.bf16.mxu1 %v13023_v32  ;;  %v545_v32 = vld [vmem:[%s19704_s1 + $0x1050] sm:$0xff] }
 0x411   :  { %v13004_v23 = vcombine.low %v545_v32, %v549_v36 }
 0x412   :  { %10836 = vmatpush1.bf16.msra.mxu0 %v12956_v61  ;;  %v13062_v61 = vcombine.low %v602_v7, %v606_v8 }
 0x413   :  { %11394 = vmatpush1.bf16.msra.mxu1 %v13022_v59  ;;  %10837 = vmatprep.subr.bf16.mxu0 %v12965_v35  ;;  %v13005_v59 = vcombine.high %v545_v32, %v549_v36  ;;  %v13071_v35 = vcombine.high %v610_v18, %v614_v51  ;;  %v654_v32 = vld [vmem:[%s19704_s1 + $0x13b8] sm:$0xff] }
 0x414   :  { %11395 = vmatprep.subr.bf16.mxu1 %v13031_v26  ;;  %v553_v26 = vld [vmem:[%s19704_s1 + $0x1090] sm:$0xff] }
 0x415   :  { %v13012_v0 = vcombine.low %v553_v26, %v557_v28 }
 0x416   :  { %10838 = vmatpush1.bf16.msra.mxu0 %v12964_v33  ;;  %v13070_v33 = vcombine.low %v610_v18, %v614_v51 }
 0x417   :  { %11396 = vmatpush1.bf16.msra.mxu1 %v13030_v37  ;;  %10839 = vmatprep.subr.bf16.mxu0 %v12973_v38  ;;  %v13013_v37 = vcombine.high %v553_v26, %v557_v28  ;;  %v13079_v38 = vcombine.high %v618_v63, %v622_v30  ;;  %v662_v26 = vld [vmem:[%s19704_s1 + $0x13f8] sm:$0xff] }
 0x418   :  { %11397 = vmatprep.subr.bf16.mxu1 %v13039_v42  ;;  %v565_v42 = vld [vmem:[%s19704_s1 + $0x10f0] sm:$0xff] }
 0x41a   :  { %10840 = vmatpush1.bf16.msra.mxu0 %v12972_v17 }
 0x41b   :  { %11398 = vmatpush1.bf16.msra.mxu1 %v13038_v54  ;;  %10841 = vmatprep.subr.bf16.mxu0 %v12981_v58  ;;  %v569_v54 = vld [vmem:[%s19704_s1 + $0x1110] sm:$0xff] }
 0x41c   :  { %11399 = vmatprep.subr.bf16.mxu1 %v13047_v27  ;;  %v573_v58 = vld [vmem:[%s19704_s1 + $0x1130] sm:$0xff]  ;;  %v634_v27 = vld [vmem:[%s19704_s1 + $0x1318] sm:$0xff] }
 0x41d   :  { %v13029_v62 = vcombine.high %v569_v54, %v573_v58  ;;  %v13028_v6 = vcombine.low %v569_v54, %v573_v58  ;;  %v13094_v7 = vcombine.low %v634_v27, %v638_v53  ;;  %v678_v54 = vld [vmem:[%s19704_s1 + $0x1478] sm:$0xff] }
 0x41e   :  { %10842 = vmatpush1.bf16.msra.mxu0 %v12980_v2  ;;  %v13095_v2 = vcombine.high %v634_v27, %v638_v53 }
 0x41f   :  { %11400 = vmatpush1.bf16.msra.mxu1 %v13046_v9  ;;  %10843 = vmatprep.subr.bf16.mxu0 %v12989_v3  ;;  %v577_v9 = vld [vmem:[%s19704_s1 + $0x1150] sm:$0xff] }
 0x420   :  { %11401 = vmatprep.subr.bf16.mxu1 %v13055_v4  ;;  %v581_v3 = vld [vmem:[%s19704_s1 + $0x1170] sm:$0xff]  ;;  %v642_v4 = vld [vmem:[%s19704_s1 + $0x1358] sm:$0xff] }
 0x421   :  { %v13037_v8 = vcombine.high %v577_v9, %v581_v3  ;;  %v13036_v36 = vcombine.low %v577_v9, %v581_v3  ;;  %v13102_v18 = vcombine.low %v642_v4, %v646_v5  ;;  %v686_v9 = vld [vmem:[%s19704_s1 + $0x14b8] sm:$0xff] }
 0x422   :  { %10844 = vmatpush1.bf16.msra.mxu0 %v12988_v10  ;;  %v13103_v10 = vcombine.high %v642_v4, %v646_v5 }
 0x423   :  { %11402 = vmatpush1.bf16.msra.mxu1 %v13054_v22  ;;  %10854 = vmatprep.subr.bf16.mxu0 %v12997_v12  ;;  %v585_v22 = vld [vmem:[%s19704_s1 + $0x1190] sm:$0xff] }
 0x424   :  { %11403 = vmatprep.subr.bf16.mxu1 %v13063_v15  ;;  %v589_v12 = vld [vmem:[%s19704_s1 + $0x11b0] sm:$0xff]  ;;  %v650_v15 = vld [vmem:[%s19704_s1 + $0x1398] sm:$0xff] }
 0x425   :  { %10846 = vmatmul.mubr.bf16.vlgmr.msra.gmra.mrb[8].mxu0 %v15353_v11  ;;  %v561_v11 = vld [vmem:[%s19704_s1 + $0x10d0] sm:$0xff]  ;;  %v13045_v51 = vcombine.high %v585_v22, %v589_v12  ;;  %v13044_v28 = vcombine.low %v585_v22, %v589_v12  ;;  %v13110_v63 = vcombine.low %v650_v15, %v654_v32  ;;  %v694_v22 = vld [vmem:[%s19704_s1 + $0x14f8] sm:$0xff] }
 0x426   :  { %10855 = vmatpush1.bf16.msra.mxu0 %v12996_v21  ;;  %10886 = vmatprep.mubr.bf16.mxu0 %v15368_v20  ;;  %v630_v20 = vld [vmem:[%s19704_s1 + $0x12f8] sm:$0xff]  ;;  %v13021_v52 = vcombine.high %v561_v11, %v565_v42  ;;  %v13020_v1 = vcombine.low %v561_v11, %v565_v42  ;;  %v13111_v21 = vcombine.high %v650_v15, %v654_v32 }
 0x427   :  { %11404 = vmatpush1.bf16.msra.mxu1 %v13062_v61  ;;  %10856 = vmatprep.subr.bf16.mxu0 %v13005_v59  ;;  %v13087_v17 = vcombine.high %v626_v43, %v630_v20  ;;  %v13086_v60 = vcombine.low %v626_v43, %v630_v20  ;;  %v593_v61 = vld [vmem:[%s19704_s1 + $0x11d0] sm:$0xff]  ;;  %v670_v11 = vld [vmem:[%s19704_s1 + $0x1438] sm:$0xff] }
 0x428   :  { %11405 = vmatprep.subr.bf16.mxu1 %v13071_v35  ;;  %v597_v59 = vld [vmem:[%s19704_s1 + $0x11f0] sm:$0xff]  ;;  %v658_v35 = vld [vmem:[%s19704_s1 + $0x13d8] sm:$0xff] }
 0x429   :  { %v13053_v30 = vcombine.high %v593_v61, %v597_v59  ;;  %v13052_v42 = vcombine.low %v593_v61, %v597_v59  ;;  %v13118_v43 = vcombine.low %v658_v35, %v662_v26  ;;  %v702_v61 = vld [vmem:[%s19704_s1 + $0x1538] sm:$0xff] }
 0x42a   :  { %10857 = vmatpush1.bf16.msra.mxu0 %v13004_v23  ;;  %v13119_v23 = vcombine.high %v658_v35, %v662_v26 }
 0x42b   :  { %11406 = vmatpush1.bf16.msra.mxu1 %v13070_v33  ;;  %10858 = vmatprep.subr.bf16.mxu0 %v13013_v37  ;;  %v601_v33 = vld [vmem:[%s19704_s1 + $0x1210] sm:$0xff] }
 0x42c   :  { %11407 = vmatprep.subr.bf16.mxu1 %v13079_v38  ;;  %v605_v37 = vld [vmem:[%s19704_s1 + $0x1230] sm:$0xff]  ;;  %v666_v38 = vld [vmem:[%s19704_s1 + $0x1418] sm:$0xff] }
 0x42d   :  { %v13061_v20 = vcombine.high %v601_v33, %v605_v37  ;;  %v13060_v58 = vcombine.low %v601_v33, %v605_v37  ;;  %v13126_v27 = vcombine.low %v666_v38, %v670_v11  ;;  %v710_v33 = vld [vmem:[%s19704_s1 + $0x1578] sm:$0xff] }
 0x42e   :  { %10859 = vmatpush1.bf16.msra.mxu0 %v13012_v0  ;;  %v13127_v0 = vcombine.high %v666_v38, %v670_v11 }
 0x42f   :  { %11408 = vmatpush1.bf16.msra.mxu1 %v13078_v49  ;;  %10860 = vmatprep.subr.bf16.mxu0 %v13021_v52  ;;  %v609_v49 = vld [vmem:[%s19704_s1 + $0x1250] sm:$0xff] }
 0x430   :  { %11409 = vmatprep.subr.bf16.mxu1 %v13087_v17  ;;  %v613_v52 = vld [vmem:[%s19704_s1 + $0x1270] sm:$0xff]  ;;  %v674_v17 = vld [vmem:[%s19704_s1 + $0x1458] sm:$0xff] }
 0x431   :  { %v13069_v53 = vcombine.high %v609_v49, %v613_v52  ;;  %v13068_v3 = vcombine.low %v609_v49, %v613_v52  ;;  %v13134_v4 = vcombine.low %v674_v17, %v678_v54  ;;  %v718_v49 = vld [vmem:[%s19704_s1 + $0x15b8] sm:$0xff] }
 0x432   :  { %10861 = vmatpush1.bf16.msra.mxu0 %v13020_v1  ;;  %v13135_v1 = vcombine.high %v674_v17, %v678_v54 }
 0x433   :  { %11410 = vmatpush1.bf16.msra.mxu1 %v13086_v60  ;;  %10862 = vmatprep.subr.bf16.mxu0 %v13029_v62  ;;  %v617_v60 = vld [vmem:[%s19704_s1 + $0x1290] sm:$0xff] }
 0x434   :  { %11411 = vmatprep.subr.bf16.mxu1 %v13095_v2  ;;  %v621_v62 = vld [vmem:[%s19704_s1 + $0x12b0] sm:$0xff]  ;;  %v682_v2 = vld [vmem:[%s19704_s1 + $0x1498] sm:$0xff] }
 0x435   :  { %v13077_v5 = vcombine.high %v617_v60, %v621_v62  ;;  %v13076_v12 = vcombine.low %v617_v60, %v621_v62  ;;  %v13142_v15 = vcombine.low %v682_v2, %v686_v9  ;;  %v726_v60 = vld [vmem:[%s19704_s1 + $0x15f8] sm:$0xff] }
 0x436   :  { %10863 = vmatpush1.bf16.msra.mxu0 %v13028_v6  ;;  %v13143_v6 = vcombine.high %v682_v2, %v686_v9 }
 0x437   :  { %11412 = vmatpush1.bf16.msra.mxu1 %v13094_v7  ;;  %10864 = vmatprep.subr.bf16.mxu0 %v13037_v8  ;;  %v625_v7 = vld [vmem:[%s19704_s1 + $0x12d0] sm:$0xff] }
 0x438   :  { %11413 = vmatprep.subr.bf16.mxu1 %v13103_v10  ;;  %v629_v8 = vld [vmem:[%s19704_s1 + $0x12f0] sm:$0xff]  ;;  %v690_v10 = vld [vmem:[%s19704_s1 + $0x14d8] sm:$0xff] }
 0x439   :  { %v13085_v32 = vcombine.high %v625_v7, %v629_v8  ;;  %v13084_v59 = vcombine.low %v625_v7, %v629_v8  ;;  %v13150_v35 = vcombine.low %v690_v10, %v694_v22  ;;  %v734_v7 = vld [vmem:[%s19704_s1 + $0x1638] sm:$0xff] }
 0x43a   :  { %10865 = vmatpush1.bf16.msra.mxu0 %v13036_v36  ;;  %v13151_v36 = vcombine.high %v690_v10, %v694_v22 }
 0x43b   :  { %11414 = vmatpush1.bf16.msra.mxu1 %v13102_v18  ;;  %10866 = vmatprep.subr.bf16.mxu0 %v13045_v51  ;;  %v633_v18 = vld [vmem:[%s19704_s1 + $0x1310] sm:$0xff] }
 0x43c   :  { %11415 = vmatprep.subr.bf16.mxu1 %v13111_v21  ;;  %v637_v51 = vld [vmem:[%s19704_s1 + $0x1330] sm:$0xff]  ;;  %v698_v21 = vld [vmem:[%s19704_s1 + $0x1518] sm:$0xff] }
 0x43d   :  { %v13093_v26 = vcombine.high %v633_v18, %v637_v51  ;;  %v13092_v37 = vcombine.low %v633_v18, %v637_v51  ;;  %v13158_v38 = vcombine.low %v698_v21, %v702_v61  ;;  %v742_v18 = vld [vmem:[%s19704_s1 + $0x1678] sm:$0xff] }
 0x43e   :  { %10867 = vmatpush1.bf16.msra.mxu0 %v13044_v28  ;;  %v13159_v28 = vcombine.high %v698_v21, %v702_v61 }
 0x43f   :  { %11416 = vmatpush1.bf16.msra.mxu1 %v13110_v63  ;;  %10868 = vmatprep.subr.bf16.mxu0 %v13053_v30  ;;  %v641_v63 = vld [vmem:[%s19704_s1 + $0x1350] sm:$0xff] }
 0x440   :  { %11417 = vmatprep.subr.bf16.mxu1 %v13119_v23  ;;  %v645_v30 = vld [vmem:[%s19704_s1 + $0x1370] sm:$0xff]  ;;  %v706_v23 = vld [vmem:[%s19704_s1 + $0x1558] sm:$0xff] }
 0x441   :  { %v13101_v11 = vcombine.high %v641_v63, %v645_v30  ;;  %v13100_v52 = vcombine.low %v641_v63, %v645_v30  ;;  %v13166_v17 = vcombine.low %v706_v23, %v710_v33  ;;  %v750_v63 = vld [vmem:[%s19704_s1 + $0x16b8] sm:$0xff] }
 0x442   :  { %10869 = vmatpush1.bf16.msra.mxu0 %v13052_v42  ;;  %v13167_v42 = vcombine.high %v706_v23, %v710_v33 }
 0x443   :  { %11418 = vmatpush1.bf16.msra.mxu1 %v13118_v43  ;;  %10870 = vmatprep.subr.bf16.mxu0 %v13061_v20  ;;  %v649_v43 = vld [vmem:[%s19704_s1 + $0x1390] sm:$0xff] }
 0x444   :  { %11428 = vmatprep.subr.bf16.mxu1 %v13127_v0  ;;  %v653_v20 = vld [vmem:[%s19704_s1 + $0x13b0] sm:$0xff]  ;;  %v714_v0 = vld [vmem:[%s19704_s1 + $0x1598] sm:$0xff] }
 0x445   :  { %v13109_v54 = vcombine.high %v649_v43, %v653_v20  ;;  %v13108_v62 = vcombine.low %v649_v43, %v653_v20  ;;  %v13174_v2 = vcombine.low %v714_v0, %v718_v49 }
 0x446   :  { %10871 = vmatpush1.bf16.msra.mxu0 %v13060_v58  ;;  %11420 = vmatmul.mubr.bf16.vlgmr.msra.gmra.mrb[4].mxu1 %v15556_v39  ;;  %v13175_v58 = vcombine.high %v714_v0, %v718_v49  ;;  %v697_v49 = vld [vmem:[%s19704_s1 + $0x1510] sm:$0xff] }
 0x447   :  { %11429 = vmatpush1.bf16.msra.mxu1 %v13126_v27  ;;  %10872 = vmatprep.subr.bf16.mxu0 %v13069_v53  ;;  %v657_v27 = vld [vmem:[%s19704_s1 + $0x13d0] sm:$0xff] }
 0x448   :  { %11430 = vmatprep.subr.bf16.mxu1 %v13135_v1  ;;  %11460 = vmatprep.mubr.bf16.mxu1 %v15572_v48  ;;  %v661_v53 = vld [vmem:[%s19704_s1 + $0x13f0] sm:$0xff]  ;;  %v722_v1 = vld [vmem:[%s19704_s1 + $0x15d8] sm:$0xff] }
 0x449   :  { %v13117_v9 = vcombine.high %v657_v27, %v661_v53  ;;  %v13116_v8 = vcombine.low %v657_v27, %v661_v53  ;;  %v13182_v10 = vcombine.low %v722_v1, %v726_v60 }
 0x44a   :  { %10873 = vmatpush1.bf16.msra.mxu0 %v13068_v3  ;;  %v13183_v3 = vcombine.high %v722_v1, %v726_v60  ;;  %v705_v60 = vld [vmem:[%s19704_s1 + $0x1550] sm:$0xff] }
 0x44b   :  { %11431 = vmatpush1.bf16.msra.mxu1 %v13134_v4  ;;  %10874 = vmatprep.subr.bf16.mxu0 %v13077_v5  ;;  %v665_v4 = vld [vmem:[%s19704_s1 + $0x1410] sm:$0xff] }
 0x44c   :  { %11432 = vmatprep.subr.bf16.mxu1 %v13143_v6  ;;  %v669_v5 = vld [vmem:[%s19704_s1 + $0x1430] sm:$0xff]  ;;  %v730_v6 = vld [vmem:[%s19704_s1 + $0x1618] sm:$0xff] }
 0x44d   :  { %v13125_v22 = vcombine.high %v665_v4, %v669_v5  ;;  %v13124_v51 = vcombine.low %v665_v4, %v669_v5  ;;  %v13190_v21 = vcombine.low %v730_v6, %v734_v7 }
 0x44e   :  { %10875 = vmatpush1.bf16.msra.mxu0 %v13076_v12  ;;  %v13191_v12 = vcombine.high %v730_v6, %v734_v7  ;;  %v713_v7 = vld [vmem:[%s19704_s1 + $0x1590] sm:$0xff] }
 0x44f   :  { %11433 = vmatpush1.bf16.msra.mxu1 %v13142_v15  ;;  %10876 = vmatprep.subr.bf16.mxu0 %v13085_v32  ;;  %v673_v15 = vld [vmem:[%s19704_s1 + $0x1450] sm:$0xff] }
 0x450   :  { %11434 = vmatprep.subr.bf16.mxu1 %v13151_v36  ;;  %v677_v32 = vld [vmem:[%s19704_s1 + $0x1470] sm:$0xff]  ;;  %v738_v36 = vld [vmem:[%s19704_s1 + $0x1658] sm:$0xff] }
 0x451   :  { %v13133_v61 = vcombine.high %v673_v15, %v677_v32  ;;  %v13132_v30 = vcombine.low %v673_v15, %v677_v32  ;;  %v13198_v23 = vcombine.low %v738_v36, %v742_v18 }
 0x452   :  { %10877 = vmatpush1.bf16.msra.mxu0 %v13084_v59  ;;  %v13199_v59 = vcombine.high %v738_v36, %v742_v18  ;;  %v721_v18 = vld [vmem:[%s19704_s1 + $0x15d0] sm:$0xff] }
 0x453   :  { %11435 = vmatpush1.bf16.msra.mxu1 %v13150_v35  ;;  %10878 = vmatprep.subr.bf16.mxu0 %v13093_v26  ;;  %v681_v35 = vld [vmem:[%s19704_s1 + $0x1490] sm:$0xff] }
 0x454   :  { %11436 = vmatprep.subr.bf16.mxu1 %v13159_v28  ;;  %v685_v26 = vld [vmem:[%s19704_s1 + $0x14b0] sm:$0xff]  ;;  %v746_v28 = vld [vmem:[%s19704_s1 + $0x1698] sm:$0xff] }
 0x455   :  { %v13141_v33 = vcombine.high %v681_v35, %v685_v26  ;;  %v13206_v43 = vcombine.low %v746_v28, %v750_v63 }
 0x456   :  { %10879 = vmatpush1.bf16.msra.mxu0 %v13092_v37  ;;  %v13207_v37 = vcombine.high %v746_v28, %v750_v63  ;;  %v729_v63 = vld [vmem:[%s19704_s1 + $0x1610] sm:$0xff] }
 0x457   :  { %11437 = vmatpush1.bf16.msra.mxu1 %v13158_v38  ;;  %10880 = vmatprep.subr.bf16.mxu0 %v13101_v11  ;;  %v693_v38 = vld [vmem:[%s19704_s1 + $0x14f0] sm:$0xff]  ;;  %v754_v11 = vld [vmem:[%s19704_s1 + $0x16d8] sm:$0xff] }
 0x458   :  { %11438 = vmatprep.subr.bf16.mxu1 %v13167_v42  ;;  %v13140_v42 = vcombine.low %v681_v35, %v685_v26 }
 0x45a   :  { %10881 = vmatpush1.bf16.msra.mxu0 %v13100_v52  ;;  %v701_v52 = vld [vmem:[%s19704_s1 + $0x1530] sm:$0xff] }
 0x45b   :  { %11439 = vmatpush1.bf16.msra.mxu1 %v13166_v17  ;;  %10882 = vmatprep.subr.bf16.mxu0 %v13109_v54  ;;  %v762_v17 = vld [vmem:[%s19704_s1 + $0x1718] sm:$0xff]  ;;  %v13157_v53 = vcombine.high %v697_v49, %v701_v52 }
 0x45c   :  { %11440 = vmatprep.subr.bf16.mxu1 %v13175_v58  ;;  %v766_v54 = vld [vmem:[%s19704_s1 + $0x1738] sm:$0xff] }
 0x45d   :  { %v13223_v1 = vcombine.high %v762_v17, %v766_v54  ;;  %v13222_v4 = vcombine.low %v762_v17, %v766_v54  ;;  %v745_v54 = vld [vmem:[%s19704_s1 + $0x1690] sm:$0xff] }
 0x45e   :  { %10883 = vmatpush1.bf16.msra.mxu0 %v13108_v62  ;;  %v709_v62 = vld [vmem:[%s19704_s1 + $0x1570] sm:$0xff] }
 0x45f   :  { %11441 = vmatpush1.bf16.msra.mxu1 %v13174_v2  ;;  %10884 = vmatprep.subr.bf16.mxu0 %v13117_v9  ;;  %v770_v2 = vld [vmem:[%s19704_s1 + $0x1758] sm:$0xff]  ;;  %v13165_v5 = vcombine.high %v705_v60, %v709_v62 }
 0x460   :  { %11442 = vmatprep.subr.bf16.mxu1 %v13183_v3  ;;  %v774_v9 = vld [vmem:[%s19704_s1 + $0x1778] sm:$0xff]  ;;  %v13156_v3 = vcombine.low %v697_v49, %v701_v52 }
 0x461   :  { %v13231_v6 = vcombine.high %v770_v2, %v774_v9  ;;  %v13230_v15 = vcombine.low %v770_v2, %v774_v9  ;;  %v753_v9 = vld [vmem:[%s19704_s1 + $0x16d0] sm:$0xff] }
 0x462   :  { %10885 = vmatpush1.bf16.msra.mxu0 %v13116_v8  ;;  %v717_v8 = vld [vmem:[%s19704_s1 + $0x15b0] sm:$0xff] }
 0x463   :  { %11443 = vmatpush1.bf16.msra.mxu1 %v13182_v10  ;;  %10895 = vmatprep.subr.bf16.mxu0 %v13125_v22  ;;  %v778_v10 = vld [vmem:[%s19704_s1 + $0x1798] sm:$0xff]  ;;  %v13173_v32 = vcombine.high %v713_v7, %v717_v8 }
 0x464   :  { %11444 = vmatprep.subr.bf16.mxu1 %v13191_v12  ;;  %v782_v22 = vld [vmem:[%s19704_s1 + $0x17b8] sm:$0xff]  ;;  %v13164_v12 = vcombine.low %v705_v60, %v709_v62 }
 0x465   :  { %10887 = vmatmul.mubr.bf16.vlgmr.msra.gmra.mrb[8].mxu0 %v15556_v39  ;;  %v689_v39 = vld [vmem:[%s19704_s1 + $0x14d0] sm:$0xff]  ;;  %v13239_v36 = vcombine.high %v778_v10, %v782_v22  ;;  %v13238_v35 = vcombine.low %v778_v10, %v782_v22 }
 0x466   :  { %10896 = vmatpush1.bf16.msra.mxu0 %v13124_v51  ;;  %10927 = vmatprep.mubr.bf16.mxu0 %v15572_v48  ;;  %v758_v48 = vld [vmem:[%s19704_s1 + $0x16f8] sm:$0xff]  ;;  %v13149_v20 = vcombine.high %v689_v39, %v693_v38  ;;  %v13148_v58 = vcombine.low %v689_v39, %v693_v38  ;;  %v725_v51 = vld [vmem:[%s19704_s1 + $0x15f0] sm:$0xff] }
 0x467   :  { %11445 = vmatpush1.bf16.msra.mxu1 %v13190_v21  ;;  %10897 = vmatprep.subr.bf16.mxu0 %v13133_v61  ;;  %v13215_v0 = vcombine.high %v754_v11, %v758_v48  ;;  %v13214_v27 = vcombine.low %v754_v11, %v758_v48  ;;  %v786_v21 = vld [vmem:[%s19704_s1 + $0x17d8] sm:$0xff]  ;;  %v13181_v26 = vcombine.high %v721_v18, %v725_v51  ;;  %v737_v48 = vld [vmem:[%s19704_s1 + $0x1650] sm:$0xff] }
 0x468   :  { %11446 = vmatprep.subr.bf16.mxu1 %v13199_v59  ;;  %v790_v61 = vld [vmem:[%s19704_s1 + $0x17f8] sm:$0xff]  ;;  %v13172_v59 = vcombine.low %v713_v7, %v717_v8  ;;  %v761_v22 = vld [vmem:[%s19704_s1 + $0x1710] sm:$0xff] }
 0x469   :  { %v13247_v28 = vcombine.high %v786_v21, %v790_v61  ;;  %v13246_v39 = vcombine.low %v786_v21, %v790_v61  ;;  %v769_v61 = vld [vmem:[%s19704_s1 + $0x1750] sm:$0xff] }
 0x46a   :  { %10898 = vmatpush1.bf16.msra.mxu0 %v13132_v30  ;;  %v733_v30 = vld [vmem:[%s19704_s1 + $0x1630] sm:$0xff] }
 0x46b   :  { %11447 = vmatpush1.bf16.msra.mxu1 %v13198_v23  ;;  %10899 = vmatprep.subr.bf16.mxu0 %v13141_v33  ;;  %v794_v23 = vld [vmem:[%s19704_s1 + $0x1818] sm:$0xff]  ;;  %v13189_v38 = vcombine.high %v729_v63, %v733_v30 }
 0x46c   :  { %11448 = vmatprep.subr.bf16.mxu1 %v13207_v37  ;;  %v798_v33 = vld [vmem:[%s19704_s1 + $0x1838] sm:$0xff]  ;;  %v13180_v37 = vcombine.low %v721_v18, %v725_v51 }
 0x46d   :  { %v13255_v11 = vcombine.high %v794_v23, %v798_v33  ;;  %v13254_v49 = vcombine.low %v794_v23, %v798_v33  ;;  %v777_v33 = vld [vmem:[%s19704_s1 + $0x1790] sm:$0xff] }
 0x46e   :  { %10900 = vmatpush1.bf16.msra.mxu0 %v13140_v42  ;;  %v741_v42 = vld [vmem:[%s19704_s1 + $0x1670] sm:$0xff] }
 0x46f   :  { %11449 = vmatpush1.bf16.msra.mxu1 %v13206_v43  ;;  %10901 = vmatprep.subr.bf16.mxu0 %v13149_v20  ;;  %v802_v43 = vld [vmem:[%s19704_s1 + $0x1858] sm:$0xff]  ;;  %v13197_v52 = vcombine.high %v737_v48, %v741_v42 }
 0x470   :  { %11450 = vmatprep.subr.bf16.mxu1 %v13215_v0  ;;  %v806_v20 = vld [vmem:[%s19704_s1 + $0x1878] sm:$0xff]  ;;  %v13188_v0 = vcombine.low %v729_v63, %v733_v30 }
 0x471   :  { %v13263_v17 = vcombine.high %v802_v43, %v806_v20  ;;  %v13262_v60 = vcombine.low %v802_v43, %v806_v20  ;;  %v785_v20 = vld [vmem:[%s19704_s1 + $0x17d0] sm:$0xff] }
 0x472   :  { %10902 = vmatpush1.bf16.msra.mxu0 %v13148_v58  ;;  %v749_v58 = vld [vmem:[%s19704_s1 + $0x16b0] sm:$0xff] }
 0x473   :  { %11451 = vmatpush1.bf16.msra.mxu1 %v13214_v27  ;;  %10903 = vmatprep.subr.bf16.mxu0 %v13157_v53  ;;  %v810_v27 = vld [vmem:[%s19704_s1 + $0x1898] sm:$0xff]  ;;  %v13205_v62 = vcombine.high %v745_v54, %v749_v58 }
 0x474   :  { %11452 = vmatprep.subr.bf16.mxu1 %v13223_v1  ;;  %v814_v53 = vld [vmem:[%s19704_s1 + $0x18b8] sm:$0xff]  ;;  %v13196_v1 = vcombine.low %v737_v48, %v741_v42 }
 0x475   :  { %v13271_v2 = vcombine.high %v810_v27, %v814_v53  ;;  %v13270_v7 = vcombine.low %v810_v27, %v814_v53  ;;  %v793_v53 = vld [vmem:[%s19704_s1 + $0x1810] sm:$0xff] }
 0x476   :  { %10904 = vmatpush1.bf16.msra.mxu0 %v13156_v3  ;;  %v757_v3 = vld [vmem:[%s19704_s1 + $0x16f0] sm:$0xff] }
 0x477   :  { %11453 = vmatpush1.bf16.msra.mxu1 %v13222_v4  ;;  %10905 = vmatprep.subr.bf16.mxu0 %v13165_v5  ;;  %v818_v4 = vld [vmem:[%s19704_s1 + $0x18d8] sm:$0xff]  ;;  %v13213_v8 = vcombine.high %v753_v9, %v757_v3 }
 0x478   :  { %11454 = vmatprep.subr.bf16.mxu1 %v13231_v6  ;;  %v822_v5 = vld [vmem:[%s19704_s1 + $0x18f8] sm:$0xff]  ;;  %v13204_v6 = vcombine.low %v745_v54, %v749_v58 }
 0x479   :  { %v13279_v10 = vcombine.high %v818_v4, %v822_v5  ;;  %v13278_v18 = vcombine.low %v818_v4, %v822_v5  ;;  %v801_v5 = vld [vmem:[%s19704_s1 + $0x1850] sm:$0xff] }
 0x47a   :  { %10906 = vmatpush1.bf16.msra.mxu0 %v13164_v12  ;;  %v765_v12 = vld [vmem:[%s19704_s1 + $0x1730] sm:$0xff] }
 0x47b   :  { %11455 = vmatpush1.bf16.msra.mxu1 %v13230_v15  ;;  %10907 = vmatprep.subr.bf16.mxu0 %v13173_v32  ;;  %v826_v15 = vld [vmem:[%s19704_s1 + $0x1918] sm:$0xff]  ;;  %v13221_v51 = vcombine.high %v761_v22, %v765_v12 }
 0x47c   :  { %11456 = vmatprep.subr.bf16.mxu1 %v13239_v36  ;;  %v830_v32 = vld [vmem:[%s19704_s1 + $0x1938] sm:$0xff]  ;;  %v13212_v36 = vcombine.low %v753_v9, %v757_v3 }
 0x47d   :  { %v13287_v21 = vcombine.high %v826_v15, %v830_v32  ;;  %v13286_v63 = vcombine.low %v826_v15, %v830_v32  ;;  %v809_v32 = vld [vmem:[%s19704_s1 + $0x1890] sm:$0xff] }
 0x47e   :  { %10908 = vmatpush1.bf16.msra.mxu0 %v13172_v59  ;;  %v773_v59 = vld [vmem:[%s19704_s1 + $0x1770] sm:$0xff] }
 0x47f   :  { %11457 = vmatpush1.bf16.msra.mxu1 %v13238_v35  ;;  %10909 = vmatprep.subr.bf16.mxu0 %v13181_v26  ;;  %v834_v35 = vld [vmem:[%s19704_s1 + $0x1958] sm:$0xff]  ;;  %v13229_v30 = vcombine.high %v769_v61, %v773_v59 }
 0x480   :  { %11458 = vmatprep.subr.bf16.mxu1 %v13247_v28  ;;  %v838_v26 = vld [vmem:[%s19704_s1 + $0x1978] sm:$0xff]  ;;  %v13220_v28 = vcombine.low %v761_v22, %v765_v12 }
 0x481   :  { %v13295_v23 = vcombine.high %v834_v35, %v838_v26  ;;  %v13294_v48 = vcombine.low %v834_v35, %v838_v26  ;;  %v821_v26 = vld [vmem:[%s19704_s1 + $0x18f0] sm:$0xff] }
 0x482   :  { %10910 = vmatpush1.bf16.msra.mxu0 %v13180_v37  ;;  %v781_v37 = vld [vmem:[%s19704_s1 + $0x17b0] sm:$0xff] }
 0x483   :  { %11459 = vmatpush1.bf16.msra.mxu1 %v13246_v39  ;;  %10911 = vmatprep.subr.bf16.mxu0 %v13189_v38  ;;  %v842_v39 = vld [vmem:[%s19704_s1 + $0x1998] sm:$0xff]  ;;  %v13237_v42 = vcombine.high %v777_v33, %v781_v37 }
 0x484   :  { %11469 = vmatprep.subr.bf16.mxu1 %v13255_v11  ;;  %v846_v38 = vld [vmem:[%s19704_s1 + $0x19b8] sm:$0xff]  ;;  %v13228_v11 = vcombine.low %v769_v61, %v773_v59 }
 0x485   :  { %v13303_v43 = vcombine.high %v842_v39, %v846_v38  ;;  %v13302_v54 = vcombine.low %v842_v39, %v846_v38  ;;  %v829_v39 = vld [vmem:[%s19704_s1 + $0x1930] sm:$0xff]  ;;  %v890_v38 = vld [vmem:[%s19704_s1 + $0x1b18] sm:$0xff] }
 0x486   :  { %10912 = vmatpush1.bf16.msra.mxu0 %v13188_v0  ;;  %11461 = vmatmul.mubr.bf16.vlgmr.msra.gmra.mrb[4].mxu1 %v15767_v13  ;;  %v789_v0 = vld [vmem:[%s19704_s1 + $0x17f0] sm:$0xff] }
 0x487   :  { %11470 = vmatpush1.bf16.msra.mxu1 %v13254_v49  ;;  %10913 = vmatprep.subr.bf16.mxu0 %v13197_v52  ;;  %v850_v49 = vld [vmem:[%s19704_s1 + $0x19d8] sm:$0xff]  ;;  %v13245_v58 = vcombine.high %v785_v20, %v789_v0 }
 0x488   :  { %11471 = vmatprep.subr.bf16.mxu1 %v13263_v17  ;;  %11501 = vmatprep.mubr.bf16.mxu1 %v15782_v24  ;;  %v854_v52 = vld [vmem:[%s19704_s1 + $0x19f8] sm:$0xff]  ;;  %v13236_v17 = vcombine.low %v777_v33, %v781_v37  ;;  %v825_v37 = vld [vmem:[%s19704_s1 + $0x1910] sm:$0xff] }
 0x489   :  { %v13311_v27 = vcombine.high %v850_v49, %v854_v52  ;;  %v13310_v9 = vcombine.low %v850_v49, %v854_v52  ;;  %v837_v49 = vld [vmem:[%s19704_s1 + $0x1970] sm:$0xff]  ;;  %v898_v52 = vld [vmem:[%s19704_s1 + $0x1b58] sm:$0xff] }
 0x48a   :  { %10914 = vmatpush1.bf16.msra.mxu0 %v13196_v1  ;;  %v797_v1 = vld [vmem:[%s19704_s1 + $0x1830] sm:$0xff] }
 0x48b   :  { %11472 = vmatpush1.bf16.msra.mxu1 %v13262_v60  ;;  %10915 = vmatprep.subr.bf16.mxu0 %v13205_v62  ;;  %v858_v60 = vld [vmem:[%s19704_s1 + $0x1a18] sm:$0xff]  ;;  %v13253_v3 = vcombine.high %v793_v53, %v797_v1 }
 0x48c   :  { %11473 = vmatprep.subr.bf16.mxu1 %v13271_v2  ;;  %v862_v62 = vld [vmem:[%s19704_s1 + $0x1a38] sm:$0xff]  ;;  %v13244_v2 = vcombine.low %v785_v20, %v789_v0  ;;  %v833_v0 = vld [vmem:[%s19704_s1 + $0x1950] sm:$0xff] }
 0x48d   :  { %v13319_v4 = vcombine.high %v858_v60, %v862_v62  ;;  %v13318_v22 = vcombine.low %v858_v60, %v862_v62  ;;  %v845_v60 = vld [vmem:[%s19704_s1 + $0x19b0] sm:$0xff]  ;;  %v906_v62 = vld [vmem:[%s19704_s1 + $0x1b98] sm:$0xff] }
 0x48e   :  { %10916 = vmatpush1.bf16.msra.mxu0 %v13204_v6  ;;  %v805_v6 = vld [vmem:[%s19704_s1 + $0x1870] sm:$0xff] }
 0x48f   :  { %11474 = vmatpush1.bf16.msra.mxu1 %v13270_v7  ;;  %10917 = vmatprep.subr.bf16.mxu0 %v13213_v8  ;;  %v866_v7 = vld [vmem:[%s19704_s1 + $0x1a58] sm:$0xff]  ;;  %v13261_v12 = vcombine.high %v801_v5, %v805_v6 }
 0x490   :  { %11475 = vmatprep.subr.bf16.mxu1 %v13279_v10  ;;  %v870_v8 = vld [vmem:[%s19704_s1 + $0x1a78] sm:$0xff]  ;;  %v13252_v10 = vcombine.low %v793_v53, %v797_v1  ;;  %v841_v1 = vld [vmem:[%s19704_s1 + $0x1990] sm:$0xff] }
 0x491   :  { %v13327_v15 = vcombine.high %v866_v7, %v870_v8  ;;  %v13326_v61 = vcombine.low %v866_v7, %v870_v8  ;;  %v853_v7 = vld [vmem:[%s19704_s1 + $0x19f0] sm:$0xff]  ;;  %v914_v8 = vld [vmem:[%s19704_s1 + $0x1bd8] sm:$0xff] }
 0x492   :  { %10918 = vmatpush1.bf16.msra.mxu0 %v13212_v36  ;;  %v813_v36 = vld [vmem:[%s19704_s1 + $0x18b0] sm:$0xff] }
 0x493   :  { %11476 = vmatpush1.bf16.msra.mxu1 %v13278_v18  ;;  %10919 = vmatprep.subr.bf16.mxu0 %v13221_v51  ;;  %v874_v18 = vld [vmem:[%s19704_s1 + $0x1a98] sm:$0xff]  ;;  %v13269_v59 = vcombine.high %v809_v32, %v813_v36 }
 0x494   :  { %11477 = vmatprep.subr.bf16.mxu1 %v13287_v21  ;;  %v878_v51 = vld [vmem:[%s19704_s1 + $0x1ab8] sm:$0xff]  ;;  %v13260_v21 = vcombine.low %v801_v5, %v805_v6  ;;  %v849_v6 = vld [vmem:[%s19704_s1 + $0x19d0] sm:$0xff] }
 0x495   :  { %v13335_v35 = vcombine.high %v874_v18, %v878_v51 }
 0x496   :  { %10920 = vmatpush1.bf16.msra.mxu0 %v13220_v28  ;;  %v882_v28 = vld [vmem:[%s19704_s1 + $0x1ad8] sm:$0xff] }
 0x497   :  { %11478 = vmatpush1.bf16.msra.mxu1 %v13286_v63  ;;  %10921 = vmatprep.subr.bf16.mxu0 %v13229_v30  ;;  %v13268_v63 = vcombine.low %v809_v32, %v813_v36  ;;  %v13334_v30 = vcombine.low %v874_v18, %v878_v51  ;;  %v857_v36 = vld [vmem:[%s19704_s1 + $0x1a10] sm:$0xff]  ;;  %v922_v51 = vld [vmem:[%s19704_s1 + $0x1c18] sm:$0xff] }
 0x498   :  { %11479 = vmatprep.subr.bf16.mxu1 %v13295_v23  ;;  %v861_v18 = vld [vmem:[%s19704_s1 + $0x1a30] sm:$0xff] }
 0x49a   :  { %10922 = vmatpush1.bf16.msra.mxu0 %v13228_v11  ;;  %v894_v11 = vld [vmem:[%s19704_s1 + $0x1b38] sm:$0xff] }
 0x49b   :  { %11480 = vmatpush1.bf16.msra.mxu1 %v13294_v48  ;;  %10923 = vmatprep.subr.bf16.mxu0 %v13237_v42  ;;  %v13351_v20 = vcombine.high %v890_v38, %v894_v11 }
 0x49c   :  { %11481 = vmatprep.subr.bf16.mxu1 %v13303_v43  ;;  %v13285_v43 = vcombine.high %v825_v37, %v829_v39 }
 0x49e   :  { %10924 = vmatpush1.bf16.msra.mxu0 %v13236_v17  ;;  %v902_v17 = vld [vmem:[%s19704_s1 + $0x1b78] sm:$0xff] }
 0x49f   :  { %11482 = vmatpush1.bf16.msra.mxu1 %v13302_v54  ;;  %10925 = vmatprep.subr.bf16.mxu0 %v13245_v58  ;;  %v13284_v54 = vcombine.low %v825_v37, %v829_v39  ;;  %v13350_v58 = vcombine.low %v890_v38, %v894_v11  ;;  %v13359_v53 = vcombine.high %v898_v52, %v902_v17  ;;  %v873_v39 = vld [vmem:[%s19704_s1 + $0x1a90] sm:$0xff]  ;;  %v938_v11 = vld [vmem:[%s19704_s1 + $0x1c98] sm:$0xff] }
 0x4a0   :  { %11483 = vmatprep.subr.bf16.mxu1 %v13311_v27  ;;  %v13293_v27 = vcombine.high %v833_v0, %v837_v49  ;;  %v877_v38 = vld [vmem:[%s19704_s1 + $0x1ab0] sm:$0xff] }
 0x4a2   :  { %10926 = vmatpush1.bf16.msra.mxu0 %v13244_v2  ;;  %v910_v2 = vld [vmem:[%s19704_s1 + $0x1bb8] sm:$0xff] }
 0x4a3   :  { %11484 = vmatpush1.bf16.msra.mxu1 %v13310_v9  ;;  %10936 = vmatprep.subr.bf16.mxu0 %v13253_v3  ;;  %v13292_v9 = vcombine.low %v833_v0, %v837_v49  ;;  %v13358_v3 = vcombine.low %v898_v52, %v902_v17  ;;  %v13367_v5 = vcombine.high %v906_v62, %v910_v2  ;;  %v881_v49 = vld [vmem:[%s19704_s1 + $0x1ad0] sm:$0xff]  ;;  %v946_v17 = vld [vmem:[%s19704_s1 + $0x1cd8] sm:$0xff] }
 0x4a4   :  { %11485 = vmatprep.subr.bf16.mxu1 %v13319_v4  ;;  %v13301_v4 = vcombine.high %v841_v1, %v845_v60  ;;  %v885_v52 = vld [vmem:[%s19704_s1 + $0x1af0] sm:$0xff] }
 0x4a5   :  { %10928 = vmatmul.mubr.bf16.vlgmr.msra.gmra.mrb[8].mxu0 %v15767_v13  ;;  %v817_v13 = vld [vmem:[%s19704_s1 + $0x18d0] sm:$0xff] }
 0x4a6   :  { %10937 = vmatpush1.bf16.msra.mxu0 %v13252_v10  ;;  %10968 = vmatprep.mubr.bf16.mxu0 %v15782_v24  ;;  %v886_v24 = vld [vmem:[%s19704_s1 + $0x1af8] sm:$0xff]  ;;  %v13277_v23 = vcombine.high %v817_v13, %v821_v26  ;;  %v13276_v48 = vcombine.low %v817_v13, %v821_v26  ;;  %v865_v26 = vld [vmem:[%s19704_s1 + $0x1a50] sm:$0xff] }
 0x4a7   :  { %11486 = vmatpush1.bf16.msra.mxu1 %v13318_v22  ;;  %10938 = vmatprep.subr.bf16.mxu0 %v13261_v12  ;;  %v13343_v33 = vcombine.high %v882_v28, %v886_v24  ;;  %v13342_v42 = vcombine.low %v882_v28, %v886_v24  ;;  %v918_v10 = vld [vmem:[%s19704_s1 + $0x1bf8] sm:$0xff]  ;;  %v13300_v22 = vcombine.low %v841_v1, %v845_v60  ;;  %v869_v28 = vld [vmem:[%s19704_s1 + $0x1a70] sm:$0xff] }
 0x4a8   :  { %11487 = vmatprep.subr.bf16.mxu1 %v13327_v15  ;;  %v13366_v12 = vcombine.low %v906_v62, %v910_v2  ;;  %v13309_v15 = vcombine.high %v849_v6, %v853_v7  ;;  %v13375_v32 = vcombine.high %v914_v8, %v918_v10  ;;  %v930_v24 = vld [vmem:[%s19704_s1 + $0x1c58] sm:$0xff]  ;;  %v889_v60 = vld [vmem:[%s19704_s1 + $0x1b10] sm:$0xff] }
 0x4a9   :  { %v893_v62 = vld [vmem:[%s19704_s1 + $0x1b30] sm:$0xff]  ;;  %v954_v2 = vld [vmem:[%s19704_s1 + $0x1d18] sm:$0xff] }
 0x4aa   :  { %10939 = vmatpush1.bf16.msra.mxu0 %v13260_v21  ;;  %v926_v21 = vld [vmem:[%s19704_s1 + $0x1c38] sm:$0xff] }
 0x4ab   :  { %11488 = vmatpush1.bf16.msra.mxu1 %v13326_v61  ;;  %10940 = vmatprep.subr.bf16.mxu0 %v13269_v59  ;;  %v13308_v61 = vcombine.low %v849_v6, %v853_v7  ;;  %v13374_v59 = vcombine.low %v914_v8, %v918_v10  ;;  %v13383_v13 = vcombine.high %v922_v51, %v926_v21  ;;  %v897_v7 = vld [vmem:[%s19704_s1 + $0x1b50] sm:$0xff]  ;;  %v962_v10 = vld [vmem:[%s19704_s1 + $0x1d58] sm:$0xff] }
 0x4ac   :  { %11489 = vmatprep.subr.bf16.mxu1 %v13335_v35  ;;  %v13317_v35 = vcombine.high %v857_v36, %v861_v18  ;;  %v901_v8 = vld [vmem:[%s19704_s1 + $0x1b70] sm:$0xff] }
 0x4ae   :  { %10941 = vmatpush1.bf16.msra.mxu0 %v13268_v63  ;;  %v934_v63 = vld [vmem:[%s19704_s1 + $0x1c78] sm:$0xff] }
 0x4af   :  { %11490 = vmatpush1.bf16.msra.mxu1 %v13334_v30  ;;  %10942 = vmatprep.subr.bf16.mxu0 %v13277_v23  ;;  %v13316_v30 = vcombine.low %v857_v36, %v861_v18  ;;  %v13382_v23 = vcombine.low %v922_v51, %v926_v21  ;;  %v13391_v37 = vcombine.high %v930_v24, %v934_v63  ;;  %v905_v18 = vld [vmem:[%s19704_s1 + $0x1b90] sm:$0xff]  ;;  %v970_v21 = vld [vmem:[%s19704_s1 + $0x1d98] sm:$0xff] }
 0x4b0   :  { %11491 = vmatprep.subr.bf16.mxu1 %v13343_v33  ;;  %v13325_v33 = vcombine.high %v865_v26, %v869_v28  ;;  %v909_v51 = vld [vmem:[%s19704_s1 + $0x1bb0] sm:$0xff] }
 0x4b2   :  { %10943 = vmatpush1.bf16.msra.mxu0 %v13276_v48  ;;  %v942_v48 = vld [vmem:[%s19704_s1 + $0x1cb8] sm:$0xff] }
 0x4b3   :  { %11492 = vmatpush1.bf16.msra.mxu1 %v13342_v42  ;;  %10944 = vmatprep.subr.bf16.mxu0 %v13285_v43  ;;  %v13324_v42 = vcombine.low %v865_v26, %v869_v28  ;;  %v13390_v43 = vcombine.low %v930_v24, %v934_v63  ;;  %v13399_v0 = vcombine.high %v938_v11, %v942_v48  ;;  %v913_v28 = vld [vmem:[%s19704_s1 + $0x1bd0] sm:$0xff]  ;;  %v978_v63 = vld [vmem:[%s19704_s1 + $0x1dd8] sm:$0xff] }
 0x4b4   :  { %11493 = vmatprep.subr.bf16.mxu1 %v13351_v20  ;;  %v13333_v20 = vcombine.high %v873_v39, %v877_v38  ;;  %v917_v24 = vld [vmem:[%s19704_s1 + $0x1bf0] sm:$0xff] }
 0x4b6   :  { %10945 = vmatpush1.bf16.msra.mxu0 %v13284_v54  ;;  %v950_v54 = vld [vmem:[%s19704_s1 + $0x1cf8] sm:$0xff] }
 0x4b7   :  { %11494 = vmatpush1.bf16.msra.mxu1 %v13350_v58  ;;  %10946 = vmatprep.subr.bf16.mxu0 %v13293_v27  ;;  %v13332_v58 = vcombine.low %v873_v39, %v877_v38  ;;  %v13398_v27 = vcombine.low %v938_v11, %v942_v48  ;;  %v13407_v1 = vcombine.high %v946_v17, %v950_v54  ;;  %v921_v38 = vld [vmem:[%s19704_s1 + $0x1c10] sm:$0xff]  ;;  %v986_v48 = vld [vmem:[%s19704_s1 + $0x1e18] sm:$0xff] }
 0x4b8   :  { %11495 = vmatprep.subr.bf16.mxu1 %v13359_v53  ;;  %v13341_v53 = vcombine.high %v881_v49, %v885_v52  ;;  %v925_v11 = vld [vmem:[%s19704_s1 + $0x1c30] sm:$0xff] }
 0x4ba   :  { %10947 = vmatpush1.bf16.msra.mxu0 %v13292_v9  ;;  %v958_v9 = vld [vmem:[%s19704_s1 + $0x1d38] sm:$0xff] }
 0x4bb   :  { %11496 = vmatpush1.bf16.msra.mxu1 %v13358_v3  ;;  %10948 = vmatprep.subr.bf16.mxu0 %v13301_v4  ;;  %v13340_v3 = vcombine.low %v881_v49, %v885_v52  ;;  %v13406_v4 = vcombine.low %v946_v17, %v950_v54  ;;  %v13415_v6 = vcombine.high %v954_v2, %v958_v9  ;;  %v929_v52 = vld [vmem:[%s19704_s1 + $0x1c50] sm:$0xff]  ;;  %v994_v54 = vld [vmem:[%s19704_s1 + $0x1e58] sm:$0xff] }
 0x4bc   :  { %11497 = vmatprep.subr.bf16.mxu1 %v13367_v5  ;;  %v13349_v5 = vcombine.high %v889_v60, %v893_v62  ;;  %v933_v17 = vld [vmem:[%s19704_s1 + $0x1c70] sm:$0xff] }
 0x4be   :  { %10949 = vmatpush1.bf16.msra.mxu0 %v13300_v22  ;;  %v966_v22 = vld [vmem:[%s19704_s1 + $0x1d78] sm:$0xff] }
 0x4bf   :  { %11498 = vmatpush1.bf16.msra.mxu1 %v13366_v12  ;;  %10950 = vmatprep.subr.bf16.mxu0 %v13309_v15  ;;  %v13348_v12 = vcombine.low %v889_v60, %v893_v62  ;;  %v13414_v15 = vcombine.low %v954_v2, %v958_v9  ;;  %v13423_v36 = vcombine.high %v962_v10, %v966_v22  ;;  %v937_v62 = vld [vmem:[%s19704_s1 + $0x1c90] sm:$0xff]  ;;  %v1002_v9 = vld [vmem:[%s19704_s1 + $0x1e98] sm:$0xff] }
 0x4c0   :  { %11499 = vmatprep.subr.bf16.mxu1 %v13375_v32  ;;  %v13357_v32 = vcombine.high %v897_v7, %v901_v8  ;;  %v941_v2 = vld [vmem:[%s19704_s1 + $0x1cb0] sm:$0xff] }
 0x4c2   :  { %10951 = vmatpush1.bf16.msra.mxu0 %v13308_v61  ;;  %v974_v61 = vld [vmem:[%s19704_s1 + $0x1db8] sm:$0xff] }
 0x4c3   :  { %11500 = vmatpush1.bf16.msra.mxu1 %v13374_v59  ;;  %10952 = vmatprep.subr.bf16.mxu0 %v13317_v35  ;;  %v13356_v59 = vcombine.low %v897_v7, %v901_v8  ;;  %v13422_v35 = vcombine.low %v962_v10, %v966_v22  ;;  %v13431_v26 = vcombine.high %v970_v21, %v974_v61  ;;  %v949_v8 = vld [vmem:[%s19704_s1 + $0x1cf0] sm:$0xff]  ;;  %v1010_v10 = vld [vmem:[%s19704_s1 + $0x1ed8] sm:$0xff] }
 0x4c4   :  { %11510 = vmatprep.subr.bf16.mxu1 %v13383_v13  ;;  %v13365_v13 = vcombine.high %v905_v18, %v909_v51  ;;  %v13396_v22 = vcombine.low %v937_v62, %v941_v2 }
 0x4c6   :  { %10953 = vmatpush1.bf16.msra.mxu0 %v13316_v30  ;;  %11502 = vmatmul.mubr.bf16.vlgmr.msra.gmra.mrb[4].mxu1 %v15970_v50  ;;  %v982_v30 = vld [vmem:[%s19704_s1 + $0x1df8] sm:$0xff] }
 0x4c7   :  { %11511 = vmatpush1.bf16.msra.mxu1 %v13382_v23  ;;  %10954 = vmatprep.subr.bf16.mxu0 %v13325_v33  ;;  %v13364_v23 = vcombine.low %v905_v18, %v909_v51  ;;  %v13430_v33 = vcombine.low %v970_v21, %v974_v61  ;;  %v13439_v39 = vcombine.high %v978_v63, %v982_v30  ;;  %v957_v18 = vld [vmem:[%s19704_s1 + $0x1d30] sm:$0xff]  ;;  %v1018_v51 = vld [vmem:[%s19704_s1 + $0x1f18] sm:$0xff] }
 0x4c8   :  { %11512 = vmatprep.subr.bf16.mxu1 %v13391_v37  ;;  %11542 = vmatprep.mubr.bf16.mxu1 %v15986_v55  ;;  %v13373_v37 = vcombine.high %v913_v28, %v917_v24  ;;  %v1022_v21 = vld [vmem:[%s19704_s1 + $0x1f38] sm:$0xff] }
 0x4ca   :  { %10955 = vmatpush1.bf16.msra.mxu0 %v13324_v42  ;;  %v990_v42 = vld [vmem:[%s19704_s1 + $0x1e38] sm:$0xff] }
 0x4cb   :  { %11513 = vmatpush1.bf16.msra.mxu1 %v13390_v43  ;;  %10956 = vmatprep.subr.bf16.mxu0 %v13333_v20  ;;  %v13372_v43 = vcombine.low %v913_v28, %v917_v24  ;;  %v13438_v20 = vcombine.low %v978_v63, %v982_v30  ;;  %v13447_v49 = vcombine.high %v986_v48, %v990_v42  ;;  %v965_v28 = vld [vmem:[%s19704_s1 + $0x1d70] sm:$0xff]  ;;  %v1026_v24 = vld [vmem:[%s19704_s1 + $0x1f58] sm:$0xff] }
 0x4cc   :  { %11514 = vmatprep.subr.bf16.mxu1 %v13399_v0  ;;  %v13381_v0 = vcombine.high %v921_v38, %v925_v11  ;;  %v1030_v63 = vld [vmem:[%s19704_s1 + $0x1f78] sm:$0xff] }
 0x4ce   :  { %10957 = vmatpush1.bf16.msra.mxu0 %v13332_v58  ;;  %v998_v58 = vld [vmem:[%s19704_s1 + $0x1e78] sm:$0xff] }
 0x4cf   :  { %11515 = vmatpush1.bf16.msra.mxu1 %v13398_v27  ;;  %10958 = vmatprep.subr.bf16.mxu0 %v13341_v53  ;;  %v13380_v27 = vcombine.low %v921_v38, %v925_v11  ;;  %v13446_v53 = vcombine.low %v986_v48, %v990_v42  ;;  %v13455_v60 = vcombine.high %v994_v54, %v998_v58  ;;  %v973_v38 = vld [vmem:[%s19704_s1 + $0x1db0] sm:$0xff]  ;;  %v1034_v11 = vld [vmem:[%s19704_s1 + $0x1f98] sm:$0xff] }
 0x4d0   :  { %11516 = vmatprep.subr.bf16.mxu1 %v13407_v1  ;;  %v13389_v1 = vcombine.high %v929_v52, %v933_v17  ;;  %v1038_v48 = vld [vmem:[%s19704_s1 + $0x1fb8] sm:$0xff] }
 0x4d2   :  { %10959 = vmatpush1.bf16.msra.mxu0 %v13340_v3  ;;  %v1006_v3 = vld [vmem:[%s19704_s1 + $0x1eb8] sm:$0xff] }
 0x4d3   :  { %11517 = vmatpush1.bf16.msra.mxu1 %v13406_v4  ;;  %10960 = vmatprep.subr.bf16.mxu0 %v13349_v5  ;;  %v13388_v4 = vcombine.low %v929_v52, %v933_v17  ;;  %v13454_v5 = vcombine.low %v994_v54, %v998_v58  ;;  %v13463_v7 = vcombine.high %v1002_v9, %v1006_v3  ;;  %v981_v52 = vld [vmem:[%s19704_s1 + $0x1df0] sm:$0xff]  ;;  %v1042_v17 = vld [vmem:[%s19704_s1 + $0x1fd8] sm:$0xff] }
 0x4d4   :  { %11518 = vmatprep.subr.bf16.mxu1 %v13415_v6  ;;  %v13397_v6 = vcombine.high %v937_v62, %v941_v2  ;;  %v1046_v54 = vld [vmem:[%s19704_s1 + $0x1ff8] sm:$0xff]  ;;  %v989_v62 = vld [vmem:[%s19704_s1 + $0x1e30] sm:$0xff] }
 0x4d5   :  { %v1050_v2 = vld [vmem:[%s19704_s1 + $0x2018] sm:$0xff] }
 0x4d6   :  { %10961 = vmatpush1.bf16.msra.mxu0 %v13348_v12  ;;  %v13462_v12 = vcombine.low %v1002_v9, %v1006_v3  ;;  %v1054_v9 = vld [vmem:[%s19704_s1 + $0x2038] sm:$0xff] }
 0x4d7   :  { %11519 = vmatpush1.bf16.msra.mxu1 %v13414_v15  ;;  %10962 = vmatprep.subr.bf16.mxu0 %v13357_v32 }
 0x4d8   :  { %11520 = vmatprep.subr.bf16.mxu1 %v13423_v36  ;;  %v953_v36 = vld [vmem:[%s19704_s1 + $0x1d10] sm:$0xff] }
 0x4d9   :  { %v13412_v30 = vcombine.low %v953_v36, %v957_v18 }
 0x4da   :  { %10963 = vmatpush1.bf16.msra.mxu0 %v13356_v59 }
 0x4db   :  { %11521 = vmatpush1.bf16.msra.mxu1 %v13422_v35  ;;  %10964 = vmatprep.subr.bf16.mxu0 %v13365_v13  ;;  %v13413_v35 = vcombine.high %v953_v36, %v957_v18  ;;  %v13479_v13 = vcombine.high %v1018_v51, %v1022_v21  ;;  %v1005_v36 = vld [vmem:[%s19704_s1 + $0x1eb0] sm:$0xff]  ;;  %v1066_v18 = vld [vmem:[%s19704_s1 + $0x2098] sm:$0xff] }
 0x4dc   :  { %11522 = vmatprep.subr.bf16.mxu1 %v13431_v26  ;;  %v961_v26 = vld [vmem:[%s19704_s1 + $0x1d50] sm:$0xff] }
 0x4dd   :  { %v13420_v42 = vcombine.low %v961_v26, %v965_v28 }
 0x4de   :  { %10965 = vmatpush1.bf16.msra.mxu0 %v13364_v23  ;;  %v13478_v23 = vcombine.low %v1018_v51, %v1022_v21  ;;  %v1070_v51 = vld [vmem:[%s19704_s1 + $0x20b8] sm:$0xff] }
 0x4df   :  { %11523 = vmatpush1.bf16.msra.mxu1 %v13430_v33  ;;  %10966 = vmatprep.subr.bf16.mxu0 %v13373_v37  ;;  %v13421_v33 = vcombine.high %v961_v26, %v965_v28  ;;  %v13487_v37 = vcombine.high %v1026_v24, %v1030_v63  ;;  %v1013_v26 = vld [vmem:[%s19704_s1 + $0x1ef0] sm:$0xff]  ;;  %v1074_v28 = vld [vmem:[%s19704_s1 + $0x20d8] sm:$0xff] }
 0x4e0   :  { %11524 = vmatprep.subr.bf16.mxu1 %v13439_v39  ;;  %v969_v39 = vld [vmem:[%s19704_s1 + $0x1d90] sm:$0xff] }
 0x4e1   :  { %v13428_v58 = vcombine.low %v969_v39, %v973_v38 }
 0x4e2   :  { %10967 = vmatpush1.bf16.msra.mxu0 %v13372_v43  ;;  %v13486_v43 = vcombine.low %v1026_v24, %v1030_v63  ;;  %v1078_v24 = vld [vmem:[%s19704_s1 + $0x20f8] sm:$0xff] }
 0x4e3   :  { %11525 = vmatpush1.bf16.msra.mxu1 %v13438_v20  ;;  %10977 = vmatprep.subr.bf16.mxu0 %v13381_v0  ;;  %v13429_v20 = vcombine.high %v969_v39, %v973_v38  ;;  %v13495_v0 = vcombine.high %v1034_v11, %v1038_v48  ;;  %v1021_v39 = vld [vmem:[%s19704_s1 + $0x1f30] sm:$0xff]  ;;  %v1082_v38 = vld [vmem:[%s19704_s1 + $0x2118] sm:$0xff] }
 0x4e4   :  { %11526 = vmatprep.subr.bf16.mxu1 %v13447_v49  ;;  %v977_v49 = vld [vmem:[%s19704_s1 + $0x1dd0] sm:$0xff] }
 0x4e5   :  { %10969 = vmatmul.mubr.bf16.vlgmr.msra.gmra.mrb[8].mxu0 %v15970_v50  ;;  %v945_v50 = vld [vmem:[%s19704_s1 + $0x1cd0] sm:$0xff]  ;;  %v13436_v3 = vcombine.low %v977_v49, %v981_v52 }
 0x4e6   :  { %10978 = vmatpush1.bf16.msra.mxu0 %v13380_v27  ;;  %11009 = vmatprep.mubr.bf16.mxu0 %v15986_v55  ;;  %v1014_v55 = vld [vmem:[%s19704_s1 + $0x1ef8] sm:$0xff]  ;;  %v13405_v15 = vcombine.high %v945_v50, %v949_v8  ;;  %v13404_v61 = vcombine.low %v945_v50, %v949_v8  ;;  %v13494_v27 = vcombine.low %v1034_v11, %v1038_v48  ;;  %v997_v50 = vld [vmem:[%s19704_s1 + $0x1e70] sm:$0xff] }
 0x4e7   :  { %11527 = vmatpush1.bf16.msra.mxu1 %v13446_v53  ;;  %10979 = vmatprep.subr.bf16.mxu0 %v13389_v1  ;;  %v13471_v32 = vcombine.high %v1010_v10, %v1014_v55  ;;  %v13470_v59 = vcombine.low %v1010_v10, %v1014_v55  ;;  %v13437_v53 = vcombine.high %v977_v49, %v981_v52  ;;  %v1058_v8 = vld [vmem:[%s19704_s1 + $0x2058] sm:$0xff]  ;;  %v1029_v49 = vld [vmem:[%s19704_s1 + $0x1f70] sm:$0xff] }
 0x4e8   :  { %11528 = vmatprep.subr.bf16.mxu1 %v13455_v60  ;;  %v13503_v1 = vcombine.high %v1042_v17, %v1046_v54  ;;  %v985_v60 = vld [vmem:[%s19704_s1 + $0x1e10] sm:$0xff]  ;;  %v1062_v10 = vld [vmem:[%s19704_s1 + $0x2078] sm:$0xff] }
 0x4e9   :  { %v13444_v55 = vcombine.low %v985_v60, %v989_v62  ;;  %v1086_v11 = vld [vmem:[%s19704_s1 + $0x2138] sm:$0xff] }
 0x4ea   :  { %10980 = vmatpush1.bf16.msra.mxu0 %v13388_v4  ;;  %v13502_v4 = vcombine.low %v1042_v17, %v1046_v54  ;;  %v1090_v52 = vld [vmem:[%s19704_s1 + $0x2158] sm:$0xff] }
 0x4eb   :  { %11529 = vmatpush1.bf16.msra.mxu1 %v13454_v5  ;;  %10981 = vmatprep.subr.bf16.mxu0 %v13397_v6  ;;  %v13445_v5 = vcombine.high %v985_v60, %v989_v62  ;;  %v13511_v6 = vcombine.high %v1050_v2, %v1054_v9  ;;  %v1094_v17 = vld [vmem:[%s19704_s1 + $0x2178] sm:$0xff]  ;;  %v1037_v60 = vld [vmem:[%s19704_s1 + $0x1fb0] sm:$0xff] }
 0x4ec   :  { %11530 = vmatprep.subr.bf16.mxu1 %v13463_v7  ;;  %v993_v7 = vld [vmem:[%s19704_s1 + $0x1e50] sm:$0xff]  ;;  %v1098_v62 = vld [vmem:[%s19704_s1 + $0x2198] sm:$0xff] }
 0x4ed   :  { %v13452_v21 = vcombine.low %v993_v7, %v997_v50 }
 0x4ee   :  { %10982 = vmatpush1.bf16.msra.mxu0 %v13396_v22  ;;  %v13510_v22 = vcombine.low %v1050_v2, %v1054_v9  ;;  %v1102_v2 = vld [vmem:[%s19704_s1 + $0x21b8] sm:$0xff] }
 0x4ef   :  { %11531 = vmatpush1.bf16.msra.mxu1 %v13462_v12  ;;  %10983 = vmatprep.subr.bf16.mxu0 %v13405_v15  ;;  %v13453_v12 = vcombine.high %v993_v7, %v997_v50  ;;  %v13519_v15 = vcombine.high %v1058_v8, %v1062_v10  ;;  %v1045_v7 = vld [vmem:[%s19704_s1 + $0x1ff0] sm:$0xff]  ;;  %v1106_v50 = vld [vmem:[%s19704_s1 + $0x21d8] sm:$0xff] }
 0x4f0   :  { %11532 = vmatprep.subr.bf16.mxu1 %v13471_v32  ;;  %v1001_v32 = vld [vmem:[%s19704_s1 + $0x1e90] sm:$0xff] }
 0x4f1   :  { %v13460_v63 = vcombine.low %v1001_v32, %v1005_v36 }
 0x4f2   :  { %10984 = vmatpush1.bf16.msra.mxu0 %v13404_v61  ;;  %v13518_v61 = vcombine.low %v1058_v8, %v1062_v10  ;;  %v1110_v8 = vld [vmem:[%s19704_s1 + $0x21f8] sm:$0xff] }
 0x4f3   :  { %11533 = vmatpush1.bf16.msra.mxu1 %v13470_v59  ;;  %10985 = vmatprep.subr.bf16.mxu0 %v13413_v35  ;;  %v13461_v59 = vcombine.high %v1001_v32, %v1005_v36  ;;  %v13527_v35 = vcombine.high %v1066_v18, %v1070_v51  ;;  %v1053_v32 = vld [vmem:[%s19704_s1 + $0x2030] sm:$0xff]  ;;  %v1114_v36 = vld [vmem:[%s19704_s1 + $0x2218] sm:$0xff] }
 0x4f4   :  { %11534 = vmatprep.subr.bf16.mxu1 %v13479_v13  ;;  %v1009_v13 = vld [vmem:[%s19704_s1 + $0x1ed0] sm:$0xff] }
 0x4f5   :  { %v13468_v48 = vcombine.low %v1009_v13, %v1013_v26 }
 0x4f6   :  { %10986 = vmatpush1.bf16.msra.mxu0 %v13412_v30  ;;  %v13526_v30 = vcombine.low %v1066_v18, %v1070_v51  ;;  %v1118_v18 = vld [vmem:[%s19704_s1 + $0x2238] sm:$0xff] }
 0x4f7   :  { %11535 = vmatpush1.bf16.msra.mxu1 %v13478_v23  ;;  %10987 = vmatprep.subr.bf16.mxu0 %v13421_v33  ;;  %v13469_v23 = vcombine.high %v1009_v13, %v1013_v26  ;;  %v13535_v33 = vcombine.high %v1074_v28, %v1078_v24  ;;  %v1061_v13 = vld [vmem:[%s19704_s1 + $0x2070] sm:$0xff]  ;;  %v1122_v26 = vld [vmem:[%s19704_s1 + $0x2258] sm:$0xff] }
 0x4f8   :  { %11536 = vmatprep.subr.bf16.mxu1 %v13487_v37  ;;  %v1017_v37 = vld [vmem:[%s19704_s1 + $0x1f10] sm:$0xff] }
 0x4f9   :  { %v13476_v54 = vcombine.low %v1017_v37, %v1021_v39 }
 0x4fa   :  { %10988 = vmatpush1.bf16.msra.mxu0 %v13420_v42  ;;  %v13534_v42 = vcombine.low %v1074_v28, %v1078_v24  ;;  %v1126_v28 = vld [vmem:[%s19704_s1 + $0x2278] sm:$0xff] }
 0x4fb   :  { %11537 = vmatpush1.bf16.msra.mxu1 %v13486_v43  ;;  %10989 = vmatprep.subr.bf16.mxu0 %v13429_v20  ;;  %v13477_v43 = vcombine.high %v1017_v37, %v1021_v39  ;;  %v13543_v20 = vcombine.high %v1082_v38, %v1086_v11  ;;  %v1069_v37 = vld [vmem:[%s19704_s1 + $0x20b0] sm:$0xff]  ;;  %v1130_v39 = vld [vmem:[%s19704_s1 + $0x2298] sm:$0xff] }
 0x4fc   :  { %11538 = vmatprep.subr.bf16.mxu1 %v13495_v0  ;;  %v1025_v0 = vld [vmem:[%s19704_s1 + $0x1f50] sm:$0xff] }
 0x4fd   :  { %v13484_v9 = vcombine.low %v1025_v0, %v1029_v49 }
 0x4fe   :  { %10990 = vmatpush1.bf16.msra.mxu0 %v13428_v58  ;;  %v13542_v58 = vcombine.low %v1082_v38, %v1086_v11  ;;  %v1134_v38 = vld [vmem:[%s19704_s1 + $0x22b8] sm:$0xff] }
 0x4ff   :  { %11539 = vmatpush1.bf16.msra.mxu1 %v13494_v27  ;;  %10991 = vmatprep.subr.bf16.mxu0 %v13437_v53  ;;  %v13485_v27 = vcombine.high %v1025_v0, %v1029_v49  ;;  %v13551_v53 = vcombine.high %v1090_v52, %v1094_v17  ;;  %v1138_v0 = vld [vmem:[%s19704_s1 + $0x22d8] sm:$0xff] }
 0x500   :  { %11540 = vmatprep.subr.bf16.mxu1 %v13503_v1  ;;  %v1033_v1 = vld [vmem:[%s19704_s1 + $0x1f90] sm:$0xff] }
 0x501   :  { %v13492_v10 = vcombine.low %v1033_v1, %v1037_v60 }
 0x502   :  { %10992 = vmatpush1.bf16.msra.mxu0 %v13436_v3  ;;  %v13550_v3 = vcombine.low %v1090_v52, %v1094_v17  ;;  %v13590_v52 = vcombine.low %v1130_v39, %v1134_v38 }
 0x503   :  { %11541 = vmatpush1.bf16.msra.mxu1 %v13502_v4  ;;  %10993 = vmatprep.subr.bf16.mxu0 %v13445_v5  ;;  %v13493_v4 = vcombine.high %v1033_v1, %v1037_v60  ;;  %v13559_v5 = vcombine.high %v1098_v62, %v1102_v2  ;;  %v1150_v1 = vld [vmem:[%s19704_s1 + $0x2338] sm:$0xff] }
 0x504   :  { %11551 = vmatprep.subr.bf16.mxu1 %v13511_v6  ;;  %v1041_v6 = vld [vmem:[%s19704_s1 + $0x1fd0] sm:$0xff] }
 0x505   :  { %v13500_v51 = vcombine.low %v1041_v6, %v1045_v7 }
 0x506   :  { %10994 = vmatpush1.bf16.msra.mxu0 %v13444_v55  ;;  %11543 = vmatmul.mubr.bf16.vlgmr.msra.gmra.mrb[4].mxu1 %v16185_v34  ;;  %v13558_v55 = vcombine.low %v1098_v62, %v1102_v2 }
 0x507   :  { %11552 = vmatpush1.bf16.msra.mxu1 %v13510_v22  ;;  %10995 = vmatprep.subr.bf16.mxu0 %v13453_v12  ;;  %v13501_v22 = vcombine.high %v1041_v6, %v1045_v7  ;;  %v13567_v12 = vcombine.high %v1106_v50, %v1110_v8  ;;  %v1158_v6 = vld [vmem:[%s19704_s1 + $0x2378] sm:$0xff] }
 0x508   :  { %11553 = vmatprep.subr.bf16.mxu1 %v13519_v15  ;;  %11583 = vmatprep.mubr.bf16.mxu1 %v16200_v46  ;;  %v1049_v15 = vld [vmem:[%s19704_s1 + $0x2010] sm:$0xff] }
 0x509   :  { %v13508_v24 = vcombine.low %v1049_v15, %v1053_v32 }
 0x50a   :  { %10996 = vmatpush1.bf16.msra.mxu0 %v13452_v21  ;;  %v13566_v21 = vcombine.low %v1106_v50, %v1110_v8 }
 0x50b   :  { %11554 = vmatpush1.bf16.msra.mxu1 %v13518_v61  ;;  %10997 = vmatprep.subr.bf16.mxu0 %v13461_v59  ;;  %v13509_v61 = vcombine.high %v1049_v15, %v1053_v32  ;;  %v13575_v59 = vcombine.high %v1114_v36, %v1118_v18  ;;  %v1166_v15 = vld [vmem:[%s19704_s1 + $0x23b8] sm:$0xff] }
 0x50c   :  { %11555 = vmatprep.subr.bf16.mxu1 %v13527_v35  ;;  %v1057_v35 = vld [vmem:[%s19704_s1 + $0x2050] sm:$0xff] }
 0x50d   :  { %v13516_v11 = vcombine.low %v1057_v35, %v1061_v13 }
 0x50e   :  { %10998 = vmatpush1.bf16.msra.mxu0 %v13460_v63  ;;  %v13574_v63 = vcombine.low %v1114_v36, %v1118_v18 }
 0x50f   :  { %11556 = vmatpush1.bf16.msra.mxu1 %v13526_v30  ;;  %10999 = vmatprep.subr.bf16.mxu0 %v13469_v23  ;;  %v13517_v30 = vcombine.high %v1057_v35, %v1061_v13  ;;  %v13583_v23 = vcombine.high %v1122_v26, %v1126_v28  ;;  %v1174_v35 = vld [vmem:[%s19704_s1 + $0x23f8] sm:$0xff] }
 0x510   :  { %11557 = vmatprep.subr.bf16.mxu1 %v13535_v33  ;;  %v1065_v33 = vld [vmem:[%s19704_s1 + $0x2090] sm:$0xff] }
 0x511   :  { %v13524_v49 = vcombine.low %v1065_v33, %v1069_v37 }
 0x512   :  { %11000 = vmatpush1.bf16.msra.mxu0 %v13468_v48  ;;  %v13582_v48 = vcombine.low %v1122_v26, %v1126_v28 }
 0x513   :  { %11558 = vmatpush1.bf16.msra.mxu1 %v13534_v42  ;;  %11001 = vmatprep.subr.bf16.mxu0 %v13477_v43  ;;  %v13525_v42 = vcombine.high %v1065_v33, %v1069_v37  ;;  %v13591_v43 = vcombine.high %v1130_v39, %v1134_v38  ;;  %v1182_v33 = vld [vmem:[%s19704_s1 + $0x2438] sm:$0xff] }
 0x514   :  { %11559 = vmatprep.subr.bf16.mxu1 %v13543_v20  ;;  %v1077_v20 = vld [vmem:[%s19704_s1 + $0x20f0] sm:$0xff] }
 0x516   :  { %11002 = vmatpush1.bf16.msra.mxu0 %v13476_v54 }
 0x517   :  { %11560 = vmatpush1.bf16.msra.mxu1 %v13542_v58  ;;  %11003 = vmatprep.subr.bf16.mxu0 %v13485_v27  ;;  %v1081_v58 = vld [vmem:[%s19704_s1 + $0x2110] sm:$0xff] }
 0x518   :  { %11561 = vmatprep.subr.bf16.mxu1 %v13551_v53  ;;  %v1085_v27 = vld [vmem:[%s19704_s1 + $0x2130] sm:$0xff]  ;;  %v1146_v53 = vld [vmem:[%s19704_s1 + $0x2318] sm:$0xff] }
 0x519   :  { %v13541_v2 = vcombine.high %v1081_v58, %v1085_v27  ;;  %v13540_v7 = vcombine.low %v1081_v58, %v1085_v27  ;;  %v13606_v50 = vcombine.low %v1146_v53, %v1150_v1  ;;  %v1198_v58 = vld [vmem:[%s19704_s1 + $0x24b8] sm:$0xff] }
 0x51a   :  { %11004 = vmatpush1.bf16.msra.mxu0 %v13484_v9  ;;  %v13607_v9 = vcombine.high %v1146_v53, %v1150_v1 }
 0x51b   :  { %11562 = vmatpush1.bf16.msra.mxu1 %v13550_v3  ;;  %11005 = vmatprep.subr.bf16.mxu0 %v13493_v4  ;;  %v1089_v3 = vld [vmem:[%s19704_s1 + $0x2150] sm:$0xff] }
 0x51c   :  { %11563 = vmatprep.subr.bf16.mxu1 %v13559_v5  ;;  %v1093_v4 = vld [vmem:[%s19704_s1 + $0x2170] sm:$0xff]  ;;  %v1154_v5 = vld [vmem:[%s19704_s1 + $0x2358] sm:$0xff] }
 0x51d   :  { %v13549_v8 = vcombine.high %v1089_v3, %v1093_v4  ;;  %v13548_v32 = vcombine.low %v1089_v3, %v1093_v4  ;;  %v13614_v36 = vcombine.low %v1154_v5, %v1158_v6  ;;  %v1206_v3 = vld [vmem:[%s19704_s1 + $0x24f8] sm:$0xff] }
 0x51e   :  { %11006 = vmatpush1.bf16.msra.mxu0 %v13492_v10  ;;  %v13615_v10 = vcombine.high %v1154_v5, %v1158_v6 }
 0x51f   :  { %11564 = vmatpush1.bf16.msra.mxu1 %v13558_v55  ;;  %11007 = vmatprep.subr.bf16.mxu0 %v13501_v22  ;;  %v1097_v55 = vld [vmem:[%s19704_s1 + $0x2190] sm:$0xff] }
 0x520   :  { %11565 = vmatprep.subr.bf16.mxu1 %v13567_v12  ;;  %v1101_v22 = vld [vmem:[%s19704_s1 + $0x21b0] sm:$0xff]  ;;  %v1162_v12 = vld [vmem:[%s19704_s1 + $0x2398] sm:$0xff] }
 0x521   :  { %v13557_v18 = vcombine.high %v1097_v55, %v1101_v22  ;;  %v13556_v13 = vcombine.low %v1097_v55, %v1101_v22  ;;  %v13622_v26 = vcombine.low %v1162_v12, %v1166_v15  ;;  %v1214_v55 = vld [vmem:[%s19704_s1 + $0x2538] sm:$0xff] }
 0x522   :  { %11008 = vmatpush1.bf16.msra.mxu0 %v13500_v51  ;;  %v13623_v51 = vcombine.high %v1162_v12, %v1166_v15 }
 0x523   :  { %11566 = vmatpush1.bf16.msra.mxu1 %v13566_v21  ;;  %11018 = vmatprep.subr.bf16.mxu0 %v13509_v61  ;;  %v1105_v21 = vld [vmem:[%s19704_s1 + $0x21d0] sm:$0xff] }
 0x524   :  { %11567 = vmatprep.subr.bf16.mxu1 %v13575_v59  ;;  %v1109_v61 = vld [vmem:[%s19704_s1 + $0x21f0] sm:$0xff]  ;;  %v1170_v59 = vld [vmem:[%s19704_s1 + $0x23d8] sm:$0xff] }
 0x525   :  { %11010 = vmatmul.mubr.bf16.vlgmr.msra.gmra.mrb[8].mxu0 %v16185_v34  ;;  %v1073_v34 = vld [vmem:[%s19704_s1 + $0x20d0] sm:$0xff]  ;;  %v13565_v28 = vcombine.high %v1105_v21, %v1109_v61  ;;  %v13564_v37 = vcombine.low %v1105_v21, %v1109_v61  ;;  %v13630_v39 = vcombine.low %v1170_v59, %v1174_v35  ;;  %v1222_v21 = vld [vmem:[%s19704_s1 + $0x2578] sm:$0xff] }
 0x526   :  { %11019 = vmatpush1.bf16.msra.mxu0 %v13508_v24  ;;  %11050 = vmatprep.mubr.bf16.mxu0 %v16200_v46  ;;  %v1142_v46 = vld [vmem:[%s19704_s1 + $0x22f8] sm:$0xff]  ;;  %v13533_v17 = vcombine.high %v1073_v34, %v1077_v20  ;;  %v13532_v60 = vcombine.low %v1073_v34, %v1077_v20  ;;  %v13631_v24 = vcombine.high %v1170_v59, %v1174_v35 }
 0x527   :  { %11568 = vmatpush1.bf16.msra.mxu1 %v13574_v63  ;;  %11020 = vmatprep.subr.bf16.mxu0 %v13517_v30  ;;  %v13599_v54 = vcombine.high %v1138_v0, %v1142_v46  ;;  %v13598_v62 = vcombine.low %v1138_v0, %v1142_v46  ;;  %v1113_v63 = vld [vmem:[%s19704_s1 + $0x2210] sm:$0xff]  ;;  %v1190_v34 = vld [vmem:[%s19704_s1 + $0x2478] sm:$0xff] }
 0x528   :  { %11569 = vmatprep.subr.bf16.mxu1 %v13583_v23  ;;  %v1117_v30 = vld [vmem:[%s19704_s1 + $0x2230] sm:$0xff]  ;;  %v1178_v23 = vld [vmem:[%s19704_s1 + $0x2418] sm:$0xff] }
 0x529   :  { %v13573_v38 = vcombine.high %v1113_v63, %v1117_v30  ;;  %v13572_v20 = vcombine.low %v1113_v63, %v1117_v30  ;;  %v13638_v0 = vcombine.low %v1178_v23, %v1182_v33  ;;  %v1230_v63 = vld [vmem:[%s19704_s1 + $0x25b8] sm:$0xff] }
 0x52a   :  { %11021 = vmatpush1.bf16.msra.mxu0 %v13516_v11  ;;  %v13639_v11 = vcombine.high %v1178_v23, %v1182_v33 }
 0x52b   :  { %11570 = vmatpush1.bf16.msra.mxu1 %v13582_v48  ;;  %11022 = vmatprep.subr.bf16.mxu0 %v13525_v42  ;;  %v1121_v48 = vld [vmem:[%s19704_s1 + $0x2250] sm:$0xff] }
 0x52c   :  { %11571 = vmatprep.subr.bf16.mxu1 %v13591_v43  ;;  %v1125_v42 = vld [vmem:[%s19704_s1 + $0x2270] sm:$0xff]  ;;  %v1186_v43 = vld [vmem:[%s19704_s1 + $0x2458] sm:$0xff] }
 0x52d   :  { %v13581_v46 = vcombine.high %v1121_v48, %v1125_v42  ;;  %v13580_v27 = vcombine.low %v1121_v48, %v1125_v42  ;;  %v13646_v53 = vcombine.low %v1186_v43, %v1190_v34  ;;  %v1238_v48 = vld [vmem:[%s19704_s1 + $0x25f8] sm:$0xff] }
 0x52e   :  { %11023 = vmatpush1.bf16.msra.mxu0 %v13524_v49  ;;  %v13647_v49 = vcombine.high %v1186_v43, %v1190_v34 }
 0x52f   :  { %11572 = vmatpush1.bf16.msra.mxu1 %v13590_v52  ;;  %11024 = vmatprep.subr.bf16.mxu0 %v13533_v17  ;;  %v1129_v52 = vld [vmem:[%s19704_s1 + $0x2290] sm:$0xff] }
 0x530   :  { %11573 = vmatprep.subr.bf16.mxu1 %v13599_v54  ;;  %v1133_v17 = vld [vmem:[%s19704_s1 + $0x22b0] sm:$0xff]  ;;  %v1194_v54 = vld [vmem:[%s19704_s1 + $0x2498] sm:$0xff] }
 0x531   :  { %v13589_v1 = vcombine.high %v1129_v52, %v1133_v17  ;;  %v13588_v4 = vcombine.low %v1129_v52, %v1133_v17  ;;  %v13654_v5 = vcombine.low %v1194_v54, %v1198_v58  ;;  %v1246_v52 = vld [vmem:[%s19704_s1 + $0x2638] sm:$0xff] }
 0x532   :  { %11025 = vmatpush1.bf16.msra.mxu0 %v13532_v60  ;;  %v13655_v60 = vcombine.high %v1194_v54, %v1198_v58 }
 0x533   :  { %11574 = vmatpush1.bf16.msra.mxu1 %v13598_v62  ;;  %11026 = vmatprep.subr.bf16.mxu0 %v13541_v2  ;;  %v1137_v62 = vld [vmem:[%s19704_s1 + $0x22d0] sm:$0xff] }
 0x534   :  { %11575 = vmatprep.subr.bf16.mxu1 %v13607_v9  ;;  %v1141_v2 = vld [vmem:[%s19704_s1 + $0x22f0] sm:$0xff]  ;;  %v1202_v9 = vld [vmem:[%s19704_s1 + $0x24d8] sm:$0xff] }
 0x535   :  { %v13597_v6 = vcombine.high %v1137_v62, %v1141_v2  ;;  %v13596_v22 = vcombine.low %v1137_v62, %v1141_v2  ;;  %v13662_v12 = vcombine.low %v1202_v9, %v1206_v3  ;;  %v1254_v62 = vld [vmem:[%s19704_s1 + $0x2678] sm:$0xff] }
 0x536   :  { %11027 = vmatpush1.bf16.msra.mxu0 %v13540_v7  ;;  %v13663_v7 = vcombine.high %v1202_v9, %v1206_v3 }
 0x537   :  { %11576 = vmatpush1.bf16.msra.mxu1 %v13606_v50  ;;  %11028 = vmatprep.subr.bf16.mxu0 %v13549_v8  ;;  %v1145_v50 = vld [vmem:[%s19704_s1 + $0x2310] sm:$0xff] }
 0x538   :  { %11577 = vmatprep.subr.bf16.mxu1 %v13615_v10  ;;  %v1149_v8 = vld [vmem:[%s19704_s1 + $0x2330] sm:$0xff]  ;;  %v1210_v10 = vld [vmem:[%s19704_s1 + $0x2518] sm:$0xff] }
 0x539   :  { %v13605_v15 = vcombine.high %v1145_v50, %v1149_v8  ;;  %v13604_v61 = vcombine.low %v1145_v50, %v1149_v8  ;;  %v13670_v59 = vcombine.low %v1210_v10, %v1214_v55  ;;  %v1262_v50 = vld [vmem:[%s19704_s1 + $0x26b8] sm:$0xff] }
 0x53a   :  { %11029 = vmatpush1.bf16.msra.mxu0 %v13548_v32  ;;  %v13671_v32 = vcombine.high %v1210_v10, %v1214_v55 }
 0x53b   :  { %11578 = vmatpush1.bf16.msra.mxu1 %v13614_v36  ;;  %11030 = vmatprep.subr.bf16.mxu0 %v13557_v18  ;;  %v1153_v36 = vld [vmem:[%s19704_s1 + $0x2350] sm:$0xff] }
 0x53c   :  { %11579 = vmatprep.subr.bf16.mxu1 %v13623_v51  ;;  %v1157_v18 = vld [vmem:[%s19704_s1 + $0x2370] sm:$0xff]  ;;  %v1218_v51 = vld [vmem:[%s19704_s1 + $0x2558] sm:$0xff] }
 0x53d   :  { %v13613_v35 = vcombine.high %v1153_v36, %v1157_v18  ;;  %v13612_v30 = vcombine.low %v1153_v36, %v1157_v18  ;;  %v13678_v23 = vcombine.low %v1218_v51, %v1222_v21 }
 0x53e   :  { %11031 = vmatpush1.bf16.msra.mxu0 %v13556_v13  ;;  %v13679_v13 = vcombine.high %v1218_v51, %v1222_v21  ;;  %v1209_v21 = vld [vmem:[%s19704_s1 + $0x2510] sm:$0xff] }
 0x53f   :  { %11580 = vmatpush1.bf16.msra.mxu1 %v13622_v26  ;;  %11032 = vmatprep.subr.bf16.mxu0 %v13565_v28  ;;  %v1161_v26 = vld [vmem:[%s19704_s1 + $0x2390] sm:$0xff] }
 0x540   :  { %11581 = vmatprep.subr.bf16.mxu1 %v13631_v24  ;;  %v1165_v28 = vld [vmem:[%s19704_s1 + $0x23b0] sm:$0xff]  ;;  %v1226_v24 = vld [vmem:[%s19704_s1 + $0x2598] sm:$0xff] }
 0x541   :  { %v13621_v33 = vcombine.high %v1161_v26, %v1165_v28  ;;  %v13620_v42 = vcombine.low %v1161_v26, %v1165_v28  ;;  %v13686_v43 = vcombine.low %v1226_v24, %v1230_v63 }
 0x542   :  { %11033 = vmatpush1.bf16.msra.mxu0 %v13564_v37  ;;  %v13687_v37 = vcombine.high %v1226_v24, %v1230_v63  ;;  %v1217_v63 = vld [vmem:[%s19704_s1 + $0x2550] sm:$0xff] }
 0x543   :  { %11582 = vmatpush1.bf16.msra.mxu1 %v13630_v39  ;;  %11034 = vmatprep.subr.bf16.mxu0 %v13573_v38  ;;  %v1169_v39 = vld [vmem:[%s19704_s1 + $0x23d0] sm:$0xff] }
 0x544   :  { %11592 = vmatprep.subr.bf16.mxu1 %v13639_v11  ;;  %v1173_v38 = vld [vmem:[%s19704_s1 + $0x23f0] sm:$0xff]  ;;  %v1234_v11 = vld [vmem:[%s19704_s1 + $0x25d8] sm:$0xff] }
 0x545   :  { %v13629_v34 = vcombine.high %v1169_v39, %v1173_v38  ;;  %v13628_v17 = vcombine.low %v1169_v39, %v1173_v38  ;;  %v13694_v54 = vcombine.low %v1234_v11, %v1238_v48 }
 0x546   :  { %11035 = vmatpush1.bf16.msra.mxu0 %v13572_v20  ;;  %11584 = vmatmul.mubr.bf16.vlgmr.msra.gmra.mrb[4].mxu1 %v16388_v29  ;;  %v13695_v20 = vcombine.high %v1234_v11, %v1238_v48  ;;  %v1225_v48 = vld [vmem:[%s19704_s1 + $0x2590] sm:$0xff] }
 0x547   :  { %11593 = vmatpush1.bf16.msra.mxu1 %v13638_v0  ;;  %11036 = vmatprep.subr.bf16.mxu0 %v13581_v46  ;;  %v1177_v0 = vld [vmem:[%s19704_s1 + $0x2410] sm:$0xff] }
 0x548   :  { %11594 = vmatprep.subr.bf16.mxu1 %v13647_v49  ;;  %11624 = vmatprep.mubr.bf16.mxu1 %v16404_v41  ;;  %v1181_v46 = vld [vmem:[%s19704_s1 + $0x2430] sm:$0xff]  ;;  %v1242_v49 = vld [vmem:[%s19704_s1 + $0x2618] sm:$0xff] }
 0x549   :  { %v13637_v58 = vcombine.high %v1177_v0, %v1181_v46  ;;  %v13636_v2 = vcombine.low %v1177_v0, %v1181_v46  ;;  %v13702_v9 = vcombine.low %v1242_v49, %v1246_v52 }
 0x54a   :  { %11037 = vmatpush1.bf16.msra.mxu0 %v13580_v27  ;;  %v13703_v27 = vcombine.high %v1242_v49, %v1246_v52  ;;  %v1233_v52 = vld [vmem:[%s19704_s1 + $0x25d0] sm:$0xff] }
 0x54b   :  { %11595 = vmatpush1.bf16.msra.mxu1 %v13646_v53  ;;  %11038 = vmatprep.subr.bf16.mxu0 %v13589_v1  ;;  %v1185_v53 = vld [vmem:[%s19704_s1 + $0x2450] sm:$0xff] }
 0x54c   :  { %11596 = vmatprep.subr.bf16.mxu1 %v13655_v60  ;;  %v1189_v1 = vld [vmem:[%s19704_s1 + $0x2470] sm:$0xff]  ;;  %v1250_v60 = vld [vmem:[%s19704_s1 + $0x2658] sm:$0xff] }
 0x54d   :  { %v13645_v3 = vcombine.high %v1185_v53, %v1189_v1  ;;  %v13644_v8 = vcombine.low %v1185_v53, %v1189_v1  ;;  %v13710_v10 = vcombine.low %v1250_v60, %v1254_v62 }
 0x54e   :  { %11039 = vmatpush1.bf16.msra.mxu0 %v13588_v4  ;;  %v13711_v4 = vcombine.high %v1250_v60, %v1254_v62  ;;  %v1241_v62 = vld [vmem:[%s19704_s1 + $0x2610] sm:$0xff] }
 0x54f   :  { %11597 = vmatpush1.bf16.msra.mxu1 %v13654_v5  ;;  %11040 = vmatprep.subr.bf16.mxu0 %v13597_v6  ;;  %v1193_v5 = vld [vmem:[%s19704_s1 + $0x2490] sm:$0xff] }
 0x550   :  { %11598 = vmatprep.subr.bf16.mxu1 %v13663_v7  ;;  %v1197_v6 = vld [vmem:[%s19704_s1 + $0x24b0] sm:$0xff]  ;;  %v1258_v7 = vld [vmem:[%s19704_s1 + $0x2698] sm:$0xff] }
 0x551   :  { %v13653_v55 = vcombine.high %v1193_v5, %v1197_v6  ;;  %v13718_v36 = vcombine.low %v1258_v7, %v1262_v50 }
 0x552   :  { %11041 = vmatpush1.bf16.msra.mxu0 %v13596_v22  ;;  %v13719_v22 = vcombine.high %v1258_v7, %v1262_v50  ;;  %v1249_v50 = vld [vmem:[%s19704_s1 + $0x2650] sm:$0xff] }
 0x553   :  { %11599 = vmatpush1.bf16.msra.mxu1 %v13662_v12  ;;  %11042 = vmatprep.subr.bf16.mxu0 %v13605_v15  ;;  %v1205_v12 = vld [vmem:[%s19704_s1 + $0x24f0] sm:$0xff]  ;;  %v1266_v15 = vld [vmem:[%s19704_s1 + $0x26d8] sm:$0xff] }
 0x554   :  { %11600 = vmatprep.subr.bf16.mxu1 %v13671_v32  ;;  %v13652_v32 = vcombine.low %v1193_v5, %v1197_v6 }
 0x556   :  { %11043 = vmatpush1.bf16.msra.mxu0 %v13604_v61  ;;  %v1213_v61 = vld [vmem:[%s19704_s1 + $0x2530] sm:$0xff] }
 0x557   :  { %11601 = vmatpush1.bf16.msra.mxu1 %v13670_v59  ;;  %11044 = vmatprep.subr.bf16.mxu0 %v13613_v35  ;;  %v1274_v59 = vld [vmem:[%s19704_s1 + $0x2718] sm:$0xff]  ;;  %v13669_v28 = vcombine.high %v1209_v21, %v1213_v61 }
 0x558   :  { %11602 = vmatprep.subr.bf16.mxu1 %v13679_v13  ;;  %v1278_v35 = vld [vmem:[%s19704_s1 + $0x2738] sm:$0xff] }
 0x559   :  { %v13735_v24 = vcombine.high %v1274_v59, %v1278_v35  ;;  %v13734_v39 = vcombine.low %v1274_v59, %v1278_v35  ;;  %v1265_v35 = vld [vmem:[%s19704_s1 + $0x26d0] sm:$0xff] }
 0x55a   :  { %11045 = vmatpush1.bf16.msra.mxu0 %v13612_v30  ;;  %v1221_v30 = vld [vmem:[%s19704_s1 + $0x2570] sm:$0xff] }
 0x55b   :  { %11603 = vmatpush1.bf16.msra.mxu1 %v13678_v23  ;;  %11046 = vmatprep.subr.bf16.mxu0 %v13621_v33  ;;  %v1282_v23 = vld [vmem:[%s19704_s1 + $0x2758] sm:$0xff]  ;;  %v13677_v38 = vcombine.high %v1217_v63, %v1221_v30 }
 0x55c   :  { %11604 = vmatprep.subr.bf16.mxu1 %v13687_v37  ;;  %v1286_v33 = vld [vmem:[%s19704_s1 + $0x2778] sm:$0xff]  ;;  %v13668_v37 = vcombine.low %v1209_v21, %v1213_v61 }
 0x55d   :  { %v13743_v11 = vcombine.high %v1282_v23, %v1286_v33  ;;  %v13742_v0 = vcombine.low %v1282_v23, %v1286_v33  ;;  %v1273_v33 = vld [vmem:[%s19704_s1 + $0x2710] sm:$0xff] }
 0x55e   :  { %11047 = vmatpush1.bf16.msra.mxu0 %v13620_v42  ;;  %v1229_v42 = vld [vmem:[%s19704_s1 + $0x25b0] sm:$0xff] }
 0x55f   :  { %11605 = vmatpush1.bf16.msra.mxu1 %v13686_v43  ;;  %11048 = vmatprep.subr.bf16.mxu0 %v13629_v34  ;;  %v1290_v43 = vld [vmem:[%s19704_s1 + $0x2798] sm:$0xff]  ;;  %v13685_v46 = vcombine.high %v1225_v48, %v1229_v42 }
 0x560   :  { %11606 = vmatprep.subr.bf16.mxu1 %v13695_v20  ;;  %v1294_v34 = vld [vmem:[%s19704_s1 + $0x27b8] sm:$0xff]  ;;  %v13676_v20 = vcombine.low %v1217_v63, %v1221_v30 }
 0x561   :  { %v13751_v49 = vcombine.high %v1290_v43, %v1294_v34  ;;  %v13750_v53 = vcombine.low %v1290_v43, %v1294_v34  ;;  %v1281_v34 = vld [vmem:[%s19704_s1 + $0x2750] sm:$0xff] }
 0x562   :  { %11049 = vmatpush1.bf16.msra.mxu0 %v13628_v17  ;;  %v1237_v17 = vld [vmem:[%s19704_s1 + $0x25f0] sm:$0xff] }
 0x563   :  { %11607 = vmatpush1.bf16.msra.mxu1 %v13694_v54  ;;  %11059 = vmatprep.subr.bf16.mxu0 %v13637_v58  ;;  %v1298_v54 = vld [vmem:[%s19704_s1 + $0x27d8] sm:$0xff]  ;;  %v13693_v1 = vcombine.high %v1233_v52, %v1237_v17 }
 0x564   :  { %11608 = vmatprep.subr.bf16.mxu1 %v13703_v27  ;;  %v1302_v58 = vld [vmem:[%s19704_s1 + $0x27f8] sm:$0xff]  ;;  %v13684_v27 = vcombine.low %v1225_v48, %v1229_v42 }
 0x565   :  { %11051 = vmatmul.mubr.bf16.vlgmr.msra.gmra.mrb[8].mxu0 %v16388_v29  ;;  %v1201_v29 = vld [vmem:[%s19704_s1 + $0x24d0] sm:$0xff]  ;;  %v13759_v60 = vcombine.high %v1298_v54, %v1302_v58  ;;  %v13758_v5 = vcombine.low %v1298_v54, %v1302_v58 }
 0x566   :  { %11060 = vmatpush1.bf16.msra.mxu0 %v13636_v2  ;;  %11091 = vmatprep.mubr.bf16.mxu0 %v16404_v41  ;;  %v1270_v41 = vld [vmem:[%s19704_s1 + $0x26f8] sm:$0xff]  ;;  %v13661_v18 = vcombine.high %v1201_v29, %v1205_v12  ;;  %v13660_v13 = vcombine.low %v1201_v29, %v1205_v12  ;;  %v1245_v2 = vld [vmem:[%s19704_s1 + $0x2630] sm:$0xff] }
 0x567   :  { %11609 = vmatpush1.bf16.msra.mxu1 %v13702_v9  ;;  %11061 = vmatprep.subr.bf16.mxu0 %v13645_v3  ;;  %v13727_v51 = vcombine.high %v1266_v15, %v1270_v41  ;;  %v13726_v26 = vcombine.low %v1266_v15, %v1270_v41  ;;  %v1306_v9 = vld [vmem:[%s19704_s1 + $0x2818] sm:$0xff]  ;;  %v13701_v6 = vcombine.high %v1241_v62, %v1245_v2  ;;  %v1257_v41 = vld [vmem:[%s19704_s1 + $0x2690] sm:$0xff] }
 0x568   :  { %11610 = vmatprep.subr.bf16.mxu1 %v13711_v4  ;;  %v1310_v3 = vld [vmem:[%s19704_s1 + $0x2838] sm:$0xff]  ;;  %v13692_v4 = vcombine.low %v1233_v52, %v1237_v17  ;;  %v1289_v58 = vld [vmem:[%s19704_s1 + $0x2790] sm:$0xff] }
 0x569   :  { %v13767_v7 = vcombine.high %v1306_v9, %v1310_v3  ;;  %v13766_v29 = vcombine.low %v1306_v9, %v1310_v3  ;;  %v1297_v3 = vld [vmem:[%s19704_s1 + $0x27d0] sm:$0xff] }
 0x56a   :  { %11062 = vmatpush1.bf16.msra.mxu0 %v13644_v8  ;;  %v1253_v8 = vld [vmem:[%s19704_s1 + $0x2670] sm:$0xff] }
 0x56b   :  { %11611 = vmatpush1.bf16.msra.mxu1 %v13710_v10  ;;  %11063 = vmatprep.subr.bf16.mxu0 %v13653_v55  ;;  %v1314_v10 = vld [vmem:[%s19704_s1 + $0x2858] sm:$0xff]  ;;  %v13709_v12 = vcombine.high %v1249_v50, %v1253_v8 }
 0x56c   :  { %11612 = vmatprep.subr.bf16.mxu1 %v13719_v22  ;;  %v1318_v55 = vld [vmem:[%s19704_s1 + $0x2878] sm:$0xff]  ;;  %v13700_v22 = vcombine.low %v1241_v62, %v1245_v2 }
 0x56d   :  { %v13775_v15 = vcombine.high %v1314_v10, %v1318_v55  ;;  %v13774_v21 = vcombine.low %v1314_v10, %v1318_v55  ;;  %v1305_v55 = vld [vmem:[%s19704_s1 + $0x2810] sm:$0xff] }
 0x56e   :  { %11064 = vmatpush1.bf16.msra.mxu0 %v13652_v32  ;;  %v1261_v32 = vld [vmem:[%s19704_s1 + $0x26b0] sm:$0xff] }
 0x56f   :  { %11613 = vmatpush1.bf16.msra.mxu1 %v13718_v36  ;;  %11065 = vmatprep.subr.bf16.mxu0 %v13661_v18  ;;  %v1322_v36 = vld [vmem:[%s19704_s1 + $0x2898] sm:$0xff]  ;;  %v13717_v61 = vcombine.high %v1257_v41, %v1261_v32 }
 0x570   :  { %11614 = vmatprep.subr.bf16.mxu1 %v13727_v51  ;;  %v1326_v18 = vld [vmem:[%s19704_s1 + $0x28b8] sm:$0xff]  ;;  %v13708_v51 = vcombine.low %v1249_v50, %v1253_v8 }
 0x571   :  { %v13783_v59 = vcombine.high %v1322_v36, %v1326_v18  ;;  %v13782_v63 = vcombine.low %v1322_v36, %v1326_v18  ;;  %v1313_v18 = vld [vmem:[%s19704_s1 + $0x2850] sm:$0xff] }
 0x572   :  { %11066 = vmatpush1.bf16.msra.mxu0 %v13660_v13  ;;  %v1269_v13 = vld [vmem:[%s19704_s1 + $0x26f0] sm:$0xff] }
 0x573   :  { %11615 = vmatpush1.bf16.msra.mxu1 %v13726_v26  ;;  %11067 = vmatprep.subr.bf16.mxu0 %v13669_v28  ;;  %v1330_v26 = vld [vmem:[%s19704_s1 + $0x28d8] sm:$0xff]  ;;  %v13725_v30 = vcombine.high %v1265_v35, %v1269_v13 }
 0x574   :  { %11616 = vmatprep.subr.bf16.mxu1 %v13735_v24  ;;  %v1334_v28 = vld [vmem:[%s19704_s1 + $0x28f8] sm:$0xff]  ;;  %v13716_v24 = vcombine.low %v1257_v41, %v1261_v32 }
 0x575   :  { %v13791_v23 = vcombine.high %v1330_v26, %v1334_v28  ;;  %v13790_v48 = vcombine.low %v1330_v26, %v1334_v28  ;;  %v1321_v28 = vld [vmem:[%s19704_s1 + $0x2890] sm:$0xff] }
 0x576   :  { %11068 = vmatpush1.bf16.msra.mxu0 %v13668_v37  ;;  %v1277_v37 = vld [vmem:[%s19704_s1 + $0x2730] sm:$0xff] }
 0x577   :  { %11617 = vmatpush1.bf16.msra.mxu1 %v13734_v39  ;;  %11069 = vmatprep.subr.bf16.mxu0 %v13677_v38  ;;  %v1338_v39 = vld [vmem:[%s19704_s1 + $0x2918] sm:$0xff]  ;;  %v13733_v42 = vcombine.high %v1273_v33, %v1277_v37 }
 0x578   :  { %11618 = vmatprep.subr.bf16.mxu1 %v13743_v11  ;;  %v1342_v38 = vld [vmem:[%s19704_s1 + $0x2938] sm:$0xff]  ;;  %v13724_v11 = vcombine.low %v1265_v35, %v1269_v13 }
 0x579   :  { %v13799_v43 = vcombine.high %v1338_v39, %v1342_v38  ;;  %v13798_v52 = vcombine.low %v1338_v39, %v1342_v38  ;;  %v1333_v38 = vld [vmem:[%s19704_s1 + $0x28f0] sm:$0xff] }
 0x57a   :  { %11070 = vmatpush1.bf16.msra.mxu0 %v13676_v20  ;;  %v1285_v20 = vld [vmem:[%s19704_s1 + $0x2770] sm:$0xff] }
 0x57b   :  { %11619 = vmatpush1.bf16.msra.mxu1 %v13742_v0  ;;  %11071 = vmatprep.subr.bf16.mxu0 %v13685_v46  ;;  %v1346_v0 = vld [vmem:[%s19704_s1 + $0x2958] sm:$0xff]  ;;  %v13741_v17 = vcombine.high %v1281_v34, %v1285_v20 }
 0x57c   :  { %11620 = vmatprep.subr.bf16.mxu1 %v13751_v49  ;;  %v1350_v46 = vld [vmem:[%s19704_s1 + $0x2978] sm:$0xff]  ;;  %v13732_v49 = vcombine.low %v1273_v33, %v1277_v37 }
 0x57d   :  { %v13807_v54 = vcombine.high %v1346_v0, %v1350_v46  ;;  %v13806_v62 = vcombine.low %v1346_v0, %v1350_v46  ;;  %v1341_v0 = vld [vmem:[%s19704_s1 + $0x2930] sm:$0xff]  ;;  %v1402_v46 = vld [vmem:[%s19704_s1 + $0x2b18] sm:$0xff] }
 0x57e   :  { %11072 = vmatpush1.bf16.msra.mxu0 %v13684_v27  ;;  %v1293_v27 = vld [vmem:[%s19704_s1 + $0x27b0] sm:$0xff] }
 0x57f   :  { %11621 = vmatpush1.bf16.msra.mxu1 %v13750_v53  ;;  %11073 = vmatprep.subr.bf16.mxu0 %v13693_v1  ;;  %v1354_v53 = vld [vmem:[%s19704_s1 + $0x2998] sm:$0xff]  ;;  %v13749_v2 = vcombine.high %v1289_v58, %v1293_v27 }
 0x580   :  { %11622 = vmatprep.subr.bf16.mxu1 %v13759_v60  ;;  %v1358_v1 = vld [vmem:[%s19704_s1 + $0x29b8] sm:$0xff]  ;;  %v13740_v60 = vcombine.low %v1281_v34, %v1285_v20  ;;  %v1337_v20 = vld [vmem:[%s19704_s1 + $0x2910] sm:$0xff] }
 0x581   :  { %v13815_v9 = vcombine.high %v1354_v53, %v1358_v1  ;;  %v13814_v50 = vcombine.low %v1354_v53, %v1358_v1  ;;  %v1349_v53 = vld [vmem:[%s19704_s1 + $0x2970] sm:$0xff]  ;;  %v1410_v1 = vld [vmem:[%s19704_s1 + $0x2b58] sm:$0xff] }
 0x582   :  { %11074 = vmatpush1.bf16.msra.mxu0 %v13692_v4  ;;  %v1301_v4 = vld [vmem:[%s19704_s1 + $0x27f0] sm:$0xff] }
 0x583   :  { %11623 = vmatpush1.bf16.msra.mxu1 %v13758_v5  ;;  %11075 = vmatprep.subr.bf16.mxu0 %v13701_v6  ;;  %v1362_v5 = vld [vmem:[%s19704_s1 + $0x29d8] sm:$0xff]  ;;  %v13757_v8 = vcombine.high %v1297_v3, %v1301_v4 }
 0x584   :  { %11633 = vmatprep.subr.bf16.mxu1 %v13767_v7  ;;  %v1366_v6 = vld [vmem:[%s19704_s1 + $0x29f8] sm:$0xff]  ;;  %v13748_v7 = vcombine.low %v1289_v58, %v1293_v27  ;;  %v1345_v27 = vld [vmem:[%s19704_s1 + $0x2950] sm:$0xff] }
 0x585   :  { %v13823_v10 = vcombine.high %v1362_v5, %v1366_v6  ;;  %v13822_v41 = vcombine.low %v1362_v5, %v1366_v6  ;;  %v1357_v5 = vld [vmem:[%s19704_s1 + $0x29b0] sm:$0xff]  ;;  %v1418_v6 = vld [vmem:[%s19704_s1 + $0x2b98] sm:$0xff] }
 0x586   :  { %11076 = vmatpush1.bf16.msra.mxu0 %v13700_v22  ;;  %11625 = vmatmul.mubr.bf16.vlgmr.msra.gmra.mrb[4].mxu1 %v16599_v31  ;;  %v1309_v22 = vld [vmem:[%s19704_s1 + $0x2830] sm:$0xff] }
 0x587   :  { %11634 = vmatpush1.bf16.msra.mxu1 %v13766_v29  ;;  %11077 = vmatprep.subr.bf16.mxu0 %v13709_v12  ;;  %v1370_v29 = vld [vmem:[%s19704_s1 + $0x2a18] sm:$0xff]  ;;  %v13765_v32 = vcombine.high %v1305_v55, %v1309_v22 }
 0x588   :  { %11635 = vmatprep.subr.bf16.mxu1 %v13775_v15  ;;  %11665 = vmatprep.mubr.bf16.mxu1 %v16614_v45  ;;  %v1374_v12 = vld [vmem:[%s19704_s1 + $0x2a38] sm:$0xff]  ;;  %v13756_v15 = vcombine.low %v1297_v3, %v1301_v4  ;;  %v1353_v4 = vld [vmem:[%s19704_s1 + $0x2990] sm:$0xff] }
 0x589   :  { %v13831_v36 = vcombine.high %v1370_v29, %v1374_v12  ;;  %v13830_v35 = vcombine.low %v1370_v29, %v1374_v12  ;;  %v1365_v29 = vld [vmem:[%s19704_s1 + $0x29f0] sm:$0xff]  ;;  %v1426_v12 = vld [vmem:[%s19704_s1 + $0x2bd8] sm:$0xff] }
 0x58a   :  { %11078 = vmatpush1.bf16.msra.mxu0 %v13708_v51  ;;  %v1317_v51 = vld [vmem:[%s19704_s1 + $0x2870] sm:$0xff] }
 0x58b   :  { %11636 = vmatpush1.bf16.msra.mxu1 %v13774_v21  ;;  %11079 = vmatprep.subr.bf16.mxu0 %v13717_v61  ;;  %v1378_v21 = vld [vmem:[%s19704_s1 + $0x2a58] sm:$0xff]  ;;  %v13773_v13 = vcombine.high %v1313_v18, %v1317_v51 }
 0x58c   :  { %11637 = vmatprep.subr.bf16.mxu1 %v13783_v59  ;;  %v1382_v61 = vld [vmem:[%s19704_s1 + $0x2a78] sm:$0xff]  ;;  %v13764_v59 = vcombine.low %v1305_v55, %v1309_v22  ;;  %v1361_v22 = vld [vmem:[%s19704_s1 + $0x29d0] sm:$0xff] }
 0x58d   :  { %v13839_v26 = vcombine.high %v1378_v21, %v1382_v61  ;;  %v13838_v33 = vcombine.low %v1378_v21, %v1382_v61  ;;  %v1373_v21 = vld [vmem:[%s19704_s1 + $0x2a30] sm:$0xff]  ;;  %v1434_v61 = vld [vmem:[%s19704_s1 + $0x2c18] sm:$0xff] }
 0x58e   :  { %11080 = vmatpush1.bf16.msra.mxu0 %v13716_v24  ;;  %v1325_v24 = vld [vmem:[%s19704_s1 + $0x28b0] sm:$0xff] }
 0x58f   :  { %11638 = vmatpush1.bf16.msra.mxu1 %v13782_v63  ;;  %11081 = vmatprep.subr.bf16.mxu0 %v13725_v30  ;;  %v1386_v63 = vld [vmem:[%s19704_s1 + $0x2a98] sm:$0xff]  ;;  %v13781_v37 = vcombine.high %v1321_v28, %v1325_v24 }
 0x590   :  { %11639 = vmatprep.subr.bf16.mxu1 %v13791_v23  ;;  %v1390_v30 = vld [vmem:[%s19704_s1 + $0x2ab8] sm:$0xff]  ;;  %v13772_v23 = vcombine.low %v1313_v18, %v1317_v51  ;;  %v1369_v51 = vld [vmem:[%s19704_s1 + $0x2a10] sm:$0xff] }
 0x591   :  { %v13847_v39 = vcombine.high %v1386_v63, %v1390_v30 }
 0x592   :  { %11082 = vmatpush1.bf16.msra.mxu0 %v13724_v11  ;;  %v1394_v11 = vld [vmem:[%s19704_s1 + $0x2ad8] sm:$0xff] }
 0x593   :  { %11640 = vmatpush1.bf16.msra.mxu1 %v13790_v48  ;;  %11083 = vmatprep.subr.bf16.mxu0 %v13733_v42  ;;  %v13780_v48 = vcombine.low %v1321_v28, %v1325_v24  ;;  %v13846_v42 = vcombine.low %v1386_v63, %v1390_v30  ;;  %v1377_v24 = vld [vmem:[%s19704_s1 + $0x2a50] sm:$0xff]  ;;  %v1442_v30 = vld [vmem:[%s19704_s1 + $0x2c58] sm:$0xff] }
 0x594   :  { %11641 = vmatprep.subr.bf16.mxu1 %v13799_v43  ;;  %v1381_v63 = vld [vmem:[%s19704_s1 + $0x2a70] sm:$0xff] }
 0x596   :  { %11084 = vmatpush1.bf16.msra.mxu0 %v13732_v49  ;;  %v1406_v49 = vld [vmem:[%s19704_s1 + $0x2b38] sm:$0xff] }
 0x597   :  { %11642 = vmatpush1.bf16.msra.mxu1 %v13798_v52  ;;  %11085 = vmatprep.subr.bf16.mxu0 %v13741_v17  ;;  %v13863_v58 = vcombine.high %v1402_v46, %v1406_v49 }
 0x598   :  { %11643 = vmatprep.subr.bf16.mxu1 %v13807_v54  ;;  %v13797_v54 = vcombine.high %v1337_v20, %v1341_v0 }
 0x59a   :  { %11086 = vmatpush1.bf16.msra.mxu0 %v13740_v60  ;;  %v1414_v60 = vld [vmem:[%s19704_s1 + $0x2b78] sm:$0xff] }
 0x59b   :  { %11644 = vmatpush1.bf16.msra.mxu1 %v13806_v62  ;;  %11087 = vmatprep.subr.bf16.mxu0 %v13749_v2  ;;  %v13796_v62 = vcombine.low %v1337_v20, %v1341_v0  ;;  %v13862_v2 = vcombine.low %v1402_v46, %v1406_v49  ;;  %v13871_v3 = vcombine.high %v1410_v1, %v1414_v60  ;;  %v1393_v0 = vld [vmem:[%s19704_s1 + $0x2ad0] sm:$0xff]  ;;  %v1458_v49 = vld [vmem:[%s19704_s1 + $0x2cd8] sm:$0xff] }
 0x59c   :  { %11645 = vmatprep.subr.bf16.mxu1 %v13815_v9  ;;  %v13805_v9 = vcombine.high %v1345_v27, %v1349_v53  ;;  %v1397_v46 = vld [vmem:[%s19704_s1 + $0x2af0] sm:$0xff] }
 0x59e   :  { %11088 = vmatpush1.bf16.msra.mxu0 %v13748_v7  ;;  %v1422_v7 = vld [vmem:[%s19704_s1 + $0x2bb8] sm:$0xff] }
 0x59f   :  { %11646 = vmatpush1.bf16.msra.mxu1 %v13814_v50  ;;  %11089 = vmatprep.subr.bf16.mxu0 %v13757_v8  ;;  %v13804_v50 = vcombine.low %v1345_v27, %v1349_v53  ;;  %v13870_v8 = vcombine.low %v1410_v1, %v1414_v60  ;;  %v13879_v55 = vcombine.high %v1418_v6, %v1422_v7  ;;  %v1401_v53 = vld [vmem:[%s19704_s1 + $0x2b10] sm:$0xff]  ;;  %v1466_v60 = vld [vmem:[%s19704_s1 + $0x2d18] sm:$0xff] }
 0x5a0   :  { %11647 = vmatprep.subr.bf16.mxu1 %v13823_v10  ;;  %v13813_v10 = vcombine.high %v1353_v4, %v1357_v5  ;;  %v1405_v1 = vld [vmem:[%s19704_s1 + $0x2b30] sm:$0xff] }
 0x5a2   :  { %11090 = vmatpush1.bf16.msra.mxu0 %v13756_v15  ;;  %v1430_v15 = vld [vmem:[%s19704_s1 + $0x2bf8] sm:$0xff] }
 0x5a3   :  { %11648 = vmatpush1.bf16.msra.mxu1 %v13822_v41  ;;  %11100 = vmatprep.subr.bf16.mxu0 %v13765_v32  ;;  %v13812_v41 = vcombine.low %v1353_v4, %v1357_v5  ;;  %v13878_v32 = vcombine.low %v1418_v6, %v1422_v7  ;;  %v13887_v18 = vcombine.high %v1426_v12, %v1430_v15  ;;  %v1409_v5 = vld [vmem:[%s19704_s1 + $0x2b50] sm:$0xff]  ;;  %v1474_v7 = vld [vmem:[%s19704_s1 + $0x2d58] sm:$0xff] }
 0x5a4   :  { %11649 = vmatprep.subr.bf16.mxu1 %v13831_v36  ;;  %v13821_v36 = vcombine.high %v1361_v22, %v1365_v29  ;;  %v1413_v6 = vld [vmem:[%s19704_s1 + $0x2b70] sm:$0xff] }
 0x5a5   :  { %11092 = vmatmul.mubr.bf16.vlgmr.msra.gmra.mrb[8].mxu0 %v16599_v31  ;;  %v1329_v31 = vld [vmem:[%s19704_s1 + $0x28d0] sm:$0xff] }
 0x5a6   :  { %11101 = vmatpush1.bf16.msra.mxu0 %v13764_v59  ;;  %11132 = vmatprep.mubr.bf16.mxu0 %v16614_v45  ;;  %v1398_v45 = vld [vmem:[%s19704_s1 + $0x2af8] sm:$0xff]  ;;  %v13789_v43 = vcombine.high %v1329_v31, %v1333_v38  ;;  %v13788_v52 = vcombine.low %v1329_v31, %v1333_v38  ;;  %v1385_v38 = vld [vmem:[%s19704_s1 + $0x2a90] sm:$0xff] }
 0x5a7   :  { %11650 = vmatpush1.bf16.msra.mxu1 %v13830_v35  ;;  %11102 = vmatprep.subr.bf16.mxu0 %v13773_v13  ;;  %v13855_v34 = vcombine.high %v1394_v11, %v1398_v45  ;;  %v13854_v17 = vcombine.low %v1394_v11, %v1398_v45  ;;  %v1438_v59 = vld [vmem:[%s19704_s1 + $0x2c38] sm:$0xff]  ;;  %v13820_v35 = vcombine.low %v1361_v22, %v1365_v29  ;;  %v1389_v11 = vld [vmem:[%s19704_s1 + $0x2ab0] sm:$0xff] }
 0x5a8   :  { %11651 = vmatprep.subr.bf16.mxu1 %v13839_v26  ;;  %v13886_v13 = vcombine.low %v1426_v12, %v1430_v15  ;;  %v13829_v26 = vcombine.high %v1369_v51, %v1373_v21  ;;  %v13895_v28 = vcombine.high %v1434_v61, %v1438_v59  ;;  %v1450_v45 = vld [vmem:[%s19704_s1 + $0x2c98] sm:$0xff]  ;;  %v1417_v29 = vld [vmem:[%s19704_s1 + $0x2b90] sm:$0xff] }
 0x5a9   :  { %v1421_v12 = vld [vmem:[%s19704_s1 + $0x2bb0] sm:$0xff]  ;;  %v1482_v15 = vld [vmem:[%s19704_s1 + $0x2d98] sm:$0xff] }
 0x5aa   :  { %11103 = vmatpush1.bf16.msra.mxu0 %v13772_v23  ;;  %v1446_v23 = vld [vmem:[%s19704_s1 + $0x2c78] sm:$0xff] }
 0x5ab   :  { %11652 = vmatpush1.bf16.msra.mxu1 %v13838_v33  ;;  %11104 = vmatprep.subr.bf16.mxu0 %v13781_v37  ;;  %v13828_v33 = vcombine.low %v1369_v51, %v1373_v21  ;;  %v13894_v37 = vcombine.low %v1434_v61, %v1438_v59  ;;  %v13903_v31 = vcombine.high %v1442_v30, %v1446_v23  ;;  %v1425_v21 = vld [vmem:[%s19704_s1 + $0x2bd0] sm:$0xff]  ;;  %v1490_v59 = vld [vmem:[%s19704_s1 + $0x2dd8] sm:$0xff] }
 0x5ac   :  { %11653 = vmatprep.subr.bf16.mxu1 %v13847_v39  ;;  %v13837_v39 = vcombine.high %v1377_v24, %v1381_v63  ;;  %v1429_v61 = vld [vmem:[%s19704_s1 + $0x2bf0] sm:$0xff] }
 0x5ae   :  { %11105 = vmatpush1.bf16.msra.mxu0 %v13780_v48  ;;  %v1454_v48 = vld [vmem:[%s19704_s1 + $0x2cb8] sm:$0xff] }
 0x5af   :  { %11654 = vmatpush1.bf16.msra.mxu1 %v13846_v42  ;;  %11106 = vmatprep.subr.bf16.mxu0 %v13789_v43  ;;  %v13836_v42 = vcombine.low %v1377_v24, %v1381_v63  ;;  %v13902_v43 = vcombine.low %v1442_v30, %v1446_v23  ;;  %v13911_v20 = vcombine.high %v1450_v45, %v1454_v48  ;;  %v1433_v63 = vld [vmem:[%s19704_s1 + $0x2c10] sm:$0xff]  ;;  %v1498_v23 = vld [vmem:[%s19704_s1 + $0x2e18] sm:$0xff] }
 0x5b0   :  { %11655 = vmatprep.subr.bf16.mxu1 %v13855_v34  ;;  %v13845_v34 = vcombine.high %v1385_v38, %v1389_v11  ;;  %v1437_v30 = vld [vmem:[%s19704_s1 + $0x2c30] sm:$0xff] }
 0x5b2   :  { %11107 = vmatpush1.bf16.msra.mxu0 %v13788_v52  ;;  %v1462_v52 = vld [vmem:[%s19704_s1 + $0x2cf8] sm:$0xff] }
 0x5b3   :  { %11656 = vmatpush1.bf16.msra.mxu1 %v13854_v17  ;;  %11108 = vmatprep.subr.bf16.mxu0 %v13797_v54  ;;  %v13844_v17 = vcombine.low %v1385_v38, %v1389_v11  ;;  %v13910_v54 = vcombine.low %v1450_v45, %v1454_v48  ;;  %v13919_v27 = vcombine.high %v1458_v49, %v1462_v52  ;;  %v1441_v11 = vld [vmem:[%s19704_s1 + $0x2c50] sm:$0xff]  ;;  %v1506_v48 = vld [vmem:[%s19704_s1 + $0x2e58] sm:$0xff] }
 0x5b4   :  { %11657 = vmatprep.subr.bf16.mxu1 %v13863_v58  ;;  %v13853_v58 = vcombine.high %v1393_v0, %v1397_v46  ;;  %v1445_v45 = vld [vmem:[%s19704_s1 + $0x2c70] sm:$0xff] }
 0x5b6   :  { %11109 = vmatpush1.bf16.msra.mxu0 %v13796_v62  ;;  %v1470_v62 = vld [vmem:[%s19704_s1 + $0x2d38] sm:$0xff] }
 0x5b7   :  { %11658 = vmatpush1.bf16.msra.mxu1 %v13862_v2  ;;  %11110 = vmatprep.subr.bf16.mxu0 %v13805_v9  ;;  %v13852_v2 = vcombine.low %v1393_v0, %v1397_v46  ;;  %v13918_v9 = vcombine.low %v1458_v49, %v1462_v52  ;;  %v13927_v4 = vcombine.high %v1466_v60, %v1470_v62  ;;  %v1449_v46 = vld [vmem:[%s19704_s1 + $0x2c90] sm:$0xff]  ;;  %v1514_v52 = vld [vmem:[%s19704_s1 + $0x2e98] sm:$0xff] }
 0x5b8   :  { %11659 = vmatprep.subr.bf16.mxu1 %v13871_v3  ;;  %v13861_v3 = vcombine.high %v1401_v53, %v1405_v1  ;;  %v1453_v49 = vld [vmem:[%s19704_s1 + $0x2cb0] sm:$0xff] }
 0x5ba   :  { %11111 = vmatpush1.bf16.msra.mxu0 %v13804_v50  ;;  %v1478_v50 = vld [vmem:[%s19704_s1 + $0x2d78] sm:$0xff] }
 0x5bb   :  { %11660 = vmatpush1.bf16.msra.mxu1 %v13870_v8  ;;  %11112 = vmatprep.subr.bf16.mxu0 %v13813_v10  ;;  %v13860_v8 = vcombine.low %v1401_v53, %v1405_v1  ;;  %v13926_v10 = vcombine.low %v1466_v60, %v1470_v62  ;;  %v13935_v22 = vcombine.high %v1474_v7, %v1478_v50  ;;  %v1461_v1 = vld [vmem:[%s19704_s1 + $0x2cf0] sm:$0xff]  ;;  %v1522_v60 = vld [vmem:[%s19704_s1 + $0x2ed8] sm:$0xff] }
 0x5bc   :  { %11661 = vmatprep.subr.bf16.mxu1 %v13879_v55  ;;  %v13869_v55 = vcombine.high %v1409_v5, %v1413_v6  ;;  %v13908_v62 = vcombine.low %v1449_v46, %v1453_v49 }
 0x5be   :  { %11113 = vmatpush1.bf16.msra.mxu0 %v13812_v41  ;;  %v1486_v41 = vld [vmem:[%s19704_s1 + $0x2db8] sm:$0xff] }
 0x5bf   :  { %11662 = vmatpush1.bf16.msra.mxu1 %v13878_v32  ;;  %11114 = vmatprep.subr.bf16.mxu0 %v13821_v36  ;;  %v13868_v32 = vcombine.low %v1409_v5, %v1413_v6  ;;  %v13934_v36 = vcombine.low %v1474_v7, %v1478_v50  ;;  %v13943_v51 = vcombine.high %v1482_v15, %v1486_v41  ;;  %v1469_v5 = vld [vmem:[%s19704_s1 + $0x2d30] sm:$0xff]  ;;  %v1530_v6 = vld [vmem:[%s19704_s1 + $0x2f18] sm:$0xff] }
 0x5c0   :  { %11663 = vmatprep.subr.bf16.mxu1 %v13887_v18  ;;  %v13877_v18 = vcombine.high %v1417_v29, %v1421_v12  ;;  %v1534_v7 = vld [vmem:[%s19704_s1 + $0x2f38] sm:$0xff] }
 0x5c2   :  { %11115 = vmatpush1.bf16.msra.mxu0 %v13820_v35  ;;  %v1494_v35 = vld [vmem:[%s19704_s1 + $0x2df8] sm:$0xff] }
 0x5c3   :  { %11664 = vmatpush1.bf16.msra.mxu1 %v13886_v13  ;;  %11116 = vmatprep.subr.bf16.mxu0 %v13829_v26  ;;  %v13876_v13 = vcombine.low %v1417_v29, %v1421_v12  ;;  %v13942_v26 = vcombine.low %v1482_v15, %v1486_v41  ;;  %v13951_v24 = vcombine.high %v1490_v59, %v1494_v35  ;;  %v1477_v29 = vld [vmem:[%s19704_s1 + $0x2d70] sm:$0xff]  ;;  %v1538_v12 = vld [vmem:[%s19704_s1 + $0x2f58] sm:$0xff] }
 0x5c4   :  { %11674 = vmatprep.subr.bf16.mxu1 %v13895_v28  ;;  %v13885_v28 = vcombine.high %v1425_v21, %v1429_v61  ;;  %v1542_v15 = vld [vmem:[%s19704_s1 + $0x2f78] sm:$0xff] }
 0x5c6   :  { %11117 = vmatpush1.bf16.msra.mxu0 %v13828_v33  ;;  %11666 = vmatmul.mubr.bf16.vlgmr.msra.gmra.mrb[4].mxu1 %v16802_v40  ;;  %v1502_v33 = vld [vmem:[%s19704_s1 + $0x2e38] sm:$0xff] }
 0x5c7   :  { %11675 = vmatpush1.bf16.msra.mxu1 %v13894_v37  ;;  %11118 = vmatprep.subr.bf16.mxu0 %v13837_v39  ;;  %v13884_v37 = vcombine.low %v1425_v21, %v1429_v61  ;;  %v13950_v39 = vcombine.low %v1490_v59, %v1494_v35  ;;  %v13959_v38 = vcombine.high %v1498_v23, %v1502_v33  ;;  %v1485_v21 = vld [vmem:[%s19704_s1 + $0x2db0] sm:$0xff]  ;;  %v1546_v61 = vld [vmem:[%s19704_s1 + $0x2f98] sm:$0xff] }
 0x5c8   :  { %11676 = vmatprep.subr.bf16.mxu1 %v13903_v31  ;;  %11706 = vmatprep.mubr.bf16.mxu1 %v16818_v56  ;;  %v13893_v31 = vcombine.high %v1433_v63, %v1437_v30  ;;  %v1550_v59 = vld [vmem:[%s19704_s1 + $0x2fb8] sm:$0xff] }
 0x5ca   :  { %11119 = vmatpush1.bf16.msra.mxu0 %v13836_v42  ;;  %v1510_v42 = vld [vmem:[%s19704_s1 + $0x2e78] sm:$0xff] }
 0x5cb   :  { %11677 = vmatpush1.bf16.msra.mxu1 %v13902_v43  ;;  %11120 = vmatprep.subr.bf16.mxu0 %v13845_v34  ;;  %v13892_v43 = vcombine.low %v1433_v63, %v1437_v30  ;;  %v13958_v34 = vcombine.low %v1498_v23, %v1502_v33  ;;  %v13967_v0 = vcombine.high %v1506_v48, %v1510_v42  ;;  %v1493_v63 = vld [vmem:[%s19704_s1 + $0x2df0] sm:$0xff]  ;;  %v1554_v30 = vld [vmem:[%s19704_s1 + $0x2fd8] sm:$0xff] }
 0x5cc   :  { %11678 = vmatprep.subr.bf16.mxu1 %v13911_v20  ;;  %v13901_v20 = vcombine.high %v1441_v11, %v1445_v45  ;;  %v1558_v23 = vld [vmem:[%s19704_s1 + $0x2ff8] sm:$0xff] }
 0x5ce   :  { %11121 = vmatpush1.bf16.msra.mxu0 %v13844_v17  ;;  %v1518_v17 = vld [vmem:[%s19704_s1 + $0x2eb8] sm:$0xff] }
 0x5cf   :  { %11679 = vmatpush1.bf16.msra.mxu1 %v13910_v54  ;;  %11122 = vmatprep.subr.bf16.mxu0 %v13853_v58  ;;  %v13900_v54 = vcombine.low %v1441_v11, %v1445_v45  ;;  %v13966_v58 = vcombine.low %v1506_v48, %v1510_v42  ;;  %v13975_v53 = vcombine.high %v1514_v52, %v1518_v17  ;;  %v1501_v11 = vld [vmem:[%s19704_s1 + $0x2e30] sm:$0xff]  ;;  %v1562_v45 = vld [vmem:[%s19704_s1 + $0x3018] sm:$0xff] }
 0x5d0   :  { %11680 = vmatprep.subr.bf16.mxu1 %v13919_v27  ;;  %v13909_v27 = vcombine.high %v1449_v46, %v1453_v49  ;;  %v1566_v48 = vld [vmem:[%s19704_s1 + $0x3038] sm:$0xff]  ;;  %v1509_v46 = vld [vmem:[%s19704_s1 + $0x2e70] sm:$0xff] }
 0x5d1   :  { %v1570_v49 = vld [vmem:[%s19704_s1 + $0x3058] sm:$0xff] }
 0x5d2   :  { %11123 = vmatpush1.bf16.msra.mxu0 %v13852_v2  ;;  %v13974_v2 = vcombine.low %v1514_v52, %v1518_v17  ;;  %v1574_v52 = vld [vmem:[%s19704_s1 + $0x3078] sm:$0xff] }
 0x5d3   :  { %11681 = vmatpush1.bf16.msra.mxu1 %v13918_v9  ;;  %11124 = vmatprep.subr.bf16.mxu0 %v13861_v3 }
 0x5d4   :  { %11682 = vmatprep.subr.bf16.mxu1 %v13927_v4  ;;  %v1465_v4 = vld [vmem:[%s19704_s1 + $0x2d10] sm:$0xff] }
 0x5d5   :  { %v13924_v41 = vcombine.low %v1465_v4, %v1469_v5 }
 0x5d6   :  { %11125 = vmatpush1.bf16.msra.mxu0 %v13860_v8 }
 0x5d7   :  { %11683 = vmatpush1.bf16.msra.mxu1 %v13926_v10  ;;  %11126 = vmatprep.subr.bf16.mxu0 %v13869_v55  ;;  %v13925_v10 = vcombine.high %v1465_v4, %v1469_v5  ;;  %v13991_v55 = vcombine.high %v1530_v6, %v1534_v7  ;;  %v1525_v4 = vld [vmem:[%s19704_s1 + $0x2ef0] sm:$0xff]  ;;  %v1586_v5 = vld [vmem:[%s19704_s1 + $0x30d8] sm:$0xff] }
 0x5d8   :  { %11684 = vmatprep.subr.bf16.mxu1 %v13935_v22  ;;  %v1473_v22 = vld [vmem:[%s19704_s1 + $0x2d50] sm:$0xff] }
 0x5d9   :  { %v13932_v35 = vcombine.low %v1473_v22, %v1477_v29 }
 0x5da   :  { %11127 = vmatpush1.bf16.msra.mxu0 %v13868_v32  ;;  %v13990_v32 = vcombine.low %v1530_v6, %v1534_v7  ;;  %v1590_v6 = vld [vmem:[%s19704_s1 + $0x30f8] sm:$0xff] }
 0x5db   :  { %11685 = vmatpush1.bf16.msra.mxu1 %v13934_v36  ;;  %11128 = vmatprep.subr.bf16.mxu0 %v13877_v18  ;;  %v13933_v36 = vcombine.high %v1473_v22, %v1477_v29  ;;  %v13999_v18 = vcombine.high %v1538_v12, %v1542_v15  ;;  %v1533_v22 = vld [vmem:[%s19704_s1 + $0x2f30] sm:$0xff]  ;;  %v11767_v29 = vmul.f32 0.2, %v17798_v44 }
 0x5dc   :  { %11686 = vmatprep.subr.bf16.mxu1 %v13943_v51  ;;  %v1481_v51 = vld [vmem:[%s19704_s1 + $0x2d90] sm:$0xff] }
 0x5dd   :  { %v13940_v33 = vcombine.low %v1481_v51, %v1485_v21 }
 0x5de   :  { %11129 = vmatpush1.bf16.msra.mxu0 %v13876_v13  ;;  %v13998_v13 = vcombine.low %v1538_v12, %v1542_v15  ;;  %v14046_v15 = vcombine.low %v1586_v5, %v1590_v6 }
 0x5df   :  { %11687 = vmatpush1.bf16.msra.mxu1 %v13942_v26  ;;  %11130 = vmatprep.subr.bf16.mxu0 %v13885_v28  ;;  %v13941_v26 = vcombine.high %v1481_v51, %v1485_v21  ;;  %v14007_v28 = vcombine.high %v1546_v61, %v1550_v59  ;;  %v11775_v21 = vsel %vm11759_vm1, %v17798_v44, %v11767_v29  ;;  %v1549_v44 = vld [vmem:[%s19704_s1 + $0x2fb0] sm:$0xff] }
 0x5e0   :  { %11688 = vmatprep.subr.bf16.mxu1 %v13951_v24  ;;  %v1489_v24 = vld [vmem:[%s19704_s1 + $0x2dd0] sm:$0xff] }
 0x5e1   :  { %v13948_v42 = vcombine.low %v1489_v24, %v1493_v63 }
 0x5e2   :  { %11131 = vmatpush1.bf16.msra.mxu0 %v13884_v37  ;;  %v14006_v37 = vcombine.low %v1546_v61, %v1550_v59  ;;  %v14380_v61 = vld [vmem:[%s19705_s2 + $0x80] sm:$0xff]  }
 0x5e3   :  { %11689 = vmatpush1.bf16.msra.mxu1 %v13950_v39  ;;  %11141 = vmatprep.subr.bf16.mxu0 %v13893_v31  ;;  %v13949_v39 = vcombine.high %v1489_v24, %v1493_v63  ;;  %v14015_v31 = vcombine.high %v1554_v30, %v1558_v23  ;;  %v14382_v24 = vld [vmem:[%s19705_s2 + $0x88] sm:$0xff]  }
 0x5e4   :  { %11690 = vmatprep.subr.bf16.mxu1 %v13959_v38  ;;  %v1497_v38 = vld [vmem:[%s19704_s1 + $0x2e10] sm:$0xff] }
 0x5e5   :  { %11133 = vmatmul.mubr.bf16.vlgmr.msra.gmra.mrb[8].mxu0 %v16802_v40  ;;  %v1457_v40 = vld [vmem:[%s19704_s1 + $0x2cd0] sm:$0xff]  ;;  %v13956_v17 = vcombine.low %v1497_v38, %v1501_v11 }
 0x5e6   :  { %11142 = vmatpush1.bf16.msra.mxu0 %v13892_v43  ;;  %11173 = vmatprep.mubr.bf16.mxu0 %v16818_v56  ;;  %v1526_v56 = vld [vmem:[%s19704_s1 + $0x2ef8] sm:$0xff]  ;;  %v13917_v9 = vcombine.high %v1457_v40, %v1461_v1  ;;  %v13916_v50 = vcombine.low %v1457_v40, %v1461_v1  ;;  %v14014_v43 = vcombine.low %v1554_v30, %v1558_v23  ;;  %v1517_v40 = vld [vmem:[%s19704_s1 + $0x2eb0] sm:$0xff] }
 0x5e7   :  { %11691 = vmatpush1.bf16.msra.mxu1 %v13958_v34  ;;  %11143 = vmatprep.subr.bf16.mxu0 %v13901_v20  ;;  %v13983_v3 = vcombine.high %v1522_v60, %v1526_v56  ;;  %v13982_v8 = vcombine.low %v1522_v60, %v1526_v56  ;;  %v13957_v34 = vcombine.high %v1497_v38, %v1501_v11  ;;  %v1578_v1 = vld [vmem:[%s19704_s1 + $0x3098] sm:$0xff]  ;;  %v14383_v30 = vld [vmem:[%s19705_s2 + $0xd0] sm:$0xff]  }
 0x5e8   :  { %11692 = vmatprep.subr.bf16.mxu1 %v13967_v0  ;;  %v14023_v20 = vcombine.high %v1562_v45, %v1566_v48  ;;  %v1505_v0 = vld [vmem:[%s19704_s1 + $0x2e50] sm:$0xff]  ;;  %v1582_v60 = vld [vmem:[%s19704_s1 + $0x30b8] sm:$0xff] }
 0x5e9   :  { %v13964_v56 = vcombine.low %v1505_v0, %v1509_v46  ;;  %v1553_v23 = vld [vmem:[%s19704_s1 + $0x2fd0] sm:$0xff]  ;;  %v14385_v38 = vld [vmem:[%s19705_s2 + $0xd8] sm:$0xff]  }
 0x5ea   :  { %11144 = vmatpush1.bf16.msra.mxu0 %v13900_v54  ;;  %v14022_v54 = vcombine.low %v1562_v45, %v1566_v48  ;;  %v1561_v11 = vld [vmem:[%s19704_s1 + $0x3010] sm:$0xff] }
 0x5eb   :  { %11693 = vmatpush1.bf16.msra.mxu1 %v13966_v58  ;;  %11145 = vmatprep.subr.bf16.mxu0 %v13909_v27  ;;  %v13965_v58 = vcombine.high %v1505_v0, %v1509_v46  ;;  %v14031_v27 = vcombine.high %v1570_v49, %v1574_v52  ;;  %v1565_v45 = vld [vmem:[%s19704_s1 + $0x3030] sm:$0xff] }
 0x5ec   :  { %11694 = vmatprep.subr.bf16.mxu1 %v13975_v53  ;;  %v1513_v53 = vld [vmem:[%s19704_s1 + $0x2e90] sm:$0xff]  ;;  %v14020_v46 = vcombine.low %v1561_v11, %v1565_v45 }
 0x5ed   :  { %v13972_v7 = vcombine.low %v1513_v53, %v1517_v40  ;;  %v1573_v0 = vld [vmem:[%s19704_s1 + $0x3070] sm:$0xff] }
 0x5ee   :  { %11146 = vmatpush1.bf16.msra.mxu0 %v13908_v62  ;;  %v14030_v62 = vcombine.low %v1570_v49, %v1574_v52  ;;  %v14388_v49 = vld [vmem:[%s19705_s2 + $0xa0] sm:$0xff]  }
 0x5ef   :  { %11695 = vmatpush1.bf16.msra.mxu1 %v13974_v2  ;;  %11147 = vmatprep.subr.bf16.mxu0 %v13917_v9  ;;  %v13973_v2 = vcombine.high %v1513_v53, %v1517_v40  ;;  %v14039_v9 = vcombine.high %v1578_v1, %v1582_v60  ;;  %v14390_v53 = vld [vmem:[%s19705_s2 + $0xa8] sm:$0xff]  }
 0x5f0   :  { %11696 = vmatprep.subr.bf16.mxu1 %v13983_v3  ;;  %v1521_v3 = vld [vmem:[%s19704_s1 + $0x2ed0] sm:$0xff] }
 0x5f1   :  { %v13980_v12 = vcombine.low %v1521_v3, %v1525_v4 }
 0x5f2   :  { %11148 = vmatpush1.bf16.msra.mxu0 %v13916_v50  ;;  %v14038_v50 = vcombine.low %v1578_v1, %v1582_v60  ;;  %v14391_v1 = vld [vmem:[%s19705_s2 + $0xf0] sm:$0xff]  }
 0x5f3   :  { %11697 = vmatpush1.bf16.msra.mxu1 %v13982_v8  ;;  %11149 = vmatprep.subr.bf16.mxu0 %v13925_v10  ;;  %v13981_v8 = vcombine.high %v1521_v3, %v1525_v4  ;;  %v14047_v10 = vcombine.high %v1586_v5, %v1590_v6  ;;  %v1589_v60 = vld [vmem:[%s19704_s1 + $0x30f0] sm:$0xff]  ;;  %v11766_v3 = vmul.f32 0.2, %v17789_v14  ;;  %v11765_v4 = vmul.f32 0.2, %v17738_v25  ;;  %v14394_v6 = vld [vmem:[%s19705_s2 + $0xb8] sm:$0xff]  }
 0x5f4   :  { %11698 = vmatprep.subr.bf16.mxu1 %v13991_v55  ;;  %v1529_v55 = vld [vmem:[%s19704_s1 + $0x2f10] sm:$0xff] }
 0x5f5   :  { %v13988_v51 = vcombine.low %v1529_v55, %v1533_v22 }
 0x5f6   :  { %11150 = vmatpush1.bf16.msra.mxu0 %v13924_v41  ;;  %v13989_v41 = vcombine.high %v1529_v55, %v1533_v22  ;;  %v14397_v55 = vld [vmem:[%s19705_s2 + $0x48] sm:$0xff]  }
 0x5f7   :  { %11699 = vmatpush1.bf16.msra.mxu1 %v13990_v32  ;;  %11151 = vmatprep.subr.bf16.mxu0 %v13933_v36  ;;  %v14379_v32 = vld [vmem:[%s19705_s2 + $0xc0] sm:$0xff]   ;;  %v1537_v36 = vld [vmem:[%s19704_s1 + $0x2f50] sm:$0xff] }
 0x5f8   :  { %11700 = vmatprep.subr.bf16.mxu1 %v13999_v18  ;;  %v1541_v18 = vld [vmem:[%s19704_s1 + $0x2f70] sm:$0xff] }
 0x5f9   :  { %v13997_v59 = vcombine.high %v1537_v36, %v1541_v18 }
 0x5fa   :  { %11152 = vmatpush1.bf16.msra.mxu0 %v13932_v35  ;;  %v14381_v35 = vld [vmem:[%s19705_s2 + $0xc8] sm:$0xff]  }
 0x5fb   :  { %11701 = vmatpush1.bf16.msra.mxu1 %v13998_v13  ;;  %11153 = vmatprep.subr.bf16.mxu0 %v13941_v26  ;;  %v1545_v13 = vld [vmem:[%s19704_s1 + $0x2f90] sm:$0xff]  ;;  %v11783_v26 = vpack.c.bf16 %v11775_v21, %v11775_v21  ;;  %v14404_v21 = vld [vmem:[%s19705_s2 + $0x20] sm:$0xff]  }
 0x5fc   :  { %11702 = vmatprep.subr.bf16.mxu1 %v14007_v28  ;;  %v13996_v28 = vcombine.low %v1537_v36, %v1541_v18  ;;  %v14005_v63 = vcombine.high %v1545_v13, %v1549_v44  ;;  %v14402_v36 = vld [vmem:[%s19705_s2 + $0x18] sm:$0xff]   ;;  %v14403_v18 = vld [vmem:[%s19705_s2 + $0x60] sm:$0xff]  }
 0x5fe   :  { %11154 = vmatpush1.bf16.msra.mxu0 %v13940_v33  ;;  %v1557_v33 = vld [vmem:[%s19704_s1 + $0x2ff0] sm:$0xff] }
 0x5ff   :  { %11703 = vmatpush1.bf16.msra.mxu1 %v14006_v37  ;;  %11155 = vmatprep.subr.bf16.mxu0 %v13949_v39  ;;  %v14004_v37 = vcombine.low %v1545_v13, %v1549_v44  ;;  %v14384_v39 = vld [vmem:[%s19705_s2 + $0x90] sm:$0xff]   ;;  %v14012_v48 = vcombine.low %v1553_v23, %v1557_v33  ;;  %v14416_v44 = vld [vmem:[%s19705_s2 + $0x1a8] sm:$0xff]  }
 0x600   :  { %11704 = vmatprep.subr.bf16.mxu1 %v14015_v31  ;;  %v14013_v31 = vcombine.high %v1553_v23, %v1557_v33  ;;  %v14407_v13 = vld [vmem:[%s19705_s2 + $0x70] sm:$0xff]   ;;  %v14418_v33 = vld [vmem:[%s19705_s2 + $0x1b8] sm:$0xff]  }
 0x602   :  { %11156 = vmatpush1.bf16.msra.mxu0 %v13948_v42  ;;  %v14386_v42 = vld [vmem:[%s19705_s2 + $0x98] sm:$0xff]  }
 0x603   :  { %11705 = vmatpush1.bf16.msra.mxu1 %v14014_v43  ;;  %11157 = vmatprep.subr.bf16.mxu0 %v13957_v34  ;;  %v14021_v43 = vcombine.high %v1561_v11, %v1565_v45  ;;  %v14387_v34 = vld [vmem:[%s19705_s2 + $0xe0] sm:$0xff]   ;;  %v14424_v45 = vld [vmem:[%s19705_s2 + $0x1e8] sm:$0xff]  }
 0x604   :  { %11715 = vmatprep.subr.bf16.mxu1 %v14023_v20  ;;  %v1569_v20 = vld [vmem:[%s19704_s1 + $0x3050] sm:$0xff]  ;;  %v14423_v11 = vld [vmem:[%s19705_s2 + $0x1e0] sm:$0xff]  }
 0x605   :  { %v14029_v52 = vcombine.high %v1569_v20, %v1573_v0 }
 0x606   :  { %11158 = vmatpush1.bf16.msra.mxu0 %v13956_v17  ;;  %11707 = vmatmul.mubr.bf16.vlgmr.msra.gmra.mrb[4].mxu1 %v17006_v57  ;;  %v14389_v17 = vld [vmem:[%s19705_s2 + $0xe8] sm:$0xff]  }
 0x607   :  { %11716 = vmatpush1.bf16.msra.mxu1 %v14022_v54  ;;  %11159 = vmatprep.subr.bf16.mxu0 %v13965_v58  ;;  %v1577_v54 = vld [vmem:[%s19704_s1 + $0x3090] sm:$0xff] }
 0x608   :  { %11717 = vmatprep.subr.bf16.mxu1 %v14031_v27  ;;  %11747 = vmatprep.mubr.bf16.mxu1 %v14467_v16  ;;  %v1581_v58 = vld [vmem:[%s19704_s1 + $0x30b0] sm:$0xff]  ;;  %v14028_v27 = vcombine.low %v1569_v20, %v1573_v0  ;;  %v14428_v20 = vld [vmem:[%s19705_s2 + $0x148] sm:$0xff]  }
 0x609   :  { %v14037_v40 = vcombine.high %v1577_v54, %v1581_v58  ;;  %v14430_v0 = vld [vmem:[%s19705_s2 + $0x150] sm:$0xff]  }
 0x60a   :  { %11160 = vmatpush1.bf16.msra.mxu0 %v13964_v56  ;;  %v14036_v56 = vcombine.low %v1577_v54, %v1581_v58  ;;  %v14435_v54 = vld [vmem:[%s19705_s2 + $0x120] sm:$0xff]   ;;  %v14436_v58 = vld [vmem:[%s19705_s2 + $0x168] sm:$0xff]  }
 0x60b   :  { %11718 = vmatpush1.bf16.msra.mxu1 %v14030_v62  ;;  %11161 = vmatprep.subr.bf16.mxu0 %v13973_v2  ;;  %v14392_v62 = vld [vmem:[%s19705_s2 + $0xb0] sm:$0xff]  }
 0x60c   :  { %11719 = vmatprep.subr.bf16.mxu1 %v14039_v9  ;;  %v14393_v9 = vld [vmem:[%s19705_s2 + $0xf8] sm:$0xff]  }
 0x60e   :  { %11162 = vmatpush1.bf16.msra.mxu0 %v13972_v7  ;;  %v14395_v7 = vld [vmem:[%s19705_s2 + $0x40] sm:$0xff]  }
 0x60f   :  { %11720 = vmatpush1.bf16.msra.mxu1 %v14038_v50  ;;  %11163 = vmatprep.subr.bf16.mxu0 %v13981_v8  ;;  %v11774_v50 = vsel %vm11758_vm2, %v17789_v14, %v11766_v3  ;;  %v11773_v8 = vsel %vm11757_vm3, %v17738_v25, %v11765_v4  ;;  %v14411_v14 = vld [vmem:[%s19705_s2 + $0x180] sm:$0xff]   ;;  %v14398_v25 = vld [vmem:[%s19705_s2 + $0x8] sm:$0xff]  }
 0x610   :  { %11721 = vmatprep.subr.bf16.mxu1 %v14047_v10  ;;  %v14396_v10 = vld [vmem:[%s19705_s2] sm:$0xff]   ;;  %v11782_v22 = vpack.c.bf16 %v11774_v50, %v11774_v50  ;;  %v11781_v29 = vpack.c.bf16 %v11773_v8, %v11773_v8 }
 0x612   :  { %11164 = vmatpush1.bf16.msra.mxu0 %v13980_v12  ;;  %v14399_v12 = vld [vmem:[%s19705_s2 + $0x50] sm:$0xff]  }
 0x613   :  { %11722 = vmatpush1.bf16.msra.mxu1 %v14046_v15  ;;  %11165 = vmatprep.subr.bf16.mxu0 %v13989_v41  ;;  %v14412_v15 = vld [vmem:[%s19705_s2 + $0x188] sm:$0xff]   ;;  %v14401_v41 = vld [vmem:[%s19705_s2 + $0x58] sm:$0xff]  }
 0x614   :  { %14139 = vmatprep.subr.bf16.mxu1 %v14379_v32  ;;  %v14413_v32 = vld [vmem:[%s19705_s2 + $0x190] sm:$0xff]  }
 0x616   :  { %14051 = vmatmul.mubr.msk.bf16.vlgmr.msra.gmra.mrb[4].mxu1 %vm9620_vm0, %v17064_v47  ;;  %11166 = vmatpush1.bf16.msra.mxu0 %v13988_v51  ;;  %v14414_v51 = vld [vmem:[%s19705_s2 + $0x198] sm:$0xff]  }
 0x617   :  { %14140 = vmatpush3.bf16.msra.mxu1 %v14380_v61  ;;  %12375 = vmatprep.mubr.bf16.mxu1 %v11783_v26  ;;  %v14405_v61 = vld [vmem:[%s19705_s2 + $0x68] sm:$0xff]   ;;  %v14408_v26 = vld [vmem:[%s19705_s2 + $0x30] sm:$0xff]  }
 0x618   :  { %11167 = vmatprep.subr.bf16.mxu0 %v13997_v59  ;;  %14141 = vmatprep.subr.bf16.mxu1 %v14381_v35  ;;  %v14415_v59 = vld [vmem:[%s19705_s2 + $0x1a0] sm:$0xff]   ;;  %v14406_v35 = vld [vmem:[%s19705_s2 + $0x28] sm:$0xff]  }
 0x61a   :  { %11168 = vmatpush1.bf16.msra.mxu0 %v13996_v28  ;;  %v14409_v28 = vld [vmem:[%s19705_s2 + $0x78] sm:$0xff]  }
 0x61b   :  { %14142 = vmatpush3.bf16.msra.mxu1 %v14382_v24  ;;  %11169 = vmatprep.subr.bf16.mxu0 %v14005_v63  ;;  %v11764_v24 = vmul.f32 0.2, %v17730_v19  ;;  %v14417_v63 = vld [vmem:[%s19705_s2 + $0x1b0] sm:$0xff]  }
 0x61c   :  { %14143 = vmatprep.subr.bf16.mxu1 %v14383_v30  ;;  %v14410_v30 = vld [vmem:[%s19705_s2 + $0x38] sm:$0xff]  }
 0x61d   :  { %v11772_v23 = vsel %vm11756_vm4, %v17730_v19, %v11764_v24  ;;  %v14420_v19 = vld [vmem:[%s19705_s2 + $0x1c8] sm:$0xff]  }
 0x61e   :  { %11170 = vmatpush1.bf16.msra.mxu0 %v14004_v37  ;;  %v11780_v37 = vpack.c.bf16 %v11772_v23, %v11772_v23 }
 0x61f   :  { %14144 = vmatpush3.bf16.msra.mxu1 %v14384_v39  ;;  %11171 = vmatprep.subr.bf16.mxu0 %v14013_v31  ;;  %v14419_v39 = vld [vmem:[%s19705_s2 + $0x1c0] sm:$0xff]   ;;  %v14421_v31 = vld [vmem:[%s19705_s2 + $0x1d0] sm:$0xff]  }
 0x620   :  { %14145 = vmatprep.subr.bf16.mxu1 %v14385_v38  ;;  %v14422_v38 = vld [vmem:[%s19705_s2 + $0x1d8] sm:$0xff]  }
 0x622   :  { %11172 = vmatpush1.bf16.msra.mxu0 %v14012_v48  ;;  %v14425_v48 = vld [vmem:[%s19705_s2 + $0x1f0] ss:$0 sps:$4 sm:$0xff]  }
 0x623   :  { %14146 = vmatpush3.bf16.msra.mxu1 %v14386_v42  ;;  %11182 = vmatprep.subr.bf16.mxu0 %v14021_v43  ;;  %v12301_v42 = vsel %vm12299_vm5, %v14425_v48, 0  ;;  %v14426_v43 = vld [vmem:[%s19705_s2 + $0x140] sm:$0xff]  }
 0x624   :  { %14147 = vmatprep.subr.bf16.mxu1 %v14387_v34  ;;  %v14427_v34 = vld [vmem:[%s19705_s2 + $0x100] sm:$0xff]  }
 0x625   :  { %11174 = vmatmul.mubr.bf16.vlgmr.msra.gmra.mrb[8].mxu0 %v17006_v57  ;;  %v1585_v57 = vld [vmem:[%s19704_s1 + $0x30d0] sm:$0xff] }
 0x626   :  { %11183 = vmatpush1.bf16.msra.mxu0 %v14020_v46  ;;  %11214 = vmatprep.mubr.bf16.mxu0 %v14467_v16  ;;  %v14045_v2 = vcombine.high %v1585_v57, %v1589_v60  ;;  %v14044_v5 = vcombine.low %v1585_v57, %v1589_v60  ;;  %v14431_v46 = vld [vmem:[%s19705_s2 + $0x110] sm:$0xff]   ;;  %v14441_v57 = vld [vmem:[%s19705_s2 + $0x138] sm:$0xff]  }
 0x627   :  { %14148 = vmatpush3.bf16.msra.mxu1 %v14388_v49  ;;  %11184 = vmatprep.subr.bf16.mxu0 %v14029_v52  ;;  %v14432_v49 = vld [vmem:[%s19705_s2 + $0x158] sm:$0xff]  }
 0x628   :  { %14149 = vmatprep.subr.bf16.mxu1 %v14389_v17  ;;  %v14433_v52 = vld [vmem:[%s19705_s2 + $0x118] sm:$0xff]   ;;  %v14434_v17 = vld [vmem:[%s19705_s2 + $0x160] sm:$0xff]  }
 0x62a   :  { %11185 = vmatpush1.bf16.msra.mxu0 %v14028_v27  ;;  %v14437_v27 = vld [vmem:[%s19705_s2 + $0x128] sm:$0xff]  }
 0x62b   :  { %14150 = vmatpush3.bf16.msra.mxu1 %v14390_v53  ;;  %11186 = vmatprep.subr.bf16.mxu0 %v14037_v40  ;;  %v14438_v53 = vld [vmem:[%s19705_s2 + $0x170] sm:$0xff]  }
 0x62c   :  { %14151 = vmatprep.subr.bf16.mxu1 %v14391_v1  ;;  %v14439_v40 = vld [vmem:[%s19705_s2 + $0x130] sm:$0xff]   ;;  %v14440_v1 = vld [vmem:[%s19705_s2 + $0x178] sm:$0xff]  }
 0x62e   :  { %11187 = vmatpush1.bf16.msra.mxu0 %v14036_v56 }
 0x62f   :  { %14152 = vmatpush3.bf16.msra.mxu1 %v14392_v62  ;;  %11188 = vmatprep.subr.bf16.mxu0 %v14045_v2 }
 0x630   :  { %14153 = vmatprep.subr.bf16.mxu1 %v14393_v9 }
 0x632   :  { %11189 = vmatpush1.bf16.msra.mxu0 %v14044_v5 }
 0x633   :  { %14154 = vmatpush3.bf16.msra.mxu1 %v14394_v6  ;;  %14117 = vmatprep.subr.bf16.mxu0 %v14395_v7 }
 0x634   :  { %12423 = vmatprep.subr.bf16.mxu1 %v14467_v16 }
 0x635   :  { %14050 = vmatmul.mubr.msk.bf16.vlgmr.msra.gmra.mrb[8].mxu0 %vm9620_vm0, %v17064_v47  ;;  %v14400_v47 = vld [vmem:[%s19705_s2 + $0x10] sm:$0xff]  }
 0x636   :  { %12376 = vmatmul.mubr.bf16.vlgmr.msra.gmra.mrb[8].mxu1 %v11782_v22  ;;  %14118 = vmatpush3.bf16.msra.mxu0 %v14396_v10 }
 0x637   :  { %12335 = vmatprep.mubr.bf16.mxu0 %v11781_v29  ;;  %14119 = vmatprep.subr.bf16.mxu0 %v14397_v55 }
 0x638   :  { %12424 = vmatpush1.bf16.msra.mxu1 %v14411_v14 }
 0x639   :  { %12425 = vmatprep.subr.bf16.mxu1 %v14467_v16 }
 0x63a   :  { %14120 = vmatpush3.bf16.msra.mxu0 %v14398_v25 }
 0x63b   :  { %14121 = vmatprep.subr.bf16.mxu0 %v14399_v12 }
 0x63c   :  { %12426 = vmatpush1.bf16.msra.mxu1 %v14412_v15 }
 0x63d   :  { %12427 = vmatprep.subr.bf16.mxu1 %v14467_v16 }
 0x63e   :  { %14122 = vmatpush3.bf16.msra.mxu0 %v14400_v47 }
 0x63f   :  { %14123 = vmatprep.subr.bf16.mxu0 %v14401_v41 }
 0x640   :  { %12428 = vmatpush1.bf16.msra.mxu1 %v14413_v32 }
 0x641   :  { %12429 = vmatprep.subr.bf16.mxu1 %v14467_v16 }
 0x642   :  { %14124 = vmatpush3.bf16.msra.mxu0 %v14402_v36 }
 0x643   :  { %14125 = vmatprep.subr.bf16.mxu0 %v14403_v18 }
 0x644   :  { %12430 = vmatpush1.bf16.msra.mxu1 %v14414_v51 }
 0x645   :  { %12431 = vmatprep.subr.bf16.mxu1 %v14467_v16 }
 0x646   :  { %14126 = vmatpush3.bf16.msra.mxu0 %v14404_v21  ;;  %v14052_v21 = vld [vmem:[%s19706_s3] ss:$0 sm:$0xff]  ;;  %s14442_s3 = scalar_lea.vmem %s12472_s22, 32 }
 0x647   :  { %14127 = vmatprep.subr.bf16.mxu0 %v14405_v61  ;;  %p14443_p0 = scmp.ne.s32.totalorder %s12472_s22, %s14442_s3  ;;  %p14448_p2 = scmp.lt.s32.totalorder %s14442_s3, %s14442_s3 }
 0x648   :  { %12432 = vmatpush1.bf16.msra.mxu1 %v14415_v59 }
 0x649   :  { %12433 = vmatprep.subr.bf16.mxu1 %v14467_v16  ;;  %p14449_p3 = por %p14448_p2, %p14447_p1 }
 0x64a   :  { %14128 = vmatpush3.bf16.msra.mxu0 %v14406_v35 }
 0x64b   :  { %14129 = vmatprep.subr.bf16.mxu0 %v14407_v13  ;;  %p14450_p4 = pnand %p14449_p3, %p14443_p0 }
 0x64c   :  { %12434 = vmatpush1.bf16.msra.mxu1 %v14416_v44 }
 0x64d   :  { %12435 = vmatprep.subr.bf16.mxu1 %v14467_v16 }
 0x64e   :  { %14130 = vmatpush3.bf16.msra.mxu0 %v14408_v26 }
 0x64f   :  { %14131 = vmatprep.subr.bf16.mxu0 %v14409_v28 }
 0x650   :  { %12436 = vmatpush1.bf16.msra.mxu1 %v14417_v63 }
 0x651   :  { %12437 = vmatprep.subr.bf16.mxu1 %v14467_v16 }
 0x652   :  { %14132 = vmatpush3.bf16.msra.mxu0 %v14410_v30 }
 0x653   :  { %14161 = vmatprep.subr.bf16.mxu0 %v14426_v43 }
 0x654   :  { %12438 = vmatpush1.bf16.msra.mxu1 %v14418_v33 }
 0x655   :  { %12336 = vmatmul.mubr.bf16.vlgmr.msra.gmra.mrb[12].mxu0 %v11780_v37  ;;  %12439 = vmatprep.subr.bf16.mxu1 %v14467_v16 }
 0x656   :  { %14162 = vmatpush3.bf16.msra.mxu0 %v14427_v34 }
 0x657   :  { %14163 = vmatprep.subr.bf16.mxu0 %v14428_v20 }
 0x658   :  { %12440 = vmatpush1.bf16.msra.mxu1 %v14419_v39 }
 0x659   :  { %12441 = vmatprep.subr.bf16.mxu1 %v14467_v16 }
 0x65c   :  { %12442 = vmatpush1.bf16.msra.mxu1 %v14420_v19 }
 0x65d   :  { %12443 = vmatprep.subr.bf16.mxu1 %v14467_v16 }
 0x660   :  { %12444 = vmatpush1.bf16.msra.mxu1 %v14421_v31 }
 0x661   :  { %12445 = vmatprep.subr.bf16.mxu1 %v14467_v16 }
 0x664   :  { %12446 = vmatpush1.bf16.msra.mxu1 %v14422_v38 }
 0x665   :  { %12447 = vmatprep.subr.bf16.mxu1 %v14467_v16 }
 0x668   :  { %12448 = vmatpush1.bf16.msra.mxu1 %v14423_v11 }
 0x669   :  { %12449 = vmatprep.subr.bf16.mxu1 %v14467_v16 }
 0x66c   :  { %12450 = vmatpush1.bf16.msra.mxu1 %v14424_v45 }
 0x66d   :  { %12451 = vmatprep.subr.bf16.mxu1 %v14467_v16  ;;  %v14429_v16 = vld [vmem:[%s19705_s2 + $0x108] sm:$0xff]  }
 0x66e   :  { %14164 = vmatpush3.bf16.msra.mxu0 %v14429_v16 }
 0x66f   :  { %14165 = vmatprep.subr.bf16.mxu0 %v14430_v0 }
 0x670   :  { %12452 = vmatpush1.bf16.msra.mxu1 %v12301_v42 }
 0x672   :  { %14166 = vmatpush3.bf16.msra.mxu0 %v14431_v46 }
 0x673   :  { %14167 = vmatprep.subr.bf16.mxu0 %v14432_v49 }
 0x676   :  { %14168 = vmatpush3.bf16.msra.mxu0 %v14433_v52 }
 0x677   :  { %14169 = vmatprep.subr.bf16.mxu0 %v14434_v17 }
 0x67a   :  { %14170 = vmatpush3.bf16.msra.mxu0 %v14435_v54 }
 0x67b   :  { %14171 = vmatprep.subr.bf16.mxu0 %v14436_v58 }
 0x67e   :  { %14172 = vmatpush3.bf16.msra.mxu0 %v14437_v27 }
 0x67f   :  { %14173 = vmatprep.subr.bf16.mxu0 %v14438_v53 }
 0x682   :  { %14174 = vmatpush3.bf16.msra.mxu0 %v14439_v40 }
 0x683   :  { %14175 = vmatprep.subr.bf16.mxu0 %v14440_v1 }
 0x686   :  { %14176 = vmatpush3.bf16.msra.mxu0 %v14441_v57 }
 0x6e9   :  { %v11749_v60 = vpop.f32.mrb[4].mxu1 }
 0x6ea   :  { %vm11762_vm6 = vcmp.ge.f32.partialorder %v11749_v60, 0.0  ;;  %v11770_v56 = vmul.f32 0.2, %v11749_v60  ;;  %v11751_v62 = vpop.f32.mrb[5].mxu1 }
 0x6eb   :  { %vm11763_vm7 = vcmp.ge.f32.partialorder %v11751_v62, 0.0  ;;  %v11771_v2 = vmul.f32 0.2, %v11751_v62  ;;  %v11753_v9 = vpop.f32.mrb[6].mxu1 }
 0x6ec   :  { %v11778_v3 = vsel %vm11762_vm6, %v11749_v60, %v11770_v56  ;;  %v11754_v4 = vpop.f32.mrb[7].mxu1 }
 0x6ed   :  { %v11779_v5 = vsel %vm11763_vm7, %v11751_v62, %v11771_v2  ;;  %v11786_v7 = vpack.c.bf16 %v11778_v3, %v11778_v3 }
 0x6ee   :  { %v11787_v6 = vpack.c.bf16 %v11779_v5, %v11779_v5 }
 0x6f0   :  { %14116 = vmatprep.mubr.msk.bf16.mxu1 %vm12295_vm8, %v11787_v6 }
 0x6f1   :  { %12456 = vmatmul.mubr.bf16.vlgmr.msra.gmra.mrb[12].mxu1 %v11786_v7 }
 0x708   :  { %v11216_v50 = vpop.f32.mrb[8].mxu0 }
 0x709   :  { %vm11760_vm9 = vcmp.ge.f32.partialorder %v11216_v50, 0.0  ;;  %v11768_v8 = vmul.f32 0.2, %v11216_v50  ;;  %v14155_v10 = vpop.f32.mrb[8].mxu1  ;;  %v11218_v55 = vpop.f32.mrb[9].mxu0 }
 0x70a   :  { %vm11761_vm10 = vcmp.ge.f32.partialorder %v11218_v55, 0.0  ;;  %v11769_v22 = vmul.f32 0.2, %v11218_v55  ;;  %v14156_v14 = vpop.f32.mrb[9].mxu1  ;;  %v11220_v29 = vpop.f32.mrb[10].mxu0 }
 0x70b   :  { %v11776_v25 = vsel %vm11760_vm9, %v11216_v50, %v11768_v8  ;;  %v14157_v12 = vadd.f32 %v14156_v14, %v14155_v10  ;;  %v14158_v15 = vpop.f32.mrb[10].mxu1  ;;  %v11221_v47 = vpop.f32.mrb[11].mxu0 }
 0x70c   :  { %v11777_v41 = vsel %vm11761_vm10, %v11218_v55, %v11769_v22  ;;  %v14159_v32 = vpop.f32.mrb[11].mxu1  ;;  %v11784_v18 = vpack.c.bf16 %v11776_v25, %v11776_v25 }
 0x70d   :  { %v11785_v36 = vpack.c.bf16 %v11777_v41, %v11777_v41 }
 0x70f   :  { %12415 = vmatprep.mubr.bf16.mxu0 %v11785_v36 }
 0x710   :  { %12416 = vmatmul.mubr.bf16.vlgmr.msra.gmra.mrb[16].mxu0 %v11784_v18 }
 0x728   :  { %v14133_v51 = vpop.f32.mrb[12].mxu0 }
 0x729   :  { %v14134_v61 = vpop.f32.mrb[13].mxu0 }
 0x72a   :  { %v14135_v59 = vadd.f32 %v14134_v61, %v14133_v51  ;;  %v14136_v35 = vpop.f32.mrb[14].mxu0 }
 0x72b   :  { %v14137_v13 = vpop.f32.mrb[15].mxu0 }
 0x72c   :  { %v12338_v44 = vadd.f32 %v14135_v59, %v14052_v21 }
 0x72e   :  { %v12378_v26 = vadd.f32 %v14157_v12, %v12338_v44 }
 0x7c4   :  { %v12457_v28 = vpop.f32.mrb[12].mxu1 }
 0x7c5   :  { %v12459_v24 = vpop.f32.mrb[13].mxu1 }
 0x7c6   :  { %v12460_v63 = vpop.f32.mrb[14].mxu1 }
 0x7c7   :  { %v12461_v30 = vpop.f32.mrb[15].mxu1 }
 0x7e3   :  { %v14177_v23 = vpop.f32.mrb[16].mxu0 }
 0x7e4   :  { %v14178_v33 = vpop.f32.mrb[17].mxu0 }
 0x7e5   :  { %v14179_v37 = vadd.f32 %v14178_v33, %v14177_v23  ;;  %v14180_v39 = vpop.f32.mrb[18].mxu0 }
 0x7e6   :  { %v14181_v19 = vpop.f32.mrb[19].mxu0 }
 0x7e7   :  { %v12418_v31 = vadd.f32 %v14179_v37, %v12378_v26 }
 0x7e9   :  { %v12458_v38 = vadd.f32 %v12457_v28, %v12418_v31 }
 0x7eb   :  { %12464 = vst.msk [vmem:[#allocation2] sm:$0x3] %vm12463_vm11, %v12458_v38 }
 0x7ec   :  { %14453 = shalt.err (!%p14450_p4)
}
 0x7ed   :  { %s14454_s25 = scalar_lea.hbm %s19707_s4, 32 }
 0x7ee   :  { %p14455_p5 = scmp.ne.s32.totalorder %s19707_s4, %s14454_s25  ;;  %p14458_p6 = scmp.lt.u32.totalorder %s14454_s25, %s19707_s4 }
 0x7f0   :  { %p14460_p7 = pnand %p14458_p6, %p14455_p5 }
 0x7f2   :  { %14463 = shalt.err (!%p14460_p7)
}
 0x7f3   :  { %12474 = dma.vmem_to_hbm [thread:$0]  %s12472_s22, 32, %s19707_s4, [#allocation3]  }
 0x7f4   :  { %14464 = dma.done.wait [#allocation3], 32  }
 0x7f5   :  { %14465 = vsyncadd [#allocation3], 4294967264 }
 0x7f6   :  { %12478 = vsyncpa [#allocation3], 1 }

</bundles_post_ra>
